<compile_context>
chip_gen: v6e
topology: v6e:2x2x1
jax: 0.10.0
libtpu: 0.0.40
codegen_flags: <defaults>
</compile_context>

<pallas_src>
import jax
import jax.numpy as jnp
from jax import lax
from jax.experimental import pallas as pl
from jax.experimental.pallas import tpu as pltpu

_CP = 128                          # lane-padded channel width
_VMEM_LIMIT = 48 * 1024 * 1024     # explicit scoped-VMEM limit (ok on v5e/v6e/v7x)
_VMEM_BUDGET = 24 * 1024 * 1024    # planning budget for scratch + pipelined blocks


def _resblock_scratch_bytes(th, W):
    """Rough VMEM bytes used by the fused residual-block kernel for a row tile."""
    raw = 2 * (th + 4) * W * _CP * 4          # double-buffered DMA landing buffer
    ypad = (th + 4) * (W + 2) * _CP * 4       # reflection-padded y window
    hpad = (th + 2) * (W + 2) * _CP * 4       # conv1 output (counted at f32)
    outb = 2 * th * W * _CP * 4               # pipelined output blocks
    wts = 2 * 2 * (3 * 3 * _CP * _CP * 4 + _CP * 4)
    return raw + ypad + hpad + outb + wts


def _pick_row_tile(H, W, row_tile=None):
    """Row-tile height: divides H, targets M = th*W >= 512, fits the VMEM budget."""
    if row_tile is None:
        cands = sorted({d for d in range(8, H + 1, 8) if H % d == 0} | {H})
        target = max(8, -(-512 // W))
        pref = [d for d in cands if d >= target]
        th = pref[0] if pref else cands[-1]
        while _resblock_scratch_bytes(th, W) > _VMEM_BUDGET and th > cands[0]:
            th = max(d for d in cands if d < th)
    else:
        th = int(row_tile)
    assert H % th == 0, f"row tile {th} must divide image height {H}"
    # TODO(synk): cdiv + masked edge tiles instead of this assert for awkward H.
    assert _resblock_scratch_bytes(th, W) <= _VMEM_BUDGET, (
        f"row tile {th} x width {W} exceeds the VMEM budget; image height {H} "
        f"needs cdiv/masked edge tiles")
    return th


def _pack_conv_weight(w9, out_off, mm_dtype):
    """(9, ci, co) conv weight -> (3, 3*_CP, _CP): kx taps fused along K, channels
    zero-padded to 128 lanes, outputs parked at [out_off, out_off+co)."""
    ci, co = w9.shape[1], w9.shape[2]
    wk = jnp.zeros((3, 3, _CP, _CP), jnp.float32)
    wk = wk.at[:, :, :ci, out_off:out_off + co].set(w9.reshape(3, 3, ci, co))
    return wk.reshape(3, 3 * _CP, _CP).astype(mm_dtype)


def _pack_bias(b, out_off):
    bf = b.reshape(-1)
    return jnp.zeros((1, _CP), jnp.float32).at[0, out_off:out_off + bf.shape[0]].set(bf)


# ---------------------------------------------------------------------------
# Head: y0 = [x | relu(conv3x3_zeropad(x) + b) | 0]   (fused concat, 128 lanes)
# ---------------------------------------------------------------------------
def _head_conv(xp, w0p, b0p, th, mm_dtype):
    B, H, W, CP = xp.shape
    nH = H // th

    def kernel(x_hbm, w_ref, b_ref, out_ref, xraw, xpad, sems):
        b = pl.program_id(0)
        i = pl.program_id(1)
        slot = i % 2
        r0 = pl.multiple_of(i * th, th)

        def fetch(tile, s):
            rr = pl.multiple_of(tile * th, th)
            return (
                pltpu.make_async_copy(x_hbm.at[b, pl.ds(rr, th)],
                                      xraw.at[s, 1:th + 1], sems.at[s, 0]),
                pltpu.make_async_copy(x_hbm.at[b, pl.ds(jnp.maximum(rr - 1, 0), 1)],
                                      xraw.at[s, 0:1], sems.at[s, 1]),
                pltpu.make_async_copy(x_hbm.at[b, pl.ds(jnp.minimum(rr + th, H - 1), 1)],
                                      xraw.at[s, th + 1:th + 2], sems.at[s, 2]),
            )

        @pl.when(i == 0)
        def _():
            for c in fetch(i, slot):
                c.start()

        @pl.when(i + 1 < nH)
        def _():
            for c in fetch(i + 1, 1 - slot):
                c.start()

        for c in fetch(i, slot):
            c.wait()

        # Assemble the zero-padded window at static addresses.
        xpad[:, 1:W + 1, :] = xraw[slot]
        zcol = jnp.zeros((th + 2, 1, CP), jnp.float32)
        xpad[:, 0:1, :] = zcol
        xpad[:, W + 1:W + 2, :] = zcol

        @pl.when(r0 == 0)
        def _():
            xpad[0:1] = jnp.zeros((1, W + 2, CP), jnp.float32)

        @pl.when(r0 + th == H)
        def _():
            xpad[th + 1:th + 2] = jnp.zeros((1, W + 2, CP), jnp.float32)

        # conv3x3 (zero pad): 3 kx-fused matmuls, K = 3*128, f32 accumulation.
        acc = jnp.broadcast_to(b_ref[...], (th * W, CP))
        for ky in range(3):
            patch = jnp.concatenate(
                [xpad[ky:ky + th, kx:kx + W, :].astype(mm_dtype) for kx in range(3)],
                axis=-1).reshape(th * W, 3 * CP)
            acc = acc + jnp.dot(patch, w_ref[ky], preferred_element_type=jnp.float32)

        # x pass-through + relu(conv): weight/bias packing keeps the channel
        # supports disjoint, so this is exactly torch.cat((x, relu(conv(x))), 1).
        out = xpad[1:th + 1, 1:W + 1, :] + jnp.maximum(acc, 0.0).reshape(th, W, CP)
        out_ref[...] = out.astype(out_ref.dtype)

    return pl.pallas_call(
        kernel,
        out_shape=jax.ShapeDtypeStruct((B, H, W, CP), jnp.float32),
        grid=(B, nH),
        in_specs=[
            pl.BlockSpec(memory_space=pl.ANY),                        # x stays in HBM
            pl.BlockSpec((3, 3 * CP, CP), lambda b, i: (0, 0, 0)),    # weights resident
            pl.BlockSpec((1, CP), lambda b, i: (0, 0)),               # bias resident
        ],
        out_specs=pl.BlockSpec((None, th, W, CP), lambda b, i: (b, i, 0, 0)),
        scratch_shapes=[
            pltpu.VMEM((2, th + 2, W, CP), jnp.float32),
            pltpu.VMEM((th + 2, W + 2, CP), jnp.float32),
            pltpu.SemaphoreType.DMA((2, 3)),
        ],
        compiler_params=pltpu.CompilerParams(
            dimension_semantics=("parallel", "arbitrary"),
            vmem_limit_bytes=_VMEM_LIMIT),
    )(xp, w0p, b0p)


# ---------------------------------------------------------------------------
# Fused ResidualBlock: y = conv2(reflpad(relu(conv1(reflpad(y))))) * 0.1 + y
# ---------------------------------------------------------------------------
def _residual_block(y, w1p, b1p, w2p, b2p, th, mm_dtype):
    B, H, W, CP = y.shape
    nH = H // th

    def kernel(y_hbm, w1_ref, b1_ref, w2_ref, b2_ref, out_ref,
               yraw, ypad, hpad, sems):
        b = pl.program_id(0)
        i = pl.program_id(1)
        slot = i % 2
        r0 = pl.multiple_of(i * th, th)

        # yraw row m <-> image row r0 - 2 + m  (2-row halo each side; edge rows
        # fetch clamped data and are fixed up / ignored below).
        def fetch(tile, s):
            rr = pl.multiple_of(tile * th, th)
            return (
                pltpu.make_async_copy(y_hbm.at[b, pl.ds(rr, th)],
                                      yraw.at[s, 2:th + 2], sems.at[s, 0]),
                pltpu.make_async_copy(y_hbm.at[b, pl.ds(jnp.maximum(rr - 2, 0), 2)],
                                      yraw.at[s, 0:2], sems.at[s, 1]),
                pltpu.make_async_copy(y_hbm.at[b, pl.ds(jnp.minimum(rr + th, H - 2), 2)],
                                      yraw.at[s, th + 2:th + 4], sems.at[s, 2]),
            )

        @pl.when(i == 0)
        def _():
            for c in fetch(i, slot):
                c.start()

        @pl.when(i + 1 < nH)       # prefetch next row tile of this batch
        def _():
            for c in fetch(i + 1, 1 - slot):
                c.start()

        for c in fetch(i, slot):
            c.wait()

        # Reflection-padded y window at static addresses.
        ypad[:, 1:W + 1, :] = yraw[slot]

        @pl.when(r0 == 0)
        def _():
            ypad[1:2] = ypad[3:4]                    # y[-1] := y[1]

        @pl.when(r0 + th == H)
        def _():
            ypad[th + 2:th + 3] = ypad[th:th + 1]    # y[H]  := y[H-2]

        ypad[:, 0:1, :] = ypad[:, 2:3, :]            # col -1 := col 1
        ypad[:, W + 1:W + 2, :] = ypad[:, W - 1:W, :]  # col W := col W-2

        # ---- conv1 + bias + relu over th+2 rows (h rows r0-1 .. r0+th) ----
        M1 = (th + 2) * W
        acc1 = jnp.broadcast_to(b1_ref[...], (M1, CP))
        for ky in range(3):
            patch = jnp.concatenate(
                [ypad[ky:ky + th + 2, kx:kx + W, :].astype(mm_dtype) for kx in range(3)],
                axis=-1).reshape(M1, 3 * CP)
            acc1 = acc1 + jnp.dot(patch, w1_ref[ky], preferred_element_type=jnp.float32)
        h = jnp.maximum(acc1, 0.0).reshape(th + 2, W, CP).astype(hpad.dtype)

        # Park conv1's tile reflection-padded at static offsets; the two edge
        # rows (h[-1], h[H]) are fixed up only at the image border.
        hpad[:, 1:W + 1, :] = h
        hpad[:, 0:1, :] = h[:, 1:2, :]
        hpad[:, W + 1:W + 2, :] = h[:, W - 2:W - 1, :]

        @pl.when(r0 == 0)
        def _():
            hpad[0:1] = hpad[2:3]                    # h[-1] := h[1]

        @pl.when(r0 + th == H)
        def _():
            hpad[th + 1:th + 2] = hpad[th - 1:th]    # h[H]  := h[H-2]

        # ---- conv2 + bias, * 0.1, + residual ----
        M2 = th * W
        acc2 = jnp.broadcast_to(b2_ref[...], (M2, CP))
        for ky in range(3):
            patch = jnp.concatenate(
                [hpad[ky:ky + th, kx:kx + W, :] for kx in range(3)],
                axis=-1).reshape(M2, 3 * CP)
            acc2 = acc2 + jnp.dot(patch, w2_ref[ky], preferred_element_type=jnp.float32)

        res = ypad[2:th + 2, 1:W + 1, :]
        out_ref[...] = (acc2.reshape(th, W, CP) * 0.1 + res).astype(out_ref.dtype)

    return pl.pallas_call(
        kernel,
        out_shape=jax.ShapeDtypeStruct((B, H, W, CP), jnp.float32),
        grid=(B, nH),
        in_specs=[
            pl.BlockSpec(memory_space=pl.ANY),                        # y stays in HBM
            pl.BlockSpec((3, 3 * CP, CP), lambda b, i: (0, 0, 0)),    # w1 resident
            pl.BlockSpec((1, CP), lambda b, i: (0, 0)),               # b1
            pl.BlockSpec((3, 3 * CP, CP), lambda b, i: (0, 0, 0)),    # w2 resident
            pl.BlockSpec((1, CP), lambda b, i: (0, 0)),               # b2
        ],
        out_specs=pl.BlockSpec((None, th, W, CP), lambda b, i: (b, i, 0, 0)),
        scratch_shapes=[
            pltpu.VMEM((2, th + 4, W, CP), jnp.float32),
            pltpu.VMEM((th + 4, W + 2, CP), jnp.float32),
            pltpu.VMEM((th + 2, W + 2, CP), mm_dtype),
            pltpu.SemaphoreType.DMA((2, 3)),
        ],
        compiler_params=pltpu.CompilerParams(
            dimension_semantics=("parallel", "arbitrary"),
            vmem_limit_bytes=_VMEM_LIMIT),
    )(y, w1p, b1p, w2p, b2p)


# ---------------------------------------------------------------------------
# Public wrapper (PyTorch-style NCHW in / NCHW out) + pure-JAX reference.
# ---------------------------------------------------------------------------
def make_dense3(x_nchw, params, row_tile=None, mm_dtype=jnp.bfloat16):
    """Pallas implementation of MakeDense3.forward.  x_nchw: (B, in_ch, H, W)."""
    x = jnp.transpose(x_nchw, (0, 2, 3, 1)).astype(jnp.float32)   # NCHW -> NHWC
    B, H, W, Cin = x.shape
    w0, b0 = params["head"]
    Cg = w0.shape[-1]
    C = params["blocks"][0][0].shape[-1]
    assert Cin + Cg == C, "in_channels + growth_rate must equal the res-block width"
    assert C <= _CP
    assert H >= 3 and W >= 3, "reflection padding needs spatial dims >= 3"
    th = _pick_row_tile(H, W, row_tile)

    # Zero-pad channels to 128 lanes once; the head writes the concat directly
    # into the padded layout, so there is no XLA concat pass over the 80ch tensor.
    xp = jnp.pad(x, ((0, 0), (0, 0), (0, 0), (0, _CP - Cin)))

    w0p = _pack_conv_weight(w0, Cin, mm_dtype)     # conv outputs land at [Cin, Cin+Cg)
    b0p = _pack_bias(b0, Cin)
    y = _head_conv(xp, w0p, b0p, th, mm_dtype)     # (B, H, W, 128)

    for (w1, b1, w2, b2) in params["blocks"]:      # dehaze3: 5x ResidualBlock(80)
        y = _residual_block(y,
                            _pack_conv_weight(w1, 0, mm_dtype), _pack_bias(b1, 0),
                            _pack_conv_weight(w2, 0, mm_dtype), _pack_bias(b2, 0),
                            th, mm_dtype)

    return jnp.transpose(y[..., :C], (0, 3, 1, 2))  # strip lane padding, NHWC -> NCHW


def make_dense3_reference(x_nchw, params):
    """Pure-JAX reference with the same semantics as the PyTorch module."""
    x = jnp.transpose(x_nchw, (0, 2, 3, 1)).astype(jnp.float32)
    w0, b0 = params["head"]

    def conv3x3(inp, w, b, mode):
        ci, co = w.shape[1], w.shape[2]
        p = jnp.pad(inp, ((0, 0), (1, 1), (1, 1), (0, 0)), mode=mode)
        out = lax.conv_general_dilated(
            p, w.reshape(3, 3, ci, co), window_strides=(1, 1), padding="VALID",
            dimension_numbers=("NHWC", "HWIO", "NHWC"))
        return out + b

    y = jnp.concatenate([x, jax.nn.relu(conv3x3(x, w0, b0, "constant"))], axis=-1)
    for (w1, b1, w2, b2) in params["blocks"]:
        h = jax.nn.relu(conv3x3(y, w1, b1, "reflect"))
        y = conv3x3(h, w2, b2, "reflect") * 0.1 + y
    return jnp.transpose(y, (0, 3, 1, 2))


def init_params(key, in_channels, growth_rate, res_blocks=6):
    """Deterministic synthetic weights. conv weight layout: (9, Cin, Cout)."""
    n_blocks = res_blocks - 1                     # res1 .. res{res_blocks-1}
    C = in_channels + growth_rate
    keys = jax.random.split(key, 2 + 4 * n_blocks)

    def uniform(k, shape, fan_in):
        bound = 1.0 / (fan_in ** 0.5)
        return jax.random.uniform(k, shape, jnp.float32, -bound, bound)

    w0 = uniform(keys[0], (9, in_channels, growth_rate), 9 * in_channels)
    b0 = uniform(keys[1], (1, growth_rate), 9 * in_channels)
    blocks = []
    for n in range(n_blocks):
        k1, k2, k3, k4 = keys[2 + 4 * n: 6 + 4 * n]
        blocks.append((uniform(k1, (9, C, C), 9 * C), uniform(k2, (1, C), 9 * C),
                       uniform(k3, (9, C, C), 9 * C), uniform(k4, (1, C), 9 * C)))
    return {"head": (w0, b0), "blocks": blocks}


if __name__ == "__main__":
    B, IN_CH, GROWTH, H, W = 2, 64, 16, 16, 16    # 64 + 16 = 80-channel res blocks
    key = jax.random.PRNGKey(0)
    k_x, k_p = jax.random.split(key)
    x = jax.random.normal(k_x, (B, IN_CH, H, W), jnp.float32)
    params = init_params(k_p, IN_CH, GROWTH)

    ref = make_dense3_reference(x, params)

    # 1) f32 MXU path, default (whole-image) row tile: structural correctness.
    out_f32 = jax.block_until_ready(
        jax.jit(lambda v: make_dense3(v, params, mm_dtype=jnp.float32))(x))
    assert out_f32.shape == (B, IN_CH + GROWTH, H, W)
    err = float(jnp.max(jnp.abs(out_f32 - ref)))
    assert err < 1e-3, f"f32 path mismatch vs reference: max abs err = {err}"

    # 2) f32 path, forced 8-row tiles: exercises halo / reflection / prefetch logic.
    out_tiled = jax.block_until_ready(
        jax.jit(lambda v: make_dense3(v, params, row_tile=8, mm_dtype=jnp.float32))(x))
    err = float(jnp.max(jnp.abs(out_tiled - ref)))
    assert err < 1e-3, f"tiled f32 path mismatch vs reference: max abs err = {err}"

    # 3) default bf16-matmul perf path (f32 accumulate): looser tolerance.
    out_bf16 = jax.block_until_ready(jax.jit(lambda v: make_dense3(v, params))(x))
    err = float(jnp.max(jnp.abs(out_bf16 - ref)))
    assert err < 5e-2, f"bf16 path mismatch vs reference: max abs err = {err}"

    print("KERNEL_OK")
</pallas_src>

<mosaic_0001>
module attributes {stable_mosaic.version = 11 : i64} {
  func.func @kernel(%arg0: i32, %arg1: i32, %arg2: memref<2x16x16x128xf32, #tpu.memory_space<any>>, %arg3: memref<3x384x128xf32, #tpu.memory_space<vmem>>, %arg4: memref<1x128xf32, #tpu.memory_space<vmem>>, %arg5: memref<1x16x16x128xf32, #tpu.memory_space<vmem>>, %arg6: memref<2x18x16x128xf32, #tpu.memory_space<vmem>>, %arg7: memref<18x18x128xf32, #tpu.memory_space<vmem>>, %arg8: memref<2x3x!tpu.dma_semaphore, #tpu.memory_space<semaphore_mem>>) attributes {dimension_semantics = [#tpu.dimension_semantics<parallel>, #tpu.dimension_semantics<arbitrary>], iteration_bounds = array<i64: 2, 1>, scalar_prefetch = 0 : i64, scratch_operands = 3 : i64, tpu.core_type = #tpu.core_type<tc>, window_params = [{}, {pipeline_mode = #tpu.pipeline_mode<synchronous>, transform_indices = @transform_1, window_bounds = array<i64: 3, 384, 128>}, {pipeline_mode = #tpu.pipeline_mode<synchronous>, transform_indices = @transform_2, window_bounds = array<i64: 1, 128>}, {transform_indices = @transform_3, window_bounds = array<i64: 1, 16, 16, 128>}]} {
    %c2_i32 = arith.constant 2 : i32
    %c0_i32 = arith.constant 0 : i32
    %0 = arith.cmpi eq, %c2_i32, %c0_i32 : i32
    %c1_i32 = arith.constant 1 : i32
    %1 = arith.select %0, %c1_i32, %c2_i32 : i32
    %2 = arith.remsi %arg1, %1 : i32
    %c0_i32_0 = arith.constant 0 : i32
    %3 = arith.cmpi ne, %2, %c0_i32_0 : i32
    %c0_i32_1 = arith.constant 0 : i32
    %4 = arith.cmpi slt, %2, %c0_i32_1 : i32
    %c0_i32_2 = arith.constant 0 : i32
    %5 = arith.cmpi slt, %1, %c0_i32_2 : i32
    %6 = arith.xori %4, %5 : i1
    %7 = arith.andi %6, %3 : i1
    %8 = arith.addi %2, %1 : i32
    %9 = arith.select %7, %8, %2 : i32
    %c16_i32 = arith.constant 16 : i32
    %10 = arith.muli %arg1, %c16_i32 : i32
    %11 = tpu.assume_multiple %10, 16 : i32
    %c0_i32_3 = arith.constant 0 : i32
    %12 = arith.cmpi eq, %arg1, %c0_i32_3 : i32
    %13 = arith.extui %12 : i1 to i32
    %c0_i32_4 = arith.constant 0 : i32
    %14 = arith.cmpi ne, %13, %c0_i32_4 : i32
    scf.if %14 {
      %c16_i32_91 = arith.constant 16 : i32
      %95 = arith.muli %arg1, %c16_i32_91 : i32
      %96 = tpu.assume_multiple %95, 16 : i32
      %c1_i32_92 = arith.constant 1 : i32
      %97 = arith.subi %96, %c1_i32_92 : i32
      %c0_i32_93 = arith.constant 0 : i32
      %98 = arith.maxsi %97, %c0_i32_93 : i32
      %c16_i32_94 = arith.constant 16 : i32
      %99 = arith.addi %96, %c16_i32_94 : i32
      %c15_i32_95 = arith.constant 15 : i32
      %100 = arith.minsi %99, %c15_i32_95 : i32
      %c0_i32_96 = arith.constant 0 : i32
      %c0_i32_97 = arith.constant 0 : i32
      %c0_i32_98 = arith.constant 0 : i32
      %101 = tpu.memref_slice %arg2[%arg0, %96, %c0_i32_97, %c0_i32_98] : memref<2x16x16x128xf32, #tpu.memory_space<any>> -> memref<1x16x16x128xf32, #tpu.memory_space<any>>
      %102 = tpu.memref_squeeze %101 : memref<1x16x16x128xf32, #tpu.memory_space<any>> -> memref<16x16x128xf32, #tpu.memory_space<any>>
      %c1_i32_99 = arith.constant 1 : i32
      %c0_i32_100 = arith.constant 0 : i32
      %c0_i32_101 = arith.constant 0 : i32
      %103 = tpu.memref_slice %arg6[%9, %c1_i32_99, %c0_i32_100, %c0_i32_101] : memref<2x18x16x128xf32, #tpu.memory_space<vmem>> -> memref<1x16x16x128xf32, #tpu.memory_space<vmem>>
      %104 = tpu.memref_squeeze %103 : memref<1x16x16x128xf32, #tpu.memory_space<vmem>> -> memref<16x16x128xf32, #tpu.memory_space<vmem>>
      %105 = tpu.memref_slice %arg8[%9, %c0_i32_96] : memref<2x3x!tpu.dma_semaphore, #tpu.memory_space<semaphore_mem>> -> memref<1x1x!tpu.dma_semaphore, #tpu.memory_space<semaphore_mem>>
      %106 = tpu.memref_squeeze %105 : memref<1x1x!tpu.dma_semaphore, #tpu.memory_space<semaphore_mem>> -> memref<!tpu.dma_semaphore, #tpu.memory_space<semaphore_mem>>
      tpu.enqueue_dma source(%102 : memref<16x16x128xf32, #tpu.memory_space<any>>) target(%104 : memref<16x16x128xf32, #tpu.memory_space<vmem>>) target_semaphore(%106 : memref<!tpu.dma_semaphore, #tpu.memory_space<semaphore_mem>>)
      %c1_i32_102 = arith.constant 1 : i32
      %c0_i32_103 = arith.constant 0 : i32
      %c0_i32_104 = arith.constant 0 : i32
      %107 = tpu.memref_slice %arg2[%arg0, %98, %c0_i32_103, %c0_i32_104] : memref<2x16x16x128xf32, #tpu.memory_space<any>> -> memref<1x1x16x128xf32, #tpu.memory_space<any>>
      %108 = tpu.memref_squeeze %107 : memref<1x1x16x128xf32, #tpu.memory_space<any>> -> memref<1x16x128xf32, #tpu.memory_space<any>>
      %c0_i32_105 = arith.constant 0 : i32
      %c0_i32_106 = arith.constant 0 : i32
      %c0_i32_107 = arith.constant 0 : i32
      %109 = tpu.memref_slice %arg6[%9, %c0_i32_105, %c0_i32_106, %c0_i32_107] : memref<2x18x16x128xf32, #tpu.memory_space<vmem>> -> memref<1x1x16x128xf32, #tpu.memory_space<vmem>>
      %110 = tpu.memref_squeeze %109 : memref<1x1x16x128xf32, #tpu.memory_space<vmem>> -> memref<1x16x128xf32, #tpu.memory_space<vmem>>
      %111 = tpu.memref_slice %arg8[%9, %c1_i32_102] : memref<2x3x!tpu.dma_semaphore, #tpu.memory_space<semaphore_mem>> -> memref<1x1x!tpu.dma_semaphore, #tpu.memory_space<semaphore_mem>>
      %112 = tpu.memref_squeeze %111 : memref<1x1x!tpu.dma_semaphore, #tpu.memory_space<semaphore_mem>> -> memref<!tpu.dma_semaphore, #tpu.memory_space<semaphore_mem>>
      tpu.enqueue_dma source(%108 : memref<1x16x128xf32, #tpu.memory_space<any>>) target(%110 : memref<1x16x128xf32, #tpu.memory_space<vmem>>) target_semaphore(%112 : memref<!tpu.dma_semaphore, #tpu.memory_space<semaphore_mem>>)
      %c2_i32_108 = arith.constant 2 : i32
      %c0_i32_109 = arith.constant 0 : i32
      %c0_i32_110 = arith.constant 0 : i32
      %113 = tpu.memref_slice %arg2[%arg0, %100, %c0_i32_109, %c0_i32_110] : memref<2x16x16x128xf32, #tpu.memory_space<any>> -> memref<1x1x16x128xf32, #tpu.memory_space<any>>
      %114 = tpu.memref_squeeze %113 : memref<1x1x16x128xf32, #tpu.memory_space<any>> -> memref<1x16x128xf32, #tpu.memory_space<any>>
      %c17_i32_111 = arith.constant 17 : i32
      %c0_i32_112 = arith.constant 0 : i32
      %c0_i32_113 = arith.constant 0 : i32
      %115 = tpu.memref_slice %arg6[%9, %c17_i32_111, %c0_i32_112, %c0_i32_113] : memref<2x18x16x128xf32, #tpu.memory_space<vmem>> -> memref<1x1x16x128xf32, #tpu.memory_space<vmem>>
      %116 = tpu.memref_squeeze %115 : memref<1x1x16x128xf32, #tpu.memory_space<vmem>> -> memref<1x16x128xf32, #tpu.memory_space<vmem>>
      %117 = tpu.memref_slice %arg8[%9, %c2_i32_108] : memref<2x3x!tpu.dma_semaphore, #tpu.memory_space<semaphore_mem>> -> memref<1x1x!tpu.dma_semaphore, #tpu.memory_space<semaphore_mem>>
      %118 = tpu.memref_squeeze %117 : memref<1x1x!tpu.dma_semaphore, #tpu.memory_space<semaphore_mem>> -> memref<!tpu.dma_semaphore, #tpu.memory_space<semaphore_mem>>
      tpu.enqueue_dma source(%114 : memref<1x16x128xf32, #tpu.memory_space<any>>) target(%116 : memref<1x16x128xf32, #tpu.memory_space<vmem>>) target_semaphore(%118 : memref<!tpu.dma_semaphore, #tpu.memory_space<semaphore_mem>>)
    } else {
    }
    %c1_i32_5 = arith.constant 1 : i32
    %15 = arith.addi %arg1, %c1_i32_5 : i32
    %c1_i32_6 = arith.constant 1 : i32
    %16 = arith.cmpi slt, %15, %c1_i32_6 : i32
    %17 = arith.extui %16 : i1 to i32
    %c0_i32_7 = arith.constant 0 : i32
    %18 = arith.cmpi ne, %17, %c0_i32_7 : i32
    scf.if %18 {
      %c1_i32_91 = arith.constant 1 : i32
      %95 = arith.addi %arg1, %c1_i32_91 : i32
      %c1_i32_92 = arith.constant 1 : i32
      %96 = arith.subi %c1_i32_92, %9 : i32
      %c16_i32_93 = arith.constant 16 : i32
      %97 = arith.muli %95, %c16_i32_93 : i32
      %98 = tpu.assume_multiple %97, 16 : i32
      %c1_i32_94 = arith.constant 1 : i32
      %99 = arith.subi %98, %c1_i32_94 : i32
      %c0_i32_95 = arith.constant 0 : i32
      %100 = arith.maxsi %99, %c0_i32_95 : i32
      %c16_i32_96 = arith.constant 16 : i32
      %101 = arith.addi %98, %c16_i32_96 : i32
      %c15_i32_97 = arith.constant 15 : i32
      %102 = arith.minsi %101, %c15_i32_97 : i32
      %c0_i32_98 = arith.constant 0 : i32
      %c0_i32_99 = arith.constant 0 : i32
      %c0_i32_100 = arith.constant 0 : i32
      %103 = tpu.memref_slice %arg2[%arg0, %98, %c0_i32_99, %c0_i32_100] : memref<2x16x16x128xf32, #tpu.memory_space<any>> -> memref<1x16x16x128xf32, #tpu.memory_space<any>>
      %104 = tpu.memref_squeeze %103 : memref<1x16x16x128xf32, #tpu.memory_space<any>> -> memref<16x16x128xf32, #tpu.memory_space<any>>
      %c1_i32_101 = arith.constant 1 : i32
      %c0_i32_102 = arith.constant 0 : i32
      %c0_i32_103 = arith.constant 0 : i32
      %105 = tpu.memref_slice %arg6[%96, %c1_i32_101, %c0_i32_102, %c0_i32_103] : memref<2x18x16x128xf32, #tpu.memory_space<vmem>> -> memref<1x16x16x128xf32, #tpu.memory_space<vmem>>
      %106 = tpu.memref_squeeze %105 : memref<1x16x16x128xf32, #tpu.memory_space<vmem>> -> memref<16x16x128xf32, #tpu.memory_space<vmem>>
      %107 = tpu.memref_slice %arg8[%96, %c0_i32_98] : memref<2x3x!tpu.dma_semaphore, #tpu.memory_space<semaphore_mem>> -> memref<1x1x!tpu.dma_semaphore, #tpu.memory_space<semaphore_mem>>
      %108 = tpu.memref_squeeze %107 : memref<1x1x!tpu.dma_semaphore, #tpu.memory_space<semaphore_mem>> -> memref<!tpu.dma_semaphore, #tpu.memory_space<semaphore_mem>>
      tpu.enqueue_dma source(%104 : memref<16x16x128xf32, #tpu.memory_space<any>>) target(%106 : memref<16x16x128xf32, #tpu.memory_space<vmem>>) target_semaphore(%108 : memref<!tpu.dma_semaphore, #tpu.memory_space<semaphore_mem>>)
      %c1_i32_104 = arith.constant 1 : i32
      %c0_i32_105 = arith.constant 0 : i32
      %c0_i32_106 = arith.constant 0 : i32
      %109 = tpu.memref_slice %arg2[%arg0, %100, %c0_i32_105, %c0_i32_106] : memref<2x16x16x128xf32, #tpu.memory_space<any>> -> memref<1x1x16x128xf32, #tpu.memory_space<any>>
      %110 = tpu.memref_squeeze %109 : memref<1x1x16x128xf32, #tpu.memory_space<any>> -> memref<1x16x128xf32, #tpu.memory_space<any>>
      %c0_i32_107 = arith.constant 0 : i32
      %c0_i32_108 = arith.constant 0 : i32
      %c0_i32_109 = arith.constant 0 : i32
      %111 = tpu.memref_slice %arg6[%96, %c0_i32_107, %c0_i32_108, %c0_i32_109] : memref<2x18x16x128xf32, #tpu.memory_space<vmem>> -> memref<1x1x16x128xf32, #tpu.memory_space<vmem>>
      %112 = tpu.memref_squeeze %111 : memref<1x1x16x128xf32, #tpu.memory_space<vmem>> -> memref<1x16x128xf32, #tpu.memory_space<vmem>>
      %113 = tpu.memref_slice %arg8[%96, %c1_i32_104] : memref<2x3x!tpu.dma_semaphore, #tpu.memory_space<semaphore_mem>> -> memref<1x1x!tpu.dma_semaphore, #tpu.memory_space<semaphore_mem>>
      %114 = tpu.memref_squeeze %113 : memref<1x1x!tpu.dma_semaphore, #tpu.memory_space<semaphore_mem>> -> memref<!tpu.dma_semaphore, #tpu.memory_space<semaphore_mem>>
      tpu.enqueue_dma source(%110 : memref<1x16x128xf32, #tpu.memory_space<any>>) target(%112 : memref<1x16x128xf32, #tpu.memory_space<vmem>>) target_semaphore(%114 : memref<!tpu.dma_semaphore, #tpu.memory_space<semaphore_mem>>)
      %c2_i32_110 = arith.constant 2 : i32
      %c0_i32_111 = arith.constant 0 : i32
      %c0_i32_112 = arith.constant 0 : i32
      %115 = tpu.memref_slice %arg2[%arg0, %102, %c0_i32_111, %c0_i32_112] : memref<2x16x16x128xf32, #tpu.memory_space<any>> -> memref<1x1x16x128xf32, #tpu.memory_space<any>>
      %116 = tpu.memref_squeeze %115 : memref<1x1x16x128xf32, #tpu.memory_space<any>> -> memref<1x16x128xf32, #tpu.memory_space<any>>
      %c17_i32_113 = arith.constant 17 : i32
      %c0_i32_114 = arith.constant 0 : i32
      %c0_i32_115 = arith.constant 0 : i32
      %117 = tpu.memref_slice %arg6[%96, %c17_i32_113, %c0_i32_114, %c0_i32_115] : memref<2x18x16x128xf32, #tpu.memory_space<vmem>> -> memref<1x1x16x128xf32, #tpu.memory_space<vmem>>
      %118 = tpu.memref_squeeze %117 : memref<1x1x16x128xf32, #tpu.memory_space<vmem>> -> memref<1x16x128xf32, #tpu.memory_space<vmem>>
      %119 = tpu.memref_slice %arg8[%96, %c2_i32_110] : memref<2x3x!tpu.dma_semaphore, #tpu.memory_space<semaphore_mem>> -> memref<1x1x!tpu.dma_semaphore, #tpu.memory_space<semaphore_mem>>
      %120 = tpu.memref_squeeze %119 : memref<1x1x!tpu.dma_semaphore, #tpu.memory_space<semaphore_mem>> -> memref<!tpu.dma_semaphore, #tpu.memory_space<semaphore_mem>>
      tpu.enqueue_dma source(%116 : memref<1x16x128xf32, #tpu.memory_space<any>>) target(%118 : memref<1x16x128xf32, #tpu.memory_space<vmem>>) target_semaphore(%120 : memref<!tpu.dma_semaphore, #tpu.memory_space<semaphore_mem>>)
    } else {
    }
    %c16_i32_8 = arith.constant 16 : i32
    %19 = arith.muli %arg1, %c16_i32_8 : i32
    %20 = tpu.assume_multiple %19, 16 : i32
    %c1_i32_9 = arith.constant 1 : i32
    %21 = arith.subi %20, %c1_i32_9 : i32
    %c0_i32_10 = arith.constant 0 : i32
    %22 = arith.maxsi %21, %c0_i32_10 : i32
    %c16_i32_11 = arith.constant 16 : i32
    %23 = arith.addi %20, %c16_i32_11 : i32
    %c15_i32 = arith.constant 15 : i32
    %24 = arith.minsi %23, %c15_i32 : i32
    %c0_i32_12 = arith.constant 0 : i32
    %c0_i32_13 = arith.constant 0 : i32
    %c0_i32_14 = arith.constant 0 : i32
    %25 = tpu.memref_slice %arg2[%arg0, %20, %c0_i32_13, %c0_i32_14] : memref<2x16x16x128xf32, #tpu.memory_space<any>> -> memref<1x16x16x128xf32, #tpu.memory_space<any>>
    %26 = tpu.memref_squeeze %25 : memref<1x16x16x128xf32, #tpu.memory_space<any>> -> memref<16x16x128xf32, #tpu.memory_space<any>>
    %c1_i32_15 = arith.constant 1 : i32
    %c0_i32_16 = arith.constant 0 : i32
    %c0_i32_17 = arith.constant 0 : i32
    %27 = tpu.memref_slice %arg6[%9, %c1_i32_15, %c0_i32_16, %c0_i32_17] : memref<2x18x16x128xf32, #tpu.memory_space<vmem>> -> memref<1x16x16x128xf32, #tpu.memory_space<vmem>>
    %28 = tpu.memref_squeeze %27 : memref<1x16x16x128xf32, #tpu.memory_space<vmem>> -> memref<16x16x128xf32, #tpu.memory_space<vmem>>
    %29 = tpu.memref_slice %arg8[%9, %c0_i32_12] : memref<2x3x!tpu.dma_semaphore, #tpu.memory_space<semaphore_mem>> -> memref<1x1x!tpu.dma_semaphore, #tpu.memory_space<semaphore_mem>>
    %30 = tpu.memref_squeeze %29 : memref<1x1x!tpu.dma_semaphore, #tpu.memory_space<semaphore_mem>> -> memref<!tpu.dma_semaphore, #tpu.memory_space<semaphore_mem>>
    tpu.wait_dma2 semaphore(%30 : memref<!tpu.dma_semaphore, #tpu.memory_space<semaphore_mem>>) src(%26 : memref<16x16x128xf32, #tpu.memory_space<any>>) dst(%28 : memref<16x16x128xf32, #tpu.memory_space<vmem>>)
    %c1_i32_18 = arith.constant 1 : i32
    %c0_i32_19 = arith.constant 0 : i32
    %c0_i32_20 = arith.constant 0 : i32
    %31 = tpu.memref_slice %arg2[%arg0, %22, %c0_i32_19, %c0_i32_20] : memref<2x16x16x128xf32, #tpu.memory_space<any>> -> memref<1x1x16x128xf32, #tpu.memory_space<any>>
    %32 = tpu.memref_squeeze %31 : memref<1x1x16x128xf32, #tpu.memory_space<any>> -> memref<1x16x128xf32, #tpu.memory_space<any>>
    %c0_i32_21 = arith.constant 0 : i32
    %c0_i32_22 = arith.constant 0 : i32
    %c0_i32_23 = arith.constant 0 : i32
    %33 = tpu.memref_slice %arg6[%9, %c0_i32_21, %c0_i32_22, %c0_i32_23] : memref<2x18x16x128xf32, #tpu.memory_space<vmem>> -> memref<1x1x16x128xf32, #tpu.memory_space<vmem>>
    %34 = tpu.memref_squeeze %33 : memref<1x1x16x128xf32, #tpu.memory_space<vmem>> -> memref<1x16x128xf32, #tpu.memory_space<vmem>>
    %35 = tpu.memref_slice %arg8[%9, %c1_i32_18] : memref<2x3x!tpu.dma_semaphore, #tpu.memory_space<semaphore_mem>> -> memref<1x1x!tpu.dma_semaphore, #tpu.memory_space<semaphore_mem>>
    %36 = tpu.memref_squeeze %35 : memref<1x1x!tpu.dma_semaphore, #tpu.memory_space<semaphore_mem>> -> memref<!tpu.dma_semaphore, #tpu.memory_space<semaphore_mem>>
    tpu.wait_dma2 semaphore(%36 : memref<!tpu.dma_semaphore, #tpu.memory_space<semaphore_mem>>) src(%32 : memref<1x16x128xf32, #tpu.memory_space<any>>) dst(%34 : memref<1x16x128xf32, #tpu.memory_space<vmem>>)
    %c2_i32_24 = arith.constant 2 : i32
    %c0_i32_25 = arith.constant 0 : i32
    %c0_i32_26 = arith.constant 0 : i32
    %37 = tpu.memref_slice %arg2[%arg0, %24, %c0_i32_25, %c0_i32_26] : memref<2x16x16x128xf32, #tpu.memory_space<any>> -> memref<1x1x16x128xf32, #tpu.memory_space<any>>
    %38 = tpu.memref_squeeze %37 : memref<1x1x16x128xf32, #tpu.memory_space<any>> -> memref<1x16x128xf32, #tpu.memory_space<any>>
    %c17_i32 = arith.constant 17 : i32
    %c0_i32_27 = arith.constant 0 : i32
    %c0_i32_28 = arith.constant 0 : i32
    %39 = tpu.memref_slice %arg6[%9, %c17_i32, %c0_i32_27, %c0_i32_28] : memref<2x18x16x128xf32, #tpu.memory_space<vmem>> -> memref<1x1x16x128xf32, #tpu.memory_space<vmem>>
    %40 = tpu.memref_squeeze %39 : memref<1x1x16x128xf32, #tpu.memory_space<vmem>> -> memref<1x16x128xf32, #tpu.memory_space<vmem>>
    %41 = tpu.memref_slice %arg8[%9, %c2_i32_24] : memref<2x3x!tpu.dma_semaphore, #tpu.memory_space<semaphore_mem>> -> memref<1x1x!tpu.dma_semaphore, #tpu.memory_space<semaphore_mem>>
    %42 = tpu.memref_squeeze %41 : memref<1x1x!tpu.dma_semaphore, #tpu.memory_space<semaphore_mem>> -> memref<!tpu.dma_semaphore, #tpu.memory_space<semaphore_mem>>
    tpu.wait_dma2 semaphore(%42 : memref<!tpu.dma_semaphore, #tpu.memory_space<semaphore_mem>>) src(%38 : memref<1x16x128xf32, #tpu.memory_space<any>>) dst(%40 : memref<1x16x128xf32, #tpu.memory_space<vmem>>)
    %43 = arith.index_cast %9 : i32 to index
    %c0 = arith.constant 0 : index
    %c0_29 = arith.constant 0 : index
    %c0_30 = arith.constant 0 : index
    %44 = vector.load %arg6[%43, %c0, %c0_29, %c0_30] : memref<2x18x16x128xf32, #tpu.memory_space<vmem>>, vector<1x18x16x128xf32>
    %45 = vector.shape_cast %44 : vector<1x18x16x128xf32> to vector<18x16x128xf32>
    %c0_31 = arith.constant 0 : index
    %c1 = arith.constant 1 : index
    %c0_32 = arith.constant 0 : index
    %46 = vector.load %arg7[%c0_31, %c1, %c0_32] : memref<18x18x128xf32, #tpu.memory_space<vmem>>, vector<18x16x128xf32>
    tpu.vector_store %arg7[%c0_31, %c1, %c0_32], %45 {strides = array<i32>} : memref<18x18x128xf32, #tpu.memory_space<vmem>>, vector<18x16x128xf32>,
    %cst = arith.constant 0.000000e+00 : f32
    %47 = vector.broadcast %cst : f32 to vector<18x1x128xf32>
    %c0_33 = arith.constant 0 : index
    %c0_34 = arith.constant 0 : index
    %c0_35 = arith.constant 0 : index
    %48 = vector.load %arg7[%c0_33, %c0_34, %c0_35] : memref<18x18x128xf32, #tpu.memory_space<vmem>>, vector<18x1x128xf32>
    tpu.vector_store %arg7[%c0_33, %c0_34, %c0_35], %47 {strides = array<i32>} : memref<18x18x128xf32, #tpu.memory_space<vmem>>, vector<18x1x128xf32>,
    %c0_36 = arith.constant 0 : index
    %c17 = arith.constant 17 : index
    %c0_37 = arith.constant 0 : index
    %49 = vector.load %arg7[%c0_36, %c17, %c0_37] : memref<18x18x128xf32, #tpu.memory_space<vmem>>, vector<18x1x128xf32>
    tpu.vector_store %arg7[%c0_36, %c17, %c0_37], %47 {strides = array<i32>} : memref<18x18x128xf32, #tpu.memory_space<vmem>>, vector<18x1x128xf32>,
    %c0_i32_38 = arith.constant 0 : i32
    %50 = arith.cmpi eq, %11, %c0_i32_38 : i32
    %51 = arith.extui %50 : i1 to i32
    %c0_i32_39 = arith.constant 0 : i32
    %52 = arith.cmpi ne, %51, %c0_i32_39 : i32
    scf.if %52 {
      %cst_91 = arith.constant 0.000000e+00 : f32
      %95 = vector.broadcast %cst_91 : f32 to vector<1x18x128xf32>
      %c0_92 = arith.constant 0 : index
      %c0_93 = arith.constant 0 : index
      %c0_94 = arith.constant 0 : index
      %96 = vector.load %arg7[%c0_92, %c0_93, %c0_94] : memref<18x18x128xf32, #tpu.memory_space<vmem>>, vector<1x18x128xf32>
      tpu.vector_store %arg7[%c0_92, %c0_93, %c0_94], %95 {strides = array<i32>} : memref<18x18x128xf32, #tpu.memory_space<vmem>>, vector<1x18x128xf32>,
    } else {
    }
    %c16_i32_40 = arith.constant 16 : i32
    %53 = arith.addi %11, %c16_i32_40 : i32
    %c16_i32_41 = arith.constant 16 : i32
    %54 = arith.cmpi eq, %53, %c16_i32_41 : i32
    %55 = arith.extui %54 : i1 to i32
    %c0_i32_42 = arith.constant 0 : i32
    %56 = arith.cmpi ne, %55, %c0_i32_42 : i32
    scf.if %56 {
      %cst_91 = arith.constant 0.000000e+00 : f32
      %95 = vector.broadcast %cst_91 : f32 to vector<1x18x128xf32>
      %c17_92 = arith.constant 17 : index
      %c0_93 = arith.constant 0 : index
      %c0_94 = arith.constant 0 : index
      %96 = vector.load %arg7[%c17_92, %c0_93, %c0_94] : memref<18x18x128xf32, #tpu.memory_space<vmem>>, vector<1x18x128xf32>
      tpu.vector_store %arg7[%c17_92, %c0_93, %c0_94], %95 {strides = array<i32>} : memref<18x18x128xf32, #tpu.memory_space<vmem>>, vector<1x18x128xf32>,
    } else {
    }
    %c0_43 = arith.constant 0 : index
    %c0_44 = arith.constant 0 : index
    %57 = vector.load %arg4[%c0_43, %c0_44] : memref<1x128xf32, #tpu.memory_space<vmem>>, vector<1x128xf32>
    %58 = vector.shape_cast %57 : vector<1x128xf32> to vector<1x128xf32>
    %59 = vector.broadcast %58 : vector<1x128xf32> to vector<256x128xf32>
    %c0_45 = arith.constant 0 : index
    %c0_46 = arith.constant 0 : index
    %c0_47 = arith.constant 0 : index
    %60 = vector.load %arg7[%c0_45, %c0_46, %c0_47] : memref<18x18x128xf32, #tpu.memory_space<vmem>>, vector<16x16x128xf32>
    %c0_48 = arith.constant 0 : index
    %c1_49 = arith.constant 1 : index
    %c0_50 = arith.constant 0 : index
    %61 = vector.load %arg7[%c0_48, %c1_49, %c0_50] : memref<18x18x128xf32, #tpu.memory_space<vmem>>, vector<16x16x128xf32>
    %c0_51 = arith.constant 0 : index
    %c2 = arith.constant 2 : index
    %c0_52 = arith.constant 0 : index
    %62 = vector.load %arg7[%c0_51, %c2, %c0_52] : memref<18x18x128xf32, #tpu.memory_space<vmem>>, vector<16x16x128xf32>
    %63 = tpu.concatenate %60, %61, %62 in 2 : vector<16x16x128xf32>, vector<16x16x128xf32>, vector<16x16x128xf32> -> vector<16x16x384xf32>
    %64 = vector.shape_cast %63 : vector<16x16x384xf32> to vector<256x384xf32>
    %c0_53 = arith.constant 0 : index
    %c0_54 = arith.constant 0 : index
    %c0_55 = arith.constant 0 : index
    %65 = vector.load %arg3[%c0_53, %c0_54, %c0_55] : memref<3x384x128xf32, #tpu.memory_space<vmem>>, vector<1x384x128xf32>
    %66 = vector.shape_cast %65 : vector<1x384x128xf32> to vector<384x128xf32>
    %cst_56 = arith.constant dense<0.000000e+00> : vector<256x128xf32>
    %67 = tpu.matmul %64, %66, %cst_56 {dimension_numbers = #tpu.dot_dimension_numbers<[1], [0], [0], [1], [0, 0, 1, 1], [], []>} : vector<256x384xf32>, vector<384x128xf32>, vector<256x128xf32> -> vector<256x128xf32>
    %68 = arith.addf %59, %67 : vector<256x128xf32>
    %c1_57 = arith.constant 1 : index
    %c0_58 = arith.constant 0 : index
    %c0_59 = arith.constant 0 : index
    %69 = vector.load %arg7[%c1_57, %c0_58, %c0_59] : memref<18x18x128xf32, #tpu.memory_space<vmem>>, vector<16x16x128xf32>
    %c1_60 = arith.constant 1 : index
    %c1_61 = arith.constant 1 : index
    %c0_62 = arith.constant 0 : index
    %70 = vector.load %arg7[%c1_60, %c1_61, %c0_62] : memref<18x18x128xf32, #tpu.memory_space<vmem>>, vector<16x16x128xf32>
    %c1_63 = arith.constant 1 : index
    %c2_64 = arith.constant 2 : index
    %c0_65 = arith.constant 0 : index
    %71 = vector.load %arg7[%c1_63, %c2_64, %c0_65] : memref<18x18x128xf32, #tpu.memory_space<vmem>>, vector<16x16x128xf32>
    %72 = tpu.concatenate %69, %70, %71 in 2 : vector<16x16x128xf32>, vector<16x16x128xf32>, vector<16x16x128xf32> -> vector<16x16x384xf32>
    %73 = vector.shape_cast %72 : vector<16x16x384xf32> to vector<256x384xf32>
    %c1_66 = arith.constant 1 : index
    %c0_67 = arith.constant 0 : index
    %c0_68 = arith.constant 0 : index
    %74 = vector.load %arg3[%c1_66, %c0_67, %c0_68] : memref<3x384x128xf32, #tpu.memory_space<vmem>>, vector<1x384x128xf32>
    %75 = vector.shape_cast %74 : vector<1x384x128xf32> to vector<384x128xf32>
    %cst_69 = arith.constant dense<0.000000e+00> : vector<256x128xf32>
    %76 = tpu.matmul %73, %75, %cst_69 {dimension_numbers = #tpu.dot_dimension_numbers<[1], [0], [0], [1], [0, 0, 1, 1], [], []>} : vector<256x384xf32>, vector<384x128xf32>, vector<256x128xf32> -> vector<256x128xf32>
    %77 = arith.addf %68, %76 : vector<256x128xf32>
    %c2_70 = arith.constant 2 : index
    %c0_71 = arith.constant 0 : index
    %c0_72 = arith.constant 0 : index
    %78 = vector.load %arg7[%c2_70, %c0_71, %c0_72] : memref<18x18x128xf32, #tpu.memory_space<vmem>>, vector<16x16x128xf32>
    %c2_73 = arith.constant 2 : index
    %c1_74 = arith.constant 1 : index
    %c0_75 = arith.constant 0 : index
    %79 = vector.load %arg7[%c2_73, %c1_74, %c0_75] : memref<18x18x128xf32, #tpu.memory_space<vmem>>, vector<16x16x128xf32>
    %c2_76 = arith.constant 2 : index
    %c2_77 = arith.constant 2 : index
    %c0_78 = arith.constant 0 : index
    %80 = vector.load %arg7[%c2_76, %c2_77, %c0_78] : memref<18x18x128xf32, #tpu.memory_space<vmem>>, vector<16x16x128xf32>
    %81 = tpu.concatenate %78, %79, %80 in 2 : vector<16x16x128xf32>, vector<16x16x128xf32>, vector<16x16x128xf32> -> vector<16x16x384xf32>
    %82 = vector.shape_cast %81 : vector<16x16x384xf32> to vector<256x384xf32>
    %c2_79 = arith.constant 2 : index
    %c0_80 = arith.constant 0 : index
    %c0_81 = arith.constant 0 : index
    %83 = vector.load %arg3[%c2_79, %c0_80, %c0_81] : memref<3x384x128xf32, #tpu.memory_space<vmem>>, vector<1x384x128xf32>
    %84 = vector.shape_cast %83 : vector<1x384x128xf32> to vector<384x128xf32>
    %cst_82 = arith.constant dense<0.000000e+00> : vector<256x128xf32>
    %85 = tpu.matmul %82, %84, %cst_82 {dimension_numbers = #tpu.dot_dimension_numbers<[1], [0], [0], [1], [0, 0, 1, 1], [], []>} : vector<256x384xf32>, vector<384x128xf32>, vector<256x128xf32> -> vector<256x128xf32>
    %86 = arith.addf %77, %85 : vector<256x128xf32>
    %c1_83 = arith.constant 1 : index
    %c1_84 = arith.constant 1 : index
    %c0_85 = arith.constant 0 : index
    %87 = vector.load %arg7[%c1_83, %c1_84, %c0_85] : memref<18x18x128xf32, #tpu.memory_space<vmem>>, vector<16x16x128xf32>
    %cst_86 = arith.constant 0.000000e+00 : f32
    %88 = vector.broadcast %cst_86 : f32 to vector<256x128xf32>
    %89 = arith.maximumf %86, %88 : vector<256x128xf32>
    %90 = vector.shape_cast %89 : vector<256x128xf32> to vector<16x16x128xf32>
    %91 = arith.addf %87, %90 : vector<16x16x128xf32>
    %c0_87 = arith.constant 0 : index
    %c0_88 = arith.constant 0 : index
    %c0_89 = arith.constant 0 : index
    %c0_90 = arith.constant 0 : index
    %92 = vector.load %arg5[%c0_87, %c0_88, %c0_89, %c0_90] : memref<1x16x16x128xf32, #tpu.memory_space<vmem>>, vector<1x16x16x128xf32>
    %93 = vector.shape_cast %92 : vector<1x16x16x128xf32> to vector<16x16x128xf32>
    %94 = vector.shape_cast %91 : vector<16x16x128xf32> to vector<1x16x16x128xf32>
    tpu.vector_store %arg5[%c0_87, %c0_88, %c0_89, %c0_90], %94 {strides = array<i32>} : memref<1x16x16x128xf32, #tpu.memory_space<vmem>>, vector<1x16x16x128xf32>,
    return
  }
  func.func @transform_1(%arg0: i32, %arg1: i32) -> (i32, i32, i32) {
    %c0_i32 = arith.constant 0 : i32
    %c0_i32_0 = arith.constant 0 : i32
    %c0_i32_1 = arith.constant 0 : i32
    %c0_i32_2 = arith.constant 0 : i32
    return %c0_i32, %c0_i32_0, %c0_i32_1 : i32, i32, i32
  }
  func.func @transform_2(%arg0: i32, %arg1: i32) -> (i32, i32) {
    %c0_i32 = arith.constant 0 : i32
    %c0_i32_0 = arith.constant 0 : i32
    %c0_i32_1 = arith.constant 0 : i32
    return %c0_i32, %c0_i32_0 : i32, i32
  }
  func.func @transform_3(%arg0: i32, %arg1: i32) -> (i32, i32, i32, i32) {
    %c0_i32 = arith.constant 0 : i32
    %c0_i32_0 = arith.constant 0 : i32
    %c0_i32_1 = arith.constant 0 : i32
    return %arg0, %arg1, %c0_i32, %c0_i32_0 : i32, i32, i32, i32
  }
}

module attributes {stable_mosaic.version = 11 : i64} {
  func.func @kernel(%arg0: i32, %arg1: i32, %arg2: memref<2x16x16x128xf32, #tpu.memory_space<any>>, %arg3: memref<3x384x128xf32, #tpu.memory_space<vmem>>, %arg4: memref<1x128xf32, #tpu.memory_space<vmem>>, %arg5: memref<3x384x128xf32, #tpu.memory_space<vmem>>, %arg6: memref<1x128xf32, #tpu.memory_space<vmem>>, %arg7: memref<1x16x16x128xf32, #tpu.memory_space<vmem>>, %arg8: memref<2x20x16x128xf32, #tpu.memory_space<vmem>>, %arg9: memref<20x18x128xf32, #tpu.memory_space<vmem>>, %arg10: memref<18x18x128xf32, #tpu.memory_space<vmem>>, %arg11: memref<2x3x!tpu.dma_semaphore, #tpu.memory_space<semaphore_mem>>) attributes {dimension_semantics = [#tpu.dimension_semantics<parallel>, #tpu.dimension_semantics<arbitrary>], iteration_bounds = array<i64: 2, 1>, scalar_prefetch = 0 : i64, scratch_operands = 4 : i64, tpu.core_type = #tpu.core_type<tc>, window_params = [{}, {pipeline_mode = #tpu.pipeline_mode<synchronous>, transform_indices = @transform_1, window_bounds = array<i64: 3, 384, 128>}, {pipeline_mode = #tpu.pipeline_mode<synchronous>, transform_indices = @transform_2, window_bounds = array<i64: 1, 128>}, {pipeline_mode = #tpu.pipeline_mode<synchronous>, transform_indices = @transform_3, window_bounds = array<i64: 3, 384, 128>}, {pipeline_mode = #tpu.pipeline_mode<synchronous>, transform_indices = @transform_4, window_bounds = array<i64: 1, 128>}, {transform_indices = @transform_5, window_bounds = array<i64: 1, 16, 16, 128>}]} {
    %c2_i32 = arith.constant 2 : i32
    %c0_i32 = arith.constant 0 : i32
    %0 = arith.cmpi eq, %c2_i32, %c0_i32 : i32
    %c1_i32 = arith.constant 1 : i32
    %1 = arith.select %0, %c1_i32, %c2_i32 : i32
    %2 = arith.remsi %arg1, %1 : i32
    %c0_i32_0 = arith.constant 0 : i32
    %3 = arith.cmpi ne, %2, %c0_i32_0 : i32
    %c0_i32_1 = arith.constant 0 : i32
    %4 = arith.cmpi slt, %2, %c0_i32_1 : i32
    %c0_i32_2 = arith.constant 0 : i32
    %5 = arith.cmpi slt, %1, %c0_i32_2 : i32
    %6 = arith.xori %4, %5 : i1
    %7 = arith.andi %6, %3 : i1
    %8 = arith.addi %2, %1 : i32
    %9 = arith.select %7, %8, %2 : i32
    %c16_i32 = arith.constant 16 : i32
    %10 = arith.muli %arg1, %c16_i32 : i32
    %11 = tpu.assume_multiple %10, 16 : i32
    %c0_i32_3 = arith.constant 0 : i32
    %12 = arith.cmpi eq, %arg1, %c0_i32_3 : i32
    %13 = arith.extui %12 : i1 to i32
    %c0_i32_4 = arith.constant 0 : i32
    %14 = arith.cmpi ne, %13, %c0_i32_4 : i32
    scf.if %14 {
      %c16_i32_151 = arith.constant 16 : i32
      %141 = arith.muli %arg1, %c16_i32_151 : i32
      %142 = tpu.assume_multiple %141, 16 : i32
      %c2_i32_152 = arith.constant 2 : i32
      %143 = arith.subi %142, %c2_i32_152 : i32
      %c0_i32_153 = arith.constant 0 : i32
      %144 = arith.maxsi %143, %c0_i32_153 : i32
      %c16_i32_154 = arith.constant 16 : i32
      %145 = arith.addi %142, %c16_i32_154 : i32
      %c14_i32_155 = arith.constant 14 : i32
      %146 = arith.minsi %145, %c14_i32_155 : i32
      %c0_i32_156 = arith.constant 0 : i32
      %c0_i32_157 = arith.constant 0 : i32
      %c0_i32_158 = arith.constant 0 : i32
      %147 = tpu.memref_slice %arg2[%arg0, %142, %c0_i32_157, %c0_i32_158] : memref<2x16x16x128xf32, #tpu.memory_space<any>> -> memref<1x16x16x128xf32, #tpu.memory_space<any>>
      %148 = tpu.memref_squeeze %147 : memref<1x16x16x128xf32, #tpu.memory_space<any>> -> memref<16x16x128xf32, #tpu.memory_space<any>>
      %c2_i32_159 = arith.constant 2 : i32
      %c0_i32_160 = arith.constant 0 : i32
      %c0_i32_161 = arith.constant 0 : i32
      %149 = tpu.memref_slice %arg8[%9, %c2_i32_159, %c0_i32_160, %c0_i32_161] : memref<2x20x16x128xf32, #tpu.memory_space<vmem>> -> memref<1x16x16x128xf32, #tpu.memory_space<vmem>>
      %150 = tpu.memref_squeeze %149 : memref<1x16x16x128xf32, #tpu.memory_space<vmem>> -> memref<16x16x128xf32, #tpu.memory_space<vmem>>
      %151 = tpu.memref_slice %arg11[%9, %c0_i32_156] : memref<2x3x!tpu.dma_semaphore, #tpu.memory_space<semaphore_mem>> -> memref<1x1x!tpu.dma_semaphore, #tpu.memory_space<semaphore_mem>>
      %152 = tpu.memref_squeeze %151 : memref<1x1x!tpu.dma_semaphore, #tpu.memory_space<semaphore_mem>> -> memref<!tpu.dma_semaphore, #tpu.memory_space<semaphore_mem>>
      tpu.enqueue_dma source(%148 : memref<16x16x128xf32, #tpu.memory_space<any>>) target(%150 : memref<16x16x128xf32, #tpu.memory_space<vmem>>) target_semaphore(%152 : memref<!tpu.dma_semaphore, #tpu.memory_space<semaphore_mem>>)
      %c1_i32_162 = arith.constant 1 : i32
      %c0_i32_163 = arith.constant 0 : i32
      %c0_i32_164 = arith.constant 0 : i32
      %153 = tpu.memref_slice %arg2[%arg0, %144, %c0_i32_163, %c0_i32_164] : memref<2x16x16x128xf32, #tpu.memory_space<any>> -> memref<1x2x16x128xf32, #tpu.memory_space<any>>
      %154 = tpu.memref_squeeze %153 : memref<1x2x16x128xf32, #tpu.memory_space<any>> -> memref<2x16x128xf32, #tpu.memory_space<any>>
      %c0_i32_165 = arith.constant 0 : i32
      %c0_i32_166 = arith.constant 0 : i32
      %c0_i32_167 = arith.constant 0 : i32
      %155 = tpu.memref_slice %arg8[%9, %c0_i32_165, %c0_i32_166, %c0_i32_167] : memref<2x20x16x128xf32, #tpu.memory_space<vmem>> -> memref<1x2x16x128xf32, #tpu.memory_space<vmem>>
      %156 = tpu.memref_squeeze %155 : memref<1x2x16x128xf32, #tpu.memory_space<vmem>> -> memref<2x16x128xf32, #tpu.memory_space<vmem>>
      %157 = tpu.memref_slice %arg11[%9, %c1_i32_162] : memref<2x3x!tpu.dma_semaphore, #tpu.memory_space<semaphore_mem>> -> memref<1x1x!tpu.dma_semaphore, #tpu.memory_space<semaphore_mem>>
      %158 = tpu.memref_squeeze %157 : memref<1x1x!tpu.dma_semaphore, #tpu.memory_space<semaphore_mem>> -> memref<!tpu.dma_semaphore, #tpu.memory_space<semaphore_mem>>
      tpu.enqueue_dma source(%154 : memref<2x16x128xf32, #tpu.memory_space<any>>) target(%156 : memref<2x16x128xf32, #tpu.memory_space<vmem>>) target_semaphore(%158 : memref<!tpu.dma_semaphore, #tpu.memory_space<semaphore_mem>>)
      %c2_i32_168 = arith.constant 2 : i32
      %c0_i32_169 = arith.constant 0 : i32
      %c0_i32_170 = arith.constant 0 : i32
      %159 = tpu.memref_slice %arg2[%arg0, %146, %c0_i32_169, %c0_i32_170] : memref<2x16x16x128xf32, #tpu.memory_space<any>> -> memref<1x2x16x128xf32, #tpu.memory_space<any>>
      %160 = tpu.memref_squeeze %159 : memref<1x2x16x128xf32, #tpu.memory_space<any>> -> memref<2x16x128xf32, #tpu.memory_space<any>>
      %c18_i32_171 = arith.constant 18 : i32
      %c0_i32_172 = arith.constant 0 : i32
      %c0_i32_173 = arith.constant 0 : i32
      %161 = tpu.memref_slice %arg8[%9, %c18_i32_171, %c0_i32_172, %c0_i32_173] : memref<2x20x16x128xf32, #tpu.memory_space<vmem>> -> memref<1x2x16x128xf32, #tpu.memory_space<vmem>>
      %162 = tpu.memref_squeeze %161 : memref<1x2x16x128xf32, #tpu.memory_space<vmem>> -> memref<2x16x128xf32, #tpu.memory_space<vmem>>
      %163 = tpu.memref_slice %arg11[%9, %c2_i32_168] : memref<2x3x!tpu.dma_semaphore, #tpu.memory_space<semaphore_mem>> -> memref<1x1x!tpu.dma_semaphore, #tpu.memory_space<semaphore_mem>>
      %164 = tpu.memref_squeeze %163 : memref<1x1x!tpu.dma_semaphore, #tpu.memory_space<semaphore_mem>> -> memref<!tpu.dma_semaphore, #tpu.memory_space<semaphore_mem>>
      tpu.enqueue_dma source(%160 : memref<2x16x128xf32, #tpu.memory_space<any>>) target(%162 : memref<2x16x128xf32, #tpu.memory_space<vmem>>) target_semaphore(%164 : memref<!tpu.dma_semaphore, #tpu.memory_space<semaphore_mem>>)
    } else {
    }
    %c1_i32_5 = arith.constant 1 : i32
    %15 = arith.addi %arg1, %c1_i32_5 : i32
    %c1_i32_6 = arith.constant 1 : i32
    %16 = arith.cmpi slt, %15, %c1_i32_6 : i32
    %17 = arith.extui %16 : i1 to i32
    %c0_i32_7 = arith.constant 0 : i32
    %18 = arith.cmpi ne, %17, %c0_i32_7 : i32
    scf.if %18 {
      %c1_i32_151 = arith.constant 1 : i32
      %141 = arith.addi %arg1, %c1_i32_151 : i32
      %c1_i32_152 = arith.constant 1 : i32
      %142 = arith.subi %c1_i32_152, %9 : i32
      %c16_i32_153 = arith.constant 16 : i32
      %143 = arith.muli %141, %c16_i32_153 : i32
      %144 = tpu.assume_multiple %143, 16 : i32
      %c2_i32_154 = arith.constant 2 : i32
      %145 = arith.subi %144, %c2_i32_154 : i32
      %c0_i32_155 = arith.constant 0 : i32
      %146 = arith.maxsi %145, %c0_i32_155 : i32
      %c16_i32_156 = arith.constant 16 : i32
      %147 = arith.addi %144, %c16_i32_156 : i32
      %c14_i32_157 = arith.constant 14 : i32
      %148 = arith.minsi %147, %c14_i32_157 : i32
      %c0_i32_158 = arith.constant 0 : i32
      %c0_i32_159 = arith.constant 0 : i32
      %c0_i32_160 = arith.constant 0 : i32
      %149 = tpu.memref_slice %arg2[%arg0, %144, %c0_i32_159, %c0_i32_160] : memref<2x16x16x128xf32, #tpu.memory_space<any>> -> memref<1x16x16x128xf32, #tpu.memory_space<any>>
      %150 = tpu.memref_squeeze %149 : memref<1x16x16x128xf32, #tpu.memory_space<any>> -> memref<16x16x128xf32, #tpu.memory_space<any>>
      %c2_i32_161 = arith.constant 2 : i32
      %c0_i32_162 = arith.constant 0 : i32
      %c0_i32_163 = arith.constant 0 : i32
      %151 = tpu.memref_slice %arg8[%142, %c2_i32_161, %c0_i32_162, %c0_i32_163] : memref<2x20x16x128xf32, #tpu.memory_space<vmem>> -> memref<1x16x16x128xf32, #tpu.memory_space<vmem>>
      %152 = tpu.memref_squeeze %151 : memref<1x16x16x128xf32, #tpu.memory_space<vmem>> -> memref<16x16x128xf32, #tpu.memory_space<vmem>>
      %153 = tpu.memref_slice %arg11[%142, %c0_i32_158] : memref<2x3x!tpu.dma_semaphore, #tpu.memory_space<semaphore_mem>> -> memref<1x1x!tpu.dma_semaphore, #tpu.memory_space<semaphore_mem>>
      %154 = tpu.memref_squeeze %153 : memref<1x1x!tpu.dma_semaphore, #tpu.memory_space<semaphore_mem>> -> memref<!tpu.dma_semaphore, #tpu.memory_space<semaphore_mem>>
      tpu.enqueue_dma source(%150 : memref<16x16x128xf32, #tpu.memory_space<any>>) target(%152 : memref<16x16x128xf32, #tpu.memory_space<vmem>>) target_semaphore(%154 : memref<!tpu.dma_semaphore, #tpu.memory_space<semaphore_mem>>)
      %c1_i32_164 = arith.constant 1 : i32
      %c0_i32_165 = arith.constant 0 : i32
      %c0_i32_166 = arith.constant 0 : i32
      %155 = tpu.memref_slice %arg2[%arg0, %146, %c0_i32_165, %c0_i32_166] : memref<2x16x16x128xf32, #tpu.memory_space<any>> -> memref<1x2x16x128xf32, #tpu.memory_space<any>>
      %156 = tpu.memref_squeeze %155 : memref<1x2x16x128xf32, #tpu.memory_space<any>> -> memref<2x16x128xf32, #tpu.memory_space<any>>
      %c0_i32_167 = arith.constant 0 : i32
      %c0_i32_168 = arith.constant 0 : i32
      %c0_i32_169 = arith.constant 0 : i32
      %157 = tpu.memref_slice %arg8[%142, %c0_i32_167, %c0_i32_168, %c0_i32_169] : memref<2x20x16x128xf32, #tpu.memory_space<vmem>> -> memref<1x2x16x128xf32, #tpu.memory_space<vmem>>
      %158 = tpu.memref_squeeze %157 : memref<1x2x16x128xf32, #tpu.memory_space<vmem>> -> memref<2x16x128xf32, #tpu.memory_space<vmem>>
      %159 = tpu.memref_slice %arg11[%142, %c1_i32_164] : memref<2x3x!tpu.dma_semaphore, #tpu.memory_space<semaphore_mem>> -> memref<1x1x!tpu.dma_semaphore, #tpu.memory_space<semaphore_mem>>
      %160 = tpu.memref_squeeze %159 : memref<1x1x!tpu.dma_semaphore, #tpu.memory_space<semaphore_mem>> -> memref<!tpu.dma_semaphore, #tpu.memory_space<semaphore_mem>>
      tpu.enqueue_dma source(%156 : memref<2x16x128xf32, #tpu.memory_space<any>>) target(%158 : memref<2x16x128xf32, #tpu.memory_space<vmem>>) target_semaphore(%160 : memref<!tpu.dma_semaphore, #tpu.memory_space<semaphore_mem>>)
      %c2_i32_170 = arith.constant 2 : i32
      %c0_i32_171 = arith.constant 0 : i32
      %c0_i32_172 = arith.constant 0 : i32
      %161 = tpu.memref_slice %arg2[%arg0, %148, %c0_i32_171, %c0_i32_172] : memref<2x16x16x128xf32, #tpu.memory_space<any>> -> memref<1x2x16x128xf32, #tpu.memory_space<any>>
      %162 = tpu.memref_squeeze %161 : memref<1x2x16x128xf32, #tpu.memory_space<any>> -> memref<2x16x128xf32, #tpu.memory_space<any>>
      %c18_i32_173 = arith.constant 18 : i32
      %c0_i32_174 = arith.constant 0 : i32
      %c0_i32_175 = arith.constant 0 : i32
      %163 = tpu.memref_slice %arg8[%142, %c18_i32_173, %c0_i32_174, %c0_i32_175] : memref<2x20x16x128xf32, #tpu.memory_space<vmem>> -> memref<1x2x16x128xf32, #tpu.memory_space<vmem>>
      %164 = tpu.memref_squeeze %163 : memref<1x2x16x128xf32, #tpu.memory_space<vmem>> -> memref<2x16x128xf32, #tpu.memory_space<vmem>>
      %165 = tpu.memref_slice %arg11[%142, %c2_i32_170] : memref<2x3x!tpu.dma_semaphore, #tpu.memory_space<semaphore_mem>> -> memref<1x1x!tpu.dma_semaphore, #tpu.memory_space<semaphore_mem>>
      %166 = tpu.memref_squeeze %165 : memref<1x1x!tpu.dma_semaphore, #tpu.memory_space<semaphore_mem>> -> memref<!tpu.dma_semaphore, #tpu.memory_space<semaphore_mem>>
      tpu.enqueue_dma source(%162 : memref<2x16x128xf32, #tpu.memory_space<any>>) target(%164 : memref<2x16x128xf32, #tpu.memory_space<vmem>>) target_semaphore(%166 : memref<!tpu.dma_semaphore, #tpu.memory_space<semaphore_mem>>)
    } else {
    }
    %c16_i32_8 = arith.constant 16 : i32
    %19 = arith.muli %arg1, %c16_i32_8 : i32
    %20 = tpu.assume_multiple %19, 16 : i32
    %c2_i32_9 = arith.constant 2 : i32
    %21 = arith.subi %20, %c2_i32_9 : i32
    %c0_i32_10 = arith.constant 0 : i32
    %22 = arith.maxsi %21, %c0_i32_10 : i32
    %c16_i32_11 = arith.constant 16 : i32
    %23 = arith.addi %20, %c16_i32_11 : i32
    %c14_i32 = arith.constant 14 : i32
    %24 = arith.minsi %23, %c14_i32 : i32
    %c0_i32_12 = arith.constant 0 : i32
    %c0_i32_13 = arith.constant 0 : i32
    %c0_i32_14 = arith.constant 0 : i32
    %25 = tpu.memref_slice %arg2[%arg0, %20, %c0_i32_13, %c0_i32_14] : memref<2x16x16x128xf32, #tpu.memory_space<any>> -> memref<1x16x16x128xf32, #tpu.memory_space<any>>
    %26 = tpu.memref_squeeze %25 : memref<1x16x16x128xf32, #tpu.memory_space<any>> -> memref<16x16x128xf32, #tpu.memory_space<any>>
    %c2_i32_15 = arith.constant 2 : i32
    %c0_i32_16 = arith.constant 0 : i32
    %c0_i32_17 = arith.constant 0 : i32
    %27 = tpu.memref_slice %arg8[%9, %c2_i32_15, %c0_i32_16, %c0_i32_17] : memref<2x20x16x128xf32, #tpu.memory_space<vmem>> -> memref<1x16x16x128xf32, #tpu.memory_space<vmem>>
    %28 = tpu.memref_squeeze %27 : memref<1x16x16x128xf32, #tpu.memory_space<vmem>> -> memref<16x16x128xf32, #tpu.memory_space<vmem>>
    %29 = tpu.memref_slice %arg11[%9, %c0_i32_12] : memref<2x3x!tpu.dma_semaphore, #tpu.memory_space<semaphore_mem>> -> memref<1x1x!tpu.dma_semaphore, #tpu.memory_space<semaphore_mem>>
    %30 = tpu.memref_squeeze %29 : memref<1x1x!tpu.dma_semaphore, #tpu.memory_space<semaphore_mem>> -> memref<!tpu.dma_semaphore, #tpu.memory_space<semaphore_mem>>
    tpu.wait_dma2 semaphore(%30 : memref<!tpu.dma_semaphore, #tpu.memory_space<semaphore_mem>>) src(%26 : memref<16x16x128xf32, #tpu.memory_space<any>>) dst(%28 : memref<16x16x128xf32, #tpu.memory_space<vmem>>)
    %c1_i32_18 = arith.constant 1 : i32
    %c0_i32_19 = arith.constant 0 : i32
    %c0_i32_20 = arith.constant 0 : i32
    %31 = tpu.memref_slice %arg2[%arg0, %22, %c0_i32_19, %c0_i32_20] : memref<2x16x16x128xf32, #tpu.memory_space<any>> -> memref<1x2x16x128xf32, #tpu.memory_space<any>>
    %32 = tpu.memref_squeeze %31 : memref<1x2x16x128xf32, #tpu.memory_space<any>> -> memref<2x16x128xf32, #tpu.memory_space<any>>
    %c0_i32_21 = arith.constant 0 : i32
    %c0_i32_22 = arith.constant 0 : i32
    %c0_i32_23 = arith.constant 0 : i32
    %33 = tpu.memref_slice %arg8[%9, %c0_i32_21, %c0_i32_22, %c0_i32_23] : memref<2x20x16x128xf32, #tpu.memory_space<vmem>> -> memref<1x2x16x128xf32, #tpu.memory_space<vmem>>
    %34 = tpu.memref_squeeze %33 : memref<1x2x16x128xf32, #tpu.memory_space<vmem>> -> memref<2x16x128xf32, #tpu.memory_space<vmem>>
    %35 = tpu.memref_slice %arg11[%9, %c1_i32_18] : memref<2x3x!tpu.dma_semaphore, #tpu.memory_space<semaphore_mem>> -> memref<1x1x!tpu.dma_semaphore, #tpu.memory_space<semaphore_mem>>
    %36 = tpu.memref_squeeze %35 : memref<1x1x!tpu.dma_semaphore, #tpu.memory_space<semaphore_mem>> -> memref<!tpu.dma_semaphore, #tpu.memory_space<semaphore_mem>>
    tpu.wait_dma2 semaphore(%36 : memref<!tpu.dma_semaphore, #tpu.memory_space<semaphore_mem>>) src(%32 : memref<2x16x128xf32, #tpu.memory_space<any>>) dst(%34 : memref<2x16x128xf32, #tpu.memory_space<vmem>>)
    %c2_i32_24 = arith.constant 2 : i32
    %c0_i32_25 = arith.constant 0 : i32
    %c0_i32_26 = arith.constant 0 : i32
    %37 = tpu.memref_slice %arg2[%arg0, %24, %c0_i32_25, %c0_i32_26] : memref<2x16x16x128xf32, #tpu.memory_space<any>> -> memref<1x2x16x128xf32, #tpu.memory_space<any>>
    %38 = tpu.memref_squeeze %37 : memref<1x2x16x128xf32, #tpu.memory_space<any>> -> memref<2x16x128xf32, #tpu.memory_space<any>>
    %c18_i32 = arith.constant 18 : i32
    %c0_i32_27 = arith.constant 0 : i32
    %c0_i32_28 = arith.constant 0 : i32
    %39 = tpu.memref_slice %arg8[%9, %c18_i32, %c0_i32_27, %c0_i32_28] : memref<2x20x16x128xf32, #tpu.memory_space<vmem>> -> memref<1x2x16x128xf32, #tpu.memory_space<vmem>>
    %40 = tpu.memref_squeeze %39 : memref<1x2x16x128xf32, #tpu.memory_space<vmem>> -> memref<2x16x128xf32, #tpu.memory_space<vmem>>
    %41 = tpu.memref_slice %arg11[%9, %c2_i32_24] : memref<2x3x!tpu.dma_semaphore, #tpu.memory_space<semaphore_mem>> -> memref<1x1x!tpu.dma_semaphore, #tpu.memory_space<semaphore_mem>>
    %42 = tpu.memref_squeeze %41 : memref<1x1x!tpu.dma_semaphore, #tpu.memory_space<semaphore_mem>> -> memref<!tpu.dma_semaphore, #tpu.memory_space<semaphore_mem>>
    tpu.wait_dma2 semaphore(%42 : memref<!tpu.dma_semaphore, #tpu.memory_space<semaphore_mem>>) src(%38 : memref<2x16x128xf32, #tpu.memory_space<any>>) dst(%40 : memref<2x16x128xf32, #tpu.memory_space<vmem>>)
    %43 = arith.index_cast %9 : i32 to index
    %c0 = arith.constant 0 : index
    %c0_29 = arith.constant 0 : index
    %c0_30 = arith.constant 0 : index
    %44 = vector.load %arg8[%43, %c0, %c0_29, %c0_30] : memref<2x20x16x128xf32, #tpu.memory_space<vmem>>, vector<1x20x16x128xf32>
    %45 = vector.shape_cast %44 : vector<1x20x16x128xf32> to vector<20x16x128xf32>
    %c0_31 = arith.constant 0 : index
    %c1 = arith.constant 1 : index
    %c0_32 = arith.constant 0 : index
    %46 = vector.load %arg9[%c0_31, %c1, %c0_32] : memref<20x18x128xf32, #tpu.memory_space<vmem>>, vector<20x16x128xf32>
    tpu.vector_store %arg9[%c0_31, %c1, %c0_32], %45 {strides = array<i32>} : memref<20x18x128xf32, #tpu.memory_space<vmem>>, vector<20x16x128xf32>,
    %c0_i32_33 = arith.constant 0 : i32
    %47 = arith.cmpi eq, %11, %c0_i32_33 : i32
    %48 = arith.extui %47 : i1 to i32
    %c0_i32_34 = arith.constant 0 : i32
    %49 = arith.cmpi ne, %48, %c0_i32_34 : i32
    scf.if %49 {
      %c3 = arith.constant 3 : index
      %c0_151 = arith.constant 0 : index
      %c0_152 = arith.constant 0 : index
      %141 = vector.load %arg9[%c3, %c0_151, %c0_152] : memref<20x18x128xf32, #tpu.memory_space<vmem>>, vector<1x18x128xf32>
      %c1_153 = arith.constant 1 : index
      %c0_154 = arith.constant 0 : index
      %c0_155 = arith.constant 0 : index
      %142 = vector.load %arg9[%c1_153, %c0_154, %c0_155] : memref<20x18x128xf32, #tpu.memory_space<vmem>>, vector<1x18x128xf32>
      tpu.vector_store %arg9[%c1_153, %c0_154, %c0_155], %141 {strides = array<i32>} : memref<20x18x128xf32, #tpu.memory_space<vmem>>, vector<1x18x128xf32>,
    } else {
    }
    %c16_i32_35 = arith.constant 16 : i32
    %50 = arith.addi %11, %c16_i32_35 : i32
    %c16_i32_36 = arith.constant 16 : i32
    %51 = arith.cmpi eq, %50, %c16_i32_36 : i32
    %52 = arith.extui %51 : i1 to i32
    %c0_i32_37 = arith.constant 0 : i32
    %53 = arith.cmpi ne, %52, %c0_i32_37 : i32
    scf.if %53 {
      %c16 = arith.constant 16 : index
      %c0_151 = arith.constant 0 : index
      %c0_152 = arith.constant 0 : index
      %141 = vector.load %arg9[%c16, %c0_151, %c0_152] : memref<20x18x128xf32, #tpu.memory_space<vmem>>, vector<1x18x128xf32>
      %c18 = arith.constant 18 : index
      %c0_153 = arith.constant 0 : index
      %c0_154 = arith.constant 0 : index
      %142 = vector.load %arg9[%c18, %c0_153, %c0_154] : memref<20x18x128xf32, #tpu.memory_space<vmem>>, vector<1x18x128xf32>
      tpu.vector_store %arg9[%c18, %c0_153, %c0_154], %141 {strides = array<i32>} : memref<20x18x128xf32, #tpu.memory_space<vmem>>, vector<1x18x128xf32>,
    } else {
    }
    %c0_38 = arith.constant 0 : index
    %c2 = arith.constant 2 : index
    %c0_39 = arith.constant 0 : index
    %54 = vector.load %arg9[%c0_38, %c2, %c0_39] : memref<20x18x128xf32, #tpu.memory_space<vmem>>, vector<20x1x128xf32>
    %c0_40 = arith.constant 0 : index
    %c0_41 = arith.constant 0 : index
    %c0_42 = arith.constant 0 : index
    %55 = vector.load %arg9[%c0_40, %c0_41, %c0_42] : memref<20x18x128xf32, #tpu.memory_space<vmem>>, vector<20x1x128xf32>
    tpu.vector_store %arg9[%c0_40, %c0_41, %c0_42], %54 {strides = array<i32>} : memref<20x18x128xf32, #tpu.memory_space<vmem>>, vector<20x1x128xf32>,
    %c0_43 = arith.constant 0 : index
    %c15 = arith.constant 15 : index
    %c0_44 = arith.constant 0 : index
    %56 = vector.load %arg9[%c0_43, %c15, %c0_44] : memref<20x18x128xf32, #tpu.memory_space<vmem>>, vector<20x1x128xf32>
    %c0_45 = arith.constant 0 : index
    %c17 = arith.constant 17 : index
    %c0_46 = arith.constant 0 : index
    %57 = vector.load %arg9[%c0_45, %c17, %c0_46] : memref<20x18x128xf32, #tpu.memory_space<vmem>>, vector<20x1x128xf32>
    tpu.vector_store %arg9[%c0_45, %c17, %c0_46], %56 {strides = array<i32>} : memref<20x18x128xf32, #tpu.memory_space<vmem>>, vector<20x1x128xf32>,
    %c0_47 = arith.constant 0 : index
    %c0_48 = arith.constant 0 : index
    %58 = vector.load %arg4[%c0_47, %c0_48] : memref<1x128xf32, #tpu.memory_space<vmem>>, vector<1x128xf32>
    %59 = vector.shape_cast %58 : vector<1x128xf32> to vector<1x128xf32>
    %60 = vector.broadcast %59 : vector<1x128xf32> to vector<288x128xf32>
    %c0_49 = arith.constant 0 : index
    %c0_50 = arith.constant 0 : index
    %c0_51 = arith.constant 0 : index
    %61 = vector.load %arg9[%c0_49, %c0_50, %c0_51] : memref<20x18x128xf32, #tpu.memory_space<vmem>>, vector<18x16x128xf32>
    %c0_52 = arith.constant 0 : index
    %c1_53 = arith.constant 1 : index
    %c0_54 = arith.constant 0 : index
    %62 = vector.load %arg9[%c0_52, %c1_53, %c0_54] : memref<20x18x128xf32, #tpu.memory_space<vmem>>, vector<18x16x128xf32>
    %c0_55 = arith.constant 0 : index
    %c2_56 = arith.constant 2 : index
    %c0_57 = arith.constant 0 : index
    %63 = vector.load %arg9[%c0_55, %c2_56, %c0_57] : memref<20x18x128xf32, #tpu.memory_space<vmem>>, vector<18x16x128xf32>
    %64 = tpu.concatenate %61, %62, %63 in 2 : vector<18x16x128xf32>, vector<18x16x128xf32>, vector<18x16x128xf32> -> vector<18x16x384xf32>
    %65 = vector.shape_cast %64 : vector<18x16x384xf32> to vector<288x384xf32>
    %c0_58 = arith.constant 0 : index
    %c0_59 = arith.constant 0 : index
    %c0_60 = arith.constant 0 : index
    %66 = vector.load %arg3[%c0_58, %c0_59, %c0_60] : memref<3x384x128xf32, #tpu.memory_space<vmem>>, vector<1x384x128xf32>
    %67 = vector.shape_cast %66 : vector<1x384x128xf32> to vector<384x128xf32>
    %cst = arith.constant dense<0.000000e+00> : vector<288x128xf32>
    %68 = tpu.matmul %65, %67, %cst {dimension_numbers = #tpu.dot_dimension_numbers<[1], [0], [0], [1], [0, 0, 1, 1], [], []>} : vector<288x384xf32>, vector<384x128xf32>, vector<288x128xf32> -> vector<288x128xf32>
    %69 = arith.addf %60, %68 : vector<288x128xf32>
    %c1_61 = arith.constant 1 : index
    %c0_62 = arith.constant 0 : index
    %c0_63 = arith.constant 0 : index
    %70 = vector.load %arg9[%c1_61, %c0_62, %c0_63] : memref<20x18x128xf32, #tpu.memory_space<vmem>>, vector<18x16x128xf32>
    %c1_64 = arith.constant 1 : index
    %c1_65 = arith.constant 1 : index
    %c0_66 = arith.constant 0 : index
    %71 = vector.load %arg9[%c1_64, %c1_65, %c0_66] : memref<20x18x128xf32, #tpu.memory_space<vmem>>, vector<18x16x128xf32>
    %c1_67 = arith.constant 1 : index
    %c2_68 = arith.constant 2 : index
    %c0_69 = arith.constant 0 : index
    %72 = vector.load %arg9[%c1_67, %c2_68, %c0_69] : memref<20x18x128xf32, #tpu.memory_space<vmem>>, vector<18x16x128xf32>
    %73 = tpu.concatenate %70, %71, %72 in 2 : vector<18x16x128xf32>, vector<18x16x128xf32>, vector<18x16x128xf32> -> vector<18x16x384xf32>
    %74 = vector.shape_cast %73 : vector<18x16x384xf32> to vector<288x384xf32>
    %c1_70 = arith.constant 1 : index
    %c0_71 = arith.constant 0 : index
    %c0_72 = arith.constant 0 : index
    %75 = vector.load %arg3[%c1_70, %c0_71, %c0_72] : memref<3x384x128xf32, #tpu.memory_space<vmem>>, vector<1x384x128xf32>
    %76 = vector.shape_cast %75 : vector<1x384x128xf32> to vector<384x128xf32>
    %cst_73 = arith.constant dense<0.000000e+00> : vector<288x128xf32>
    %77 = tpu.matmul %74, %76, %cst_73 {dimension_numbers = #tpu.dot_dimension_numbers<[1], [0], [0], [1], [0, 0, 1, 1], [], []>} : vector<288x384xf32>, vector<384x128xf32>, vector<288x128xf32> -> vector<288x128xf32>
    %78 = arith.addf %69, %77 : vector<288x128xf32>
    %c2_74 = arith.constant 2 : index
    %c0_75 = arith.constant 0 : index
    %c0_76 = arith.constant 0 : index
    %79 = vector.load %arg9[%c2_74, %c0_75, %c0_76] : memref<20x18x128xf32, #tpu.memory_space<vmem>>, vector<18x16x128xf32>
    %c2_77 = arith.constant 2 : index
    %c1_78 = arith.constant 1 : index
    %c0_79 = arith.constant 0 : index
    %80 = vector.load %arg9[%c2_77, %c1_78, %c0_79] : memref<20x18x128xf32, #tpu.memory_space<vmem>>, vector<18x16x128xf32>
    %c2_80 = arith.constant 2 : index
    %c2_81 = arith.constant 2 : index
    %c0_82 = arith.constant 0 : index
    %81 = vector.load %arg9[%c2_80, %c2_81, %c0_82] : memref<20x18x128xf32, #tpu.memory_space<vmem>>, vector<18x16x128xf32>
    %82 = tpu.concatenate %79, %80, %81 in 2 : vector<18x16x128xf32>, vector<18x16x128xf32>, vector<18x16x128xf32> -> vector<18x16x384xf32>
    %83 = vector.shape_cast %82 : vector<18x16x384xf32> to vector<288x384xf32>
    %c2_83 = arith.constant 2 : index
    %c0_84 = arith.constant 0 : index
    %c0_85 = arith.constant 0 : index
    %84 = vector.load %arg3[%c2_83, %c0_84, %c0_85] : memref<3x384x128xf32, #tpu.memory_space<vmem>>, vector<1x384x128xf32>
    %85 = vector.shape_cast %84 : vector<1x384x128xf32> to vector<384x128xf32>
    %cst_86 = arith.constant dense<0.000000e+00> : vector<288x128xf32>
    %86 = tpu.matmul %83, %85, %cst_86 {dimension_numbers = #tpu.dot_dimension_numbers<[1], [0], [0], [1], [0, 0, 1, 1], [], []>} : vector<288x384xf32>, vector<384x128xf32>, vector<288x128xf32> -> vector<288x128xf32>
    %87 = arith.addf %78, %86 : vector<288x128xf32>
    %cst_87 = arith.constant 0.000000e+00 : f32
    %88 = vector.broadcast %cst_87 : f32 to vector<288x128xf32>
    %89 = arith.maximumf %87, %88 : vector<288x128xf32>
    %90 = vector.shape_cast %89 : vector<288x128xf32> to vector<18x16x128xf32>
    %c0_88 = arith.constant 0 : index
    %c1_89 = arith.constant 1 : index
    %c0_90 = arith.constant 0 : index
    %91 = vector.load %arg10[%c0_88, %c1_89, %c0_90] : memref<18x18x128xf32, #tpu.memory_space<vmem>>, vector<18x16x128xf32>
    tpu.vector_store %arg10[%c0_88, %c1_89, %c0_90], %90 {strides = array<i32>} : memref<18x18x128xf32, #tpu.memory_space<vmem>>, vector<18x16x128xf32>,
    %92 = vector.extract_strided_slice %90 {offsets = [0, 1, 0], sizes = [18, 1, 128], strides = [1, 1, 1]} : vector<18x16x128xf32> to vector<18x1x128xf32>
    %c0_91 = arith.constant 0 : index
    %c0_92 = arith.constant 0 : index
    %c0_93 = arith.constant 0 : index
    %93 = vector.load %arg10[%c0_91, %c0_92, %c0_93] : memref<18x18x128xf32, #tpu.memory_space<vmem>>, vector<18x1x128xf32>
    tpu.vector_store %arg10[%c0_91, %c0_92, %c0_93], %92 {strides = array<i32>} : memref<18x18x128xf32, #tpu.memory_space<vmem>>, vector<18x1x128xf32>,
    %94 = vector.extract_strided_slice %90 {offsets = [0, 14, 0], sizes = [18, 1, 128], strides = [1, 1, 1]} : vector<18x16x128xf32> to vector<18x1x128xf32>
    %c0_94 = arith.constant 0 : index
    %c17_95 = arith.constant 17 : index
    %c0_96 = arith.constant 0 : index
    %95 = vector.load %arg10[%c0_94, %c17_95, %c0_96] : memref<18x18x128xf32, #tpu.memory_space<vmem>>, vector<18x1x128xf32>
    tpu.vector_store %arg10[%c0_94, %c17_95, %c0_96], %94 {strides = array<i32>} : memref<18x18x128xf32, #tpu.memory_space<vmem>>, vector<18x1x128xf32>,
    %c0_i32_97 = arith.constant 0 : i32
    %96 = arith.cmpi eq, %11, %c0_i32_97 : i32
    %97 = arith.extui %96 : i1 to i32
    %c0_i32_98 = arith.constant 0 : i32
    %98 = arith.cmpi ne, %97, %c0_i32_98 : i32
    scf.if %98 {
      %c2_151 = arith.constant 2 : index
      %c0_152 = arith.constant 0 : index
      %c0_153 = arith.constant 0 : index
      %141 = vector.load %arg10[%c2_151, %c0_152, %c0_153] : memref<18x18x128xf32, #tpu.memory_space<vmem>>, vector<1x18x128xf32>
      %c0_154 = arith.constant 0 : index
      %c0_155 = arith.constant 0 : index
      %c0_156 = arith.constant 0 : index
      %142 = vector.load %arg10[%c0_154, %c0_155, %c0_156] : memref<18x18x128xf32, #tpu.memory_space<vmem>>, vector<1x18x128xf32>
      tpu.vector_store %arg10[%c0_154, %c0_155, %c0_156], %141 {strides = array<i32>} : memref<18x18x128xf32, #tpu.memory_space<vmem>>, vector<1x18x128xf32>,
    } else {
    }
    %c16_i32_99 = arith.constant 16 : i32
    %99 = arith.addi %11, %c16_i32_99 : i32
    %c16_i32_100 = arith.constant 16 : i32
    %100 = arith.cmpi eq, %99, %c16_i32_100 : i32
    %101 = arith.extui %100 : i1 to i32
    %c0_i32_101 = arith.constant 0 : i32
    %102 = arith.cmpi ne, %101, %c0_i32_101 : i32
    scf.if %102 {
      %c15_151 = arith.constant 15 : index
      %c0_152 = arith.constant 0 : index
      %c0_153 = arith.constant 0 : index
      %141 = vector.load %arg10[%c15_151, %c0_152, %c0_153] : memref<18x18x128xf32, #tpu.memory_space<vmem>>, vector<1x18x128xf32>
      %c17_154 = arith.constant 17 : index
      %c0_155 = arith.constant 0 : index
      %c0_156 = arith.constant 0 : index
      %142 = vector.load %arg10[%c17_154, %c0_155, %c0_156] : memref<18x18x128xf32, #tpu.memory_space<vmem>>, vector<1x18x128xf32>
      tpu.vector_store %arg10[%c17_154, %c0_155, %c0_156], %141 {strides = array<i32>} : memref<18x18x128xf32, #tpu.memory_space<vmem>>, vector<1x18x128xf32>,
    } else {
    }
    %c0_102 = arith.constant 0 : index
    %c0_103 = arith.constant 0 : index
    %103 = vector.load %arg6[%c0_102, %c0_103] : memref<1x128xf32, #tpu.memory_space<vmem>>, vector<1x128xf32>
    %104 = vector.shape_cast %103 : vector<1x128xf32> to vector<1x128xf32>
    %105 = vector.broadcast %104 : vector<1x128xf32> to vector<256x128xf32>
    %c0_104 = arith.constant 0 : index
    %c0_105 = arith.constant 0 : index
    %c0_106 = arith.constant 0 : index
    %106 = vector.load %arg10[%c0_104, %c0_105, %c0_106] : memref<18x18x128xf32, #tpu.memory_space<vmem>>, vector<16x16x128xf32>
    %c0_107 = arith.constant 0 : index
    %c1_108 = arith.constant 1 : index
    %c0_109 = arith.constant 0 : index
    %107 = vector.load %arg10[%c0_107, %c1_108, %c0_109] : memref<18x18x128xf32, #tpu.memory_space<vmem>>, vector<16x16x128xf32>
    %c0_110 = arith.constant 0 : index
    %c2_111 = arith.constant 2 : index
    %c0_112 = arith.constant 0 : index
    %108 = vector.load %arg10[%c0_110, %c2_111, %c0_112] : memref<18x18x128xf32, #tpu.memory_space<vmem>>, vector<16x16x128xf32>
    %109 = tpu.concatenate %106, %107, %108 in 2 : vector<16x16x128xf32>, vector<16x16x128xf32>, vector<16x16x128xf32> -> vector<16x16x384xf32>
    %110 = vector.shape_cast %109 : vector<16x16x384xf32> to vector<256x384xf32>
    %c0_113 = arith.constant 0 : index
    %c0_114 = arith.constant 0 : index
    %c0_115 = arith.constant 0 : index
    %111 = vector.load %arg5[%c0_113, %c0_114, %c0_115] : memref<3x384x128xf32, #tpu.memory_space<vmem>>, vector<1x384x128xf32>
    %112 = vector.shape_cast %111 : vector<1x384x128xf32> to vector<384x128xf32>
    %cst_116 = arith.constant dense<0.000000e+00> : vector<256x128xf32>
    %113 = tpu.matmul %110, %112, %cst_116 {dimension_numbers = #tpu.dot_dimension_numbers<[1], [0], [0], [1], [0, 0, 1, 1], [], []>} : vector<256x384xf32>, vector<384x128xf32>, vector<256x128xf32> -> vector<256x128xf32>
    %114 = arith.addf %105, %113 : vector<256x128xf32>
    %c1_117 = arith.constant 1 : index
    %c0_118 = arith.constant 0 : index
    %c0_119 = arith.constant 0 : index
    %115 = vector.load %arg10[%c1_117, %c0_118, %c0_119] : memref<18x18x128xf32, #tpu.memory_space<vmem>>, vector<16x16x128xf32>
    %c1_120 = arith.constant 1 : index
    %c1_121 = arith.constant 1 : index
    %c0_122 = arith.constant 0 : index
    %116 = vector.load %arg10[%c1_120, %c1_121, %c0_122] : memref<18x18x128xf32, #tpu.memory_space<vmem>>, vector<16x16x128xf32>
    %c1_123 = arith.constant 1 : index
    %c2_124 = arith.constant 2 : index
    %c0_125 = arith.constant 0 : index
    %117 = vector.load %arg10[%c1_123, %c2_124, %c0_125] : memref<18x18x128xf32, #tpu.memory_space<vmem>>, vector<16x16x128xf32>
    %118 = tpu.concatenate %115, %116, %117 in 2 : vector<16x16x128xf32>, vector<16x16x128xf32>, vector<16x16x128xf32> -> vector<16x16x384xf32>
    %119 = vector.shape_cast %118 : vector<16x16x384xf32> to vector<256x384xf32>
    %c1_126 = arith.constant 1 : index
    %c0_127 = arith.constant 0 : index
    %c0_128 = arith.constant 0 : index
    %120 = vector.load %arg5[%c1_126, %c0_127, %c0_128] : memref<3x384x128xf32, #tpu.memory_space<vmem>>, vector<1x384x128xf32>
    %121 = vector.shape_cast %120 : vector<1x384x128xf32> to vector<384x128xf32>
    %cst_129 = arith.constant dense<0.000000e+00> : vector<256x128xf32>
    %122 = tpu.matmul %119, %121, %cst_129 {dimension_numbers = #tpu.dot_dimension_numbers<[1], [0], [0], [1], [0, 0, 1, 1], [], []>} : vector<256x384xf32>, vector<384x128xf32>, vector<256x128xf32> -> vector<256x128xf32>
    %123 = arith.addf %114, %122 : vector<256x128xf32>
    %c2_130 = arith.constant 2 : index
    %c0_131 = arith.constant 0 : index
    %c0_132 = arith.constant 0 : index
    %124 = vector.load %arg10[%c2_130, %c0_131, %c0_132] : memref<18x18x128xf32, #tpu.memory_space<vmem>>, vector<16x16x128xf32>
    %c2_133 = arith.constant 2 : index
    %c1_134 = arith.constant 1 : index
    %c0_135 = arith.constant 0 : index
    %125 = vector.load %arg10[%c2_133, %c1_134, %c0_135] : memref<18x18x128xf32, #tpu.memory_space<vmem>>, vector<16x16x128xf32>
    %c2_136 = arith.constant 2 : index
    %c2_137 = arith.constant 2 : index
    %c0_138 = arith.constant 0 : index
    %126 = vector.load %arg10[%c2_136, %c2_137, %c0_138] : memref<18x18x128xf32, #tpu.memory_space<vmem>>, vector<16x16x128xf32>
    %127 = tpu.concatenate %124, %125, %126 in 2 : vector<16x16x128xf32>, vector<16x16x128xf32>, vector<16x16x128xf32> -> vector<16x16x384xf32>
    %128 = vector.shape_cast %127 : vector<16x16x384xf32> to vector<256x384xf32>
    %c2_139 = arith.constant 2 : index
    %c0_140 = arith.constant 0 : index
    %c0_141 = arith.constant 0 : index
    %129 = vector.load %arg5[%c2_139, %c0_140, %c0_141] : memref<3x384x128xf32, #tpu.memory_space<vmem>>, vector<1x384x128xf32>
    %130 = vector.shape_cast %129 : vector<1x384x128xf32> to vector<384x128xf32>
    %cst_142 = arith.constant dense<0.000000e+00> : vector<256x128xf32>
    %131 = tpu.matmul %128, %130, %cst_142 {dimension_numbers = #tpu.dot_dimension_numbers<[1], [0], [0], [1], [0, 0, 1, 1], [], []>} : vector<256x384xf32>, vector<384x128xf32>, vector<256x128xf32> -> vector<256x128xf32>
    %132 = arith.addf %123, %131 : vector<256x128xf32>
    %c2_143 = arith.constant 2 : index
    %c1_144 = arith.constant 1 : index
    %c0_145 = arith.constant 0 : index
    %133 = vector.load %arg9[%c2_143, %c1_144, %c0_145] : memref<20x18x128xf32, #tpu.memory_space<vmem>>, vector<16x16x128xf32>
    %134 = vector.shape_cast %132 : vector<256x128xf32> to vector<16x16x128xf32>
    %cst_146 = arith.constant 1.000000e-01 : f32
    %135 = vector.broadcast %cst_146 : f32 to vector<16x16x128xf32>
    %136 = arith.mulf %134, %135 : vector<16x16x128xf32>
    %137 = arith.addf %136, %133 : vector<16x16x128xf32>
    %c0_147 = arith.constant 0 : index
    %c0_148 = arith.constant 0 : index
    %c0_149 = arith.constant 0 : index
    %c0_150 = arith.constant 0 : index
    %138 = vector.load %arg7[%c0_147, %c0_148, %c0_149, %c0_150] : memref<1x16x16x128xf32, #tpu.memory_space<vmem>>, vector<1x16x16x128xf32>
    %139 = vector.shape_cast %138 : vector<1x16x16x128xf32> to vector<16x16x128xf32>
    %140 = vector.shape_cast %137 : vector<16x16x128xf32> to vector<1x16x16x128xf32>
    tpu.vector_store %arg7[%c0_147, %c0_148, %c0_149, %c0_150], %140 {strides = array<i32>} : memref<1x16x16x128xf32, #tpu.memory_space<vmem>>, vector<1x16x16x128xf32>,
    return
  }
  func.func @transform_1(%arg0: i32, %arg1: i32) -> (i32, i32, i32) {
    %c0_i32 = arith.constant 0 : i32
    %c0_i32_0 = arith.constant 0 : i32
    %c0_i32_1 = arith.constant 0 : i32
    %c0_i32_2 = arith.constant 0 : i32
    return %c0_i32, %c0_i32_0, %c0_i32_1 : i32, i32, i32
  }
  func.func @transform_2(%arg0: i32, %arg1: i32) -> (i32, i32) {
    %c0_i32 = arith.constant 0 : i32
    %c0_i32_0 = arith.constant 0 : i32
    %c0_i32_1 = arith.constant 0 : i32
    return %c0_i32, %c0_i32_0 : i32, i32
  }
  func.func @transform_3(%arg0: i32, %arg1: i32) -> (i32, i32, i32) {
    %c0_i32 = arith.constant 0 : i32
    %c0_i32_0 = arith.constant 0 : i32
    %c0_i32_1 = arith.constant 0 : i32
    %c0_i32_2 = arith.constant 0 : i32
    return %c0_i32, %c0_i32_0, %c0_i32_1 : i32, i32, i32
  }
  func.func @transform_4(%arg0: i32, %arg1: i32) -> (i32, i32) {
    %c0_i32 = arith.constant 0 : i32
    %c0_i32_0 = arith.constant 0 : i32
    %c0_i32_1 = arith.constant 0 : i32
    return %c0_i32, %c0_i32_0 : i32, i32
  }
  func.func @transform_5(%arg0: i32, %arg1: i32) -> (i32, i32, i32, i32) {
    %c0_i32 = arith.constant 0 : i32
    %c0_i32_0 = arith.constant 0 : i32
    %c0_i32_1 = arith.constant 0 : i32
    return %arg0, %arg1, %c0_i32, %c0_i32_0 : i32, i32, i32, i32
  }
}

</mosaic_0001>

<bundles_post_ra>
// kernel: _lambda_.6
= control target key start
LH: loop header
LB: loop body
LE: loop exit
PB: predicated region body
PF: predicated region fallthrough
CT: control target
= control target key end

     0   :  { %s3700_s12 = smov 0   ;;  %s3702_s13 = smov 0   ;;  %s5295_s0 = inlined_call_operand.vmem [shape: f32[2,16,16,128], index: 0, kind: input, shape index: {}]   ;;  %s5296_s1 = inlined_call_operand.vmem [shape: f32[3,384,128], index: 1, kind: input, shape index: {}]   ;;  %s5297_s2 = inlined_call_operand.vmem [shape: f32[1,128], index: 2, kind: input, shape index: {}]   ;;  %s5298_s3 = inlined_call_operand.vmem [shape: f32[2,16,16,128], index: 3, kind: output, shape index: {}]  }
   0x1   :  { %s3704_s14 = smov 0  }
   0x2 LB: > { %s25_s15 = sadd.s32 1, %s3672_s13  ;;  %p2981_p0 = scmp.ge.s32.totalorder %s3676_s14, 1  ;;  %s3676_s14 = sphi %s3704_s14, %s13_s14   ;;  %s3672_s13 = sphi %s3702_s13, %s5444_s13   ;;  %s3668_s12 = sphi %s3700_s12, %s5443_s12  }
   0x3   : > { %p27_p1 = scmp.ge.s32.totalorder %s25_s15, 2  ;;  %p117_p2 = scmp.lt.s32.totalorder %s3676_s14, 3 }
   0x5   : > { %s5446_s15 = smov (%p27_p1, %s25_s15), 0  ;;  %p118_p3 = pnand %p2981_p0, %p117_p2 }
   0x7   : > { %121 = sbr.rel (%p118_p3) target bundleno = 603 (0x25b), region = 28 }
   0xc   : > { %p140_p4 = scmp.lt.s32.totalorder %s3668_s12, 1  ;;  %s2984_s16 = sshll.u32 %s3668_s12, 8 }
   0xd   : > { %s3727_s19 = scalar_lea.vmem %s5295_s0, %s2984_s16 }
   0xe   : > { %s141_s20 = scalar_select %p140_p4, %s3668_s12, 1  ;;  %v3731_v0 = vld [vmem:[%s3727_s19] sm:$0xff]  ;;  %v3734_v1 = vld [vmem:[%s3727_s19 + $0x8] sm:$0xff]  ;;  %v3737_v2 = vld [vmem:[%s3727_s19 + $0x10] sm:$0xff] }
   0xf   : > { %v3740_v3 = vld [vmem:[%s3727_s19 + $0x18] sm:$0xff]  ;;  %v3743_v4 = vld [vmem:[%s3727_s19 + $0x20] sm:$0xff]  ;;  %v3746_v5 = vld [vmem:[%s3727_s19 + $0x28] sm:$0xff] }
  0x10   : > { %s3204_s21 = sshll.u32 %s141_s20, 8  ;;  %v3749_v6 = vld [vmem:[%s3727_s19 + $0x30] sm:$0xff]  ;;  %v3752_v7 = vld [vmem:[%s3727_s19 + $0x38] sm:$0xff]  ;;  %v3755_v8 = vld [vmem:[%s3727_s19 + $0x40] sm:$0xff] }
  0x11   : > { %s3760_s24 = scalar_lea.vmem %s5298_s3, %s3204_s21  ;;  %v3763_v9 = vld [vmem:[%s3727_s19 + $0x48] sm:$0xff]  ;;  %v3766_v10 = vld [vmem:[%s3727_s19 + $0x50] sm:$0xff]  ;;  %v3769_v11 = vld [vmem:[%s3727_s19 + $0x58] sm:$0xff] }
  0x12   : > { %v3772_v12 = vld [vmem:[%s3727_s19 + $0x60] sm:$0xff]  ;;  %v3775_v13 = vld [vmem:[%s3727_s19 + $0x68] sm:$0xff]  ;;  %v3778_v14 = vld [vmem:[%s3727_s19 + $0x70] sm:$0xff] }
  0x13   : > { %v3781_v15 = vld [vmem:[%s3727_s19 + $0x78] sm:$0xff]  ;;  %v247_v16 = vld [vmem:[%s3727_s19 + $0x80] sm:$0xff]  ;;  %v249_v17 = vld [vmem:[%s3727_s19 + $0x88] sm:$0xff] }
  0x14   : > { %v251_v18 = vld [vmem:[%s3727_s19 + $0x90] sm:$0xff]  ;;  %v253_v19 = vld [vmem:[%s3727_s19 + $0x98] sm:$0xff]  ;;  %v255_v20 = vld [vmem:[%s3727_s19 + $0xa0] sm:$0xff] }
  0x15   : > { %v257_v21 = vld [vmem:[%s3727_s19 + $0xa8] sm:$0xff]  ;;  %v259_v22 = vld [vmem:[%s3727_s19 + $0xb0] sm:$0xff]  ;;  %v261_v23 = vld [vmem:[%s3727_s19 + $0xb8] sm:$0xff] }
  0x16   : > { %v263_v24 = vld [vmem:[%s3727_s19 + $0xc0] sm:$0xff]  ;;  %v265_v25 = vld [vmem:[%s3727_s19 + $0xc8] sm:$0xff]  ;;  %v267_v26 = vld [vmem:[%s3727_s19 + $0xd0] sm:$0xff] }
  0x17   : > { %v269_v27 = vld [vmem:[%s3727_s19 + $0xd8] sm:$0xff]  ;;  %v271_v28 = vld [vmem:[%s3727_s19 + $0xe0] sm:$0xff]  ;;  %v273_v29 = vld [vmem:[%s3727_s19 + $0xe8] sm:$0xff] }
  0x18   : > { %v275_v30 = vld [vmem:[%s3727_s19 + $0xf0] sm:$0xff]  ;;  %v277_v31 = vld [vmem:[%s3727_s19 + $0xf8] sm:$0xff] }
  0x19   : > { %286 = vsyncadd [#allocation4], 4096  ;;  %v326_v32 = vld [vmem:[%s3727_s19] sm:$0xff]  ;;  %v328_v33 = vld [vmem:[%s3727_s19 + $0x8] sm:$0xff]  ;;  %s3678_s25 = smov [#allocation4]  }
  0x1a   : > { %s2847_s26 = scalar_lea.sflag %s3678_s25, 1 }
  0x1b   : > { %337 = vsyncadd %s2847_s26, 256  ;;  %s339_s27 = sadd.s32 240, %s2984_s16  ;;  %s2857_s28 = scalar_lea.sflag %s3678_s25, 2 }
  0x1c   : > { %s340_s4 = scalar_lea.vmem %s5295_s0, %s339_s27 }
  0x1d   : > { %v378_v34 = vld [vmem:[%s340_s4] sm:$0xff]  ;;  %v380_v35 = vld [vmem:[%s340_s4 + $0x8] sm:$0xff] }
  0x1e   : > { %389 = vsyncadd %s2857_s28, 256 }
  0x1f   : > { %3660 = dma.done.wait [#allocation4], 4096 }
  0x20   : > { %3661 = vsyncadd [#allocation4], 4294963200 }
  0x21   : > { %3662 = dma.done.wait %s2847_s26, 256 }
  0x22   : > { %3663 = vsyncadd %s2847_s26, 4294967040 }
  0x23   : > { %3664 = dma.done.wait %s2857_s28, 256 }
  0x24   : > { %3665 = vsyncadd %s2857_s28, 4294967040  ;;  %675 = vst [vmem:[#allocation3 + $0x1] sm:$0xff] %v326_v32  ;;  %v3679_v36 = vmov 0.0   ;;  %v880_v37 = vld [vmem:[%s5296_s1 + $0x78] sm:$0xff]  ;;  %v879_v39 = vld [vmem:[%s5296_s1 + $0x70] sm:$0xff] }
  0x25   : > { %676 = vst [vmem:[#allocation3 + $0x9] sm:$0xff] %v328_v33  ;;  %677 = vst [vmem:[#allocation3 + $0x19] sm:$0xff] %v3731_v0  ;;  %913 = vmatprep.subr.mxu0 %v3679_v36  ;;  %v912_v38 = vld [vmem:[%s5296_s1 + $0x178] sm:$0xff]  ;;  %v911_v40 = vld [vmem:[%s5296_s1 + $0x170] sm:$0xff] }
  0x26   : > { %678 = vst [vmem:[#allocation3 + $0x21] sm:$0xff] %v3734_v1  ;;  %679 = vst [vmem:[#allocation3 + $0x31] sm:$0xff] %v3737_v2  ;;  %914 = vmatpush1.msra.mxu0 %v880_v37  ;;  %3349 = vmatprep.subr.mxu1 %v912_v38  ;;  %v878_v41 = vld [vmem:[%s5296_s1 + $0x68] sm:$0xff]  ;;  %v877_v43 = vld [vmem:[%s5296_s1 + $0x60] sm:$0xff] }
  0x27   : > { %680 = vst [vmem:[#allocation3 + $0x39] sm:$0xff] %v3740_v3  ;;  %681 = vst [vmem:[#allocation3 + $0x49] sm:$0xff] %v3743_v4  ;;  %915 = vmatprep.subr.mxu0 %v3679_v36  ;;  %3350 = vmatpush3.msra.mxu1 %v912_v38  ;;  %v910_v42 = vld [vmem:[%s5296_s1 + $0x168] sm:$0xff]  ;;  %v909_v44 = vld [vmem:[%s5296_s1 + $0x160] sm:$0xff] }
  0x28   : > { %682 = vst [vmem:[#allocation3 + $0x51] sm:$0xff] %v3746_v5  ;;  %683 = vst [vmem:[#allocation3 + $0x61] sm:$0xff] %v3749_v6  ;;  %916 = vmatpush1.msra.mxu0 %v879_v39  ;;  %3351 = vmatprep.subr.mxu1 %v911_v40  ;;  %v876_v45 = vld [vmem:[%s5296_s1 + $0x58] sm:$0xff]  ;;  %v875_v47 = vld [vmem:[%s5296_s1 + $0x50] sm:$0xff] }
  0x29   : > { %684 = vst [vmem:[#allocation3 + $0x69] sm:$0xff] %v3752_v7  ;;  %685 = vst [vmem:[#allocation3 + $0x79] sm:$0xff] %v3755_v8  ;;  %917 = vmatprep.subr.mxu0 %v3679_v36  ;;  %3352 = vmatpush3.msra.mxu1 %v911_v40  ;;  %v908_v46 = vld [vmem:[%s5296_s1 + $0x158] sm:$0xff]  ;;  %v907_v48 = vld [vmem:[%s5296_s1 + $0x150] sm:$0xff] }
  0x2a   : > { %686 = vst [vmem:[#allocation3 + $0x81] sm:$0xff] %v3763_v9  ;;  %687 = vst [vmem:[#allocation3 + $0x91] sm:$0xff] %v3766_v10  ;;  %918 = vmatpush1.msra.mxu0 %v878_v41  ;;  %3353 = vmatprep.subr.mxu1 %v910_v42  ;;  %v874_v49 = vld [vmem:[%s5296_s1 + $0x48] sm:$0xff]  ;;  %v873_v51 = vld [vmem:[%s5296_s1 + $0x40] sm:$0xff] }
  0x2b   : > { %688 = vst [vmem:[#allocation3 + $0x99] sm:$0xff] %v3769_v11  ;;  %689 = vst [vmem:[#allocation3 + $0xa9] sm:$0xff] %v3772_v12  ;;  %919 = vmatprep.subr.mxu0 %v3679_v36  ;;  %3354 = vmatpush3.msra.mxu1 %v910_v42  ;;  %v906_v50 = vld [vmem:[%s5296_s1 + $0x148] sm:$0xff]  ;;  %v905_v52 = vld [vmem:[%s5296_s1 + $0x140] sm:$0xff] }
  0x2c   : > { %690 = vst [vmem:[#allocation3 + $0xb1] sm:$0xff] %v3775_v13  ;;  %691 = vst [vmem:[#allocation3 + $0xc1] sm:$0xff] %v3778_v14  ;;  %920 = vmatpush1.msra.mxu0 %v877_v43  ;;  %3355 = vmatprep.subr.mxu1 %v909_v44  ;;  %v872_v53 = vld [vmem:[%s5296_s1 + $0x38] sm:$0xff]  ;;  %v871_v55 = vld [vmem:[%s5296_s1 + $0x30] sm:$0xff] }
  0x2d   : > { %692 = vst [vmem:[#allocation3 + $0xc9] sm:$0xff] %v3781_v15  ;;  %693 = vst [vmem:[#allocation3 + $0xd9] sm:$0xff] %v247_v16  ;;  %921 = vmatprep.subr.mxu0 %v3679_v36  ;;  %3356 = vmatpush3.msra.mxu1 %v909_v44  ;;  %v904_v54 = vld [vmem:[%s5296_s1 + $0x138] sm:$0xff]  ;;  %v903_v56 = vld [vmem:[%s5296_s1 + $0x130] sm:$0xff] }
  0x2e   : > { %694 = vst [vmem:[#allocation3 + $0xe1] sm:$0xff] %v249_v17  ;;  %695 = vst [vmem:[#allocation3 + $0xf1] sm:$0xff] %v251_v18  ;;  %922 = vmatpush1.msra.mxu0 %v876_v45  ;;  %3357 = vmatprep.subr.mxu1 %v908_v46  ;;  %v870_v57 = vld [vmem:[%s5296_s1 + $0x28] sm:$0xff]  ;;  %v869_v59 = vld [vmem:[%s5296_s1 + $0x20] sm:$0xff] }
  0x2f   : > { %696 = vst [vmem:[#allocation3 + $0xf9] sm:$0xff] %v253_v19  ;;  %697 = vst [vmem:[#allocation3 + $0x109] sm:$0xff] %v255_v20  ;;  %923 = vmatprep.subr.mxu0 %v3679_v36  ;;  %3358 = vmatpush3.msra.mxu1 %v908_v46  ;;  %v902_v58 = vld [vmem:[%s5296_s1 + $0x128] sm:$0xff]  ;;  %v901_v60 = vld [vmem:[%s5296_s1 + $0x120] sm:$0xff] }
  0x30   : > { %698 = vst [vmem:[#allocation3 + $0x111] sm:$0xff] %v257_v21  ;;  %699 = vst [vmem:[#allocation3 + $0x121] sm:$0xff] %v259_v22  ;;  %924 = vmatpush1.msra.mxu0 %v875_v47  ;;  %3359 = vmatprep.subr.mxu1 %v907_v48  ;;  %v868_v61 = vld [vmem:[%s5296_s1 + $0x18] sm:$0xff]  ;;  %v867_v63 = vld [vmem:[%s5296_s1 + $0x10] sm:$0xff] }
  0x31   : > { %700 = vst [vmem:[#allocation3 + $0x129] sm:$0xff] %v261_v23  ;;  %701 = vst [vmem:[#allocation3 + $0x139] sm:$0xff] %v263_v24  ;;  %925 = vmatprep.subr.mxu0 %v3679_v36  ;;  %3360 = vmatpush3.msra.mxu1 %v907_v48  ;;  %v900_v62 = vld [vmem:[%s5296_s1 + $0x118] sm:$0xff]  ;;  %v899_v16 = vld [vmem:[%s5296_s1 + $0x110] sm:$0xff] }
  0x32   : > { %702 = vst [vmem:[#allocation3 + $0x141] sm:$0xff] %v265_v25  ;;  %703 = vst [vmem:[#allocation3 + $0x151] sm:$0xff] %v267_v26  ;;  %926 = vmatpush1.msra.mxu0 %v874_v49  ;;  %3361 = vmatprep.subr.mxu1 %v906_v50  ;;  %v866_v17 = vld [vmem:[%s5296_s1 + $0x8] sm:$0xff]  ;;  %v865_v19 = vld [vmem:[%s5296_s1] sm:$0xff] }
  0x33   : > { %704 = vst [vmem:[#allocation3 + $0x159] sm:$0xff] %v269_v27  ;;  %705 = vst [vmem:[#allocation3 + $0x169] sm:$0xff] %v271_v28  ;;  %927 = vmatprep.subr.mxu0 %v3679_v36  ;;  %3362 = vmatpush3.msra.mxu1 %v906_v50  ;;  %v898_v18 = vld [vmem:[%s5296_s1 + $0x108] sm:$0xff]  ;;  %v897_v20 = vld [vmem:[%s5296_s1 + $0x100] sm:$0xff] }
  0x34   : > { %706 = vst [vmem:[#allocation3 + $0x171] sm:$0xff] %v273_v29  ;;  %707 = vst [vmem:[#allocation3 + $0x181] sm:$0xff] %v275_v30  ;;  %928 = vmatpush1.msra.mxu0 %v873_v51  ;;  %3363 = vmatprep.subr.mxu1 %v905_v52  ;;  %v896_v22 = vld [vmem:[%s5296_s1 + $0xf8] sm:$0xff]  ;;  %v895_v25 = vld [vmem:[%s5296_s1 + $0xf0] sm:$0xff] }
  0x35   : > { %708 = vst [vmem:[#allocation3 + $0x189] sm:$0xff] %v277_v31  ;;  %709 = vst [vmem:[#allocation3 + $0x199] sm:$0xff] %v378_v34  ;;  %929 = vmatprep.subr.mxu0 %v3679_v36  ;;  %3364 = vmatpush3.msra.mxu1 %v905_v52  ;;  %v3115_v24 = vld [vmem:[%s5296_s1 + $0x1f8] sm:$0xff]  ;;  %v3114_v27 = vld [vmem:[%s5296_s1 + $0x1f0] sm:$0xff] }
  0x36   : > { %710 = vst [vmem:[#allocation3 + $0x1a1] sm:$0xff] %v380_v35  ;;  %712 = vst [vmem:[#allocation3 + $0x18] sm:$0x1] %v3679_v36  ;;  %930 = vmatpush1.msra.mxu0 %v872_v53  ;;  %3365 = vmatprep.subr.mxu1 %v904_v54  ;;  %v835_v26 = vld [vmem:[#allocation3 + $0x1a] sm:$0xff]  ;;  %v894_v28 = vld [vmem:[%s5296_s1 + $0xe8] sm:$0xff] }
  0x37   : > { %713 = vst [vmem:[#allocation3 + $0x30] sm:$0x1] %v3679_v36  ;;  %714 = vst [vmem:[#allocation3 + $0x48] sm:$0x1] %v3679_v36  ;;  %931 = vmatprep.subr.mxu0 %v3679_v36  ;;  %3366 = vmatpush3.msra.mxu1 %v904_v54  ;;  %v3113_v30 = vld [vmem:[%s5296_s1 + $0x1e8] sm:$0xff]  ;;  %v893_v31 = vld [vmem:[%s5296_s1 + $0xe0] sm:$0xff] }
  0x38   : > { %715 = vst [vmem:[#allocation3 + $0x60] sm:$0x1] %v3679_v36  ;;  %716 = vst [vmem:[#allocation3 + $0x78] sm:$0x1] %v3679_v36  ;;  %932 = vmatpush1.msra.mxu0 %v871_v55  ;;  %3367 = vmatprep.subr.mxu1 %v903_v56  ;;  %v837_v32 = vld [vmem:[#allocation3 + $0x32] sm:$0xff]  ;;  %v3112_v33 = vld [vmem:[%s5296_s1 + $0x1e0] sm:$0xff] }
  0x39   : > { %717 = vst [vmem:[#allocation3 + $0x90] sm:$0x1] %v3679_v36  ;;  %718 = vst [vmem:[#allocation3 + $0xa8] sm:$0x1] %v3679_v36  ;;  %933 = vmatprep.subr.mxu0 %v3679_v36  ;;  %3368 = vmatpush3.msra.mxu1 %v903_v56  ;;  %v892_v34 = vld [vmem:[%s5296_s1 + $0xd8] sm:$0xff]  ;;  %v891_v38 = vld [vmem:[%s5296_s1 + $0xd0] sm:$0xff] }
  0x3a   : > { %719 = vst [vmem:[#allocation3 + $0xc0] sm:$0x1] %v3679_v36  ;;  %720 = vst [vmem:[#allocation3 + $0xd8] sm:$0x1] %v3679_v36  ;;  %934 = vmatpush1.msra.mxu0 %v870_v57  ;;  %3369 = vmatprep.subr.mxu1 %v902_v58  ;;  %v3111_v37 = vld [vmem:[%s5296_s1 + $0x1d8] sm:$0xff]  ;;  %v839_v39 = vld [vmem:[#allocation3 + $0x4a] sm:$0xff] }
  0x3b   : > { %721 = vst [vmem:[#allocation3 + $0xf0] sm:$0x1] %v3679_v36  ;;  %722 = vst [vmem:[#allocation3 + $0x108] sm:$0x1] %v3679_v36  ;;  %935 = vmatprep.subr.mxu0 %v3679_v36  ;;  %3370 = vmatpush3.msra.mxu1 %v902_v58  ;;  %v3110_v40 = vld [vmem:[%s5296_s1 + $0x1d0] sm:$0xff]  ;;  %v890_v41 = vld [vmem:[%s5296_s1 + $0xc8] sm:$0xff] }
  0x3c   : > { %723 = vst [vmem:[#allocation3 + $0x120] sm:$0x1] %v3679_v36  ;;  %724 = vst [vmem:[#allocation3 + $0x138] sm:$0x1] %v3679_v36  ;;  %936 = vmatpush1.msra.mxu0 %v869_v59  ;;  %3371 = vmatprep.subr.mxu1 %v901_v60  ;;  %v3109_v43 = vld [vmem:[%s5296_s1 + $0x1c8] sm:$0xff]  ;;  %v889_v44 = vld [vmem:[%s5296_s1 + $0xc0] sm:$0xff] }
  0x3d   : > { %725 = vst [vmem:[#allocation3 + $0x150] sm:$0x1] %v3679_v36  ;;  %726 = vst [vmem:[#allocation3 + $0x168] sm:$0x1] %v3679_v36  ;;  %937 = vmatprep.subr.mxu0 %v3679_v36  ;;  %3372 = vmatpush3.msra.mxu1 %v901_v60  ;;  %v841_v45 = vld [vmem:[#allocation3 + $0x62] sm:$0xff]  ;;  %v888_v47 = vld [vmem:[%s5296_s1 + $0xb8] sm:$0xff] }
  0x3e   : > { %727 = vst [vmem:[#allocation3 + $0x180] sm:$0x1] %v3679_v36  ;;  %729 = vst [vmem:[#allocation3 + $0x11] sm:$0x1] %v3679_v36  ;;  %938 = vmatpush1.msra.mxu0 %v868_v61  ;;  %3373 = vmatprep.subr.mxu1 %v900_v62  ;;  %v3108_v46 = vld [vmem:[%s5296_s1 + $0x1c0] sm:$0xff]  ;;  %v3107_v49 = vld [vmem:[%s5296_s1 + $0x1b8] sm:$0xff] }
  0x3f   : > { %730 = vst [vmem:[#allocation3 + $0x29] sm:$0x1] %v3679_v36  ;;  %731 = vst [vmem:[#allocation3 + $0x41] sm:$0x1] %v3679_v36  ;;  %939 = vmatprep.subr.mxu0 %v3679_v36  ;;  %3374 = vmatpush3.msra.mxu1 %v900_v62  ;;  %v887_v50 = vld [vmem:[%s5296_s1 + $0xb0] sm:$0xff]  ;;  %v843_v51 = vld [vmem:[#allocation3 + $0x7a] sm:$0xff] }
  0x40   : > { %732 = vst [vmem:[#allocation3 + $0x59] sm:$0x1] %v3679_v36  ;;  %733 = vst [vmem:[#allocation3 + $0x71] sm:$0x1] %v3679_v36  ;;  %940 = vmatpush1.msra.mxu0 %v867_v63  ;;  %3375 = vmatprep.subr.mxu1 %v899_v16  ;;  %v3106_v52 = vld [vmem:[%s5296_s1 + $0x1b0] sm:$0xff]  ;;  %v886_v53 = vld [vmem:[%s5296_s1 + $0xa8] sm:$0xff] }
  0x41   : > { %734 = vst [vmem:[#allocation3 + $0x89] sm:$0x1] %v3679_v36  ;;  %735 = vst [vmem:[#allocation3 + $0xa1] sm:$0x1] %v3679_v36  ;;  %941 = vmatprep.subr.mxu0 %v3679_v36  ;;  %3376 = vmatpush3.msra.mxu1 %v899_v16  ;;  %v3105_v55 = vld [vmem:[%s5296_s1 + $0x1a8] sm:$0xff]  ;;  %v885_v56 = vld [vmem:[%s5296_s1 + $0xa0] sm:$0xff] }
  0x42   : > { %736 = vst [vmem:[#allocation3 + $0xb9] sm:$0x1] %v3679_v36  ;;  %737 = vst [vmem:[#allocation3 + $0xd1] sm:$0x1] %v3679_v36  ;;  %942 = vmatpush1.msra.mxu0 %v866_v17  ;;  %3377 = vmatprep.subr.mxu1 %v898_v18  ;;  %v4065_v57 = vld [vmem:[#allocation3 + $0x92] sm:$0xff]  ;;  %v3104_v58 = vld [vmem:[%s5296_s1 + $0x1a0] sm:$0xff] }
  0x43   : > { %738 = vst [vmem:[#allocation3 + $0xe9] sm:$0x1] %v3679_v36  ;;  %739 = vst [vmem:[#allocation3 + $0x101] sm:$0x1] %v3679_v36  ;;  %943 = vmatprep.subr.mxu0 %v3679_v36  ;;  %3378 = vmatpush3.msra.mxu1 %v898_v18  ;;  %v884_v59 = vld [vmem:[%s5296_s1 + $0x98] sm:$0xff]  ;;  %v883_v62 = vld [vmem:[%s5296_s1 + $0x90] sm:$0xff] }
  0x44   : > { %740 = vst [vmem:[#allocation3 + $0x119] sm:$0x1] %v3679_v36  ;;  %741 = vst [vmem:[#allocation3 + $0x131] sm:$0x1] %v3679_v36  ;;  %944 = vmatpush1.msra.mxu0 %v865_v19  ;;  %3379 = vmatprep.subr.mxu1 %v897_v20  ;;  %v3103_v61 = vld [vmem:[%s5296_s1 + $0x198] sm:$0xff]  ;;  %v4087_v63 = vld [vmem:[#allocation3 + $0xaa] sm:$0xff] }
  0x45   : > { %742 = vst [vmem:[#allocation3 + $0x149] sm:$0x1] %v3679_v36  ;;  %743 = vst [vmem:[#allocation3 + $0x161] sm:$0x1] %v3679_v36  ;;  %945 = vmatprep.subr.mxu0 %v3679_v36  ;;  %3380 = vmatpush3.msra.mxu1 %v897_v20  ;;  %v3102_v16 = vld [vmem:[%s5296_s1 + $0x190] sm:$0xff]  ;;  %v882_v17 = vld [vmem:[%s5296_s1 + $0x88] sm:$0xff] }
  0x46   : > { %744 = vst [vmem:[#allocation3 + $0x179] sm:$0x1] %v3679_v36  ;;  %745 = vst [vmem:[#allocation3 + $0x191] sm:$0x1] %v3679_v36  ;;  %946 = vmatpush2.msra.mxu0 %v896_v22  ;;  %1541 = vmatprep.subr.mxu1 %v3679_v36  ;;  %v836_v29 = vld [vmem:[#allocation3 + $0x22] sm:$0xff]  ;;  %v838_v35 = vld [vmem:[#allocation3 + $0x3a] sm:$0xff] }
  0x47   : > { %746 = vst [vmem:[#allocation3 + $0x1a9] sm:$0x1] %v3679_v36  ;;  %752 = vst [vmem:[#allocation3 + $0x8] sm:$0xff] %v3679_v36  ;;  %947 = vmatprep.subr.mxu0 %v3679_v36  ;;  %v840_v42 = vld [vmem:[#allocation3 + $0x52] sm:$0xff]  ;;  %v842_v48 = vld [vmem:[#allocation3 + $0x6a] sm:$0xff] }
  0x48   : > { %760 = vst [vmem:[#allocation3 + $0x1a0] sm:$0xff] %v3679_v36  ;;  %751 = vst [vmem:[#allocation3] sm:$0xff] %v3679_v36  ;;  %948 = vmatpush2.msra.mxu0 %v895_v25  ;;  %v844_v54 = vld [vmem:[#allocation3 + $0x82] sm:$0xff]  ;;  %v4075_v60 = vld [vmem:[#allocation3 + $0x9a] sm:$0xff] }
  0x49   : > { %753 = vst [vmem:[#allocation3 + $0x10] sm:$0x3] %v3679_v36  ;;  %759 = vst [vmem:[#allocation3 + $0x198] sm:$0xff] %v3679_v36  ;;  %949 = vmatprep.subr.mxu0 %v3679_v36  ;;  %v4097_v18 = vld [vmem:[#allocation3 + $0xb2] sm:$0xff]  ;;  %v3101_v19 = vld [vmem:[%s5296_s1 + $0x188] sm:$0xff] }
  0x4a   : > { %761 = vst [vmem:[#allocation3 + $0x1a8] sm:$0x3] %v3679_v36  ;;  %950 = vmatpush2.msra.mxu0 %v894_v28  ;;  %v881_v20 = vld [vmem:[%s5296_s1 + $0x80] sm:$0xff]  ;;  %v3131_v25 = vld [vmem:[%s5296_s1 + $0x278] sm:$0xff]  ;;  %v3130_v28 = vld [vmem:[%s5296_s1 + $0x270] sm:$0xff] }
  0x4b   : > { %951 = vmatprep.subr.mxu0 %v3679_v36  ;;  %v4110_v22 = vld [vmem:[#allocation3 + $0xc2] sm:$0xff] }
  0x4c   : > { %952 = vmatpush2.msra.mxu0 %v893_v31  ;;  %v4138_v31 = vld [vmem:[#allocation3 + $0x18] sm:$0xff] }
  0x4d   : > { %953 = vmatprep.subr.mxu0 %v3679_v36 }
  0x4e   : > { %954 = vmatpush2.msra.mxu0 %v892_v34  ;;  %v4148_v34 = vld [vmem:[#allocation3 + $0xfa] sm:$0xff] }
  0x4f   : > { %v833_v21 = vld [vmem:[#allocation3 + $0x2] sm:$0xff]  ;;  %955 = vmatprep.subr.mxu0 %v3679_v36 }
  0x50   : > { %v834_v23 = vld [vmem:[#allocation3 + $0xa] sm:$0xff]  ;;  %3381 = vmatprep.mubr.f32.mxu1 %v833_v21  ;;  %956 = vmatpush2.msra.mxu0 %v891_v38  ;;  %v801_v21 = vld [vmem:[#allocation3 + $0x1] sm:$0xff] }
  0x51   : > { %3382 = vmatmul.mubr.f32.vlgmr.msra.gmra.mxu1 %v834_v23  ;;  %957 = vmatprep.subr.mxu0 %v3679_v36  ;;  %v3100_v23 = vld [vmem:[%s5296_s1 + $0x180] sm:$0xff]  ;;  %v4160_v38 = vld [vmem:[#allocation3 + $0x10a] sm:$0xff] }
  0x52   : > { %1542 = vmatpush1.msra.mxu1 %v3115_v24  ;;  %3384 = vmatprep.mubr.f32.mxu1 %v835_v26  ;;  %v4115_v24 = vld [vmem:[#allocation3 + $0xca] sm:$0xff] }
  0x53   : > { %1543 = vmatprep.subr.mxu1 %v3679_v36  ;;  %958 = vmatpush2.msra.mxu0 %v890_v41  ;;  %v802_v26 = vld [vmem:[#allocation3 + $0x9] sm:$0xff] }
  0x54   : > { %1544 = vmatpush1.msra.mxu1 %v3114_v27  ;;  %959 = vmatprep.subr.mxu0 %v3679_v36  ;;  %v4125_v27 = vld [vmem:[#allocation3 + $0xda] sm:$0xff]  ;;  %v3125_v41 = vld [vmem:[%s5296_s1 + $0x248] sm:$0xff] }
  0x55   : > { %3385 = vmatmul.mubr.f32.gmra.mxu1 %v836_v29  ;;  %1545 = vmatprep.subr.mxu1 %v3679_v36  ;;  %v4130_v29 = vld [vmem:[#allocation3 + $0xe2] sm:$0xff] }
  0x56   : > { %1546 = vmatpush1.msra.mxu1 %v3113_v30  ;;  %3387 = vmatprep.mubr.f32.mxu1 %v837_v32  ;;  %v3129_v30 = vld [vmem:[%s5296_s1 + $0x268] sm:$0xff]  ;;  %v4142_v32 = vld [vmem:[#allocation3 + $0xf2] sm:$0xff] }
  0x57   : > { %1547 = vmatprep.subr.mxu1 %v3679_v36  ;;  %960 = vmatpush2.msra.mxu0 %v889_v44  ;;  %v3124_v44 = vld [vmem:[%s5296_s1 + $0x240] sm:$0xff] }
  0x58   : > { %1548 = vmatpush1.msra.mxu1 %v3112_v33  ;;  %961 = vmatprep.subr.mxu0 %v3679_v36  ;;  %v3128_v33 = vld [vmem:[%s5296_s1 + $0x260] sm:$0xff] }
  0x59   : > { %3388 = vmatmul.mubr.f32.gmra.mxu1 %v838_v35  ;;  %1549 = vmatprep.subr.mxu1 %v3679_v36  ;;  %v3127_v35 = vld [vmem:[%s5296_s1 + $0x258] sm:$0xff] }
  0x5a   : > { %1550 = vmatpush1.msra.mxu1 %v3111_v37  ;;  %3390 = vmatprep.mubr.f32.mxu1 %v839_v39  ;;  %v4156_v37 = vld [vmem:[#allocation3 + $0x20] sm:$0xff]  ;;  %v3126_v39 = vld [vmem:[%s5296_s1 + $0x250] sm:$0xff] }
  0x5b   : > { %1551 = vmatprep.subr.mxu1 %v3679_v36  ;;  %962 = vmatpush2.msra.mxu0 %v888_v47  ;;  %v4192_v47 = vld [vmem:[#allocation3 + $0x38] sm:$0xff] }
  0x5c   : > { %1552 = vmatpush1.msra.mxu1 %v3110_v40  ;;  %963 = vmatprep.subr.mxu0 %v3679_v36  ;;  %v4166_v40 = vld [vmem:[#allocation3 + $0x112] sm:$0xff] }
  0x5d   : > { %3391 = vmatmul.mubr.f32.gmra.mxu1 %v840_v42  ;;  %1553 = vmatprep.subr.mxu1 %v3679_v36  ;;  %v4174_v42 = vld [vmem:[#allocation3 + $0x30] sm:$0xff] }
  0x5e   : > { %1554 = vmatpush1.msra.mxu1 %v3109_v43  ;;  %3393 = vmatprep.mubr.f32.mxu1 %v841_v45  ;;  %v4178_v43 = vld [vmem:[#allocation3 + $0x122] sm:$0xff]  ;;  %v4184_v45 = vld [vmem:[#allocation3 + $0x12a] sm:$0xff] }
  0x5f   : > { %1555 = vmatprep.subr.mxu1 %v3679_v36  ;;  %964 = vmatpush2.msra.mxu0 %v887_v50  ;;  %v4202_v50 = vld [vmem:[#allocation3 + $0x142] sm:$0xff] }
  0x60   : > { %1556 = vmatpush1.msra.mxu1 %v3108_v46  ;;  %965 = vmatprep.subr.mxu0 %v3679_v36  ;;  %v3123_v46 = vld [vmem:[%s5296_s1 + $0x238] sm:$0xff] }
  0x61   : > { %3394 = vmatmul.mubr.f32.gmra.mxu1 %v842_v48  ;;  %1557 = vmatprep.subr.mxu1 %v3679_v36  ;;  %v4196_v48 = vld [vmem:[#allocation3 + $0x13a] sm:$0xff] }
  0x62   : > { %1558 = vmatpush1.msra.mxu1 %v3107_v49  ;;  %3396 = vmatprep.mubr.f32.mxu1 %v843_v51  ;;  %v3122_v49 = vld [vmem:[%s5296_s1 + $0x230] sm:$0xff]  ;;  %v3121_v51 = vld [vmem:[%s5296_s1 + $0x228] sm:$0xff] }
  0x63   : > { %1559 = vmatprep.subr.mxu1 %v3679_v36  ;;  %966 = vmatpush2.msra.mxu0 %v886_v53  ;;  %v4214_v53 = vld [vmem:[#allocation3 + $0x152] sm:$0xff] }
  0x64   : > { %1560 = vmatpush1.msra.mxu1 %v3106_v52  ;;  %967 = vmatprep.subr.mxu0 %v3679_v36  ;;  %v4210_v52 = vld [vmem:[#allocation3 + $0x48] sm:$0xff] }
  0x65   : > { %3397 = vmatmul.mubr.f32.gmra.mxu1 %v844_v54  ;;  %1561 = vmatprep.subr.mxu1 %v3679_v36  ;;  %v3120_v54 = vld [vmem:[%s5296_s1 + $0x220] sm:$0xff] }
  0x66   : > { %1562 = vmatpush1.msra.mxu1 %v3105_v55  ;;  %968 = vmatpush2.msra.mxu0 %v885_v56  ;;  %v4220_v55 = vld [vmem:[#allocation3 + $0x15a] sm:$0xff] }
  0x67   : > { %1563 = vmatprep.subr.mxu1 %v3679_v36  ;;  %969 = vmatprep.subr.mxu0 %v3679_v36  ;;  %v3119_v56 = vld [vmem:[%s5296_s1 + $0x218] sm:$0xff] }
  0x68   : > { %3399 = vmatprep.mubr.f32.mxu1 %v4065_v57  ;;  %1564 = vmatpush1.msra.mxu1 %v3104_v58  ;;  %v4228_v58 = vld [vmem:[#allocation3 + $0x50] sm:$0xff] }
  0x69   : > { %970 = vmatpush2.msra.mxu0 %v884_v59  ;;  %3400 = vmatmul.mubr.f32.gmra.mxu1 %v4075_v60  ;;  %v4232_v59 = vld [vmem:[#allocation3 + $0x16a] sm:$0xff] }
  0x6a   : > { %1565 = vmatprep.subr.mxu1 %v3679_v36  ;;  %971 = vmatprep.subr.mxu0 %v3679_v36 }
  0x6b   : > { %1566 = vmatpush1.msra.mxu1 %v3103_v61  ;;  %972 = vmatpush2.msra.mxu0 %v883_v62  ;;  %v3118_v61 = vld [vmem:[%s5296_s1 + $0x210] sm:$0xff] }
  0x6c   : > { %1567 = vmatprep.subr.mxu1 %v3679_v36  ;;  %973 = vmatprep.subr.mxu0 %v3679_v36  ;;  %v4238_v62 = vld [vmem:[#allocation3 + $0x172] sm:$0xff] }
  0x6d   : > { %3402 = vmatprep.mubr.f32.mxu1 %v4087_v63  ;;  %1568 = vmatpush1.msra.mxu1 %v3102_v16  ;;  %v3117_v16 = vld [vmem:[%s5296_s1 + $0x208] sm:$0xff] }
  0x6e   : > { %974 = vmatpush2.msra.mxu0 %v882_v17  ;;  %3403 = vmatmul.mubr.f32.gmra.mxu1 %v4097_v18  ;;  %v3147_v17 = vld [vmem:[%s5296_s1 + $0x2f8] sm:$0xff] }
  0x6f   : > { %1569 = vmatprep.subr.mxu1 %v3679_v36  ;;  %975 = vmatprep.subr.mxu0 %v3679_v36 }
  0x70   : > { %1570 = vmatpush1.msra.mxu1 %v3101_v19  ;;  %976 = vmatpush2.msra.mxu0 %v881_v20  ;;  %v4251_v19 = vld [vmem:[#allocation3 + $0x60] sm:$0xff] }
  0x71   : > { %977 = vmatprep.mubr.f32.mxu0 %v801_v21  ;;  %1571 = vmatprep.subr.mxu1 %v3679_v36  ;;  %v3116_v20 = vld [vmem:[%s5296_s1 + $0x200] sm:$0xff]  ;;  %v3163_v21 = vld [vmem:[%s5296_s1 + $0x378] sm:$0xff] }
  0x72   : > { %978 = vmatmul.mubr.f32.vlgmr.msra.gmra.mxu0 %v3679_v36  ;;  %3405 = vmatprep.mubr.f32.mxu1 %v4110_v22 }
  0x73   : > { %1572 = vmatpush1.msra.mxu1 %v3100_v23  ;;  %982 = vmatprep.mubr.f32.mxu0 %v802_v26  ;;  %v4263_v23 = vld [vmem:[#allocation3 + $0x68] sm:$0xff]  ;;  %v4278_v26 = vld [vmem:[#allocation3 + $0x78] sm:$0xff] }
  0x74   : > { %3406 = vmatmul.mubr.f32.gmra.mxu1 %v4115_v24  ;;  %1573 = vmatprep.subr.mxu1 %v3679_v36 }
  0x75   : > { %1574 = vmatpush2.msra.mxu1 %v3131_v25  ;;  %3408 = vmatprep.mubr.f32.mxu1 %v4125_v27  ;;  %v3146_v25 = vld [vmem:[%s5296_s1 + $0x2f0] sm:$0xff] }
  0x76   : > { %1575 = vmatprep.subr.mxu1 %v3679_v36  ;;  %983 = vmatmul.mubr.f32.gmra.mxu0 %v3679_v36 }
  0x77   : > { %1576 = vmatpush2.msra.mxu1 %v3130_v28  ;;  %987 = vmatprep.mubr.f32.mxu0 %v3731_v0  ;;  %v3161_v28 = vld [vmem:[%s5296_s1 + $0x368] sm:$0xff] }
  0x78   : > { %3409 = vmatmul.mubr.f32.gmra.mxu1 %v4130_v29  ;;  %1577 = vmatprep.subr.mxu1 %v3679_v36 }
  0x79   : > { %1578 = vmatpush2.msra.mxu1 %v3129_v30  ;;  %3411 = vmatprep.mubr.f32.mxu1 %v4142_v32  ;;  %v3160_v30 = vld [vmem:[%s5296_s1 + $0x360] sm:$0xff] }
  0x7a   : > { %1579 = vmatprep.subr.mxu1 %v3679_v36  ;;  %988 = vmatmul.mubr.f32.gmra.mxu0 %v4138_v31 }
  0x7b   : > { %1580 = vmatpush2.msra.mxu1 %v3128_v33  ;;  %992 = vmatprep.mubr.f32.mxu0 %v3734_v1  ;;  %v4317_v33 = vld [vmem:[#allocation3 + $0x98] sm:$0xff] }
  0x7c   : > { %3412 = vmatmul.mubr.f32.gmra.mxu1 %v4148_v34  ;;  %1581 = vmatprep.subr.mxu1 %v3679_v36 }
  0x7d   : > { %1582 = vmatpush2.msra.mxu1 %v3127_v35  ;;  %3414 = vmatprep.mubr.f32.mxu1 %v4160_v38  ;;  %v4331_v35 = vld [vmem:[#allocation3 + $0xa8] sm:$0xff] }
  0x7e   : > { %1583 = vmatprep.subr.mxu1 %v3679_v36  ;;  %993 = vmatmul.mubr.f32.gmra.mxu0 %v4156_v37 }
  0x7f   : > { %1584 = vmatpush2.msra.mxu1 %v3126_v39  ;;  %997 = vmatprep.mubr.f32.mxu0 %v3737_v2  ;;  %v4357_v39 = vld [vmem:[#allocation3 + $0xc0] sm:$0xff] }
  0x80   : > { %3415 = vmatmul.mubr.f32.gmra.mxu1 %v4166_v40  ;;  %1585 = vmatprep.subr.mxu1 %v3679_v36 }
  0x81   : > { %1586 = vmatpush2.msra.mxu1 %v3125_v41  ;;  %3417 = vmatprep.mubr.f32.mxu1 %v4178_v43  ;;  %v4366_v41 = vld [vmem:[#allocation3 + $0x81] sm:$0xff] }
  0x82   : > { %1587 = vmatprep.subr.mxu1 %v3679_v36  ;;  %998 = vmatmul.mubr.f32.gmra.mxu0 %v4174_v42 }
  0x83   : > { %1588 = vmatpush2.msra.mxu1 %v3124_v44  ;;  %1002 = vmatprep.mubr.f32.mxu0 %v3740_v3  ;;  %v4373_v44 = vld [vmem:[#allocation3 + $0xc8] sm:$0xff] }
  0x84   : > { %3418 = vmatmul.mubr.f32.gmra.mxu1 %v4184_v45  ;;  %1589 = vmatprep.subr.mxu1 %v3679_v36 }
  0x85   : > { %1590 = vmatpush2.msra.mxu1 %v3123_v46  ;;  %3420 = vmatprep.mubr.f32.mxu1 %v4196_v48  ;;  %v3152_v46 = vld [vmem:[%s5296_s1 + $0x320] sm:$0xff] }
  0x86   : > { %1591 = vmatprep.subr.mxu1 %v3679_v36  ;;  %1003 = vmatmul.mubr.f32.gmra.mxu0 %v4192_v47 }
  0x87   : > { %1592 = vmatpush2.msra.mxu1 %v3122_v49  ;;  %1007 = vmatprep.mubr.f32.mxu0 %v3743_v4  ;;  %v4383_v49 = vld [vmem:[#allocation3 + $0x91] sm:$0xff] }
  0x88   : > { %3421 = vmatmul.mubr.f32.gmra.mxu1 %v4202_v50  ;;  %1593 = vmatprep.subr.mxu1 %v3679_v36 }
  0x89   : > { %1594 = vmatpush2.msra.mxu1 %v3121_v51  ;;  %3423 = vmatprep.mubr.f32.mxu1 %v4214_v53  ;;  %v3151_v51 = vld [vmem:[%s5296_s1 + $0x318] sm:$0xff] }
  0x8a   : > { %1595 = vmatprep.subr.mxu1 %v3679_v36  ;;  %1008 = vmatmul.mubr.f32.gmra.mxu0 %v4210_v52 }
  0x8b   : > { %1596 = vmatpush2.msra.mxu1 %v3120_v54  ;;  %1012 = vmatprep.mubr.f32.mxu0 %v3746_v5  ;;  %v4393_v54 = vld [vmem:[#allocation3 + $0xe1] sm:$0xff] }
  0x8c   : > { %3424 = vmatmul.mubr.f32.gmra.mxu1 %v4220_v55  ;;  %1597 = vmatprep.subr.mxu1 %v3679_v36  ;;  %5322 = vst [vmem:[#allocation15_spill] sm:$0xff] %v4393_v54 }
  0x8d   : > { %1598 = vmatpush2.msra.mxu1 %v3119_v56  ;;  %3426 = vmatprep.mubr.f32.mxu1 %v4232_v59  ;;  %v3140_v56 = vld [vmem:[%s5296_s1 + $0x2c0] sm:$0xff] }
  0x8e   : > { %1599 = vmatprep.subr.mxu1 %v3679_v36  ;;  %1013 = vmatmul.mubr.f32.gmra.mxu0 %v4228_v58 }
  0x8f   : > { %1600 = vmatpush2.msra.mxu1 %v3118_v61  ;;  %1017 = vmatprep.mubr.f32.mxu0 %v3749_v6  ;;  %v4401_v61 = vld [vmem:[#allocation3 + $0x99] sm:$0xff] }
  0x90   : > { %3427 = vmatmul.mubr.f32.gmra.mxu1 %v4238_v62  ;;  %1601 = vmatprep.subr.mxu1 %v3679_v36 }
  0x91   : > { %1602 = vmatpush2.msra.mxu1 %v3117_v16  ;;  %3429 = vmatprep.subr.mxu0 %v3147_v17  ;;  %v3150_v16 = vld [vmem:[%s5296_s1 + $0x310] sm:$0xff] }
  0x92   : > { %1603 = vmatprep.subr.mxu1 %v3679_v36  ;;  %1018 = vmatmul.mubr.f32.gmra.mxu0 %v4251_v19 }
  0x93   : > { %1604 = vmatpush2.msra.mxu1 %v3116_v20  ;;  %1605 = vmatprep.mubr.f32.mxu1 %v3731_v0  ;;  %v3162_v0 = vld [vmem:[%s5296_s1 + $0x370] sm:$0xff] }
  0x94   : > { %3430 = vmatpush3.msra.mxu0 %v3147_v17  ;;  %1606 = vmatmul.mubr.f32.vlgmr.msra.gmra.mxu1 %v4138_v31  ;;  %v4301_v31 = vld [vmem:[#allocation3 + $0x90] sm:$0xff]  ;;  %v4407_v17 = vld [vmem:[#allocation3 + $0xe0] sm:$0xff] }
  0x95   : > { %2169 = vmatprep.subr.mxu1 %v3679_v36  ;;  %1022 = vmatprep.mubr.f32.mxu0 %v3752_v7  ;;  %5323 = vst [vmem:[#allocation16_spill] sm:$0xff] %v4407_v17  ;;  %v4411_v20 = vld [vmem:[#allocation3 + $0xf1] sm:$0xff] }
  0x96   : > { %2170 = vmatpush1.msra.mxu1 %v3163_v21  ;;  %1023 = vmatmul.mubr.f32.gmra.mxu0 %v4263_v23  ;;  %5324 = vst [vmem:[#allocation17_spill] sm:$0xff] %v4411_v20  ;;  %v3139_v21 = vld [vmem:[%s5296_s1 + $0x2b8] sm:$0xff] }
  0x97   : > { %1610 = vmatprep.mubr.f32.mxu1 %v3734_v1  ;;  %2171 = vmatprep.subr.mxu1 %v3679_v36  ;;  %v4287_v1 = vld [vmem:[#allocation3 + $0x80] sm:$0xff] }
  0x98   : > { %1027 = vmatprep.mubr.f32.mxu0 %v3755_v8  ;;  %1611 = vmatmul.mubr.f32.gmra.mxu1 %v4156_v37  ;;  %v3155_v37 = vld [vmem:[%s5296_s1 + $0x338] sm:$0xff] }
  0x99   : > { %3431 = vmatprep.subr.mxu0 %v3146_v25  ;;  %2172 = vmatpush1.msra.mxu1 %v3162_v0  ;;  %v3149_v0 = vld [vmem:[%s5296_s1 + $0x308] sm:$0xff] }
  0x9a   : > { %1615 = vmatprep.mubr.f32.mxu1 %v3737_v2  ;;  %1028 = vmatmul.mubr.f32.gmra.mxu0 %v4278_v26  ;;  %v3145_v2 = vld [vmem:[%s5296_s1 + $0x2e8] sm:$0xff] }
  0x9b   : > { %2173 = vmatprep.subr.mxu1 %v3679_v36  ;;  %3432 = vmatpush3.msra.mxu0 %v3146_v25  ;;  %v4418_v25 = vld [vmem:[#allocation3 + $0xa9] sm:$0xff] }
  0x9c   : > { %2174 = vmatpush1.msra.mxu1 %v3161_v28  ;;  %1032 = vmatprep.mubr.f32.mxu0 %v3763_v9  ;;  %v3159_v9 = vld [vmem:[%s5296_s1 + $0x358] sm:$0xff]  ;;  %v4425_v28 = vld [vmem:[#allocation3 + $0xf0] sm:$0xff] }
  0x9d   : > { %1616 = vmatmul.mubr.f32.gmra.mxu1 %v4174_v42  ;;  %2175 = vmatprep.subr.mxu1 %v3679_v36  ;;  %5325 = vst [vmem:[#allocation18_spill] sm:$0xff] %v4425_v28 }
  0x9e   : > { %1620 = vmatprep.mubr.f32.mxu1 %v3740_v3  ;;  %1033 = vmatmul.mubr.f32.gmra.mxu0 %v4287_v1  ;;  %v3144_v3 = vld [vmem:[%s5296_s1 + $0x2e0] sm:$0xff] }
  0x9f   : > { %2176 = vmatpush1.msra.mxu1 %v3160_v30  ;;  %1037 = vmatprep.mubr.f32.mxu0 %v3766_v10  ;;  %v3158_v10 = vld [vmem:[%s5296_s1 + $0x350] sm:$0xff]  ;;  %v4428_v30 = vld [vmem:[#allocation3 + $0xf9] sm:$0xff] }
  0xa0   : > { %3433 = vmatprep.subr.mxu0 %v3145_v2  ;;  %2177 = vmatprep.subr.mxu1 %v3679_v36  ;;  %5326 = vst [vmem:[#allocation19_spill] sm:$0xff] %v4428_v30 }
  0xa1   : > { %1621 = vmatmul.mubr.f32.gmra.mxu1 %v4192_v47  ;;  %3434 = vmatpush3.msra.mxu0 %v3145_v2  ;;  %v3148_v2 = vld [vmem:[%s5296_s1 + $0x300] sm:$0xff] }
  0xa2   : > { %1625 = vmatprep.mubr.f32.mxu1 %v3743_v4  ;;  %1038 = vmatmul.mubr.f32.gmra.mxu0 %v4301_v31  ;;  %v3143_v4 = vld [vmem:[%s5296_s1 + $0x2d8] sm:$0xff] }
  0xa3   : > { %2178 = vmatpush1.msra.mxu1 %v3159_v9  ;;  %1042 = vmatprep.mubr.f32.mxu0 %v3769_v11  ;;  %v3157_v11 = vld [vmem:[%s5296_s1 + $0x348] sm:$0xff]  ;;  %v4435_v9 = vld [vmem:[#allocation3 + $0xb1] sm:$0xff] }
  0xa4   : > { %2179 = vmatprep.subr.mxu1 %v3679_v36  ;;  %3435 = vmatprep.subr.mxu0 %v3144_v3 }
  0xa5   : > { %1626 = vmatmul.mubr.f32.gmra.mxu1 %v4210_v52  ;;  %3436 = vmatpush3.msra.mxu0 %v3144_v3  ;;  %v4439_v3 = vld [vmem:[#allocation3 + $0xf8] sm:$0xff] }
  0xa6   : > { %1630 = vmatprep.mubr.f32.mxu1 %v3746_v5  ;;  %2180 = vmatpush1.msra.mxu1 %v3158_v10  ;;  %v3156_v5 = vld [vmem:[%s5296_s1 + $0x340] sm:$0xff]  ;;  %5327 = vst [vmem:[#allocation20_spill] sm:$0xff] %v4439_v3  ;;  %v3179_v10 = vld [vmem:[%s5296_s1 + $0x3f8] sm:$0xff] }
  0xa7   : > { %1043 = vmatmul.mubr.f32.gmra.mxu0 %v4317_v33  ;;  %2181 = vmatprep.subr.mxu1 %v3679_v36 }
  0xa8   : > { %1047 = vmatprep.mubr.f32.mxu0 %v3772_v12  ;;  %3437 = vmatprep.subr.mxu0 %v3143_v4  ;;  %v4341_v12 = vld [vmem:[#allocation3 + $0xb0] sm:$0xff] }
  0xa9   : > { %1631 = vmatmul.mubr.f32.gmra.mxu1 %v4228_v58  ;;  %3438 = vmatpush3.msra.mxu0 %v3143_v4  ;;  %v4445_v4 = vld [vmem:[#allocation3 + $0x109] sm:$0xff] }
  0xaa   : > { %1635 = vmatprep.mubr.f32.mxu1 %v3749_v6  ;;  %2182 = vmatpush1.msra.mxu1 %v3157_v11  ;;  %v3142_v6 = vld [vmem:[%s5296_s1 + $0x2d0] sm:$0xff]  ;;  %5328 = vst [vmem:[#allocation21_spill] sm:$0xff] %v4445_v4 }
  0xab   : > { %1048 = vmatmul.mubr.f32.gmra.mxu0 %v4331_v35  ;;  %2183 = vmatprep.subr.mxu1 %v3679_v36  ;;  %v3138_v11 = vld [vmem:[%s5296_s1 + $0x2b0] sm:$0xff] }
  0xac   : > { %1052 = vmatprep.mubr.f32.mxu0 %v3775_v13  ;;  %2184 = vmatpush1.msra.mxu1 %v3156_v5  ;;  %v3154_v13 = vld [vmem:[%s5296_s1 + $0x330] sm:$0xff]  ;;  %v4453_v5 = vld [vmem:[#allocation3 + $0xc1] sm:$0xff] }
  0xad   : > { %1636 = vmatmul.mubr.f32.gmra.mxu1 %v4251_v19  ;;  %2185 = vmatprep.subr.mxu1 %v3679_v36 }
  0xae   : > { %1640 = vmatprep.mubr.f32.mxu1 %v3752_v7  ;;  %2186 = vmatpush1.msra.mxu1 %v3155_v37  ;;  %v3141_v7 = vld [vmem:[%s5296_s1 + $0x2c8] sm:$0xff]  ;;  %v3178_v37 = vld [vmem:[%s5296_s1 + $0x3f0] sm:$0xff] }
  0xaf   : > { %1053 = vmatmul.mubr.f32.gmra.mxu0 %v4341_v12  ;;  %2187 = vmatprep.subr.mxu1 %v3679_v36 }
  0xb0   : > { %1057 = vmatprep.mubr.f32.mxu0 %v3778_v14  ;;  %3439 = vmatprep.subr.mxu0 %v3142_v6  ;;  %v3153_v14 = vld [vmem:[%s5296_s1 + $0x328] sm:$0xff] }
  0xb1   : > { %1641 = vmatmul.mubr.f32.gmra.mxu1 %v4263_v23  ;;  %3440 = vmatpush3.msra.mxu0 %v3142_v6  ;;  %v4459_v6 = vld [vmem:[#allocation3 + $0x108] sm:$0xff] }
  0xb2   : > { %1645 = vmatprep.mubr.f32.mxu1 %v3755_v8  ;;  %2188 = vmatpush1.msra.mxu1 %v3154_v13  ;;  %v4376_v8 = vld [vmem:[#allocation3 + $0xd9] sm:$0xff]  ;;  %5329 = vst [vmem:[#allocation22_spill] sm:$0xff] %v4459_v6  ;;  %v4463_v13 = vld [vmem:[#allocation3 + $0x111] sm:$0xff] }
  0xb3   : > { %1058 = vmatmul.mubr.f32.gmra.mxu0 %v4357_v39  ;;  %2189 = vmatprep.subr.mxu1 %v3679_v36  ;;  %5330 = vst [vmem:[#allocation23_spill] sm:$0xff] %v4463_v13 }
  0xb4   : > { %1062 = vmatprep.mubr.f32.mxu0 %v3781_v15  ;;  %3441 = vmatprep.subr.mxu0 %v3141_v7  ;;  %v4387_v15 = vld [vmem:[#allocation3 + $0xd8] sm:$0xff] }
  0xb5   : > { %1646 = vmatmul.mubr.f32.gmra.mxu1 %v4278_v26  ;;  %5321 = vst [vmem:[#allocation14_spill] sm:$0xff] %v4387_v15  ;;  %3442 = vmatpush3.msra.mxu0 %v3141_v7  ;;  %v3137_v7 = vld [vmem:[%s5296_s1 + $0x2a8] sm:$0xff] }
  0xb6   : > { %1650 = vmatprep.mubr.f32.mxu1 %v4366_v41  ;;  %2190 = vmatpush1.msra.mxu1 %v3153_v14  ;;  %v4470_v14 = vld [vmem:[#allocation3 + $0xc9] sm:$0xff] }
  0xb7   : > { %1063 = vmatmul.mubr.f32.gmra.mxu0 %v4373_v44  ;;  %2191 = vmatprep.subr.mxu1 %v3679_v36 }
  0xb8   : > { %1067 = vmatprep.mubr.f32.mxu0 %v4376_v8  ;;  %2192 = vmatpush1.msra.mxu1 %v3152_v46  ;;  %v3177_v46 = vld [vmem:[%s5296_s1 + $0x3e8] sm:$0xff] }
  0xb9   : > { %1651 = vmatmul.mubr.f32.gmra.mxu1 %v4287_v1  ;;  %2193 = vmatprep.subr.mxu1 %v3679_v36 }
  0xba   : > { %1655 = vmatprep.mubr.f32.mxu1 %v4383_v49  ;;  %2194 = vmatpush1.msra.mxu1 %v3151_v51  ;;  %v4477_v51 = vld [vmem:[#allocation3 + $0x110] sm:$0xff] }
  0xbb   : > { %1068 = vmatmul.mubr.f32.gmra.mxu0 %v4387_v15  ;;  %2195 = vmatprep.subr.mxu1 %v3679_v36  ;;  %5331 = vst [vmem:[#allocation24_spill] sm:$0xff] %v4477_v51 }
  0xbc   : > { %1072 = vmatprep.mubr.f32.mxu0 %v4393_v54  ;;  %3443 = vmatprep.subr.mxu0 %v3140_v56 }
  0xbd   : > { %1656 = vmatmul.mubr.f32.gmra.mxu1 %v4301_v31  ;;  %3444 = vmatpush3.msra.mxu0 %v3140_v56  ;;  %v4480_v56 = vld [vmem:[#allocation3 + $0x121] sm:$0xff] }
  0xbe   : > { %1660 = vmatprep.mubr.f32.mxu1 %v4401_v61  ;;  %2196 = vmatpush1.msra.mxu1 %v3150_v16  ;;  %5332 = vst [vmem:[#allocation25_spill] sm:$0xff] %v4480_v56  ;;  %v3176_v16 = vld [vmem:[%s5296_s1 + $0x3e0] sm:$0xff] }
  0xbf   : > { %1073 = vmatmul.mubr.f32.gmra.mxu0 %v4407_v17  ;;  %2197 = vmatprep.subr.mxu1 %v3679_v36 }
  0xc0   : > { %1077 = vmatprep.mubr.f32.mxu0 %v4411_v20  ;;  %3445 = vmatprep.subr.mxu0 %v3139_v21 }
  0xc1   : > { %1661 = vmatmul.mubr.f32.gmra.mxu1 %v4317_v33  ;;  %3446 = vmatpush3.msra.mxu0 %v3139_v21  ;;  %v4491_v21 = vld [vmem:[#allocation3 + $0x120] sm:$0xff] }
  0xc2   : > { %1665 = vmatprep.mubr.f32.mxu1 %v4418_v25  ;;  %2198 = vmatpush1.msra.mxu1 %v3149_v0  ;;  %5334 = vst [vmem:[#allocation27_spill] sm:$0xff] %v4491_v21  ;;  %v3175_v0 = vld [vmem:[%s5296_s1 + $0x3d8] sm:$0xff] }
  0xc3   : > { %1078 = vmatmul.mubr.f32.gmra.mxu0 %v4425_v28  ;;  %2199 = vmatprep.subr.mxu1 %v3679_v36 }
  0xc4   : > { %1082 = vmatprep.mubr.f32.mxu0 %v4428_v30  ;;  %2200 = vmatpush1.msra.mxu1 %v3148_v2  ;;  %v4497_v2 = vld [vmem:[#allocation3 + $0x129] sm:$0xff] }
  0xc5   : > { %1666 = vmatmul.mubr.f32.gmra.mxu1 %v4331_v35  ;;  %2201 = vmatprep.subr.mxu1 %v3679_v36 }
  0xc6   : > { %1670 = vmatprep.mubr.f32.mxu1 %v4435_v9  ;;  %2202 = vmatpush2.msra.mxu1 %v3179_v10  ;;  %v3136_v10 = vld [vmem:[%s5296_s1 + $0x2a0] sm:$0xff] }
  0xc7   : > { %1083 = vmatmul.mubr.f32.gmra.mxu0 %v4439_v3  ;;  %2203 = vmatprep.subr.mxu1 %v3679_v36 }
  0xc8   : > { %1087 = vmatprep.mubr.f32.mxu0 %v4445_v4  ;;  %3447 = vmatprep.subr.mxu0 %v3138_v11 }
  0xc9   : > { %1671 = vmatmul.mubr.f32.gmra.mxu1 %v4341_v12  ;;  %3448 = vmatpush3.msra.mxu0 %v3138_v11  ;;  %v3174_v11 = vld [vmem:[%s5296_s1 + $0x3d0] sm:$0xff] }
  0xca   : > { %1675 = vmatprep.mubr.f32.mxu1 %v4453_v5  ;;  %2204 = vmatpush2.msra.mxu1 %v3178_v37  ;;  %v4509_v37 = vld [vmem:[#allocation3 + $0x128] sm:$0xff] }
  0xcb   : > { %1088 = vmatmul.mubr.f32.gmra.mxu0 %v4459_v6  ;;  %2205 = vmatprep.subr.mxu1 %v3679_v36  ;;  %v4487_v36 = vld [vmem:[#allocation3 + $0x8] sm:$0xff]  ;;  %5335 = vst [vmem:[#allocation28_spill] sm:$0xff] %v4509_v37 }
  0xcc   : > { %1092 = vmatprep.mubr.f32.mxu0 %v4463_v13  ;;  %3449 = vmatprep.subr.mxu0 %v3137_v7  ;;  %5333 = vst [vmem:[#allocation26_spill] sm:$0xff] %v4487_v36 }
  0xcd   : > { %1676 = vmatmul.mubr.f32.gmra.mxu1 %v4357_v39  ;;  %3450 = vmatpush3.msra.mxu0 %v3137_v7  ;;  %v4513_v7 = vld [vmem:[#allocation3 + $0x139] sm:$0xff] }
  0xce   : > { %1680 = vmatprep.mubr.f32.mxu1 %v4470_v14  ;;  %2206 = vmatpush2.msra.mxu1 %v3177_v46  ;;  %v3135_v46 = vld [vmem:[%s5296_s1 + $0x298] sm:$0xff] }
  0xcf   : > { %1093 = vmatmul.mubr.f32.gmra.mxu0 %v4477_v51  ;;  %2207 = vmatprep.subr.mxu1 %v4487_v36 }
  0xd0   : > { %1097 = vmatprep.mubr.f32.mxu0 %v4480_v56  ;;  %2208 = vmatpush2.msra.mxu1 %v3176_v16  ;;  %v4522_v16 = vld [vmem:[#allocation3 + $0x138] sm:$0xff] }
  0xd1   : > { %1681 = vmatmul.mubr.f32.gmra.mxu1 %v4373_v44  ;;  %2209 = vmatprep.subr.mxu1 %v4487_v36 }
  0xd2   : > { %1685 = vmatprep.mubr.f32.mxu1 %v4376_v8  ;;  %2210 = vmatpush2.msra.mxu1 %v3175_v0  ;;  %v3134_v0 = vld [vmem:[%s5296_s1 + $0x290] sm:$0xff] }
  0xd3   : > { %1098 = vmatmul.mubr.f32.gmra.mxu0 %v4491_v21  ;;  %2211 = vmatprep.subr.mxu1 %v4487_v36 }
  0xd4   : > { %1102 = vmatprep.mubr.f32.mxu0 %v4497_v2  ;;  %3451 = vmatprep.subr.mxu0 %v3136_v10 }
  0xd5   : > { %1686 = vmatmul.mubr.f32.gmra.mxu1 %v4387_v15  ;;  %3452 = vmatpush3.msra.mxu0 %v3136_v10  ;;  %v3133_v10 = vld [vmem:[%s5296_s1 + $0x288] sm:$0xff]  ;;  %v4542_v15 = vld [vmem:[#allocation3 + $0x151] sm:$0xff] }
  0xd6   : > { %1690 = vmatprep.mubr.f32.mxu1 %v4393_v54  ;;  %2212 = vmatpush2.msra.mxu1 %v3174_v11  ;;  %v4528_v11 = vld [vmem:[#allocation3 + $0x141] sm:$0xff]  ;;  %5337 = vst [vmem:[#allocation30_spill] sm:$0xff] %v4542_v15 }
  0xd7   : > { %1103 = vmatmul.mubr.f32.gmra.mxu0 %v4509_v37  ;;  %2213 = vmatprep.subr.mxu1 %v4487_v36  ;;  %v3173_v54 = vld [vmem:[%s5296_s1 + $0x3c8] sm:$0xff] }
  0xd8   : > { %1107 = vmatprep.mubr.f32.mxu0 %v4513_v7  ;;  %3453 = vmatprep.subr.mxu0 %v3135_v46 }
  0xd9   : > { %1691 = vmatmul.mubr.f32.gmra.mxu1 %v4407_v17  ;;  %3454 = vmatpush3.msra.mxu0 %v3135_v46  ;;  %v4539_v17 = vld [vmem:[#allocation3 + $0x140] sm:$0xff] }
  0xda   : > { %1695 = vmatprep.mubr.f32.mxu1 %v4411_v20  ;;  %3455 = vmatprep.subr.mxu0 %v3134_v0  ;;  %5336 = vst [vmem:[#allocation29_spill] sm:$0xff] %v4539_v17  ;;  %v3132_v46 = vld [vmem:[%s5296_s1 + $0x280] sm:$0xff]  ;;  %v4587_v20 = vld [vmem:[#allocation3 + $0x171] sm:$0xff] }
  0xdb   : > { %1108 = vmatmul.mubr.f32.gmra.mxu0 %v4522_v16  ;;  %2214 = vmatpush2.msra.mxu1 %v3173_v54  ;;  %v3172_v54 = vld [vmem:[%s5296_s1 + $0x3c0] sm:$0xff] }
  0xdc   : > { %1112 = vmatprep.mubr.f32.mxu0 %v4528_v11  ;;  %3456 = vmatpush3.msra.mxu0 %v3134_v0  ;;  %v4557_v0 = vld [vmem:[#allocation3 + $0x159] sm:$0xff] }
  0xdd   : > { %1696 = vmatmul.mubr.f32.gmra.mxu1 %v4425_v28  ;;  %3457 = vmatprep.subr.mxu0 %v3133_v10  ;;  %v4554_v28 = vld [vmem:[#allocation3 + $0x150] sm:$0xff] }
  0xde   : > { %1700 = vmatprep.mubr.f32.mxu1 %v4428_v30  ;;  %2215 = vmatprep.subr.mxu1 %v4487_v36  ;;  %5338 = vst [vmem:[#allocation31_spill] sm:$0xff] %v4554_v28  ;;  %v3195_v30 = vld [vmem:[%s5296_s1 + $0x478] sm:$0xff] }
  0xdf   : > { %1113 = vmatmul.mubr.f32.gmra.mxu0 %v4539_v17  ;;  %2216 = vmatpush2.msra.mxu1 %v3172_v54  ;;  %v4572_v54 = vld [vmem:[#allocation3 + $0x169] sm:$0xff] }
  0xe0   : > { %1117 = vmatprep.mubr.f32.mxu0 %v4542_v15  ;;  %3458 = vmatpush3.msra.mxu0 %v3133_v10  ;;  %v3171_v10 = vld [vmem:[%s5296_s1 + $0x3b8] sm:$0xff]  ;;  %5339 = vst [vmem:[#allocation32_spill] sm:$0xff] %v4572_v54 }
  0xe1   : > { %1701 = vmatmul.mubr.f32.gmra.mxu1 %v4439_v3  ;;  %3459 = vmatprep.subr.mxu0 %v3132_v46  ;;  %v4569_v3 = vld [vmem:[#allocation3 + $0x158] sm:$0xff] }
  0xe2   : > { %1705 = vmatprep.mubr.f32.mxu1 %v4445_v4  ;;  %2217 = vmatprep.subr.mxu1 %v4487_v36  ;;  %v3170_v4 = vld [vmem:[%s5296_s1 + $0x3b0] sm:$0xff] }
  0xe3   : > { %1118 = vmatmul.mubr.f32.gmra.mxu0 %v4554_v28  ;;  %2218 = vmatpush2.msra.mxu1 %v3171_v10  ;;  %v3168_v10 = vld [vmem:[%s5296_s1 + $0x3a0] sm:$0xff] }
  0xe4   : > { %1122 = vmatprep.mubr.f32.mxu0 %v4557_v0  ;;  %3460 = vmatpush3.msra.mxu0 %v3132_v46  ;;  %v3169_v46 = vld [vmem:[%s5296_s1 + $0x3a8] sm:$0xff] }
  0xe5   : > { %1706 = vmatmul.mubr.f32.gmra.mxu1 %v4459_v6  ;;  %3509 = vmatprep.subr.mxu0 %v3195_v30  ;;  %v4584_v6 = vld [vmem:[#allocation3 + $0x168] sm:$0xff] }
  0xe6   : > { %1710 = vmatprep.mubr.f32.mxu1 %v4463_v13  ;;  %2219 = vmatprep.subr.mxu1 %v4487_v36  ;;  %v1460_v13 = vld [vmem:[#allocation3 + $0x1a] sm:$0xff] }
  0xe7   : > { %1123 = vmatmul.mubr.f32.gmra.mxu0 %v4569_v3  ;;  %2220 = vmatpush2.msra.mxu1 %v3170_v4  ;;  %v3167_v4 = vld [vmem:[%s5296_s1 + $0x398] sm:$0xff] }
  0xe8   : > { %1127 = vmatprep.mubr.f32.mxu0 %v4572_v54  ;;  %2221 = vmatprep.subr.mxu1 %v4487_v36 }
  0xe9   : > { %1711 = vmatmul.mubr.f32.gmra.mxu1 %v4477_v51  ;;  %v4600_v51 = vld [vmem:[#allocation3 + $0x170] sm:$0xff] }
  0xea   : > { %1715 = vmatprep.mubr.f32.mxu1 %v4480_v56  ;;  %2222 = vmatpush2.msra.mxu1 %v3169_v46  ;;  %v3166_v46 = vld [vmem:[%s5296_s1 + $0x390] sm:$0xff] }
  0xeb   : > { %1128 = vmatmul.mubr.f32.gmra.mxu0 %v4584_v6  ;;  %2223 = vmatprep.subr.mxu1 %v4487_v36  ;;  %v4614_v56 = vld [vmem:[#allocation3 + $0x32] sm:$0xff] }
  0xec   : > { %1132 = vmatprep.mubr.f32.mxu0 %v4587_v20  ;;  %2224 = vmatpush2.msra.mxu1 %v3168_v10  ;;  %v3165_v10 = vld [vmem:[%s5296_s1 + $0x388] sm:$0xff] }
  0xed   : > { %1716 = vmatmul.mubr.f32.gmra.mxu1 %v4491_v21  ;;  %2225 = vmatprep.subr.mxu1 %v4487_v36  ;;  %v1461_v21 = vld [vmem:[#allocation3 + $0x22] sm:$0xff] }
  0xee   : > { %1720 = vmatprep.mubr.f32.mxu1 %v4497_v2  ;;  %2226 = vmatpush2.msra.mxu1 %v3167_v4  ;;  %v3164_v4 = vld [vmem:[%s5296_s1 + $0x380] sm:$0xff] }
  0xef   : > { %1133 = vmatmul.mubr.f32.gmra.mxu0 %v4600_v51  ;;  %2227 = vmatprep.subr.mxu1 %v4487_v36 }
  0xf0   : > { %3461 = vmatprep.mubr.f32.mxu0 %v1460_v13  ;;  %2228 = vmatpush2.msra.mxu1 %v3166_v46  ;;  %v3194_v13 = vld [vmem:[%s5296_s1 + $0x470] sm:$0xff]  ;;  %v4626_v46 = vld [vmem:[#allocation3 + $0x3a] sm:$0xff] }
  0xf1   : > { %1721 = vmatmul.mubr.f32.gmra.mxu1 %v4509_v37  ;;  %2229 = vmatprep.subr.mxu1 %v4487_v36  ;;  %v4629_v37 = vld [vmem:[#allocation3 + $0x4a] sm:$0xff] }
  0xf2   : > { %1725 = vmatprep.mubr.f32.mxu1 %v4513_v7  ;;  %2230 = vmatpush2.msra.mxu1 %v3165_v10  ;;  %v4637_v10 = vld [vmem:[#allocation3 + $0x52] sm:$0xff] }
  0xf3   : > { %3462 = vmatmul.mubr.f32.vlgmr.msra.gmra.mxu0 %v1461_v21  ;;  %2231 = vmatprep.subr.mxu1 %v4487_v36  ;;  %v3193_v21 = vld [vmem:[%s5296_s1 + $0x468] sm:$0xff]  ;;  %v3191_v36 = vld [vmem:[%s5296_s1 + $0x458] sm:$0xff] }
  0xf4   : > { %3464 = vmatprep.mubr.f32.mxu0 %v4614_v56  ;;  %2232 = vmatpush2.msra.mxu1 %v3164_v4  ;;  %v3192_v4 = vld [vmem:[%s5296_s1 + $0x460] sm:$0xff] }
  0xf5   : > { %1726 = vmatmul.mubr.f32.gmra.mxu1 %v4522_v16  ;;  %3510 = vmatpush3.msra.mxu0 %v3195_v30  ;;  %v4643_v30 = vld [vmem:[#allocation3 + $0x62] sm:$0xff] }
  0xf6   : > { %1730 = vmatprep.mubr.f32.mxu1 %v4528_v11  ;;  %3511 = vmatprep.subr.mxu0 %v3194_v13 }
  0xf7   : > { %3465 = vmatmul.mubr.f32.gmra.mxu0 %v4626_v46 }
  0xf8   : > { %3467 = vmatprep.mubr.f32.mxu0 %v4629_v37  ;;  %3512 = vmatpush3.msra.mxu0 %v3194_v13  ;;  %v4651_v13 = vld [vmem:[#allocation3 + $0x6a] sm:$0xff] }
  0xf9   : > { %1731 = vmatmul.mubr.f32.gmra.mxu1 %v4539_v17  ;;  %3513 = vmatprep.subr.mxu0 %v3193_v21  ;;  %v3190_v17 = vld [vmem:[%s5296_s1 + $0x450] sm:$0xff] }
  0xfa   : > { %1735 = vmatprep.mubr.f32.mxu1 %v4542_v15  ;;  %3514 = vmatpush3.msra.mxu0 %v3193_v21  ;;  %v4657_v15 = vld [vmem:[#allocation3 + $0x7a] sm:$0xff]  ;;  %v3189_v21 = vld [vmem:[%s5296_s1 + $0x448] sm:$0xff] }
  0xfb   : > { %3468 = vmatmul.mubr.f32.gmra.mxu0 %v4637_v10  ;;  %3515 = vmatprep.subr.mxu0 %v3192_v4 }
  0xfc   : > { %3470 = vmatprep.mubr.f32.mxu0 %v4643_v30  ;;  %3516 = vmatpush3.msra.mxu0 %v3192_v4  ;;  %v4665_v4 = vld [vmem:[#allocation3 + $0x82] sm:$0xff] }
  0xfd   : > { %1736 = vmatmul.mubr.f32.gmra.mxu1 %v4554_v28  ;;  %3517 = vmatprep.subr.mxu0 %v3191_v36  ;;  %v3188_v28 = vld [vmem:[%s5296_s1 + $0x440] sm:$0xff] }
  0xfe   : > { %1740 = vmatprep.mubr.f32.mxu1 %v4557_v0  ;;  %3518 = vmatpush3.msra.mxu0 %v3191_v36  ;;  %v3187_v36 = vld [vmem:[%s5296_s1 + $0x438] sm:$0xff] }
  0xff   : > { %3471 = vmatmul.mubr.f32.gmra.mxu0 %v4651_v13  ;;  %3519 = vmatprep.subr.mxu0 %v3190_v17 }
 0x100   : > { %3473 = vmatprep.mubr.f32.mxu0 %v4657_v15  ;;  %3520 = vmatpush3.msra.mxu0 %v3190_v17  ;;  %v3186_v17 = vld [vmem:[%s5296_s1 + $0x430] sm:$0xff] }
 0x101   : > { %1741 = vmatmul.mubr.f32.gmra.mxu1 %v4569_v3  ;;  %3521 = vmatprep.subr.mxu0 %v3189_v21 }
 0x102   : > { %1745 = vmatprep.mubr.f32.mxu1 %v4572_v54  ;;  %3522 = vmatpush3.msra.mxu0 %v3189_v21  ;;  %v3185_v21 = vld [vmem:[%s5296_s1 + $0x428] sm:$0xff] }
 0x103   : > { %3474 = vmatmul.mubr.f32.gmra.mxu0 %v4665_v4  ;;  %3523 = vmatprep.subr.mxu0 %v3188_v28  ;;  %v4686_v54 = vld [vmem:[#allocation3 + $0x181] sm:$0xff] }
 0x104   : > { %3476 = vmatprep.mubr.f32.mxu0 %v4065_v57  ;;  %3524 = vmatpush3.msra.mxu0 %v3188_v28  ;;  %v3184_v57 = vld [vmem:[%s5296_s1 + $0x420] sm:$0xff] }
 0x105   : > { %1746 = vmatmul.mubr.f32.gmra.mxu1 %v4584_v6  ;;  %3525 = vmatprep.subr.mxu0 %v3187_v36  ;;  %v4694_v28 = vld [vmem:[#allocation3 + $0x180] sm:$0xff] }
 0x106   : > { %1750 = vmatprep.mubr.f32.mxu1 %v4587_v20  ;;  %3526 = vmatpush3.msra.mxu0 %v3187_v36  ;;  %5340 = vst [vmem:[#allocation33_spill] sm:$0xff] %v4694_v28 }
 0x107   : > { %3477 = vmatmul.mubr.f32.gmra.mxu0 %v4075_v60  ;;  %3527 = vmatprep.subr.mxu0 %v3186_v17  ;;  %v3183_v60 = vld [vmem:[%s5296_s1 + $0x418] sm:$0xff] }
 0x108   : > { %3479 = vmatprep.mubr.f32.mxu0 %v4087_v63  ;;  %3528 = vmatpush3.msra.mxu0 %v3186_v17  ;;  %v4700_v63 = vld [vmem:[#allocation3 + $0x189] sm:$0xff] }
 0x109   : > { %1751 = vmatmul.mubr.f32.gmra.mxu1 %v4600_v51  ;;  %3529 = vmatprep.subr.mxu0 %v3185_v21  ;;  %5341 = vst [vmem:[#allocation34_spill] sm:$0xff] %v4700_v63  ;;  %v3182_v17 = vld [vmem:[%s5296_s1 + $0x410] sm:$0xff] }
 0x10a   : > { %1755 = vmatprep.mubr.f32.mxu1 %v4686_v54  ;;  %3530 = vmatpush3.msra.mxu0 %v3185_v21  ;;  %v4710_v21 = vld [vmem:[#allocation3 + $0x188] sm:$0xff] }
 0x10b   : > { %3480 = vmatmul.mubr.f32.gmra.mxu0 %v4097_v18  ;;  %3531 = vmatprep.subr.mxu0 %v3184_v57 }
 0x10c   : > { %3482 = vmatprep.mubr.f32.mxu0 %v4110_v22  ;;  %3532 = vmatpush3.msra.mxu0 %v3184_v57  ;;  %v3181_v22 = vld [vmem:[%s5296_s1 + $0x408] sm:$0xff]  ;;  %v2056_v57 = vld [vmem:[#allocation3 + $0x31] sm:$0xff] }
 0x10d   : > { %1756 = vmatmul.mubr.f32.gmra.mxu1 %v4694_v28  ;;  %3533 = vmatprep.subr.mxu0 %v3183_v60 }
 0x10e   : > { %1760 = vmatprep.mubr.f32.mxu1 %v4700_v63  ;;  %3534 = vmatpush3.msra.mxu0 %v3183_v60  ;;  %v3180_v63 = vld [vmem:[%s5296_s1 + $0x400] sm:$0xff] }
 0x10f   : > { %3483 = vmatmul.mubr.f32.gmra.mxu0 %v4115_v24  ;;  %3535 = vmatprep.subr.mxu0 %v3182_v17  ;;  %v2057_v60 = vld [vmem:[#allocation3 + $0x39] sm:$0xff] }
 0x110   : > { %3485 = vmatprep.mubr.f32.mxu0 %v4125_v27  ;;  %3536 = vmatpush3.msra.mxu0 %v3182_v17  ;;  %v2058_v17 = vld [vmem:[#allocation3 + $0x49] sm:$0xff] }
 0x111   : > { %v4703_v36 = vpop.f32.mrf.mxu1  ;;  %1761 = vmatmul.mubr.f32.gmra.mxu1 %v4710_v21  ;;  %3537 = vmatprep.subr.mxu0 %v3181_v22 }
 0x112   : > { %2233 = vmatprep.mubr.f32.mxu1 %v2056_v57  ;;  %3538 = vmatpush3.msra.mxu0 %v3181_v22  ;;  %v2097_v57 = vld [vmem:[#allocation3 + $0x9a] sm:$0xff] }
 0x113   : > { %v4712_v18 = vpop.f32.mrf.mxu1  ;;  %3486 = vmatmul.mubr.f32.gmra.mxu0 %v4130_v29  ;;  %3539 = vmatprep.subr.mxu0 %v3180_v63  ;;  %v2059_v29 = vld [vmem:[#allocation3 + $0x51] sm:$0xff] }
 0x114   : > { %3488 = vmatprep.mubr.f32.mxu0 %v4142_v32  ;;  %3540 = vmatpush3.msra.mxu0 %v3180_v63 }
 0x115   : > { %v4723_v28 = vpop.f32.mrf.mxu1  ;;  %2234 = vmatmul.mubr.f32.vlgmr.msra.gmra.mxu1 %v4174_v42 }
 0x116   : > { %2238 = vmatprep.mubr.f32.mxu1 %v2057_v60 }
 0x117   : > { %v4726_v24 = vpop.f32.mrf.mxu1  ;;  %3489 = vmatmul.mubr.f32.gmra.mxu0 %v4148_v34  ;;  %v2060_v34 = vld [vmem:[#allocation3 + $0x61] sm:$0xff] }
 0x118   : > { %3491 = vmatprep.mubr.f32.mxu0 %v4160_v38 }
 0x119   : > { %v4730_v27 = vpop.f32.mrf.mxu1  ;;  %2239 = vmatmul.mubr.f32.gmra.mxu1 %v4192_v47 }
 0x11a   : > { %2243 = vmatprep.mubr.f32.mxu1 %v2058_v17  ;;  %v2100_v17 = vld [vmem:[#allocation3 + $0xc2] sm:$0xff] }
 0x11b   : > { %v4734_v22 = vpop.f32.mrf.mxu1  ;;  %3492 = vmatmul.mubr.f32.gmra.mxu0 %v4166_v40 }
 0x11c   : > { %3494 = vmatprep.mubr.f32.mxu0 %v4178_v43  ;;  %v2061_v43 = vld [vmem:[#allocation3 + $0x69] sm:$0xff] }
 0x11d   : > { %v4738_v32 = vpop.f32.mrf.mxu1  ;;  %2244 = vmatmul.mubr.f32.gmra.mxu1 %v4210_v52  ;;  %v4761_v52 = vld [vmem:[#allocation3 + $0x182] sm:$0xff] }
 0x11e   : > { %2248 = vmatprep.mubr.f32.mxu1 %v2059_v29 }
 0x11f   : > { %v4742_v42 = vpop.f32.mrf.mxu1  ;;  %3495 = vmatmul.mubr.f32.gmra.mxu0 %v4184_v45 }
 0x120   : > { %3497 = vmatprep.mubr.f32.mxu0 %v4196_v48  ;;  %v2062_v48 = vld [vmem:[#allocation3 + $0x79] sm:$0xff] }
 0x121   : > { %v4746_v38 = vpop.f32.mrf.mxu1  ;;  %2249 = vmatmul.mubr.f32.gmra.mxu1 %v4228_v58  ;;  %v4769_v58 = vld [vmem:[#allocation3 + $0x18a] sm:$0xff] }
 0x122   : > { %2253 = vmatprep.mubr.f32.mxu1 %v2060_v34 }
 0x123   : > { %v4749_v40 = vpop.f32.mrf.mxu1  ;;  %3498 = vmatmul.mubr.f32.gmra.mxu0 %v4202_v50 }
 0x124   : > { %3500 = vmatprep.mubr.f32.mxu0 %v4214_v53 }
 0x125   : > { %2254 = vmatmul.mubr.f32.gmra.mxu1 %v4251_v19  ;;  %v4754_v47 = vpop.f32.mrf.mxu1 }
 0x126   : > { %2258 = vmatprep.mubr.f32.mxu1 %v2061_v43  ;;  %v2101_v43 = vld [vmem:[#allocation3 + $0xca] sm:$0xff] }
 0x127   : > { %3501 = vmatmul.mubr.f32.gmra.mxu0 %v4220_v55  ;;  %v4757_v45 = vpop.f32.mrf.mxu1 }
 0x128   : > { %3503 = vmatprep.mubr.f32.mxu0 %v4232_v59 }
 0x129   : > { %2259 = vmatmul.mubr.f32.gmra.mxu1 %v4263_v23  ;;  %v4763_v50 = vpop.f32.mrf.mxu1 }
 0x12a   : > { %2263 = vmatprep.mubr.f32.mxu1 %v2062_v48  ;;  %v2102_v48 = vld [vmem:[#allocation3 + $0xda] sm:$0xff] }
 0x12b   : > { %3504 = vmatmul.mubr.f32.gmra.mxu0 %v4238_v62  ;;  %v4766_v53 = vpop.f32.mrf.mxu1 }
 0x12c   : > { %3506 = vmatprep.mubr.f32.mxu0 %v4761_v52 }
 0x12d   : > { %2264 = vmatmul.mubr.f32.gmra.mxu1 %v4278_v26 }
 0x12e   : > { %2268 = vmatprep.mubr.f32.mxu1 %v4366_v41  ;;  %v4774_v55 = vpop.f32.mrf.mxu1 }
 0x12f   : > { %3507 = vmatmul.mubr.f32.gmra.mxu0 %v4769_v58 }
 0x130   : > { %3541 = vmatprep.mubr.f32.mxu0 %v4614_v56  ;;  %v4778_v59 = vpop.f32.mrf.mxu1 }
 0x131   : > { %2269 = vmatmul.mubr.f32.gmra.mxu1 %v4287_v1 }
 0x132   : > { %v979_v62 = vpop.f32.mrf.mxu0  ;;  %2273 = vmatprep.mubr.f32.mxu1 %v4383_v49 }
 0x133   : > { %v4782_v19 = vadd.f32 %v4712_v18, %v979_v62  ;;  %3542 = vmatmul.mubr.f32.vlgmr.msra.gmra.mxu0 %v4626_v46 }
 0x134   : > { %v4785_v23 = vpop.f32.mrf.mxu1  ;;  %v981_v26 = vpop.f32.mrf.mxu0  ;;  %3544 = vmatprep.mubr.f32.mxu0 %v4629_v37 }
 0x135   : > { %5342 = vst [vmem:[#allocation35_spill] sm:$0xff] %v4782_v19  ;;  %2274 = vmatmul.mubr.f32.gmra.mxu1 %v4301_v31 }
 0x136   : > { %v4789_v41 = vpop.f32.mrf.mxu1  ;;  %v984_v1 = vpop.f32.mrf.mxu0  ;;  %2278 = vmatprep.mubr.f32.mxu1 %v4401_v61 }
 0x137   : > { %v4793_v56 = vadd.f32 %v4703_v36, %v984_v1  ;;  %3545 = vmatmul.mubr.f32.gmra.mxu0 %v4637_v10  ;;  %v2103_v1 = vld [vmem:[#allocation3 + $0xe2] sm:$0xff] }
 0x138   : > { %v4796_v49 = vpop.f32.mrf.mxu1  ;;  %v986_v46 = vpop.f32.mrf.mxu0  ;;  %3547 = vmatprep.mubr.f32.mxu0 %v4643_v30  ;;  %v2096_v30 = vld [vmem:[#allocation3 + $0x92] sm:$0xff] }
 0x139   : > { %2279 = vmatmul.mubr.f32.gmra.mxu1 %v4317_v33  ;;  %v5348_v46 = vld [vmem:[#allocation14_spill] sm:$0xff] }
 0x13a   : > { %v4800_v37 = vpop.f32.mrf.mxu1  ;;  %v989_v31 = vpop.f32.mrf.mxu0  ;;  %2283 = vmatprep.mubr.f32.mxu1 %v4418_v25 }
 0x13b   : > { %v4804_v63 = vadd.f32 %v4726_v24, %v989_v31  ;;  %3548 = vmatmul.mubr.f32.gmra.mxu0 %v4651_v13  ;;  %v2099_v24 = vld [vmem:[#allocation3 + $0xb2] sm:$0xff] }
 0x13c   : > { %v4807_v61 = vpop.f32.mrf.mxu1  ;;  %v991_v10 = vpop.f32.mrf.mxu0  ;;  %3550 = vmatprep.mubr.f32.mxu0 %v4657_v15  ;;  %v2098_v15 = vld [vmem:[#allocation3 + $0xaa] sm:$0xff]  ;;  %v2104_v31 = vld [vmem:[#allocation3 + $0xf2] sm:$0xff] }
 0x13d   : > { %5343 = vst [vmem:[#allocation36_spill] sm:$0xff] %v4804_v63  ;;  %2284 = vmatmul.mubr.f32.gmra.mxu1 %v4331_v35 }
 0x13e   : > { %v4811_v36 = vpop.f32.mrf.mxu1  ;;  %v994_v33 = vpop.f32.mrf.mxu0  ;;  %2288 = vmatprep.mubr.f32.mxu1 %v4435_v9 }
 0x13f   : > { %v4815_v25 = vadd.f32 %v4723_v28, %v994_v33  ;;  %3551 = vmatmul.mubr.f32.gmra.mxu0 %v4665_v4 }
 0x140   : > { %v4818_v18 = vpop.f32.mrf.mxu1  ;;  %v996_v13 = vpop.f32.mrf.mxu0  ;;  %3553 = vmatprep.mubr.f32.mxu0 %v2096_v30  ;;  %v5349_v30 = vld [vmem:[#allocation15_spill] sm:$0xff] }
 0x141   : > { %5344 = vst [vmem:[#allocation37_spill] sm:$0xff] %v4815_v25  ;;  %2289 = vmatmul.mubr.f32.gmra.mxu1 %v4341_v12  ;;  %v2105_v13 = vld [vmem:[#allocation3 + $0xfa] sm:$0xff] }
 0x142   : > { %v4821_v35 = vpop.f32.mrf.mxu1  ;;  %v999_v60 = vpop.f32.mrf.mxu0  ;;  %2293 = vmatprep.mubr.f32.mxu1 %v4453_v5 }
 0x143   : > { %v4825_v9 = vadd.f32 %v4734_v22, %v999_v60  ;;  %3554 = vmatmul.mubr.f32.gmra.mxu0 %v2097_v57  ;;  %v5351_v57 = vld [vmem:[#allocation16_spill] sm:$0xff] }
 0x144   : > { %v4827_v28 = vpop.f32.mrf.mxu1  ;;  %v1001_v4 = vpop.f32.mrf.mxu0  ;;  %3556 = vmatprep.mubr.f32.mxu0 %v2098_v15  ;;  %v2106_v15 = vld [vmem:[#allocation3 + $0x10a] sm:$0xff] }
 0x145   : > { %5345 = vst [vmem:[#allocation38_spill] sm:$0xff] %v4825_v9  ;;  %2294 = vmatmul.mubr.f32.gmra.mxu1 %v4357_v39  ;;  %v5352_v4 = vld [vmem:[#allocation17_spill] sm:$0xff] }
 0x146   : > { %v4830_v29 = vpop.f32.mrf.mxu1  ;;  %v1004_v12 = vpop.f32.mrf.mxu0  ;;  %2298 = vmatprep.mubr.f32.mxu1 %v4470_v14 }
 0x147   : > { %v4834_v34 = vadd.f32 %v4730_v27, %v1004_v12  ;;  %3557 = vmatmul.mubr.f32.gmra.mxu0 %v2099_v24 }
 0x148   : > { %v4836_v5 = vpop.f32.mrf.mxu1  ;;  %v1006_v22 = vpop.f32.mrf.mxu0  ;;  %3559 = vmatprep.mubr.f32.mxu0 %v2100_v17 }
 0x149   : > { %5346 = vst [vmem:[#allocation39_spill] sm:$0xff] %v4834_v34  ;;  %2299 = vmatmul.mubr.f32.gmra.mxu1 %v4373_v44  ;;  %v5354_v22 = vld [vmem:[#allocation18_spill] sm:$0xff] }
 0x14a   : > { %v4839_v62 = vpop.f32.mrf.mxu1  ;;  %v1009_v39 = vpop.f32.mrf.mxu0  ;;  %2303 = vmatprep.mubr.f32.mxu1 %v4376_v8 }
 0x14b   : > { %v4843_v26 = vadd.f32 %v4742_v42, %v1009_v39  ;;  %3560 = vmatmul.mubr.f32.gmra.mxu0 %v2101_v43  ;;  %v5355_v39 = vld [vmem:[#allocation19_spill] sm:$0xff] }
 0x14c   : > { %v4845_v14 = vpop.f32.mrf.mxu1  ;;  %v1011_v27 = vpop.f32.mrf.mxu0  ;;  %3562 = vmatprep.mubr.f32.mxu0 %v2102_v48  ;;  %v2108_v48 = vld [vmem:[#allocation3 + $0x122] sm:$0xff] }
 0x14d   : > { %5347 = vst [vmem:[#allocation40_spill] sm:$0xff] %v4843_v26  ;;  %2304 = vmatmul.mubr.f32.gmra.mxu1 %v5348_v46 }
 0x14e   : > { %v4848_v10 = vpop.f32.mrf.mxu1  ;;  %v1014_v44 = vpop.f32.mrf.mxu0  ;;  %2308 = vmatprep.mubr.f32.mxu1 %v5349_v30 }
 0x14f   : > { %v4852_v33 = vadd.f32 %v4738_v32, %v1014_v44  ;;  %3563 = vmatmul.mubr.f32.gmra.mxu0 %v2103_v1  ;;  %v2107_v32 = vld [vmem:[#allocation3 + $0x112] sm:$0xff]  ;;  %v5357_v44 = vld [vmem:[#allocation20_spill] sm:$0xff] }
 0x150   : > { %v4854_v8 = vpop.f32.mrf.mxu1  ;;  %v1016_v42 = vpop.f32.mrf.mxu0  ;;  %3565 = vmatprep.mubr.f32.mxu0 %v2104_v31  ;;  %v2109_v31 = vld [vmem:[#allocation3 + $0x12a] sm:$0xff] }
 0x151   : > { %5350 = vst [vmem:[#allocation14_spill] sm:$0xff] %v4852_v33  ;;  %2309 = vmatmul.mubr.f32.gmra.mxu1 %v5351_v57  ;;  %v2110_v42 = vld [vmem:[#allocation3 + $0x13a] sm:$0xff] }
 0x152   : > { %v4857_v60 = vpop.f32.mrf.mxu1  ;;  %2313 = vmatprep.mubr.f32.mxu1 %v5352_v4  ;;  %v1019_v24 = vpop.f32.mrf.mxu0 }
 0x153   : > { %3566 = vmatmul.mubr.f32.gmra.mxu0 %v2105_v13  ;;  %v4861_v17 = vadd.f32 %v4749_v40, %v1019_v24  ;;  %v5358_v13 = vld [vmem:[#allocation21_spill] sm:$0xff] }
 0x154   : > { %3568 = vmatprep.mubr.f32.mxu0 %v2106_v15  ;;  %v4863_v12 = vpop.f32.mrf.mxu1  ;;  %v1021_v43 = vpop.f32.mrf.mxu0  ;;  %v2111_v24 = vld [vmem:[#allocation3 + $0x142] sm:$0xff] }
 0x155   : > { %5353 = vst [vmem:[#allocation15_spill] sm:$0xff] %v4861_v17  ;;  %2314 = vmatmul.mubr.f32.gmra.mxu1 %v5354_v22  ;;  %v2112_v43 = vld [vmem:[#allocation3 + $0x152] sm:$0xff] }
 0x156   : > { %2318 = vmatprep.mubr.f32.mxu1 %v5355_v39  ;;  %v1609_v27 = vpop.f32.mrf.mxu1  ;;  %v1024_v1 = vpop.f32.mrf.mxu0 }
 0x157   : > { %3569 = vmatmul.mubr.f32.gmra.mxu0 %v2107_v32  ;;  %v4868_v46 = vadd.f32 %v4746_v38, %v1024_v1  ;;  %v5361_v32 = vld [vmem:[#allocation22_spill] sm:$0xff] }
 0x158   : > { %3571 = vmatprep.mubr.f32.mxu0 %v2108_v48  ;;  %v4870_v40 = vpop.f32.mrf.mxu1  ;;  %v1026_v30 = vpop.f32.mrf.mxu0  ;;  %v5362_v48 = vld [vmem:[#allocation23_spill] sm:$0xff] }
 0x159   : > { %5356 = vst [vmem:[#allocation16_spill] sm:$0xff] %v4868_v46  ;;  %2319 = vmatmul.mubr.f32.gmra.mxu1 %v5357_v44  ;;  %v5365_v44 = vld [vmem:[#allocation24_spill] sm:$0xff] }
 0x15a   : > { %2323 = vmatprep.mubr.f32.mxu1 %v5358_v13  ;;  %v1614_v57 = vpop.f32.mrf.mxu1  ;;  %v1029_v15 = vpop.f32.mrf.mxu0  ;;  %v5366_v13 = vld [vmem:[#allocation25_spill] sm:$0xff] }
 0x15b   : > { %3572 = vmatmul.mubr.f32.gmra.mxu0 %v2109_v31  ;;  %v4875_v4 = vadd.f32 %v4757_v45, %v1029_v15  ;;  %v2113_v31 = vld [vmem:[#allocation3 + $0x15a] sm:$0xff] }
 0x15c   : > { %3574 = vmatprep.mubr.f32.mxu0 %v2110_v42  ;;  %v1031_v22 = vpop.f32.mrf.mxu0  ;;  %v2114_v42 = vld [vmem:[#allocation3 + $0x16a] sm:$0xff] }
 0x15d   : > { %5359 = vst [vmem:[#allocation17_spill] sm:$0xff] %v4875_v4  ;;  %v4877_v38 = vpop.f32.mrf.mxu1  ;;  %2324 = vmatmul.mubr.f32.gmra.mxu1 %v5361_v32  ;;  %v5369_v22 = vld [vmem:[#allocation27_spill] sm:$0xff] }
 0x15e   : > { %5360 = vst [vmem:[#allocation18_spill] sm:$0xff] %v4877_v38  ;;  %2328 = vmatprep.mubr.f32.mxu1 %v5362_v48  ;;  %v1034_v27 = vpop.f32.mrf.mxu0 }
 0x15f   : > { %v1619_v39 = vpop.f32.mrf.mxu1  ;;  %3575 = vmatmul.mubr.f32.gmra.mxu0 %v2111_v24  ;;  %v4882_v1 = vadd.f32 %v4754_v47, %v1034_v27  ;;  %v2115_v24 = vld [vmem:[#allocation3 + $0x172] sm:$0xff] }
 0x160   : > { %3577 = vmatprep.mubr.f32.mxu0 %v2112_v43  ;;  %v1036_v30 = vpop.f32.mrf.mxu0 }
 0x161   : > { %5363 = vst [vmem:[#allocation19_spill] sm:$0xff] %v4882_v1  ;;  %v4884_v45 = vpop.f32.mrf.mxu1  ;;  %2329 = vmatmul.mubr.f32.gmra.mxu1 %v5365_v44  ;;  %v2118_v30 = vld [vmem:[#allocation3 + $0x19a] sm:$0xff] }
 0x162   : > { %5364 = vst [vmem:[#allocation20_spill] sm:$0xff] %v4884_v45  ;;  %2333 = vmatprep.mubr.f32.mxu1 %v5366_v13  ;;  %v1039_v15 = vpop.f32.mrf.mxu0 }
 0x163   : > { %v1624_v57 = vpop.f32.mrf.mxu1  ;;  %3578 = vmatmul.mubr.f32.gmra.mxu0 %v2113_v31  ;;  %v4889_v32 = vadd.f32 %v4766_v53, %v1039_v15  ;;  %v5372_v53 = vld [vmem:[#allocation28_spill] sm:$0xff] }
 0x164   : > { %3580 = vmatprep.mubr.f32.mxu0 %v2114_v42  ;;  %v1041_v43 = vpop.f32.mrf.mxu0 }
 0x165   : > { %5367 = vst [vmem:[#allocation21_spill] sm:$0xff] %v4889_v32  ;;  %v4891_v47 = vpop.f32.mrf.mxu1  ;;  %2334 = vmatmul.mubr.f32.gmra.mxu1 %v5369_v22  ;;  %v5377_v43 = vld [vmem:[#allocation30_spill] sm:$0xff] }
 0x166   : > { %5368 = vst [vmem:[#allocation22_spill] sm:$0xff] %v4891_v47  ;;  %2338 = vmatprep.mubr.f32.mxu1 %v4497_v2 }
 0x167   : > { %v1629_v48 = vpop.f32.mrf.mxu1  ;;  %v1044_v39 = vpop.f32.mrf.mxu0  ;;  %3581 = vmatmul.mubr.f32.gmra.mxu0 %v2115_v24 }
 0x168   : > { %v4896_v27 = vadd.f32 %v4763_v50, %v1044_v39  ;;  %3583 = vmatprep.mubr.f32.mxu0 %v4761_v52  ;;  %v2119_v50 = vld [vmem:[#allocation3 + $0x1a2] sm:$0xff] }
 0x169   : > { %v4899_v31 = vpop.f32.mrf.mxu1  ;;  %2339 = vmatmul.mubr.f32.gmra.mxu1 %v5372_v53  ;;  %v1046_v44 = vpop.f32.mrf.mxu0 }
 0x16a   : > { %5370 = vst [vmem:[#allocation23_spill] sm:$0xff] %v4896_v27  ;;  %5371 = vst [vmem:[#allocation24_spill] sm:$0xff] %v4899_v31  ;;  %2343 = vmatprep.mubr.f32.mxu1 %v4513_v7 }
 0x16b   : > { %v1634_v42 = vpop.f32.mrf.mxu1  ;;  %v1049_v13 = vpop.f32.mrf.mxu0  ;;  %3584 = vmatmul.mubr.f32.gmra.mxu0 %v4769_v58  ;;  %v5376_v58 = vld [vmem:[#allocation29_spill] sm:$0xff] }
 0x16c   : > { %v4905_v2 = vadd.f32 %v4778_v59, %v1049_v13  ;;  %3586 = vmatprep.mubr.f32.mxu0 %v2118_v30 }
 0x16d   : > { %v4907_v57 = vpop.f32.mrf.mxu1  ;;  %2344 = vmatmul.mubr.f32.gmra.mxu1 %v4522_v16  ;;  %v1051_v52 = vpop.f32.mrf.mxu0 }
 0x16e   : > { %5373 = vst [vmem:[#allocation25_spill] sm:$0xff] %v4905_v2  ;;  %5374 = vst [vmem:[#allocation27_spill] sm:$0xff] %v4907_v57  ;;  %2348 = vmatprep.mubr.f32.mxu1 %v4528_v11  ;;  %v5379_v11 = vld [vmem:[#allocation31_spill] sm:$0xff] }
 0x16f   : > { %v1639_v15 = vpop.f32.mrf.mxu1  ;;  %v1054_v24 = vpop.f32.mrf.mxu0  ;;  %3587 = vmatmul.mubr.f32.gmra.mxu0 %v2119_v50  ;;  %v5381_v50 = vld [vmem:[#allocation32_spill] sm:$0xff] }
 0x170   : > { %v4912_v7 = vadd.f32 %v4774_v55, %v1054_v24 }
 0x171   : > { %v4914_v22 = vpop.f32.mrf.mxu1  ;;  %2349 = vmatmul.mubr.f32.gmra.mxu1 %v5376_v58  ;;  %v1056_v59 = vpop.f32.mrf.mxu0 }
 0x172   : > { %5375 = vst [vmem:[#allocation28_spill] sm:$0xff] %v4914_v22  ;;  %2353 = vmatprep.mubr.f32.mxu1 %v5377_v43 }
 0x173   : > { %v1644_v48 = vpop.f32.mrf.mxu1  ;;  %v1059_v39 = vpop.f32.mrf.mxu0 }
 0x174   : > { %v4919_v16 = vadd.f32 %v4789_v41, %v1059_v39 }
 0x175   : > { %v4921_v53 = vpop.f32.mrf.mxu1  ;;  %2354 = vmatmul.mubr.f32.gmra.mxu1 %v5379_v11  ;;  %v1061_v44 = vpop.f32.mrf.mxu0  ;;  %v5385_v11 = vld [vmem:[#allocation33_spill] sm:$0xff] }
 0x176   : > { %5378 = vst [vmem:[#allocation29_spill] sm:$0xff] %v4921_v53  ;;  %2358 = vmatprep.mubr.f32.mxu1 %v4557_v0  ;;  %v5386_v44 = vld [vmem:[#allocation34_spill] sm:$0xff] }
 0x177   : > { %v1649_v55 = vpop.f32.mrf.mxu1  ;;  %v4925_v30 = vpop.f32.mrf.mxu0 }
 0x179   : > { %v4927_v42 = vpop.f32.mrf.mxu1  ;;  %2359 = vmatmul.mubr.f32.gmra.mxu1 %v4569_v3  ;;  %v1066_v13 = vpop.f32.mrf.mxu0 }
 0x17a   : > { %5380 = vst [vmem:[#allocation30_spill] sm:$0xff] %v4927_v42  ;;  %2363 = vmatprep.mubr.f32.mxu1 %v5381_v50  ;;  %v2086_v13 = vld [vmem:[#allocation3 + $0x199] sm:$0xff] }
 0x17b   : > { %v1654_v52 = vpop.f32.mrf.mxu1  ;;  %v1069_v41 = vpop.f32.mrf.mxu0 }
 0x17c   : > { %v4932_v15 = vadd.f32 %v4800_v37, %v1069_v41  ;;  %v2087_v41 = vld [vmem:[#allocation3 + $0x1a1] sm:$0xff] }
 0x17d   : > { %v4934_v24 = vpop.f32.mrf.mxu1  ;;  %2364 = vmatmul.mubr.f32.gmra.mxu1 %v4584_v6  ;;  %v1071_v0 = vpop.f32.mrf.mxu0 }
 0x17e   : > { %5382 = vst [vmem:[#allocation31_spill] sm:$0xff] %v4934_v24  ;;  %2368 = vmatprep.mubr.f32.mxu1 %v4587_v20 }
 0x17f   : > { %v1659_v58 = vpop.f32.mrf.mxu1  ;;  %v4938_v59 = vpop.f32.mrf.mxu0 }
 0x180   : > { %v5389_v58 = vld [vmem:[#allocation26_spill] sm:$0xff] }
 0x181   : > { %v4940_v43 = vpop.f32.mrf.mxu1  ;;  %2369 = vmatmul.mubr.f32.gmra.mxu1 %v4600_v51  ;;  %v1076_v3 = vpop.f32.mrf.mxu0 }
 0x182   : > { %5383 = vst [vmem:[#allocation32_spill] sm:$0xff] %v4940_v43  ;;  %2373 = vmatprep.mubr.f32.mxu1 %v4686_v54 }
 0x183   : > { %v1664_v48 = vpop.f32.mrf.mxu1  ;;  %v4944_v37 = vpop.f32.mrf.mxu0 }
 0x185   : > { %v4946_v39 = vpop.f32.mrf.mxu1  ;;  %2374 = vmatmul.mubr.f32.gmra.mxu1 %v5385_v11  ;;  %v1081_v6 = vpop.f32.mrf.mxu0 }
 0x186   : > { %5384 = vst [vmem:[#allocation41_spill] sm:$0xff] %v4946_v39  ;;  %2378 = vmatprep.mubr.f32.mxu1 %v5386_v44 }
 0x187   : > { %v1669_v20 = vpop.f32.mrf.mxu1  ;;  %v4950_v55 = vpop.f32.mrf.mxu0 }
 0x189   : > { %v4952_v50 = vpop.f32.mrf.mxu1  ;;  %2379 = vmatmul.mubr.f32.gmra.mxu1 %v4710_v21  ;;  %v1086_v51 = vpop.f32.mrf.mxu0 }
 0x18a   : > { %5387 = vst [vmem:[#allocation33_spill] sm:$0xff] %v4952_v50  ;;  %2383 = vmatprep.mubr.f32.mxu1 %v2086_v13 }
 0x18b   : > { %v1674_v54 = vpop.f32.mrf.mxu1  ;;  %v4955_v52 = vpop.f32.mrf.mxu0 }
 0x18d   : > { %v4957_v0 = vpop.f32.mrf.mxu1  ;;  %2384 = vmatmul.mubr.f32.gmra.mxu1 %v5389_v58  ;;  %v1091_v3 = vpop.f32.mrf.mxu0 }
 0x18e   : > { %5388 = vst [vmem:[#allocation34_spill] sm:$0xff] %v4957_v0  ;;  %2388 = vmatprep.mubr.f32.mxu1 %v2087_v41 }
 0x18f   : > { %v1679_v48 = vpop.f32.mrf.mxu1  ;;  %v4960_v11 = vpop.f32.mrf.mxu0 }
 0x191   : > { %v4962_v6 = vpop.f32.mrf.mxu1  ;;  %2389 = vmatmul.mubr.f32.gmra.mxu1 %v5389_v58  ;;  %v1096_v21 = vpop.f32.mrf.mxu0 }
 0x193   : > { %v1684_v44 = vpop.f32.mrf.mxu1  ;;  %v4965_v20 = vpop.f32.mrf.mxu0 }
 0x195   : > { %v4967_v13 = vpop.f32.mrf.mxu1  ;;  %v1101_v51 = vpop.f32.mrf.mxu0 }
 0x197   : > { %v1689_v54 = vpop.f32.mrf.mxu1  ;;  %v4969_v2 = vpop.f32.mrf.mxu0 }
 0x199   : > { %v4971_v0 = vpop.f32.mrf.mxu1  ;;  %v1106_v41 = vpop.f32.mrf.mxu0 }
 0x19b   : > { %v1694_v3 = vpop.f32.mrf.mxu1  ;;  %v4973_v48 = vpop.f32.mrf.mxu0 }
 0x19d   : > { %v4975_v32 = vpop.f32.mrf.mxu1  ;;  %v1111_v39 = vpop.f32.mrf.mxu0 }
 0x19f   : > { %v1699_v58 = vpop.f32.mrf.mxu1  ;;  %v4977_v21 = vpop.f32.mrf.mxu0 }
 0x1a1   : > { %v4979_v44 = vpop.f32.mrf.mxu1  ;;  %v1116_v27 = vpop.f32.mrf.mxu0 }
 0x1a3   : > { %v1704_v50 = vpop.f32.mrf.mxu1  ;;  %v4981_v51 = vpop.f32.mrf.mxu0 }
 0x1a5   : > { %v4983_v54 = vpop.f32.mrf.mxu1  ;;  %v1121_v4 = vpop.f32.mrf.mxu0 }
 0x1a7   : > { %v1709_v24 = vpop.f32.mrf.mxu1  ;;  %v4985_v41 = vpop.f32.mrf.mxu0 }
 0x1a9   : > { %v4987_v3 = vpop.f32.mrf.mxu1  ;;  %v1126_v1 = vpop.f32.mrf.mxu0 }
 0x1ab   : > { %v1714_v43 = vpop.f32.mrf.mxu1  ;;  %v4989_v39 = vpop.f32.mrf.mxu0 }
 0x1ad   : > { %v4991_v58 = vpop.f32.mrf.mxu1  ;;  %v1131_v17 = vpop.f32.mrf.mxu0 }
 0x1af   : > { %v1719_v53 = vpop.f32.mrf.mxu1  ;;  %v4993_v27 = vpop.f32.mrf.mxu0 }
 0x1b1   : > { %v4995_v50 = vpop.f32.mrf.mxu1  ;;  %v1136_v46 = vpop.f32.mrf.mxu0 }
 0x1b3   : > { %v1724_v42 = vpop.f32.mrf.mxu1  ;;  %v4997_v4 = vpop.f32.mrf.mxu0 }
 0x1b5   : > { %v4999_v24 = vpop.f32.mrf.mxu1  ;;  %v5001_v26 = vpop.f32.mrf.mxu0 }
 0x1b7   : > { %v1729_v1 = vpop.f32.mrf.mxu1  ;;  %v5003_v43 = vpop.f32.mrf.mxu0 }
 0x1b8   : > { %5390 = vst [vmem:[#allocation26_spill] sm:$0xff] %v5003_v43 }
 0x1b9   : > { %v5005_v57 = vpop.f32.mrf.mxu1  ;;  %v5007_v33 = vpop.f32.mrf.mxu0 }
 0x1ba   : > { %5391 = vst [vmem:[#allocation42_spill] sm:$0xff] %v5007_v33 }
 0x1bb   : > { %v1734_v17 = vpop.f32.mrf.mxu1  ;;  %v5009_v53 = vpop.f32.mrf.mxu0 }
 0x1bc   : > { %5392 = vst [vmem:[#allocation43_spill] sm:$0xff] %v5009_v53 }
 0x1bd   : > { %v5011_v22 = vpop.f32.mrf.mxu1  ;;  %v5013_v46 = vpop.f32.mrf.mxu0 }
 0x1be   : > { %5393 = vst [vmem:[#allocation44_spill] sm:$0xff] %v5013_v46 }
 0x1bf   : > { %v1739_v42 = vpop.f32.mrf.mxu1  ;;  %v5015_v9 = vpop.f32.mrf.mxu0 }
 0x1c0   : > { %5394 = vst [vmem:[#allocation45_spill] sm:$0xff] %v5015_v9 }
 0x1c1   : > { %v5017_v47 = vpop.f32.mrf.mxu1  ;;  %v5019_v34 = vpop.f32.mrf.mxu0 }
 0x1c2   : > { %5395 = vst [vmem:[#allocation46_spill] sm:$0xff] %v5019_v34 }
 0x1c3   : > { %v1744_v1 = vpop.f32.mrf.mxu1  ;;  %v5021_v31 = vpop.f32.mrf.mxu0 }
 0x1c4   : > { %5396 = vst [vmem:[#allocation47_spill] sm:$0xff] %v5021_v31  ;;  %v5042_v1 = vld [vmem:[%s5297_s2] ss:$0 sm:$0xff] }
 0x1c5   : > { %v5023_v63 = vpop.f32.mrf.mxu1  ;;  %v5025_v25 = vpop.f32.mrf.mxu0 }
 0x1c6   : > { %5397 = vst [vmem:[#allocation48_spill] sm:$0xff] %v5025_v25 }
 0x1c7   : > { %v1749_v17 = vpop.f32.mrf.mxu1  ;;  %v5027_v53 = vpop.f32.mrf.mxu0 }
 0x1c8   : > { %5398 = vst [vmem:[#allocation49_spill] sm:$0xff] %v5027_v53  ;;  %v1378_v53 = vadd.f32 %v5042_v1, %v4912_v7 }
 0x1c9   : > { %v5029_v33 = vpop.f32.mrf.mxu1  ;;  %v5031_v46 = vpop.f32.mrf.mxu0 }
 0x1ca   : > { %5399 = vst [vmem:[#allocation50_spill] sm:$0xff] %v5031_v46  ;;  %v1290_v46 = vadd.f32 %v4785_v23, %v4925_v30  ;;  %v1379_v30 = vadd.f32 %v5042_v1, %v4919_v16  ;;  %v1305_v16 = vadd.f32 %v4811_v36, %v4944_v37  ;;  %v1315_v37 = vadd.f32 %v4821_v35, %v4955_v52 }
 0x1cb   : > { %v1754_v42 = vpop.f32.mrf.mxu1  ;;  %v5033_v9 = vpop.f32.mrf.mxu0  ;;  %v1325_v52 = vadd.f32 %v4830_v29, %v4965_v20  ;;  %v1335_v20 = vadd.f32 %v4839_v62, %v4973_v48  ;;  %v1345_v48 = vadd.f32 %v4848_v10, %v4981_v51  ;;  %v1355_v51 = vadd.f32 %v4857_v60, %v4989_v39 }
 0x1cc   : > { %5400 = vst [vmem:[#allocation51_spill] sm:$0xff] %v5033_v9  ;;  %v1380_v19 = vadd.f32 %v5042_v1, %v1290_v46  ;;  %v1310_v46 = vadd.f32 %v4807_v61, %v4950_v55  ;;  %v1320_v55 = vadd.f32 %v4818_v18, %v4960_v11  ;;  %v1383_v36 = vadd.f32 %v5042_v1, %v1305_v16 }
 0x1cd   : > { %v5035_v38 = vpop.f32.mrf.mxu1  ;;  %v5037_v34 = vpop.f32.mrf.mxu0  ;;  %v1330_v11 = vadd.f32 %v4827_v28, %v4969_v2  ;;  %v1385_v35 = vadd.f32 %v5042_v1, %v1315_v37  ;;  %v1340_v2 = vadd.f32 %v4836_v5, %v4977_v21  ;;  %v1387_v29 = vadd.f32 %v5042_v1, %v1325_v52 }
 0x1ce   : > { %5401 = vst [vmem:[#allocation52_spill] sm:$0xff] %v5035_v38  ;;  %5402 = vst [vmem:[#allocation53_spill] sm:$0xff] %v5037_v34  ;;  %v1384_v61 = vadd.f32 %v5042_v1, %v1310_v46  ;;  %v1386_v18 = vadd.f32 %v5042_v1, %v1320_v55  ;;  %v1350_v21 = vadd.f32 %v4845_v14, %v4985_v41 }
 0x1cf   : > { %v1759_v25 = vpop.f32.mrf.mxu1  ;;  %v3484_v17 = vpop.f32.mrf.mxu0  ;;  %v1388_v28 = vadd.f32 %v5042_v1, %v1330_v11  ;;  %v1390_v5 = vadd.f32 %v5042_v1, %v1340_v2  ;;  %v1389_v62 = vadd.f32 %v5042_v1, %v1335_v20  ;;  %v1360_v41 = vadd.f32 %v4854_v8, %v4993_v27 }
 0x1d0   : > { %v1908_v42 = vadd.f32 %v3484_v17, %v4962_v6  ;;  %v1300_v25 = vadd.f32 %v4796_v49, %v4938_v59  ;;  %v1392_v14 = vadd.f32 %v5042_v1, %v1350_v21  ;;  %v1391_v10 = vadd.f32 %v5042_v1, %v1345_v48  ;;  %v5407_v21 = vld [vmem:[#allocation18_spill] sm:$0xff] }
 0x1d1   : > { %v5049_v9 = vpop.f32.mrf.mxu1  ;;  %v5051_v31 = vpop.f32.mrf.mxu0  ;;  %v1394_v8 = vadd.f32 %v5042_v1, %v1360_v41  ;;  %v1838_v27 = vadd.f32 %v4997_v4, %v4870_v40  ;;  %v1393_v39 = vadd.f32 %v5042_v1, %v1355_v51  ;;  %v5404_v40 = vld [vmem:[#allocation35_spill] sm:$0xff] }
 0x1d2   : > { %v5053_v34 = vadd.f32 %v1908_v42, %v1378_v53  ;;  %v1382_v42 = vadd.f32 %v5042_v1, %v1300_v25  ;;  %v1363_v4 = vadd.f32 %v5042_v1, %v5404_v40 }
 0x1d3   : > { %v1764_v43 = vpop.f32.mrf.mxu1  ;;  %v3487_v45 = vpop.f32.mrf.mxu0 }
 0x1d4   : > { %v1918_v7 = vadd.f32 %v3487_v45, %v4971_v0 }
 0x1d5   : > { %v5059_v38 = vpop.f32.mrf.mxu1  ;;  %v1912_v23 = vpop.f32.mrf.mxu0 }
 0x1d6   : > { %v5063_v6 = vadd.f32 %v1918_v7, %v1380_v19  ;;  %v1913_v53 = vadd.f32 %v1912_v23, %v4967_v13  ;;  %v1381_v19 = vadd.f32 %v5042_v1, %v4932_v15 }
 0x1d7   : > { %v2237_v17 = vpop.f32.mrf.mxu1  ;;  %v3490_v43 = vpop.f32.mrf.mxu0 }
 0x1d8   : > { %v5069_v49 = vadd.f32 %v1913_v53, %v1379_v30  ;;  %v1928_v45 = vadd.f32 %v3490_v43, %v4979_v44 }
 0x1d9   : > { %v5072_v59 = vpop.f32.mrf.mxu1  ;;  %v1922_v0 = vpop.f32.mrf.mxu0 }
 0x1da   : > { %v5078_v13 = vadd.f32 %v1928_v45, %v1382_v42  ;;  %v1923_v25 = vadd.f32 %v1922_v0, %v4975_v32 }
 0x1db   : > { %v2242_v7 = vpop.f32.mrf.mxu1  ;;  %v3493_v23 = vpop.f32.mrf.mxu0 }
 0x1dc   : > { %v5084_v44 = vadd.f32 %v1923_v25, %v1381_v19  ;;  %v1938_v30 = vadd.f32 %v3493_v23, %v4987_v3 }
 0x1dd   : > { %v5087_v53 = vpop.f32.mrf.mxu1  ;;  %v1932_v15 = vpop.f32.mrf.mxu0 }
 0x1de   : > { %v5092_v32 = vadd.f32 %v1938_v30, %v1384_v61  ;;  %v1933_v17 = vadd.f32 %v1932_v15, %v4983_v54 }
 0x1df   : > { %v2247_v43 = vpop.f32.mrf.mxu1  ;;  %v3496_v42 = vpop.f32.mrf.mxu0 }
 0x1e0   : > { %v5098_v3 = vadd.f32 %v1933_v17, %v1383_v36  ;;  %v1948_v46 = vadd.f32 %v3496_v42, %v4995_v50 }
 0x1e1   : > { %v5101_v45 = vpop.f32.mrf.mxu1  ;;  %v1942_v0 = vpop.f32.mrf.mxu0 }
 0x1e2   : > { %v5106_v54 = vadd.f32 %v1948_v46, %v1386_v18  ;;  %v1943_v19 = vadd.f32 %v1942_v0, %v4991_v58 }
 0x1e3   : > { %v2252_v16 = vpop.f32.mrf.mxu1  ;;  %v3499_v25 = vpop.f32.mrf.mxu0 }
 0x1e4   : > { %v5112_v50 = vadd.f32 %v1943_v19, %v1385_v35  ;;  %v1958_v7 = vadd.f32 %v3499_v25, %v5005_v57  ;;  %v1364_v25 = vadd.f32 %v5042_v1, %v4793_v56  ;;  %v5406_v56 = vld [vmem:[#allocation26_spill] sm:$0xff] }
 0x1e5   : > { %v5115_v23 = vpop.f32.mrf.mxu1  ;;  %v1952_v61 = vpop.f32.mrf.mxu0 }
 0x1e6   : > { %v5120_v58 = vadd.f32 %v1958_v7, %v1388_v28  ;;  %v1953_v55 = vadd.f32 %v1952_v61, %v4999_v24  ;;  %v5403_v7 = vld [vmem:[#allocation52_spill] sm:$0xff]  ;;  %v1992_v20 = vadd.f32 %v1838_v27, %v1364_v25  ;;  %v5413_v27 = vld [vmem:[#allocation39_spill] sm:$0xff] }
 0x1e7   : > { %v2257_v30 = vpop.f32.mrf.mxu1  ;;  %v3502_v15 = vpop.f32.mrf.mxu0 }
 0x1e8   : > { %v5126_v57 = vadd.f32 %v1953_v55, %v1387_v29  ;;  %v1968_v36 = vadd.f32 %v3502_v15, %v5017_v47  ;;  %v5405_v55 = vld [vmem:[#allocation20_spill] sm:$0xff] }
 0x1e9   : > { %v5129_v37 = vpop.f32.mrf.mxu1  ;;  %v1962_v17 = vpop.f32.mrf.mxu0  ;;  %v1848_v30 = vadd.f32 %v5406_v56, %v5405_v55  ;;  %v5417_v56 = vld [vmem:[#allocation28_spill] sm:$0xff] }
 0x1ea   : > { %v5134_v24 = vadd.f32 %v1968_v36, %v1390_v5  ;;  %v1963_v43 = vadd.f32 %v1962_v17, %v5011_v22  ;;  %v5408_v36 = vld [vmem:[#allocation42_spill] sm:$0xff] }
 0x1eb   : > { %v2262_v42 = vpop.f32.mrf.mxu1  ;;  %v3505_v18 = vpop.f32.mrf.mxu0 }
 0x1ec   : > { %v5140_v47 = vadd.f32 %v1963_v43, %v1389_v62  ;;  %v1978_v11 = vadd.f32 %v3505_v18, %v5029_v33  ;;  %v5409_v62 = vld [vmem:[#allocation37_spill] sm:$0xff] }
 0x1ed   : > { %v5143_v46 = vpop.f32.mrf.mxu1  ;;  %v1972_v0 = vpop.f32.mrf.mxu0  ;;  %v1366_v48 = vadd.f32 %v5042_v1, %v5409_v62 }
 0x1ee   : > { %v5148_v22 = vadd.f32 %v1978_v11, %v1392_v14  ;;  %v1973_v35 = vadd.f32 %v1972_v0, %v5023_v63  ;;  %v1833_v63 = vadd.f32 %v5001_v26, %v4863_v12  ;;  %v1843_v26 = vadd.f32 %v5408_v36, %v5407_v21  ;;  %v5410_v14 = vld [vmem:[#allocation36_spill] sm:$0xff]  ;;  %v5412_v0 = vld [vmem:[#allocation43_spill] sm:$0xff] }
 0x1ef   : > { %v2267_v52 = vpop.f32.mrf.mxu1  ;;  %v3508_v19 = vpop.f32.mrf.mxu0  ;;  %v1365_v41 = vadd.f32 %v5042_v1, %v5410_v14  ;;  %v5411_v11 = vld [vmem:[#allocation24_spill] sm:$0xff]  ;;  %v5420_v14 = vld [vmem:[#allocation27_spill] sm:$0xff] }
 0x1f0   : > { %v5154_v33 = vadd.f32 %v1973_v35, %v1391_v10  ;;  %v1988_v16 = vadd.f32 %v3508_v19, %v5049_v9  ;;  %v1991_v43 = vadd.f32 %v1833_v63, %v1363_v4  ;;  %v1858_v10 = vadd.f32 %v5412_v0, %v5411_v11 }
 0x1f1   : > { %v5159_v28 = vpop.f32.mrf.mxu1  ;;  %v1982_v60 = vpop.f32.mrf.mxu0  ;;  %v1994_v35 = vadd.f32 %v1848_v30, %v1366_v48  ;;  %v1993_v25 = vadd.f32 %v1843_v26, %v1365_v41  ;;  %v5418_v30 = vld [vmem:[#allocation45_spill] sm:$0xff]  ;;  %v3617_v26 = vld [vmem:[#allocation3 + $0x19] sm:$0xff]  ;;  %v5421_v41 = vld [vmem:[#allocation46_spill] sm:$0xff] }
 0x1f2   : > { %v5164_v2 = vadd.f32 %v1988_v16, %v1394_v8  ;;  %v1983_v61 = vadd.f32 %v1982_v60, %v5403_v7  ;;  %v1368_v16 = vadd.f32 %v5042_v1, %v5413_v27  ;;  %v5414_v60 = vld [vmem:[#allocation22_spill] sm:$0xff]  ;;  %v1863_v11 = vadd.f32 %v5421_v41, %v5420_v14 }
 0x1f3   : > { %v2272_v29 = vpop.f32.mrf.mxu1  ;;  %v3543_v9 = vpop.f32.mrf.mxu0 }
 0x1f4   : > { %v5171_v15 = vadd.f32 %v1983_v61, %v1393_v39  ;;  %v2466_v5 = vadd.f32 %v3543_v9, %v5072_v59  ;;  %v3616_v61 = vld [vmem:[#allocation3 + $0x21] sm:$0xff] }
 0x1f5   : > { %v5176_v12 = vpop.f32.mrf.mxu1  ;;  %v2460_v17 = vpop.f32.mrf.mxu0 }
 0x1f6   : > { %v2620_v42 = vadd.f32 %v2466_v5, %v1992_v20  ;;  %v2461_v18 = vadd.f32 %v2460_v17, %v5059_v38  ;;  %v5415_v38 = vld [vmem:[#allocation44_spill] sm:$0xff]  ;;  %v5416_v20 = vld [vmem:[#allocation38_spill] sm:$0xff]  ;;  %v1868_v5 = vadd.f32 %v5418_v30, %v5417_v56 }
 0x1f7   : > { %v2277_v59 = vpop.f32.mrf.mxu1  ;;  %v3546_v51 = vpop.f32.mrf.mxu0  ;;  %v1853_v39 = vadd.f32 %v5415_v38, %v5414_v60  ;;  %v1367_v55 = vadd.f32 %v5042_v1, %v5416_v20 }
 0x1f8   : > { %v2652_v52 = vmax.f32 %v2620_v42, 0.0  ;;  %v2619_v19 = vadd.f32 %v2461_v18, %v1991_v43  ;;  %v2476_v8 = vadd.f32 %v3546_v51, %v5101_v45  ;;  %v1996_v45 = vadd.f32 %v1858_v10, %v1368_v16  ;;  %v5419_v42 = vld [vmem:[#allocation14_spill] sm:$0xff]  ;;  %v3618_v59 = vld [vmem:[#allocation3 + $0x39] sm:$0xff] }
 0x1f9   : > { %v2280_v63 = vpop.f32.mrf.mxu1  ;;  %v2470_v7 = vpop.f32.mrf.mxu0  ;;  %v1995_v18 = vadd.f32 %v1853_v39, %v1367_v55  ;;  %v5423_v16 = vld [vmem:[#allocation30_spill] sm:$0xff]  ;;  %v5426_v55 = vld [vmem:[#allocation29_spill] sm:$0xff] }
 0x1fa   : > { %v2684_v40 = vadd.f32 %v3616_v61, %v2652_v52  ;;  %v2651_v4 = vmax.f32 %v2619_v19, 0.0  ;;  %v2622_v29 = vadd.f32 %v2476_v8, %v1994_v35  ;;  %v2471_v9 = vadd.f32 %v2470_v7, %v5087_v53  ;;  %v5422_v8 = vld [vmem:[#allocation40_spill] sm:$0xff]  ;;  %v3619_v7 = vld [vmem:[#allocation3 + $0x31] sm:$0xff] }
 0x1fb   : > { %v2282_v21 = vpop.f32.mrf.mxu1  ;;  %v3549_v36 = vpop.f32.mrf.mxu0  ;;  %v1370_v53 = vadd.f32 %v5042_v1, %v5419_v42  ;;  %v5429_v42 = vld [vmem:[#allocation32_spill] sm:$0xff] }
 0x1fc   : > { %2716 = vst [vmem:[%s3760_s24 + $0x8] sm:$0xff] %v2684_v40  ;;  %v2683_v17 = vadd.f32 %v3617_v26, %v2651_v4  ;;  %v2654_v62 = vmax.f32 %v2622_v29, 0.0  ;;  %v2621_v48 = vadd.f32 %v2471_v9, %v1993_v25  ;;  %v2486_v43 = vadd.f32 %v3549_v36, %v5129_v37  ;;  %v5424_v25 = vld [vmem:[#allocation47_spill] sm:$0xff]  ;;  %v5425_v9 = vld [vmem:[#allocation16_spill] sm:$0xff] }
 0x1fd   : > { %v5201_v0 = vpop.f32.mrf.mxu1  ;;  %v2480_v10 = vpop.f32.mrf.mxu0  ;;  %v1369_v37 = vadd.f32 %v5042_v1, %v5422_v8  ;;  %v1998_v27 = vadd.f32 %v1868_v5, %v1370_v53  ;;  %v1878_v60 = vadd.f32 %v5424_v25, %v5423_v16  ;;  %v3620_v21 = vld [vmem:[#allocation3 + $0x51] sm:$0xff]  ;;  %v5430_v53 = vld [vmem:[#allocation49_spill] sm:$0xff] }
 0x1fe   : > { %2715 = vst [vmem:[%s3760_s24] sm:$0xff] %v2683_v17  ;;  %v2686_v51 = vadd.f32 %v3618_v59, %v2654_v62  ;;  %v2653_v35 = vmax.f32 %v2621_v48, 0.0  ;;  %v2624_v52 = vadd.f32 %v2486_v43, %v1996_v45  ;;  %v2481_v19 = vadd.f32 %v2480_v10, %v5115_v23  ;;  %v5427_v45 = vld [vmem:[#allocation48_spill] sm:$0xff]  ;;  %v5428_v48 = vld [vmem:[#allocation15_spill] sm:$0xff] }
 0x1ff   : > { %v2287_v38 = vpop.f32.mrf.mxu1  ;;  %v3552_v39 = vpop.f32.mrf.mxu0  ;;  %v1372_v23 = vadd.f32 %v5042_v1, %v5425_v9  ;;  %v1997_v20 = vadd.f32 %v1863_v11, %v1369_v37  ;;  %v1873_v56 = vadd.f32 %v5427_v45, %v5426_v55  ;;  %v3621_v11 = vld [vmem:[#allocation3 + $0x49] sm:$0xff]  ;;  %v5432_v8 = vld [vmem:[#allocation31_spill] sm:$0xff]  ;;  %v3623_v45 = vld [vmem:[#allocation3 + $0x61] sm:$0xff] }
 0x200   : > { %2718 = vst [vmem:[%s3760_s24 + $0x18] sm:$0xff] %v2686_v51  ;;  %v2685_v61 = vadd.f32 %v3619_v7, %v2653_v35  ;;  %v2656_v40 = vmax.f32 %v2624_v52, 0.0  ;;  %v2623_v4 = vadd.f32 %v2481_v19, %v1995_v18  ;;  %v2496_v29 = vadd.f32 %v3552_v39, %v5159_v28  ;;  %v5431_v52 = vld [vmem:[#allocation19_spill] sm:$0xff]  ;;  %v5433_v37 = vld [vmem:[#allocation50_spill] sm:$0xff] }
 0x201   : > { %v2290_v30 = vpop.f32.mrf.mxu1  ;;  %v2490_v5 = vpop.f32.mrf.mxu0  ;;  %v1371_v28 = vadd.f32 %v5042_v1, %v5428_v48  ;;  %v2000_v43 = vadd.f32 %v1878_v60, %v1372_v23  ;;  %v1888_v18 = vadd.f32 %v5430_v53, %v5429_v42  ;;  %v1374_v19 = vadd.f32 %v5042_v1, %v5431_v52  ;;  %v3622_v60 = vld [vmem:[#allocation3 + $0x69] sm:$0xff]  ;;  %v5436_v9 = vld [vmem:[#allocation51_spill] sm:$0xff]  ;;  %v3624_v53 = vld [vmem:[#allocation3 + $0x81] sm:$0xff] }
 0x202   : > { %2717 = vst [vmem:[%s3760_s24 + $0x10] sm:$0xff] %v2685_v61  ;;  %v2688_v36 = vadd.f32 %v3620_v21, %v2656_v40  ;;  %v2655_v26 = vmax.f32 %v2623_v4, 0.0  ;;  %v2626_v17 = vadd.f32 %v2496_v29, %v1998_v27  ;;  %v2491_v62 = vadd.f32 %v2490_v5, %v5143_v46  ;;  %v5434_v40 = vld [vmem:[#allocation17_spill] sm:$0xff]  ;;  %v3625_v52 = vld [vmem:[#allocation3 + $0x79] sm:$0xff] }
 0x203   : > { %v2292_v14 = vpop.f32.mrf.mxu1  ;;  %v3555_v41 = vpop.f32.mrf.mxu0  ;;  %v1999_v46 = vadd.f32 %v1873_v56, %v1371_v28  ;;  %v1883_v27 = vadd.f32 %v5433_v37, %v5432_v8  ;;  %v2002_v4 = vadd.f32 %v1888_v18, %v1374_v19  ;;  %v5435_v29 = vld [vmem:[#allocation33_spill] sm:$0xff] }
 0x204   : > { %2720 = vst [vmem:[%s3760_s24 + $0x28] sm:$0xff] %v2688_v36  ;;  %v2687_v10 = vadd.f32 %v3621_v11, %v2655_v26  ;;  %v2658_v59 = vmax.f32 %v2626_v17, 0.0  ;;  %v2625_v51 = vadd.f32 %v2491_v62, %v1997_v20  ;;  %v2506_v35 = vadd.f32 %v3555_v41, %v2280_v63  ;;  %v5437_v26 = vld [vmem:[#allocation23_spill] sm:$0xff]  ;;  %v5438_v62 = vld [vmem:[#allocation41_spill] sm:$0xff] }
 0x205   : > { %v2295_v16 = vpop.f32.mrf.mxu1  ;;  %v2500_v25 = vpop.f32.mrf.mxu0  ;;  %v1373_v63 = vadd.f32 %v5042_v1, %v5434_v40  ;;  %v1898_v23 = vadd.f32 %v5436_v9, %v5435_v29  ;;  %v5439_v48 = vld [vmem:[#allocation53_spill] sm:$0xff] }
 0x206   : > { %2719 = vst [vmem:[%s3760_s24 + $0x20] sm:$0xff] %v2687_v10  ;;  %v2690_v38 = vadd.f32 %v3622_v60, %v2658_v59  ;;  %v2657_v39 = vmax.f32 %v2625_v51, 0.0  ;;  %v2628_v7 = vadd.f32 %v2506_v35, %v2000_v43  ;;  %v2501_v61 = vadd.f32 %v2500_v25, %v5176_v12  ;;  %v5440_v10 = vld [vmem:[#allocation21_spill] sm:$0xff]  ;;  %v5441_v25 = vld [vmem:[#allocation34_spill] sm:$0xff] }
 0x207   : > { %v2297_v20 = vpop.f32.mrf.mxu1  ;;  %v3558_v55 = vpop.f32.mrf.mxu0  ;;  %v1376_v12 = vadd.f32 %v5042_v1, %v5437_v26  ;;  %v2001_v17 = vadd.f32 %v1883_v27, %v1373_v63  ;;  %v1893_v28 = vadd.f32 %v5439_v48, %v5438_v62  ;;  %v1903_v60 = vadd.f32 %v5051_v31, %v5441_v25  ;;  %v3629_v48 = vld [vmem:[#allocation3 + $0xa9] sm:$0xff]  ;;  %v3632_v25 = vld [vmem:[#allocation3 + $0xd9] sm:$0xff] }
 0x208   : > { %2722 = vst [vmem:[%s3760_s24 + $0x38] sm:$0xff] %v2690_v38  ;;  %v2689_v56 = vadd.f32 %v3623_v45, %v2657_v39  ;;  %v2660_v5 = vmax.f32 %v2628_v7, 0.0  ;;  %v2627_v21 = vadd.f32 %v2501_v61, %v1999_v46  ;;  %v2516_v36 = vadd.f32 %v3558_v55, %v2290_v30  ;;  %v3627_v20 = vld [vmem:[#allocation3 + $0x91] sm:$0xff] }
 0x209   : > { %v2300_v43 = vpop.f32.mrf.mxu1  ;;  %v2510_v42 = vpop.f32.mrf.mxu0  ;;  %v1375_v30 = vadd.f32 %v5042_v1, %v5440_v10  ;;  %v2004_v59 = vadd.f32 %v1898_v23, %v1376_v12 }
 0x20a   : > { %2721 = vst [vmem:[%s3760_s24 + $0x30] sm:$0xff] %v2689_v56  ;;  %v2692_v18 = vadd.f32 %v3624_v53, %v2660_v5  ;;  %v2659_v14 = vmax.f32 %v2627_v21, 0.0  ;;  %v2630_v41 = vadd.f32 %v2516_v36, %v2002_v4  ;;  %v2511_v11 = vadd.f32 %v2510_v42, %v5201_v0  ;;  %v3626_v0 = vld [vmem:[#allocation3 + $0x99] sm:$0xff]  ;;  %v5442_v4 = vld [vmem:[#allocation25_spill] sm:$0xff]  ;;  %v3628_v36 = vld [vmem:[#allocation3 + $0xb1] sm:$0xff] }
 0x20b   : > { %v2302_v51 = vpop.f32.mrf.mxu1  ;;  %v3561_v35 = vpop.f32.mrf.mxu0  ;;  %v2003_v27 = vadd.f32 %v1893_v28, %v1375_v30  ;;  %v1377_v29 = vadd.f32 %v5042_v1, %v5442_v4 }
 0x20c   : > { %2724 = vst [vmem:[%s3760_s24 + $0x48] sm:$0xff] %v2692_v18  ;;  %v2691_v19 = vadd.f32 %v3625_v52, %v2659_v14  ;;  %v2662_v46 = vmax.f32 %v2630_v41, 0.0  ;;  %v2629_v8 = vadd.f32 %v2511_v11, %v2001_v17  ;;  %v2526_v37 = vadd.f32 %v3561_v35, %v2300_v43  ;;  %v3631_v35 = vld [vmem:[#allocation3 + $0xc1] sm:$0xff] }
 0x20d   : > { %v2305_v38 = vpop.f32.mrf.mxu1  ;;  %v2520_v39 = vpop.f32.mrf.mxu0  ;;  %v2005_v56 = vadd.f32 %v1903_v60, %v1377_v29 }
 0x20e   : > { %2723 = vst [vmem:[%s3760_s24 + $0x40] sm:$0xff] %v2691_v19  ;;  %v2694_v7 = vadd.f32 %v3626_v0, %v2662_v46  ;;  %v2661_v61 = vmax.f32 %v2629_v8, 0.0  ;;  %v2632_v40 = vadd.f32 %v2526_v37, %v2004_v59  ;;  %v2521_v63 = vadd.f32 %v2520_v39, %v2295_v16  ;;  %v3630_v59 = vld [vmem:[#allocation3 + $0xc9] sm:$0xff] }
 0x20f   : > { %v2307_v9 = vpop.f32.mrf.mxu1  ;;  %v3564_v23 = vpop.f32.mrf.mxu0 }
 0x210   : > { %2726 = vst [vmem:[%s3760_s24 + $0x58] sm:$0xff] %v2694_v7  ;;  %v2693_v55 = vadd.f32 %v3627_v20, %v2661_v61  ;;  %v2664_v45 = vmax.f32 %v2632_v40, 0.0  ;;  %v2631_v31 = vadd.f32 %v2521_v63, %v2003_v27 }
 0x211   : > { %v2310_v5 = vpop.f32.mrf.mxu1  ;;  %v2530_v21 = vpop.f32.mrf.mxu0 }
 0x212   : > { %2725 = vst [vmem:[%s3760_s24 + $0x50] sm:$0xff] %v2693_v55  ;;  %v2696_v26 = vadd.f32 %v3628_v36, %v2664_v45  ;;  %v2663_v12 = vmax.f32 %v2631_v31, 0.0  ;;  %v2536_v16 = vadd.f32 %v3564_v23, %v2310_v5  ;;  %v2531_v17 = vadd.f32 %v2530_v21, %v2305_v38  ;;  %v3634_v45 = vld [vmem:[#allocation3 + $0xf1] sm:$0xff] }
 0x213   : > { %v2312_v62 = vpop.f32.mrf.mxu1  ;;  %v3567_v1 = vpop.f32.mrf.mxu0 }
 0x214   : > { %2728 = vst [vmem:[%s3760_s24 + $0x68] sm:$0xff] %v2696_v26  ;;  %v2695_v28 = vadd.f32 %v3629_v48, %v2663_v12  ;;  %v2634_v43 = vadd.f32 %v2536_v16, %v5053_v34  ;;  %v2633_v42 = vadd.f32 %v2531_v17, %v2005_v56  ;;  %v3635_v12 = vld [vmem:[#allocation3 + $0xf9] sm:$0xff] }
 0x215   : > { %v2315_v53 = vpop.f32.mrf.mxu1  ;;  %v2540_v18 = vpop.f32.mrf.mxu0 }
 0x216   : > { %2727 = vst [vmem:[%s3760_s24 + $0x60] sm:$0xff] %v2695_v28  ;;  %v2666_v14 = vmax.f32 %v2634_v43, 0.0  ;;  %v2665_v41 = vmax.f32 %v2633_v42, 0.0  ;;  %v2541_v11 = vadd.f32 %v2540_v18, %v2315_v53  ;;  %v3636_v43 = vld [vmem:[#allocation3 + $0x109] sm:$0xff] }
 0x217   : > { %v2317_v10 = vpop.f32.mrf.mxu1  ;;  %v3570_v30 = vpop.f32.mrf.mxu0 }
 0x218   : > { %v2698_v51 = vadd.f32 %v3630_v59, %v2666_v14  ;;  %v2697_v52 = vadd.f32 %v3631_v35, %v2665_v41  ;;  %v2635_v19 = vadd.f32 %v2541_v11, %v5069_v49  ;;  %v3633_v49 = vld [vmem:[#allocation3 + $0xe1] sm:$0xff]  ;;  %v3637_v10 = vld [vmem:[#allocation3 + $0x111] sm:$0xff] }
 0x219   : > { %v2320_v46 = vpop.f32.mrf.mxu1  ;;  %v2550_v27 = vpop.f32.mrf.mxu0 }
 0x21a   : > { %2730 = vst [vmem:[%s3760_s24 + $0x78] sm:$0xff] %v2698_v51  ;;  %2729 = vst [vmem:[%s3760_s24 + $0x70] sm:$0xff] %v2697_v52  ;;  %v2667_v34 = vmax.f32 %v2635_v19, 0.0  ;;  %v2546_v8 = vadd.f32 %v3567_v1, %v2320_v46  ;;  %v3638_v46 = vld [vmem:[#allocation3 + $0x121] sm:$0xff] }
 0x21b   : > { %v2322_v37 = vpop.f32.mrf.mxu1  ;;  %v3573_v40 = vpop.f32.mrf.mxu0 }
 0x21c   : > { %v2699_v60 = vadd.f32 %v3632_v25, %v2667_v34  ;;  %v2636_v38 = vadd.f32 %v2546_v8, %v5063_v6 }
 0x21d   : > { %v2325_v39 = vpop.f32.mrf.mxu1  ;;  %v2560_v55 = vpop.f32.mrf.mxu0 }
 0x21e   : > { %2731 = vst [vmem:[%s3760_s24 + $0x80] sm:$0xff] %v2699_v60  ;;  %v2668_v0 = vmax.f32 %v2636_v38, 0.0  ;;  %v2551_v7 = vadd.f32 %v2550_v27, %v2325_v39  ;;  %v3639_v38 = vld [vmem:[#allocation3 + $0x129] sm:$0xff] }
 0x21f   : > { %v2327_v61 = vpop.f32.mrf.mxu1  ;;  %v3576_v26 = vpop.f32.mrf.mxu0 }
 0x220   : > { %v2700_v63 = vadd.f32 %v3633_v49, %v2668_v0  ;;  %v2637_v4 = vadd.f32 %v2551_v7, %v5084_v44 }
 0x221   : > { %v2330_v29 = vpop.f32.mrf.mxu1  ;;  %v2570_v28 = vpop.f32.mrf.mxu0 }
 0x222   : > { %2732 = vst [vmem:[%s3760_s24 + $0x88] sm:$0xff] %v2700_v63  ;;  %v2669_v9 = vmax.f32 %v2637_v4, 0.0  ;;  %v2556_v23 = vadd.f32 %v3570_v30, %v2330_v29  ;;  %v3640_v63 = vld [vmem:[#allocation3 + $0x139] sm:$0xff] }
 0x223   : > { %v2332_v20 = vpop.f32.mrf.mxu1  ;;  %v3579_v11 = vpop.f32.mrf.mxu0 }
 0x224   : > { %v2701_v6 = vadd.f32 %v3634_v45, %v2669_v9  ;;  %v2638_v31 = vadd.f32 %v2556_v23, %v5078_v13  ;;  %v3641_v45 = vld [vmem:[#allocation3 + $0x141] sm:$0xff] }
 0x225   : > { %v2335_v56 = vpop.f32.mrf.mxu1  ;;  %v2580_v19 = vpop.f32.mrf.mxu0 }
 0x226   : > { %2733 = vst [vmem:[%s3760_s24 + $0x90] sm:$0xff] %v2701_v6  ;;  %v2670_v5 = vmax.f32 %v2638_v31, 0.0  ;;  %v2561_v21 = vadd.f32 %v2560_v55, %v2335_v56 }
 0x227   : > { %v2337_v36 = vpop.f32.mrf.mxu1  ;;  %v3582_v60 = vpop.f32.mrf.mxu0 }
 0x228   : > { %v2702_v44 = vadd.f32 %v3635_v12, %v2670_v5  ;;  %v2639_v16 = vadd.f32 %v2561_v21, %v5098_v3 }
 0x229   : > { %v2340_v17 = vpop.f32.mrf.mxu1  ;;  %v2590_v49 = vpop.f32.mrf.mxu0 }
 0x22a   : > { %2734 = vst [vmem:[%s3760_s24 + $0x98] sm:$0xff] %v2702_v44  ;;  %v2671_v62 = vmax.f32 %v2639_v16, 0.0  ;;  %v2566_v1 = vadd.f32 %v3573_v40, %v2340_v17 }
 0x22b   : > { %v2342_v48 = vpop.f32.mrf.mxu1  ;;  %v3585_v55 = vpop.f32.mrf.mxu0 }
 0x22c   : > { %v2703_v13 = vadd.f32 %v3636_v43, %v2671_v62  ;;  %v2640_v42 = vadd.f32 %v2566_v1, %v5092_v32  ;;  %v3643_v48 = vld [vmem:[#allocation3 + $0x159] sm:$0xff] }
 0x22d   : > { %v2345_v53 = vpop.f32.mrf.mxu1  ;;  %v2600_v36 = vpop.f32.mrf.mxu0 }
 0x22e   : > { %2735 = vst [vmem:[%s3760_s24 + $0xa0] sm:$0xff] %v2703_v13  ;;  %v2672_v18 = vmax.f32 %v2640_v42, 0.0  ;;  %v2571_v14 = vadd.f32 %v2570_v28, %v2345_v53 }
 0x22f   : > { %v2347_v41 = vpop.f32.mrf.mxu1  ;;  %v3588_v1 = vpop.f32.mrf.mxu0 }
 0x230   : > { %v2704_v3 = vadd.f32 %v3637_v10, %v2672_v18  ;;  %v2641_v30 = vadd.f32 %v2571_v14, %v5112_v50  ;;  %v3644_v14 = vld [vmem:[#allocation3 + $0x169] sm:$0xff] }
 0x231   : > { %v2350_v59 = vpop.f32.mrf.mxu1  ;;  %v2610_v18 = vpop.f32.mrf.mxu0 }
 0x232   : > { %2736 = vst [vmem:[%s3760_s24 + $0xa8] sm:$0xff] %v2704_v3  ;;  %v2673_v51 = vmax.f32 %v2641_v30, 0.0  ;;  %v2576_v35 = vadd.f32 %v3576_v26, %v2350_v59  ;;  %v3642_v26 = vld [vmem:[#allocation3 + $0x151] sm:$0xff] }
 0x233   : > { %v2352_v52 = vpop.f32.mrf.mxu1  ;;  %v3645_v59 = vld [vmem:[#allocation3 + $0x171] sm:$0xff] }
 0x234   : > { %v2705_v32 = vadd.f32 %v3638_v46, %v2673_v51  ;;  %v2642_v34 = vadd.f32 %v2576_v35, %v5106_v54 }
 0x235   : > { %v2355_v8 = vpop.f32.mrf.mxu1 }
 0x236   : > { %2737 = vst [vmem:[%s3760_s24 + $0xb0] sm:$0xff] %v2705_v32  ;;  %v2674_v37 = vmax.f32 %v2642_v34, 0.0  ;;  %v2581_v27 = vadd.f32 %v2580_v19, %v2355_v8  ;;  %v3646_v32 = vld [vmem:[#allocation3 + $0x181] sm:$0xff] }
 0x237   : > { %v2357_v25 = vpop.f32.mrf.mxu1 }
 0x238   : > { %v2706_v50 = vadd.f32 %v3639_v38, %v2674_v37  ;;  %v2643_v39 = vadd.f32 %v2581_v27, %v5126_v57  ;;  %v3647_v37 = vld [vmem:[#allocation3 + $0x189] sm:$0xff] }
 0x239   : > { %v2360_v0 = vpop.f32.mrf.mxu1 }
 0x23a   : > { %2738 = vst [vmem:[%s3760_s24 + $0xb8] sm:$0xff] %v2706_v50  ;;  %v2675_v7 = vmax.f32 %v2643_v39, 0.0  ;;  %v2586_v61 = vadd.f32 %v3579_v11, %v2360_v0 }
 0x23b   : > { %v2362_v40 = vpop.f32.mrf.mxu1 }
 0x23c   : > { %v2707_v54 = vadd.f32 %v3640_v63, %v2675_v7  ;;  %v2644_v4 = vadd.f32 %v2586_v61, %v5120_v58 }
 0x23d   : > { %v2365_v29 = vpop.f32.mrf.mxu1 }
 0x23e   : > { %2739 = vst [vmem:[%s3760_s24 + $0xc0] sm:$0xff] %v2707_v54  ;;  %v2676_v9 = vmax.f32 %v2644_v4, 0.0  ;;  %v2591_v23 = vadd.f32 %v2590_v49, %v2365_v29 }
 0x23f   : > { %v2367_v20 = vpop.f32.mrf.mxu1 }
 0x240   : > { %v2708_v57 = vadd.f32 %v3641_v45, %v2676_v9  ;;  %v2645_v6 = vadd.f32 %v2591_v23, %v5140_v47 }
 0x241   : > { %v2370_v31 = vpop.f32.mrf.mxu1 }
 0x242   : > { %2740 = vst [vmem:[%s3760_s24 + $0xc8] sm:$0xff] %v2708_v57  ;;  %v2677_v56 = vmax.f32 %v2645_v6, 0.0  ;;  %v2596_v5 = vadd.f32 %v3582_v60, %v2370_v31 }
 0x243   : > { %v2372_v21 = vpop.f32.mrf.mxu1 }
 0x244   : > { %v2709_v58 = vadd.f32 %v3642_v26, %v2677_v56  ;;  %v2646_v12 = vadd.f32 %v2596_v5, %v5134_v24 }
 0x245   : > { %v2375_v44 = vpop.f32.mrf.mxu1 }
 0x246   : > { %2741 = vst [vmem:[%s3760_s24 + $0xd0] sm:$0xff] %v2709_v58  ;;  %v2678_v16 = vmax.f32 %v2646_v12, 0.0  ;;  %v2601_v17 = vadd.f32 %v2600_v36, %v2375_v44 }
 0x247   : > { %v2377_v62 = vpop.f32.mrf.mxu1 }
 0x248   : > { %v2710_v47 = vadd.f32 %v3643_v48, %v2678_v16  ;;  %v2647_v28 = vadd.f32 %v2601_v17, %v5154_v33 }
 0x249   : > { %v2380_v43 = vpop.f32.mrf.mxu1 }
 0x24a   : > { %2742 = vst [vmem:[%s3760_s24 + $0xd8] sm:$0xff] %v2710_v47  ;;  %v2679_v13 = vmax.f32 %v2647_v28, 0.0  ;;  %v2606_v42 = vadd.f32 %v3585_v55, %v2380_v43 }
 0x24b   : > { %v2382_v53 = vpop.f32.mrf.mxu1 }
 0x24c   : > { %v2711_v24 = vadd.f32 %v3644_v14, %v2679_v13  ;;  %v2648_v41 = vadd.f32 %v2606_v42, %v5148_v22 }
 0x24d   : > { %v2385_v11 = vpop.f32.mrf.mxu1 }
 0x24e   : > { %2743 = vst [vmem:[%s3760_s24 + $0xe0] sm:$0xff] %v2711_v24  ;;  %v2680_v10 = vmax.f32 %v2648_v41, 0.0  ;;  %v2611_v3 = vadd.f32 %v2610_v18, %v2385_v11 }
 0x24f   : > { %v2387_v30 = vpop.f32.mrf.mxu1 }
 0x250   : > { %v2712_v33 = vadd.f32 %v3645_v59, %v2680_v10  ;;  %v2649_v51 = vadd.f32 %v2611_v3, %v5171_v15 }
 0x251   : > { %v2390_v35 = vpop.f32.mrf.mxu1 }
 0x252   : > { %2744 = vst [vmem:[%s3760_s24 + $0xe8] sm:$0xff] %v2712_v33  ;;  %v2681_v52 = vmax.f32 %v2649_v51, 0.0  ;;  %v2616_v19 = vadd.f32 %v3588_v1, %v2390_v35 }
 0x253   : > { %v2392_v46 = vpop.f32.mrf.mxu1 }
 0x254   : > { %v2713_v34 = vadd.f32 %v3646_v32, %v2681_v52  ;;  %v2650_v22 = vadd.f32 %v2616_v19, %v5164_v2 }
 0x256   : > { %2745 = vst [vmem:[%s3760_s24 + $0xf0] sm:$0xff] %v2713_v34  ;;  %v2682_v8 = vmax.f32 %v2650_v22, 0.0 }
 0x258   : > { %v2714_v27 = vadd.f32 %v3647_v37, %v2682_v8 }
 0x25a   : > { %2746 = vst [vmem:[%s3760_s24 + $0xf8] sm:$0xff] %v2714_v27 }
 0x25b PF: > { %s13_s14 = sadd.s32 1, %s3676_s14   ;;  %s5443_s12 = smov %s3672_s13 }
 0x25c   : > { %p10_p5 = scmp.ge.s32.totalorder %s13_s14, 4   ;;  %s5444_s13 = smov %s5446_s15 }
 0x25e   :  { %12 = sbr.rel (!%p10_p5) target bundleno = 2 (0x2), region = 355 }
 0x263   :  { %2779 = vsyncmov [#allocation4] }
 0x266   :  { %s2780_s22 = vpop.sfrf %2779 }
 0x267   :  { %p3198_p6 = scmp.ne.s32.totalorder %s2780_s22, 0 }
 0x269   :  { %2784 = shalt.err (%p3198_p6)  }
 0x26a   :  { %2786 = vsyncmov [#allocation4 + $0x1] }
 0x26d   :  { %s2787_s23 = vpop.sfrf %2786 }
 0x26e   :  { %p3199_p7 = scmp.ne.s32.totalorder %s2787_s23, 0 }
 0x270   :  { %2791 = shalt.err (%p3199_p7)  }
 0x271   :  { %2793 = vsyncmov [#allocation4 + $0x2] }
 0x274   :  { %s2794_s24 = vpop.sfrf %2793 }
 0x275   :  { %p3200_p8 = scmp.ne.s32.totalorder %s2794_s24, 0 }
 0x277   :  { %2798 = shalt.err (%p3200_p8)  }
 0x278   :  { %2800 = vsyncmov [#allocation4 + $0x3] }
 0x27b   :  { %s2801_s25 = vpop.sfrf %2800 }
 0x27c   :  { %p3201_p9 = scmp.ne.s32.totalorder %s2801_s25, 0 }
 0x27e   :  { %2805 = shalt.err (%p3201_p9)  }
 0x27f   :  { %2807 = vsyncmov [#allocation4 + $0x4] }
 0x282   :  { %s2808_s15 = vpop.sfrf %2807 }
 0x283   :  { %p3202_p10 = scmp.ne.s32.totalorder %s2808_s15, 0 }
 0x285   :  { %2812 = shalt.err (%p3202_p10)  }
 0x286   :  { %2814 = vsyncmov [#allocation4 + $0x5] }
 0x289   :  { %s2815_s0 = vpop.sfrf %2814 }
 0x28a   :  { %p3203_p11 = scmp.ne.s32.totalorder %s2815_s0, 0 }
 0x28c   :  { %2819 = shalt.err (%p3203_p11)  }

// kernel: _lambda_.7
= control target key start
LH: loop header
LB: loop body
LE: loop exit
PB: predicated region body
PF: predicated region fallthrough
CT: control target
= control target key end

     0   :  { %s6548_s18 = smov 0   ;;  %s6550_s19 = smov 0   ;;  %s9520_s0 = inlined_call_operand.vmem [shape: f32[2,16,16,128], index: 0, kind: input, shape index: {}]   ;;  %s9521_s1 = inlined_call_operand.vmem [shape: f32[3,384,128], index: 1, kind: input, shape index: {}]   ;;  %s9522_s2 = inlined_call_operand.vmem [shape: f32[1,128], index: 2, kind: input, shape index: {}]   ;;  %s9523_s3 = inlined_call_operand.vmem [shape: f32[3,384,128], index: 3, kind: input, shape index: {}]   ;;  %s9524_s4 = inlined_call_operand.vmem [shape: f32[1,128], index: 4, kind: input, shape index: {}]   ;;  %s9525_s5 = inlined_call_operand.vmem [shape: f32[2,16,16,128], index: 5, kind: output, shape index: {}]  }
   0x1   :  { %s6552_s20 = smov 0  }
   0x2 LB: > { %s27_s21 = sadd.s32 1, %s6510_s19  ;;  %p5330_p0 = scmp.ge.s32.totalorder %s6514_s20, 1  ;;  %s6514_s20 = sphi %s6552_s20, %s15_s20   ;;  %s6510_s19 = sphi %s6550_s19, %s9646_s19   ;;  %s6506_s18 = sphi %s6548_s18, %s9645_s18  }
   0x3   : > { %p29_p1 = scmp.ge.s32.totalorder %s27_s21, 2  ;;  %p167_p2 = scmp.lt.s32.totalorder %s6514_s20, 3 }
   0x5   : > { %s9648_s21 = smov (%p29_p1, %s27_s21), 0  ;;  %p168_p3 = pnand %p5330_p0, %p167_p2 }
   0x7   : > { %171 = sbr.rel (%p168_p3) target bundleno = 1076 (0x434), region = 36 }
   0xc   : > { %p194_p4 = scmp.lt.s32.totalorder %s6506_s18, 1  ;;  %s5333_s22 = sshll.u32 %s6506_s18, 8 }
   0xd   : > { %s6575_s25 = scalar_lea.vmem %s9520_s0, %s5333_s22 }
   0xe   : > { %s195_s26 = scalar_select %p194_p4, %s6506_s18, 1  ;;  %v6579_v0 = vld [vmem:[%s6575_s25] sm:$0xff]  ;;  %v6582_v1 = vld [vmem:[%s6575_s25 + $0x8] sm:$0xff]  ;;  %v6585_v2 = vld [vmem:[%s6575_s25 + $0x10] sm:$0xff] }
   0xf   : > { %v6588_v3 = vld [vmem:[%s6575_s25 + $0x18] sm:$0xff]  ;;  %v6591_v4 = vld [vmem:[%s6575_s25 + $0x20] sm:$0xff]  ;;  %v6594_v5 = vld [vmem:[%s6575_s25 + $0x28] sm:$0xff] }
  0x10   : > { %s5656_s27 = sshll.u32 %s195_s26, 8  ;;  %v6597_v6 = vld [vmem:[%s6575_s25 + $0x30] sm:$0xff]  ;;  %v6600_v7 = vld [vmem:[%s6575_s25 + $0x38] sm:$0xff]  ;;  %v6603_v8 = vld [vmem:[%s6575_s25 + $0x40] sm:$0xff] }
  0x11   : > { %s6608_s30 = scalar_lea.vmem %s9525_s5, %s5656_s27  ;;  %v6611_v9 = vld [vmem:[%s6575_s25 + $0x48] sm:$0xff]  ;;  %v6614_v10 = vld [vmem:[%s6575_s25 + $0x50] sm:$0xff]  ;;  %v291_v11 = vld [vmem:[%s6575_s25 + $0x58] sm:$0xff] }
  0x12   : > { %v293_v12 = vld [vmem:[%s6575_s25 + $0x60] sm:$0xff]  ;;  %v295_v13 = vld [vmem:[%s6575_s25 + $0x68] sm:$0xff]  ;;  %v297_v14 = vld [vmem:[%s6575_s25 + $0x70] sm:$0xff] }
  0x13   : > { %v299_v15 = vld [vmem:[%s6575_s25 + $0x78] sm:$0xff]  ;;  %v301_v16 = vld [vmem:[%s6575_s25 + $0x80] sm:$0xff]  ;;  %v303_v17 = vld [vmem:[%s6575_s25 + $0x88] sm:$0xff] }
  0x14   : > { %v305_v18 = vld [vmem:[%s6575_s25 + $0x90] sm:$0xff]  ;;  %v307_v19 = vld [vmem:[%s6575_s25 + $0x98] sm:$0xff]  ;;  %v309_v20 = vld [vmem:[%s6575_s25 + $0xa0] sm:$0xff] }
  0x15   : > { %v311_v21 = vld [vmem:[%s6575_s25 + $0xa8] sm:$0xff]  ;;  %v313_v22 = vld [vmem:[%s6575_s25 + $0xb0] sm:$0xff]  ;;  %v315_v23 = vld [vmem:[%s6575_s25 + $0xb8] sm:$0xff] }
  0x16   : > { %v317_v24 = vld [vmem:[%s6575_s25 + $0xc0] sm:$0xff]  ;;  %v319_v25 = vld [vmem:[%s6575_s25 + $0xc8] sm:$0xff]  ;;  %v321_v26 = vld [vmem:[%s6575_s25 + $0xd0] sm:$0xff] }
  0x17   : > { %v323_v27 = vld [vmem:[%s6575_s25 + $0xd8] sm:$0xff]  ;;  %v325_v28 = vld [vmem:[%s6575_s25 + $0xe0] sm:$0xff]  ;;  %v327_v29 = vld [vmem:[%s6575_s25 + $0xe8] sm:$0xff] }
  0x18   : > { %v329_v30 = vld [vmem:[%s6575_s25 + $0xf0] sm:$0xff]  ;;  %v331_v31 = vld [vmem:[%s6575_s25 + $0xf8] sm:$0xff] }
  0x19   : > { %340 = vsyncadd [#allocation5], 4096  ;;  %v380_v32 = vld [vmem:[%s6575_s25] sm:$0xff]  ;;  %v6639_v33 = vld [vmem:[%s6575_s25 + $0x8] sm:$0xff]  ;;  %s6516_s6 = smov [#allocation5]  }
  0x1a   : > { %s5196_s7 = scalar_lea.sflag %s6516_s6, 1  ;;  %v384_v34 = vld [vmem:[%s6575_s25 + $0x10] sm:$0xff]  ;;  %v386_v35 = vld [vmem:[%s6575_s25 + $0x18] sm:$0xff] }
  0x1b   : > { %395 = vsyncadd %s5196_s7, 512  ;;  %s397_s8 = sadd.s32 224, %s5333_s22  ;;  %s5206_s9 = scalar_lea.sflag %s6516_s6, 2 }
  0x1c   : > { %s398_s12 = scalar_lea.vmem %s9520_s0, %s397_s8 }
  0x1d   : > { %v436_v36 = vld [vmem:[%s398_s12] sm:$0xff]  ;;  %v438_v37 = vld [vmem:[%s398_s12 + $0x8] sm:$0xff]  ;;  %v440_v38 = vld [vmem:[%s398_s12 + $0x10] sm:$0xff] }
  0x1e   : > { %v442_v39 = vld [vmem:[%s398_s12 + $0x18] sm:$0xff] }
  0x1f   : > { %451 = vsyncadd %s5206_s9, 512 }
  0x20   : > { %6498 = dma.done.wait [#allocation5], 4096 }
  0x21   : > { %6499 = vsyncadd [#allocation5], 4294963200 }
  0x22   : > { %6500 = dma.done.wait %s5196_s7, 512 }
  0x23   : > { %6501 = vsyncadd %s5196_s7, 4294966784 }
  0x24   : > { %6502 = dma.done.wait %s5206_s9, 512 }
  0x25   : > { %6503 = vsyncadd %s5206_s9, 4294966784  ;;  %1120 = vmatprep.mubr.f32.mxu0 %v380_v32  ;;  %749 = vst [vmem:[#allocation3 + $0x1] sm:$0xff] %v380_v32  ;;  %v9526_v40 = vmov 0.0   ;;  %v1023_v41 = vld [vmem:[%s9521_s1 + $0x78] sm:$0xff]  ;;  %v1022_v43 = vld [vmem:[%s9521_s1 + $0x70] sm:$0xff] }
  0x26   : > { %750 = vst [vmem:[#allocation3 + $0x9] sm:$0xff] %v6639_v33  ;;  %751 = vst [vmem:[#allocation3 + $0x19] sm:$0xff] %v384_v34  ;;  %1056 = vmatprep.subr.mxu0 %v9526_v40  ;;  %v1055_v42 = vld [vmem:[%s9521_s1 + $0x178] sm:$0xff]  ;;  %v1054_v44 = vld [vmem:[%s9521_s1 + $0x170] sm:$0xff] }
  0x27   : > { %752 = vst [vmem:[#allocation3 + $0x21] sm:$0xff] %v386_v35  ;;  %753 = vst [vmem:[#allocation3 + $0x31] sm:$0xff] %v6579_v0  ;;  %1057 = vmatpush1.msra.mxu0 %v1023_v41  ;;  %5957 = vmatprep.subr.mxu1 %v1055_v42  ;;  %v1021_v45 = vld [vmem:[%s9521_s1 + $0x68] sm:$0xff]  ;;  %v1020_v47 = vld [vmem:[%s9521_s1 + $0x60] sm:$0xff] }
  0x28   : > { %754 = vst [vmem:[#allocation3 + $0x39] sm:$0xff] %v6582_v1  ;;  %755 = vst [vmem:[#allocation3 + $0x49] sm:$0xff] %v6585_v2  ;;  %1058 = vmatprep.subr.mxu0 %v9526_v40  ;;  %5958 = vmatpush3.msra.mxu1 %v1055_v42  ;;  %v1053_v46 = vld [vmem:[%s9521_s1 + $0x168] sm:$0xff]  ;;  %v1052_v48 = vld [vmem:[%s9521_s1 + $0x160] sm:$0xff] }
  0x29   : > { %756 = vst [vmem:[#allocation3 + $0x51] sm:$0xff] %v6588_v3  ;;  %757 = vst [vmem:[#allocation3 + $0x61] sm:$0xff] %v6591_v4  ;;  %1059 = vmatpush1.msra.mxu0 %v1022_v43  ;;  %5959 = vmatprep.subr.mxu1 %v1054_v44  ;;  %v1019_v49 = vld [vmem:[%s9521_s1 + $0x58] sm:$0xff]  ;;  %v1018_v51 = vld [vmem:[%s9521_s1 + $0x50] sm:$0xff] }
  0x2a   : > { %758 = vst [vmem:[#allocation3 + $0x69] sm:$0xff] %v6594_v5  ;;  %759 = vst [vmem:[#allocation3 + $0x79] sm:$0xff] %v6597_v6  ;;  %1060 = vmatprep.subr.mxu0 %v9526_v40  ;;  %5960 = vmatpush3.msra.mxu1 %v1054_v44  ;;  %v1051_v50 = vld [vmem:[%s9521_s1 + $0x158] sm:$0xff]  ;;  %v1050_v52 = vld [vmem:[%s9521_s1 + $0x150] sm:$0xff] }
  0x2b   : > { %760 = vst [vmem:[#allocation3 + $0x81] sm:$0xff] %v6600_v7  ;;  %761 = vst [vmem:[#allocation3 + $0x91] sm:$0xff] %v6603_v8  ;;  %1061 = vmatpush1.msra.mxu0 %v1021_v45  ;;  %5961 = vmatprep.subr.mxu1 %v1053_v46  ;;  %v1017_v53 = vld [vmem:[%s9521_s1 + $0x48] sm:$0xff]  ;;  %v1016_v55 = vld [vmem:[%s9521_s1 + $0x40] sm:$0xff] }
  0x2c   : > { %762 = vst [vmem:[#allocation3 + $0x99] sm:$0xff] %v6611_v9  ;;  %763 = vst [vmem:[#allocation3 + $0xa9] sm:$0xff] %v6614_v10  ;;  %1062 = vmatprep.subr.mxu0 %v9526_v40  ;;  %5962 = vmatpush3.msra.mxu1 %v1053_v46  ;;  %v1049_v54 = vld [vmem:[%s9521_s1 + $0x148] sm:$0xff]  ;;  %v1048_v57 = vld [vmem:[%s9521_s1 + $0x140] sm:$0xff] }
  0x2d   : > { %764 = vst [vmem:[#allocation3 + $0xb1] sm:$0xff] %v291_v11  ;;  %765 = vst [vmem:[#allocation3 + $0xc1] sm:$0xff] %v293_v12  ;;  %1063 = vmatpush1.msra.mxu0 %v1020_v47  ;;  %5963 = vmatprep.subr.mxu1 %v1052_v48  ;;  %v853_v56 = vld [vmem:[#allocation3 + $0xf] sm:$0x1]  ;;  %v1015_v61 = vld [vmem:[%s9521_s1 + $0x38] sm:$0xff] }
  0x2e   : > { %766 = vst [vmem:[#allocation3 + $0xc9] sm:$0xff] %v295_v13  ;;  %767 = vst [vmem:[#allocation3 + $0xd9] sm:$0xff] %v297_v14  ;;  %1064 = vmatprep.subr.mxu0 %v9526_v40  ;;  %5964 = vmatpush3.msra.mxu1 %v1052_v48  ;;  %v1047_v62 = vld [vmem:[%s9521_s1 + $0x138] sm:$0xff]  ;;  %v1014_v11 = vld [vmem:[%s9521_s1 + $0x30] sm:$0xff] }
  0x2f   : > { %768 = vst [vmem:[#allocation3 + $0xe1] sm:$0xff] %v299_v15  ;;  %769 = vst [vmem:[#allocation3 + $0xf1] sm:$0xff] %v301_v16  ;;  %1065 = vmatpush1.msra.mxu0 %v1019_v49  ;;  %5965 = vmatprep.subr.mxu1 %v1051_v50  ;;  %v794_v58 = vld [vmem:[#allocation3 + $0x48] sm:$0xff]  ;;  %v855_v63 = vld [vmem:[#allocation3 + $0x3f] sm:$0x1] }
  0x30   : > { %770 = vst [vmem:[#allocation3 + $0xf9] sm:$0xff] %v303_v17  ;;  %771 = vst [vmem:[#allocation3 + $0x109] sm:$0xff] %v305_v18  ;;  %1066 = vmatprep.subr.mxu0 %v9526_v40  ;;  %5966 = vmatpush3.msra.mxu1 %v1051_v50  ;;  %v6715_v59 = vld [vmem:[#allocation3 + $0x50] sm:$0xff]  ;;  %v796_v60 = vld [vmem:[#allocation3 + $0x58] sm:$0x3] }
  0x31   : > { %772 = vst [vmem:[#allocation3 + $0x111] sm:$0xff] %v307_v19  ;;  %773 = vst [vmem:[#allocation3 + $0x121] sm:$0xff] %v309_v20  ;;  %1067 = vmatpush1.msra.mxu0 %v1018_v51  ;;  %5967 = vmatprep.subr.mxu1 %v1050_v52  ;;  %v1046_v12 = vld [vmem:[%s9521_s1 + $0x130] sm:$0xff]  ;;  %v1013_v14 = vld [vmem:[%s9521_s1 + $0x28] sm:$0xff] }
  0x32   : > { %774 = vst [vmem:[#allocation3 + $0x129] sm:$0xff] %v311_v21  ;;  %775 = vst [vmem:[#allocation3 + $0x139] sm:$0xff] %v313_v22  ;;  %1068 = vmatprep.subr.mxu0 %v9526_v40  ;;  %5968 = vmatpush3.msra.mxu1 %v1050_v52  ;;  %v856_v13 = vld [vmem:[#allocation3 + $0x57] sm:$0x1]  ;;  %v1045_v15 = vld [vmem:[%s9521_s1 + $0x128] sm:$0xff] }
  0x33   : > { %776 = vst [vmem:[#allocation3 + $0x141] sm:$0xff] %v315_v23  ;;  %777 = vst [vmem:[#allocation3 + $0x151] sm:$0xff] %v317_v24  ;;  %1069 = vmatpush1.msra.mxu0 %v1017_v53  ;;  %5969 = vmatprep.subr.mxu1 %v1049_v54  ;;  %v857_v16 = vld [vmem:[#allocation3 + $0x6f] sm:$0x1]  ;;  %v1012_v17 = vld [vmem:[%s9521_s1 + $0x20] sm:$0xff] }
  0x34   : > { %778 = vst [vmem:[#allocation3 + $0x159] sm:$0xff] %v319_v25  ;;  %779 = vst [vmem:[#allocation3 + $0x169] sm:$0xff] %v321_v26  ;;  %1070 = vmatprep.subr.mxu0 %v9526_v40  ;;  %5970 = vmatpush3.msra.mxu1 %v1049_v54  ;;  %v1044_v18 = vld [vmem:[%s9521_s1 + $0x120] sm:$0xff]  ;;  %v1011_v21 = vld [vmem:[%s9521_s1 + $0x18] sm:$0xff] }
  0x35   : > { %780 = vst [vmem:[#allocation3 + $0x171] sm:$0xff] %v323_v27  ;;  %781 = vst [vmem:[#allocation3 + $0x181] sm:$0xff] %v325_v28  ;;  %1071 = vmatpush1.msra.mxu0 %v1016_v55  ;;  %5971 = vmatprep.subr.mxu1 %v1048_v57  ;;  %v858_v20 = vld [vmem:[#allocation3 + $0x87] sm:$0x1]  ;;  %v1043_v22 = vld [vmem:[%s9521_s1 + $0x118] sm:$0xff] }
  0x36   : > { %782 = vst [vmem:[#allocation3 + $0x189] sm:$0xff] %v327_v29  ;;  %783 = vst [vmem:[#allocation3 + $0x199] sm:$0xff] %v329_v30  ;;  %1072 = vmatprep.subr.mxu0 %v9526_v40  ;;  %5972 = vmatpush3.msra.mxu1 %v1048_v57  ;;  %v859_v23 = vld [vmem:[#allocation3 + $0x9f] sm:$0x1]  ;;  %v1010_v24 = vld [vmem:[%s9521_s1 + $0x10] sm:$0xff] }
  0x37   : > { %784 = vst [vmem:[#allocation3 + $0x1a1] sm:$0xff] %v331_v31  ;;  %785 = vst [vmem:[#allocation3 + $0x1b1] sm:$0xff] %v436_v36  ;;  %1073 = vmatpush1.msra.mxu0 %v1015_v61  ;;  %5973 = vmatprep.subr.mxu1 %v1047_v62  ;;  %v1042_v25 = vld [vmem:[%s9521_s1 + $0x110] sm:$0xff]  ;;  %v1009_v26 = vld [vmem:[%s9521_s1 + $0x8] sm:$0xff] }
  0x38   : > { %786 = vst [vmem:[#allocation3 + $0x1b9] sm:$0xff] %v438_v37  ;;  %787 = vst [vmem:[#allocation3 + $0x1c9] sm:$0xff] %v440_v38  ;;  %1074 = vmatprep.subr.mxu0 %v9526_v40  ;;  %5974 = vmatpush3.msra.mxu1 %v1047_v62  ;;  %v1041_v27 = vld [vmem:[%s9521_s1 + $0x108] sm:$0xff]  ;;  %v860_v28 = vld [vmem:[#allocation3 + $0xb7] sm:$0x1] }
  0x39   : > { %788 = vst [vmem:[#allocation3 + $0x1d1] sm:$0xff] %v442_v39  ;;  %873 = vst [vmem:[#allocation3 + $0x11] sm:$0x1] %v853_v56  ;;  %1075 = vmatpush1.msra.mxu0 %v1014_v11  ;;  %5975 = vmatprep.subr.mxu1 %v1046_v12  ;;  %v813_v29 = vld [vmem:[#allocation3 + $0x2] sm:$0x1]  ;;  %v1039_v35 = vld [vmem:[%s9521_s1 + $0xf8] sm:$0xff] }
  0x3a   : > { %798 = vst [vmem:[#allocation3 + $0x18] sm:$0xff] %v794_v58  ;;  %799 = vst [vmem:[#allocation3 + $0x20] sm:$0xff] %v6715_v59  ;;  %1076 = vmatprep.subr.mxu0 %v9526_v40  ;;  %5976 = vmatpush3.msra.mxu1 %v1046_v12  ;;  %v1008_v30 = vld [vmem:[%s9521_s1] sm:$0xff]  ;;  %v861_v32 = vld [vmem:[#allocation3 + $0xcf] sm:$0x1] }
  0x3b   : > { %800 = vst [vmem:[#allocation3 + $0x28] sm:$0x3] %v796_v60  ;;  %875 = vst [vmem:[#allocation3 + $0x41] sm:$0x1] %v855_v63  ;;  %1077 = vmatpush1.msra.mxu0 %v1013_v14  ;;  %5977 = vmatprep.subr.mxu1 %v1045_v15  ;;  %v1040_v31 = vld [vmem:[%s9521_s1 + $0x100] sm:$0xff]  ;;  %v1038_v38 = vld [vmem:[%s9521_s1 + $0xf0] sm:$0xff] }
  0x3c   : > { %876 = vst [vmem:[#allocation3 + $0x59] sm:$0x1] %v856_v13  ;;  %877 = vst [vmem:[#allocation3 + $0x71] sm:$0x1] %v857_v16  ;;  %1078 = vmatprep.subr.mxu0 %v9526_v40  ;;  %5978 = vmatpush3.msra.mxu1 %v1045_v15  ;;  %v972_v34 = vld [vmem:[#allocation3 + $0x2] sm:$0xff]  ;;  %v5470_v44 = vld [vmem:[%s9521_s1 + $0x1f8] sm:$0xff] }
  0x3d   : > { %878 = vst [vmem:[#allocation3 + $0x89] sm:$0x1] %v858_v20  ;;  %1079 = vmatpush1.msra.mxu0 %v1012_v17  ;;  %5979 = vmatprep.subr.mxu1 %v1044_v18  ;;  %879 = vst [vmem:[#allocation3 + $0xa1] sm:$0x1] %v859_v23  ;;  %v862_v37 = vld [vmem:[#allocation3 + $0xe7] sm:$0x1] }
  0x3e   : > { %1080 = vmatprep.subr.mxu0 %v9526_v40  ;;  %5980 = vmatpush3.msra.mxu1 %v1044_v18  ;;  %880 = vst [vmem:[#allocation3 + $0xb9] sm:$0x1] %v860_v28  ;;  %833 = vst [vmem:[#allocation3] sm:$0x1] %v813_v29  ;;  %v863_v42 = vld [vmem:[#allocation3 + $0xff] sm:$0x1] }
  0x3f   : > { %1081 = vmatpush1.msra.mxu0 %v1011_v21  ;;  %5981 = vmatprep.subr.mxu1 %v1043_v22  ;;  %881 = vst [vmem:[#allocation3 + $0xd1] sm:$0x1] %v861_v32  ;;  %882 = vst [vmem:[#allocation3 + $0xe9] sm:$0x1] %v862_v37  ;;  %v1037_v43 = vld [vmem:[%s9521_s1 + $0xe8] sm:$0xff]  ;;  %v1036_v46 = vld [vmem:[%s9521_s1 + $0xe0] sm:$0xff] }
  0x40   : > { %1082 = vmatprep.subr.mxu0 %v9526_v40  ;;  %5982 = vmatpush3.msra.mxu1 %v1043_v22  ;;  %v973_v36 = vld [vmem:[#allocation3 + $0xa] sm:$0xff]  ;;  %883 = vst [vmem:[#allocation3 + $0x101] sm:$0x1] %v863_v42  ;;  %v976_v47 = vld [vmem:[#allocation3 + $0x32] sm:$0xff]  ;;  %v866_v56 = vld [vmem:[#allocation3 + $0x147] sm:$0x1] }
  0x41   : > { %v854_v19 = vld [vmem:[#allocation3 + $0x27] sm:$0x1]  ;;  %1083 = vmatpush1.msra.mxu0 %v1010_v24  ;;  %5983 = vmatprep.subr.mxu1 %v1042_v25  ;;  %v974_v39 = vld [vmem:[#allocation3 + $0x1a] sm:$0xff]  ;;  %v864_v48 = vld [vmem:[#allocation3 + $0x117] sm:$0x1] }
  0x42   : > { %874 = vst [vmem:[#allocation3 + $0x29] sm:$0x1] %v854_v19  ;;  %1084 = vmatprep.subr.mxu0 %v9526_v40  ;;  %5984 = vmatpush3.msra.mxu1 %v1042_v25  ;;  %v814_v41 = vld [vmem:[#allocation3 + $0x1a] sm:$0x1]  ;;  %v815_v49 = vld [vmem:[#allocation3 + $0x32] sm:$0x1] }
  0x43   : > { %1085 = vmatpush1.msra.mxu0 %v1009_v26  ;;  %5985 = vmatprep.subr.mxu1 %v1041_v27  ;;  %834 = vst [vmem:[#allocation3 + $0x18] sm:$0x1] %v814_v41  ;;  %884 = vst [vmem:[#allocation3 + $0x119] sm:$0x1] %v864_v48  ;;  %v1035_v50 = vld [vmem:[%s9521_s1 + $0xd8] sm:$0xff]  ;;  %v5469_v51 = vld [vmem:[%s9521_s1 + $0x1f0] sm:$0xff] }
  0x44   : > { %1086 = vmatprep.subr.mxu0 %v9526_v40  ;;  %5986 = vmatpush3.msra.mxu1 %v1041_v27  ;;  %835 = vst [vmem:[#allocation3 + $0x30] sm:$0x1] %v815_v49  ;;  %v865_v52 = vld [vmem:[#allocation3 + $0x12f] sm:$0x1]  ;;  %v977_v53 = vld [vmem:[#allocation3 + $0x3a] sm:$0xff]  ;;  %v1034_v54 = vld [vmem:[%s9521_s1 + $0xd0] sm:$0xff] }
  0x45   : > { %1087 = vmatpush1.msra.mxu0 %v1008_v30  ;;  %5987 = vmatprep.subr.mxu1 %v1040_v31  ;;  %885 = vst [vmem:[#allocation3 + $0x131] sm:$0x1] %v865_v52  ;;  %v978_v55 = vld [vmem:[#allocation3 + $0x4a] sm:$0xff]  ;;  %886 = vst [vmem:[#allocation3 + $0x149] sm:$0x1] %v866_v56  ;;  %v979_v62 = vld [vmem:[#allocation3 + $0x52] sm:$0xff] }
  0x46   : > { %1088 = vmatprep.subr.mxu0 %v9526_v40  ;;  %5988 = vmatpush3.msra.mxu1 %v1040_v31  ;;  %v816_v57 = vld [vmem:[#allocation3 + $0x4a] sm:$0x1]  ;;  %v867_v61 = vld [vmem:[#allocation3 + $0x15f] sm:$0x1]  ;;  %v1032_v63 = vld [vmem:[%s9521_s1 + $0xc0] sm:$0xff] }
  0x47   : > { %5989 = vmatprep.mubr.f32.mxu1 %v972_v34  ;;  %1089 = vmatpush2.msra.mxu0 %v1039_v35  ;;  %v1033_v58 = vld [vmem:[%s9521_s1 + $0xc8] sm:$0xff]  ;;  %836 = vst [vmem:[#allocation3 + $0x48] sm:$0x1] %v816_v57  ;;  %887 = vst [vmem:[#allocation3 + $0x161] sm:$0x1] %v867_v61  ;;  %v5467_v14 = vld [vmem:[%s9521_s1 + $0x1e0] sm:$0xff] }
  0x48   : > { %5990 = vmatmul.mubr.f32.vlgmr.msra.gmra.mxu1 %v973_v36  ;;  %1090 = vmatprep.subr.mxu0 %v9526_v40  ;;  %v5468_v60 = vld [vmem:[%s9521_s1 + $0x1e8] sm:$0xff]  ;;  %v868_v12 = vld [vmem:[#allocation3 + $0x177] sm:$0x1]  ;;  %v817_v13 = vld [vmem:[#allocation3 + $0x62] sm:$0x1] }
  0x49   : > { %1091 = vmatpush2.msra.mxu0 %v1038_v38  ;;  %5992 = vmatprep.mubr.f32.mxu1 %v974_v39  ;;  %v975_v45 = vld [vmem:[#allocation3 + $0x22] sm:$0xff]  ;;  %v1031_v15 = vld [vmem:[%s9521_s1 + $0xb8] sm:$0xff]  ;;  %888 = vst [vmem:[#allocation3 + $0x179] sm:$0x1] %v868_v12  ;;  %837 = vst [vmem:[#allocation3 + $0x60] sm:$0x1] %v817_v13 }
  0x4a   : > { %1092 = vmatprep.subr.mxu0 %v9526_v40  ;;  %1740 = vmatprep.subr.mxu1 %v9526_v40  ;;  %v980_v11 = vld [vmem:[#allocation3 + $0x62] sm:$0xff]  ;;  %v981_v16 = vld [vmem:[#allocation3 + $0x6a] sm:$0xff]  ;;  %v5466_v19 = vld [vmem:[%s9521_s1 + $0x1d8] sm:$0xff] }
  0x4b   : > { %1093 = vmatpush2.msra.mxu0 %v1037_v43  ;;  %1741 = vmatpush1.msra.mxu1 %v5470_v44  ;;  %v808_v17 = vld [vmem:[#allocation3 + $0x190] sm:$0x3]  ;;  %v869_v18 = vld [vmem:[#allocation3 + $0x18f] sm:$0x1]  ;;  %v982_v21 = vld [vmem:[#allocation3 + $0x7a] sm:$0xff] }
  0x4c   : > { %5993 = vmatmul.mubr.f32.gmra.mxu1 %v975_v45  ;;  %1094 = vmatprep.subr.mxu0 %v9526_v40  ;;  %889 = vst [vmem:[#allocation3 + $0x191] sm:$0x1] %v869_v18  ;;  %812 = vst [vmem:[#allocation3 + $0x1c0] sm:$0x3] %v808_v17  ;;  %v1030_v20 = vld [vmem:[%s9521_s1 + $0xb0] sm:$0xff]  ;;  %v1029_v24 = vld [vmem:[%s9521_s1 + $0xa8] sm:$0xff] }
  0x4d   : > { %1095 = vmatpush2.msra.mxu0 %v1036_v46  ;;  %5995 = vmatprep.mubr.f32.mxu1 %v976_v47  ;;  %v870_v22 = vld [vmem:[#allocation3 + $0x1a7] sm:$0x1]  ;;  %v5465_v23 = vld [vmem:[%s9521_s1 + $0x1d0] sm:$0xff]  ;;  %v818_v25 = vld [vmem:[#allocation3 + $0x7a] sm:$0x1] }
  0x4e   : > { %1096 = vmatprep.subr.mxu0 %v9526_v40  ;;  %1742 = vmatprep.subr.mxu1 %v9526_v40  ;;  %890 = vst [vmem:[#allocation3 + $0x1a9] sm:$0x1] %v870_v22  ;;  %v983_v26 = vld [vmem:[#allocation3 + $0x82] sm:$0xff]  ;;  %838 = vst [vmem:[#allocation3 + $0x78] sm:$0x1] %v818_v25  ;;  %v984_v31 = vld [vmem:[#allocation3 + $0x92] sm:$0xff] }
  0x4f   : > { %1097 = vmatpush2.msra.mxu0 %v1035_v50  ;;  %1743 = vmatpush1.msra.mxu1 %v5469_v51  ;;  %v819_v27 = vld [vmem:[#allocation3 + $0x92] sm:$0x1]  ;;  %v5464_v28 = vld [vmem:[%s9521_s1 + $0x1c8] sm:$0xff]  ;;  %v1028_v29 = vld [vmem:[%s9521_s1 + $0xa0] sm:$0xff] }
  0x50   : > { %5996 = vmatmul.mubr.f32.gmra.mxu1 %v977_v53  ;;  %1098 = vmatprep.subr.mxu0 %v9526_v40  ;;  %839 = vst [vmem:[#allocation3 + $0x90] sm:$0x1] %v819_v27  ;;  %v820_v30 = vld [vmem:[#allocation3 + $0xaa] sm:$0x1]  ;;  %v821_v32 = vld [vmem:[#allocation3 + $0xc2] sm:$0x1] }
  0x51   : > { %1099 = vmatpush2.msra.mxu0 %v1034_v54  ;;  %5998 = vmatprep.mubr.f32.mxu1 %v978_v55  ;;  %840 = vst [vmem:[#allocation3 + $0xa8] sm:$0x1] %v820_v30  ;;  %v5463_v34 = vld [vmem:[%s9521_s1 + $0x1c0] sm:$0xff]  ;;  %v1027_v35 = vld [vmem:[%s9521_s1 + $0x98] sm:$0xff]  ;;  %841 = vst [vmem:[#allocation3 + $0xc0] sm:$0x1] %v821_v32 }
  0x52   : > { %1100 = vmatprep.subr.mxu0 %v9526_v40  ;;  %1744 = vmatprep.subr.mxu1 %v9526_v40  ;;  %v985_v36 = vld [vmem:[#allocation3 + $0x9a] sm:$0xff]  ;;  %v1026_v39 = vld [vmem:[%s9521_s1 + $0x90] sm:$0xff]  ;;  %v1025_v43 = vld [vmem:[%s9521_s1 + $0x88] sm:$0xff] }
  0x53   : > { %1101 = vmatpush2.msra.mxu0 %v1033_v58  ;;  %1745 = vmatpush1.msra.mxu1 %v5468_v60  ;;  %v5462_v37 = vld [vmem:[%s9521_s1 + $0x1b8] sm:$0xff]  ;;  %v986_v41 = vld [vmem:[#allocation3 + $0xaa] sm:$0xff]  ;;  %v823_v45 = vld [vmem:[#allocation3 + $0xf2] sm:$0x1] }
  0x54   : > { %5999 = vmatmul.mubr.f32.gmra.mxu1 %v979_v62  ;;  %1102 = vmatprep.subr.mxu0 %v9526_v40  ;;  %v822_v38 = vld [vmem:[#allocation3 + $0xda] sm:$0x1]  ;;  %v5461_v42 = vld [vmem:[%s9521_s1 + $0x1b0] sm:$0xff]  ;;  %v5460_v46 = vld [vmem:[%s9521_s1 + $0x1a8] sm:$0xff]  ;;  %843 = vst [vmem:[#allocation3 + $0xf0] sm:$0x1] %v823_v45 }
  0x55   : > { %1103 = vmatpush2.msra.mxu0 %v1032_v63  ;;  %1746 = vmatprep.subr.mxu1 %v9526_v40  ;;  %842 = vst [vmem:[#allocation3 + $0xd8] sm:$0x1] %v822_v38  ;;  %v987_v44 = vld [vmem:[#allocation3 + $0xb2] sm:$0xff]  ;;  %v1024_v47 = vld [vmem:[%s9521_s1 + $0x80] sm:$0xff]  ;;  %v824_v50 = vld [vmem:[#allocation3 + $0x10a] sm:$0x1] }
  0x56   : > { %1104 = vmatprep.subr.mxu0 %v9526_v40  ;;  %6001 = vmatprep.mubr.f32.mxu1 %v980_v11  ;;  %v900_v48 = vld [vmem:[#allocation3] sm:$0xff]  ;;  %v5502_v52 = vld [vmem:[%s9521_s1 + $0x2f8] sm:$0xff]  ;;  %844 = vst [vmem:[#allocation3 + $0x108] sm:$0x1] %v824_v50  ;;  %v989_v53 = vld [vmem:[#allocation3 + $0xca] sm:$0xff] }
  0x57   : > { %1747 = vmatpush1.msra.mxu1 %v5467_v14  ;;  %1105 = vmatpush2.msra.mxu0 %v1031_v15  ;;  %v988_v49 = vld [vmem:[#allocation3 + $0xc2] sm:$0xff]  ;;  %v5458_v54 = vld [vmem:[%s9521_s1 + $0x198] sm:$0xff]  ;;  %v5457_v58 = vld [vmem:[%s9521_s1 + $0x190] sm:$0xff] }
  0x58   : > { %6002 = vmatmul.mubr.f32.gmra.mxu1 %v981_v16  ;;  %1748 = vmatprep.subr.mxu1 %v9526_v40  ;;  %v5459_v51 = vld [vmem:[%s9521_s1 + $0x1a0] sm:$0xff]  ;;  %v901_v56 = vld [vmem:[#allocation3 + $0x8] sm:$0xff]  ;;  %v826_v61 = vld [vmem:[#allocation3 + $0x13a] sm:$0x1] }
  0x59   : > { %1106 = vmatprep.subr.mxu0 %v9526_v40  ;;  %1749 = vmatpush1.msra.mxu1 %v5466_v19  ;;  %v825_v55 = vld [vmem:[#allocation3 + $0x122] sm:$0x1]  ;;  %v990_v57 = vld [vmem:[#allocation3 + $0xda] sm:$0xff]  ;;  %846 = vst [vmem:[#allocation3 + $0x138] sm:$0x1] %v826_v61  ;;  %v5456_v63 = vld [vmem:[%s9521_s1 + $0x188] sm:$0xff] }
  0x5a   : > { %1107 = vmatpush2.msra.mxu0 %v1030_v20  ;;  %1750 = vmatprep.subr.mxu1 %v9526_v40  ;;  %845 = vst [vmem:[#allocation3 + $0x120] sm:$0x1] %v825_v55  ;;  %v6897_v60 = vld [vmem:[#allocation3 + $0x19] sm:$0xff]  ;;  %v991_v62 = vld [vmem:[#allocation3 + $0xe2] sm:$0xff]  ;;  %v827_v13 = vld [vmem:[#allocation3 + $0x152] sm:$0x1] }
  0x5b   : > { %1108 = vmatprep.subr.mxu0 %v9526_v40  ;;  %6004 = vmatprep.mubr.f32.mxu1 %v982_v21  ;;  %v992_v11 = vld [vmem:[#allocation3 + $0xf2] sm:$0xff]  ;;  %847 = vst [vmem:[#allocation3 + $0x150] sm:$0x1] %v827_v13  ;;  %v993_v15 = vld [vmem:[#allocation3 + $0xfa] sm:$0xff]  ;;  %v828_v16 = vld [vmem:[#allocation3 + $0x16a] sm:$0x1] }
  0x5c   : > { %1751 = vmatpush1.msra.mxu1 %v5465_v23  ;;  %1109 = vmatpush2.msra.mxu0 %v1029_v24  ;;  %v6905_v12 = vld [vmem:[#allocation3 + $0x18] sm:$0xff]  ;;  %v5501_v14 = vld [vmem:[%s9521_s1 + $0x2f0] sm:$0xff]  ;;  %848 = vst [vmem:[#allocation3 + $0x168] sm:$0x1] %v828_v16  ;;  %v6919_v18 = vld [vmem:[#allocation3 + $0x21] sm:$0xff] }
  0x5d   : > { %6005 = vmatmul.mubr.f32.gmra.mxu1 %v983_v26  ;;  %1752 = vmatprep.subr.mxu1 %v9526_v40  ;;  %v5486_v17 = vld [vmem:[%s9521_s1 + $0x278] sm:$0xff]  ;;  %v994_v19 = vld [vmem:[#allocation3 + $0x10a] sm:$0xff]  ;;  %v806_v20 = vld [vmem:[#allocation3 + $0x180] sm:$0xff] }
  0x5e   : > { %1110 = vmatprep.subr.mxu0 %v9526_v40  ;;  %1753 = vmatpush1.msra.mxu1 %v5464_v28  ;;  %v5485_v21 = vld [vmem:[%s9521_s1 + $0x270] sm:$0xff]  ;;  %v829_v22 = vld [vmem:[#allocation3 + $0x182] sm:$0x1]  ;;  %810 = vst [vmem:[#allocation3 + $0x1b0] sm:$0xff] %v806_v20  ;;  %v6927_v24 = vld [vmem:[#allocation3 + $0x188] sm:$0xff] }
  0x5f   : > { %1111 = vmatpush2.msra.mxu0 %v1028_v29  ;;  %1754 = vmatprep.subr.mxu1 %v9526_v40  ;;  %v995_v23 = vld [vmem:[#allocation3 + $0x112] sm:$0xff]  ;;  %849 = vst [vmem:[#allocation3 + $0x180] sm:$0x1] %v829_v22  ;;  %v5484_v25 = vld [vmem:[%s9521_s1 + $0x268] sm:$0xff]  ;;  %v830_v27 = vld [vmem:[#allocation3 + $0x19a] sm:$0x1] }
  0x60   : > { %1112 = vmatprep.subr.mxu0 %v9526_v40  ;;  %6007 = vmatprep.mubr.f32.mxu1 %v984_v31  ;;  %v996_v26 = vld [vmem:[#allocation3 + $0x122] sm:$0xff]  ;;  %811 = vst [vmem:[#allocation3 + $0x1b8] sm:$0xff] %v6927_v24  ;;  %v6935_v28 = vld [vmem:[#allocation3 + $0x30] sm:$0xff]  ;;  %850 = vst [vmem:[#allocation3 + $0x198] sm:$0x1] %v830_v27 }
  0x61   : > { %1755 = vmatpush1.msra.mxu1 %v5463_v34  ;;  %1113 = vmatpush2.msra.mxu0 %v1027_v35  ;;  %v5483_v29 = vld [vmem:[%s9521_s1 + $0x260] sm:$0xff]  ;;  %v5500_v30 = vld [vmem:[%s9521_s1 + $0x2e8] sm:$0xff]  ;;  %v5482_v32 = vld [vmem:[%s9521_s1 + $0x258] sm:$0xff] }
  0x62   : > { %6008 = vmatmul.mubr.f32.gmra.mxu1 %v985_v36  ;;  %1756 = vmatprep.subr.mxu1 %v9526_v40  ;;  %v997_v31 = vld [vmem:[#allocation3 + $0x12a] sm:$0xff]  ;;  %v6950_v34 = vld [vmem:[#allocation3 + $0x38] sm:$0xff]  ;;  %v5475_v50 = vld [vmem:[%s9521_s1 + $0x220] sm:$0xff] }
  0x63   : > { %1114 = vmatprep.subr.mxu0 %v9526_v40  ;;  %1757 = vmatpush1.msra.mxu1 %v5462_v37  ;;  %v998_v35 = vld [vmem:[#allocation3 + $0x13a] sm:$0xff]  ;;  %v5481_v36 = vld [vmem:[%s9521_s1 + $0x250] sm:$0xff]  ;;  %v999_v37 = vld [vmem:[#allocation3 + $0x142] sm:$0xff] }
  0x64   : > { %1115 = vmatpush2.msra.mxu0 %v1026_v39  ;;  %1758 = vmatprep.subr.mxu1 %v9526_v40  ;;  %v5480_v38 = vld [vmem:[%s9521_s1 + $0x248] sm:$0xff]  ;;  %v1000_v39 = vld [vmem:[#allocation3 + $0x152] sm:$0xff] }
  0x65   : > { %1116 = vmatprep.subr.mxu0 %v9526_v40  ;;  %6010 = vmatprep.mubr.f32.mxu1 %v986_v41  ;;  %v6962_v41 = vld [vmem:[#allocation3 + $0x48] sm:$0xff]  ;;  %v5498_v55 = vld [vmem:[%s9521_s1 + $0x2d8] sm:$0xff]  ;;  %v5497_v61 = vld [vmem:[%s9521_s1 + $0x2d0] sm:$0xff] }
  0x66   : > { %1759 = vmatpush1.msra.mxu1 %v5461_v42  ;;  %1117 = vmatpush2.msra.mxu0 %v1025_v43  ;;  %v5479_v42 = vld [vmem:[%s9521_s1 + $0x240] sm:$0xff]  ;;  %v1002_v45 = vld [vmem:[#allocation3 + $0x16a] sm:$0xff]  ;;  %v5514_v16 = vld [vmem:[%s9521_s1 + $0x358] sm:$0xff] }
  0x67   : > { %6011 = vmatmul.mubr.f32.gmra.mxu1 %v987_v44  ;;  %1760 = vmatprep.subr.mxu1 %v9526_v40  ;;  %v1001_v43 = vld [vmem:[#allocation3 + $0x15a] sm:$0xff]  ;;  %v7066_v13 = vld [vmem:[#allocation3 + $0xa8] sm:$0xff] }
  0x68   : > { %1118 = vmatprep.subr.mxu0 %v9526_v40  ;;  %1761 = vmatpush1.msra.mxu1 %v5460_v46  ;;  %v5499_v44 = vld [vmem:[%s9521_s1 + $0x2e0] sm:$0xff]  ;;  %v5477_v46 = vld [vmem:[%s9521_s1 + $0x230] sm:$0xff] }
  0x69   : > { %1119 = vmatpush2.msra.mxu0 %v1024_v47  ;;  %1762 = vmatprep.subr.mxu1 %v9526_v40  ;;  %v1003_v47 = vld [vmem:[#allocation3 + $0x172] sm:$0xff]  ;;  %v6484_v20 = vld [vmem:[#allocation3 + $0xc1] sm:$0xff]  ;;  %v7093_v22 = vld [vmem:[#allocation3 + $0xc9] sm:$0xff] }
  0x6a   : > { %1121 = vmatmul.mubr.f32.vlgmr.msra.gmra.mxu0 %v900_v48  ;;  %6013 = vmatprep.mubr.f32.mxu1 %v988_v49  ;;  %v6986_v48 = vld [vmem:[#allocation3 + $0x60] sm:$0xff] }
  0x6b   : > { %1763 = vmatpush1.msra.mxu1 %v5459_v51  ;;  %6043 = vmatprep.subr.mxu0 %v5502_v52  ;;  %v1004_v49 = vld [vmem:[#allocation3 + $0x182] sm:$0xff]  ;;  %v1005_v51 = vld [vmem:[#allocation3 + $0x18a] sm:$0xff]  ;;  %v7111_v27 = vld [vmem:[#allocation3 + $0xd9] sm:$0xff] }
  0x6c   : > { %6014 = vmatmul.mubr.f32.gmra.mxu1 %v989_v53  ;;  %1764 = vmatprep.subr.mxu1 %v9526_v40  ;;  %v6998_v53 = vld [vmem:[#allocation3 + $0x68] sm:$0xff] }
  0x6d   : > { %6044 = vmatpush3.msra.mxu0 %v5502_v52  ;;  %1765 = vmatpush1.msra.mxu1 %v5458_v54  ;;  %v5474_v52 = vld [vmem:[%s9521_s1 + $0x218] sm:$0xff]  ;;  %v5473_v54 = vld [vmem:[%s9521_s1 + $0x210] sm:$0xff] }
  0x6e   : > { %1125 = vmatprep.mubr.f32.mxu0 %v6639_v33  ;;  %1766 = vmatprep.subr.mxu1 %v9526_v40  ;;  %v5455_v33 = vld [vmem:[%s9521_s1 + $0x180] sm:$0xff] }
  0x6f   : > { %1126 = vmatmul.mubr.f32.gmra.mxu0 %v901_v56  ;;  %6016 = vmatprep.mubr.f32.mxu1 %v990_v57  ;;  %v1007_v56 = vld [vmem:[#allocation3 + $0x1a2] sm:$0xff]  ;;  %v7014_v57 = vld [vmem:[#allocation3 + $0x78] sm:$0xff] }
  0x70   : > { %1767 = vmatpush1.msra.mxu1 %v5457_v58  ;;  %1130 = vmatprep.mubr.f32.mxu0 %v6897_v60  ;;  %v5471_v58 = vld [vmem:[%s9521_s1 + $0x200] sm:$0xff] }
  0x71   : > { %6017 = vmatmul.mubr.f32.gmra.mxu1 %v991_v62  ;;  %1768 = vmatprep.subr.mxu1 %v9526_v40  ;;  %v7027_v62 = vld [vmem:[#allocation3 + $0x80] sm:$0xff] }
  0x72   : > { %1769 = vmatpush1.msra.mxu1 %v5456_v63  ;;  %6019 = vmatprep.mubr.f32.mxu1 %v992_v11  ;;  %v5496_v63 = vld [vmem:[%s9521_s1 + $0x2c8] sm:$0xff]  ;;  %v5518_v11 = vld [vmem:[%s9521_s1 + $0x378] sm:$0xff] }
  0x73   : > { %1770 = vmatprep.subr.mxu1 %v9526_v40  ;;  %1131 = vmatmul.mubr.f32.gmra.mxu0 %v6905_v12 }
  0x74   : > { %1771 = vmatpush1.msra.mxu1 %v5455_v33  ;;  %6045 = vmatprep.subr.mxu0 %v5501_v14  ;;  %v6481_v33 = vld [vmem:[#allocation3 + $0x49] sm:$0xff] }
  0x75   : > { %6020 = vmatmul.mubr.f32.gmra.mxu1 %v993_v15  ;;  %1772 = vmatprep.subr.mxu1 %v9526_v40  ;;  %v7077_v15 = vld [vmem:[#allocation3 + $0xb0] sm:$0xff] }
  0x76   : > { %1773 = vmatpush2.msra.mxu1 %v5486_v17  ;;  %6046 = vmatpush3.msra.mxu0 %v5501_v14  ;;  %v6482_v14 = vld [vmem:[#allocation3 + $0xb1] sm:$0xff] }
  0x77   : > { %1135 = vmatprep.mubr.f32.mxu0 %v6919_v18  ;;  %1774 = vmatprep.subr.mxu1 %v9526_v40  ;;  %v6483_v17 = vld [vmem:[#allocation3 + $0x51] sm:$0xff] }
  0x78   : > { %1136 = vmatmul.mubr.f32.gmra.mxu0 %v6715_v59  ;;  %6022 = vmatprep.mubr.f32.mxu1 %v994_v19  ;;  %v5513_v19 = vld [vmem:[%s9521_s1 + $0x350] sm:$0xff] }
  0x79   : > { %1775 = vmatpush2.msra.mxu1 %v5485_v21  ;;  %1140 = vmatprep.mubr.f32.mxu0 %v6579_v0  ;;  %v7090_v21 = vld [vmem:[#allocation3 + $0xc0] sm:$0xff] }
  0x7a   : > { %6023 = vmatmul.mubr.f32.gmra.mxu1 %v995_v23  ;;  %1776 = vmatprep.subr.mxu1 %v9526_v40  ;;  %v5492_v23 = vld [vmem:[%s9521_s1 + $0x2a8] sm:$0xff] }
  0x7b   : > { %1777 = vmatpush2.msra.mxu1 %v5484_v25  ;;  %6025 = vmatprep.mubr.f32.mxu1 %v996_v26  ;;  %v7101_v25 = vld [vmem:[#allocation3 + $0x69] sm:$0xff] }
  0x7c   : > { %1778 = vmatprep.subr.mxu1 %v9526_v40  ;;  %1141 = vmatmul.mubr.f32.gmra.mxu0 %v6935_v28  ;;  %v7108_v26 = vld [vmem:[#allocation3 + $0xc8] sm:$0xff] }
  0x7d   : > { %1779 = vmatpush2.msra.mxu1 %v5483_v29  ;;  %6047 = vmatprep.subr.mxu0 %v5500_v30  ;;  %v7118_v29 = vld [vmem:[#allocation3 + $0x79] sm:$0xff] }
  0x7e   : > { %6026 = vmatmul.mubr.f32.gmra.mxu1 %v997_v31  ;;  %1780 = vmatprep.subr.mxu1 %v9526_v40  ;;  %v7125_v31 = vld [vmem:[#allocation3 + $0xd8] sm:$0xff] }
  0x7f   : > { %1781 = vmatpush2.msra.mxu1 %v5482_v32  ;;  %1145 = vmatprep.mubr.f32.mxu0 %v6582_v1  ;;  %v5510_v32 = vld [vmem:[%s9521_s1 + $0x338] sm:$0xff] }
  0x80   : > { %1782 = vmatprep.subr.mxu1 %v9526_v40  ;;  %6048 = vmatpush3.msra.mxu0 %v5500_v30  ;;  %v5491_v30 = vld [vmem:[%s9521_s1 + $0x2a0] sm:$0xff] }
  0x81   : > { %1146 = vmatmul.mubr.f32.gmra.mxu0 %v6950_v34  ;;  %6028 = vmatprep.mubr.f32.mxu1 %v998_v35  ;;  %v7136_v35 = vld [vmem:[#allocation3 + $0x81] sm:$0xff] }
  0x82   : > { %1783 = vmatpush2.msra.mxu1 %v5481_v36  ;;  %1150 = vmatprep.mubr.f32.mxu0 %v6585_v2  ;;  %v5478_v2 = vld [vmem:[%s9521_s1 + $0x238] sm:$0xff]  ;;  %v5509_v36 = vld [vmem:[%s9521_s1 + $0x330] sm:$0xff] }
  0x83   : > { %6029 = vmatmul.mubr.f32.gmra.mxu1 %v999_v37  ;;  %1784 = vmatprep.subr.mxu1 %v9526_v40  ;;  %v7142_v37 = vld [vmem:[#allocation3 + $0xe0] sm:$0xff] }
  0x84   : > { %1785 = vmatpush2.msra.mxu1 %v5480_v38  ;;  %6031 = vmatprep.mubr.f32.mxu1 %v1000_v39  ;;  %v7145_v38 = vld [vmem:[#allocation3 + $0xf1] sm:$0xff] }
  0x85   : > { %1786 = vmatprep.subr.mxu1 %v9526_v40  ;;  %1151 = vmatmul.mubr.f32.gmra.mxu0 %v6962_v41  ;;  %v5490_v39 = vld [vmem:[%s9521_s1 + $0x298] sm:$0xff] }
  0x86   : > { %1787 = vmatpush2.msra.mxu1 %v5479_v42  ;;  %1155 = vmatprep.mubr.f32.mxu0 %v6588_v3  ;;  %v5476_v3 = vld [vmem:[%s9521_s1 + $0x228] sm:$0xff] }
  0x87   : > { %6032 = vmatmul.mubr.f32.gmra.mxu1 %v1001_v43  ;;  %1788 = vmatprep.subr.mxu1 %v9526_v40  ;;  %v5508_v42 = vld [vmem:[%s9521_s1 + $0x328] sm:$0xff]  ;;  %v871_v43 = vld [vmem:[#allocation3 + $0x1bf] sm:$0x1] }
  0x88   : > { %1789 = vmatpush2.msra.mxu1 %v5478_v2  ;;  %6049 = vmatprep.subr.mxu0 %v5499_v44  ;;  %v7160_v2 = vld [vmem:[#allocation3 + $0xf0] sm:$0xff]  ;;  %891 = vst [vmem:[#allocation3 + $0x1c1] sm:$0x1] %v871_v43  ;;  %v7377_v43 = vld [vmem:[#allocation3 + $0x198] sm:$0xff] }
  0x89   : > { %1790 = vmatprep.subr.mxu1 %v9526_v40  ;;  %1156 = vmatmul.mubr.f32.gmra.mxu0 %v6715_v59 }
  0x8a   : > { %6034 = vmatprep.mubr.f32.mxu1 %v1002_v45  ;;  %1791 = vmatpush2.msra.mxu1 %v5477_v46  ;;  %v5507_v45 = vld [vmem:[%s9521_s1 + $0x320] sm:$0xff] }
  0x8b   : > { %6050 = vmatpush3.msra.mxu0 %v5499_v44  ;;  %6035 = vmatmul.mubr.f32.gmra.mxu1 %v1003_v47  ;;  %v7163_v44 = vld [vmem:[#allocation3 + $0xf9] sm:$0xff]  ;;  %v5489_v47 = vld [vmem:[%s9521_s1 + $0x290] sm:$0xff] }
  0x8c   : > { %1792 = vmatprep.subr.mxu1 %v9526_v40  ;;  %1160 = vmatprep.mubr.f32.mxu0 %v6591_v4  ;;  %v1006_v4 = vld [vmem:[#allocation3 + $0x19a] sm:$0xff] }
  0x8d   : > { %1793 = vmatpush2.msra.mxu1 %v5476_v3  ;;  %1161 = vmatmul.mubr.f32.gmra.mxu0 %v6986_v48  ;;  %v7170_v46 = vld [vmem:[#allocation3 + $0x99] sm:$0xff] }
  0x8e   : > { %1794 = vmatprep.subr.mxu1 %v9526_v40  ;;  %6037 = vmatprep.mubr.f32.mxu1 %v1004_v49  ;;  %v7177_v3 = vld [vmem:[#allocation3 + $0xf8] sm:$0xff]  ;;  %v7183_v49 = vld [vmem:[#allocation3 + $0x109] sm:$0xff] }
  0x8f   : > { %1795 = vmatpush2.msra.mxu1 %v5475_v50  ;;  %1165 = vmatprep.mubr.f32.mxu0 %v6594_v5  ;;  %v5472_v5 = vld [vmem:[%s9521_s1 + $0x208] sm:$0xff] }
  0x90   : > { %6038 = vmatmul.mubr.f32.gmra.mxu1 %v1005_v51  ;;  %1796 = vmatprep.subr.mxu1 %v9526_v40  ;;  %v7188_v50 = vld [vmem:[#allocation3 + $0xa9] sm:$0xff] }
  0x91   : > { %1797 = vmatpush2.msra.mxu1 %v5474_v52  ;;  %1166 = vmatmul.mubr.f32.gmra.mxu0 %v6998_v53  ;;  %v5505_v51 = vld [vmem:[%s9521_s1 + $0x310] sm:$0xff]  ;;  %v7194_v52 = vld [vmem:[#allocation3 + $0x108] sm:$0xff] }
  0x92   : > { %1798 = vmatprep.subr.mxu1 %v9526_v40  ;;  %6040 = vmatprep.mubr.f32.mxu1 %v1006_v4  ;;  %v5488_v4 = vld [vmem:[%s9521_s1 + $0x288] sm:$0xff] }
  0x93   : > { %1799 = vmatpush2.msra.mxu1 %v5473_v54  ;;  %6051 = vmatprep.subr.mxu0 %v5498_v55  ;;  %v7205_v54 = vld [vmem:[#allocation3 + $0xb1] sm:$0xff] }
  0x94   : > { %6041 = vmatmul.mubr.f32.gmra.mxu1 %v1007_v56  ;;  %1800 = vmatprep.subr.mxu1 %v9526_v40  ;;  %v7212_v56 = vld [vmem:[#allocation3 + $0x110] sm:$0xff] }
  0x95   : > { %6052 = vmatpush3.msra.mxu0 %v5498_v55  ;;  %1801 = vmatpush2.msra.mxu1 %v5472_v5  ;;  %v5504_v55 = vld [vmem:[%s9521_s1 + $0x308] sm:$0xff] }
  0x96   : > { %1170 = vmatprep.mubr.f32.mxu0 %v6597_v6  ;;  %1802 = vmatprep.subr.mxu1 %v9526_v40  ;;  %v831_v6 = vld [vmem:[#allocation3 + $0x1b2] sm:$0x1]  ;;  %v7215_v5 = vld [vmem:[#allocation3 + $0x121] sm:$0xff] }
  0x97   : > { %1171 = vmatmul.mubr.f32.gmra.mxu0 %v7014_v57  ;;  %1803 = vmatpush2.msra.mxu1 %v5471_v58  ;;  %851 = vst [vmem:[#allocation3 + $0x1b0] sm:$0x1] %v831_v6  ;;  %v7222_v58 = vld [vmem:[#allocation3 + $0xc1] sm:$0xff]  ;;  %v7235_v6 = vld [vmem:[#allocation3 + $0x129] sm:$0xff] }
  0x98   : > { %1804 = vmatprep.mubr.f32.mxu1 %v6897_v60  ;;  %1175 = vmatprep.mubr.f32.mxu0 %v6600_v7  ;;  %v5495_v7 = vld [vmem:[%s9521_s1 + $0x2c0] sm:$0xff]  ;;  %v7039_v60 = vld [vmem:[#allocation3 + $0x90] sm:$0xff] }
  0x99   : > { %1805 = vmatmul.mubr.f32.vlgmr.msra.gmra.mxu1 %v6905_v12  ;;  %6053 = vmatprep.subr.mxu0 %v5497_v61  ;;  %v7052_v12 = vld [vmem:[#allocation3 + $0x98] sm:$0xff] }
  0x9a   : > { %1809 = vmatprep.mubr.f32.mxu1 %v6919_v18  ;;  %6054 = vmatpush3.msra.mxu0 %v5497_v61  ;;  %v7085_v18 = vld [vmem:[#allocation3 + $0x61] sm:$0xff] }
  0x9b   : > { %1176 = vmatmul.mubr.f32.gmra.mxu0 %v7027_v62  ;;  %6055 = vmatprep.subr.mxu0 %v5496_v63  ;;  %v5487_v61 = vld [vmem:[%s9521_s1 + $0x280] sm:$0xff] }
  0x9c   : > { %1180 = vmatprep.mubr.f32.mxu0 %v6603_v8  ;;  %6056 = vmatpush3.msra.mxu0 %v5496_v63  ;;  %v5517_v8 = vld [vmem:[%s9521_s1 + $0x370] sm:$0xff]  ;;  %v5534_v63 = vld [vmem:[%s9521_s1 + $0x3f8] sm:$0xff] }
  0x9d   : > { %1810 = vmatmul.mubr.f32.gmra.mxu1 %v6715_v59  ;;  %2424 = vmatprep.subr.mxu1 %v9526_v40 }
  0x9e   : > { %1814 = vmatprep.mubr.f32.mxu1 %v6579_v0  ;;  %6057 = vmatprep.subr.mxu0 %v5495_v7  ;;  %v5494_v0 = vld [vmem:[%s9521_s1 + $0x2b8] sm:$0xff] }
  0x9f   : > { %1181 = vmatmul.mubr.f32.gmra.mxu0 %v7039_v60  ;;  %2425 = vmatpush1.msra.mxu1 %v5518_v11  ;;  %v7247_v11 = vld [vmem:[#allocation3 + $0x139] sm:$0xff] }
  0xa0   : > { %1185 = vmatprep.mubr.f32.mxu0 %v6611_v9  ;;  %6058 = vmatpush3.msra.mxu0 %v5495_v7  ;;  %v5516_v9 = vld [vmem:[%s9521_s1 + $0x368] sm:$0xff]  ;;  %v5533_v7 = vld [vmem:[%s9521_s1 + $0x3f0] sm:$0xff] }
  0xa1   : > { %1815 = vmatmul.mubr.f32.gmra.mxu1 %v6935_v28  ;;  %2426 = vmatprep.subr.mxu1 %v9526_v40  ;;  %v5511_v28 = vld [vmem:[%s9521_s1 + $0x340] sm:$0xff] }
  0xa2   : > { %1819 = vmatprep.mubr.f32.mxu1 %v6582_v1  ;;  %2427 = vmatpush1.msra.mxu1 %v5517_v8  ;;  %v5515_v1 = vld [vmem:[%s9521_s1 + $0x360] sm:$0xff]  ;;  %v5532_v8 = vld [vmem:[%s9521_s1 + $0x3e8] sm:$0xff] }
  0xa3   : > { %1186 = vmatmul.mubr.f32.gmra.mxu0 %v7052_v12  ;;  %2428 = vmatprep.subr.mxu1 %v9526_v40 }
  0xa4   : > { %1190 = vmatprep.mubr.f32.mxu0 %v6614_v10  ;;  %6059 = vmatprep.subr.mxu0 %v5494_v0  ;;  %v5493_v10 = vld [vmem:[%s9521_s1 + $0x2b0] sm:$0xff] }
  0xa5   : > { %1820 = vmatmul.mubr.f32.gmra.mxu1 %v6950_v34  ;;  %6060 = vmatpush3.msra.mxu0 %v5494_v0  ;;  %v7131_v34 = vld [vmem:[#allocation3 + $0xe1] sm:$0xff]  ;;  %v7262_v0 = vld [vmem:[#allocation3 + $0x138] sm:$0xff] }
  0xa6   : > { %1824 = vmatprep.mubr.f32.mxu1 %v6481_v33  ;;  %2429 = vmatpush1.msra.mxu1 %v5516_v9  ;;  %v5531_v9 = vld [vmem:[%s9521_s1 + $0x3e0] sm:$0xff] }
  0xa7   : > { %1191 = vmatmul.mubr.f32.gmra.mxu0 %v7066_v13  ;;  %2430 = vmatprep.subr.mxu1 %v9526_v40  ;;  %v7278_v33 = vld [vmem:[#allocation3 + $0x140] sm:$0xff] }
  0xa8   : > { %1195 = vmatprep.mubr.f32.mxu0 %v6482_v14  ;;  %2431 = vmatpush1.msra.mxu1 %v5515_v1  ;;  %v5530_v1 = vld [vmem:[%s9521_s1 + $0x3d8] sm:$0xff]  ;;  %v5529_v14 = vld [vmem:[%s9521_s1 + $0x3d0] sm:$0xff] }
  0xa9   : > { %1825 = vmatmul.mubr.f32.gmra.mxu1 %v6962_v41  ;;  %2432 = vmatprep.subr.mxu1 %v9526_v40  ;;  %v7153_v41 = vld [vmem:[#allocation3 + $0x91] sm:$0xff] }
  0xaa   : > { %1829 = vmatprep.mubr.f32.mxu1 %v6483_v17  ;;  %6061 = vmatprep.subr.mxu0 %v5493_v10  ;;  %v7297_v17 = vld [vmem:[#allocation3 + $0x159] sm:$0xff] }
  0xab   : > { %1196 = vmatmul.mubr.f32.gmra.mxu0 %v7077_v15  ;;  %2433 = vmatpush1.msra.mxu1 %v5514_v16  ;;  %v7294_v16 = vld [vmem:[#allocation3 + $0x150] sm:$0xff] }
  0xac   : > { %1200 = vmatprep.mubr.f32.mxu0 %v6484_v20  ;;  %6062 = vmatpush3.msra.mxu0 %v5493_v10  ;;  %v7282_v10 = vld [vmem:[#allocation3 + $0x151] sm:$0xff] }
  0xad   : > { %1830 = vmatmul.mubr.f32.gmra.mxu1 %v6715_v59  ;;  %2434 = vmatprep.subr.mxu1 %v9526_v40  ;;  %v5512_v59 = vld [vmem:[%s9521_s1 + $0x348] sm:$0xff]  ;;  %v5526_v20 = vld [vmem:[%s9521_s1 + $0x3b8] sm:$0xff] }
  0xae   : > { %1834 = vmatprep.mubr.f32.mxu1 %v7085_v18  ;;  %2435 = vmatpush1.msra.mxu1 %v5513_v19  ;;  %v5527_v19 = vld [vmem:[%s9521_s1 + $0x3c0] sm:$0xff] }
  0xaf   : > { %1201 = vmatmul.mubr.f32.gmra.mxu0 %v7090_v21  ;;  %2436 = vmatprep.subr.mxu1 %v9526_v40 }
  0xb0   : > { %1205 = vmatprep.mubr.f32.mxu0 %v7093_v22  ;;  %6063 = vmatprep.subr.mxu0 %v5492_v23 }
  0xb1   : > { %1835 = vmatmul.mubr.f32.gmra.mxu1 %v6986_v48  ;;  %6064 = vmatpush3.msra.mxu0 %v5492_v23  ;;  %v5506_v48 = vld [vmem:[%s9521_s1 + $0x318] sm:$0xff]  ;;  %v5525_v23 = vld [vmem:[%s9521_s1 + $0x3b0] sm:$0xff] }
  0xb2   : > { %1839 = vmatprep.mubr.f32.mxu1 %v7101_v25  ;;  %2437 = vmatpush1.msra.mxu1 %v5512_v59  ;;  %v5524_v59 = vld [vmem:[%s9521_s1 + $0x3a8] sm:$0xff] }
  0xb3   : > { %1206 = vmatmul.mubr.f32.gmra.mxu0 %v7108_v26  ;;  %2438 = vmatprep.subr.mxu1 %v9526_v40 }
  0xb4   : > { %1210 = vmatprep.mubr.f32.mxu0 %v7111_v27  ;;  %2439 = vmatpush1.msra.mxu1 %v5511_v28  ;;  %v5523_v28 = vld [vmem:[%s9521_s1 + $0x3a0] sm:$0xff] }
  0xb5   : > { %1840 = vmatmul.mubr.f32.gmra.mxu1 %v6998_v53  ;;  %2440 = vmatprep.subr.mxu1 %v9526_v40  ;;  %v7197_v53 = vld [vmem:[#allocation3 + $0x111] sm:$0xff] }
  0xb6   : > { %1844 = vmatprep.mubr.f32.mxu1 %v7118_v29  ;;  %6065 = vmatprep.subr.mxu0 %v5491_v30 }
  0xb7   : > { %1211 = vmatmul.mubr.f32.gmra.mxu0 %v7125_v31  ;;  %2441 = vmatpush1.msra.mxu1 %v5510_v32  ;;  %v7345_v32 = vld [vmem:[#allocation3 + $0x181] sm:$0xff] }
  0xb8   : > { %1215 = vmatprep.mubr.f32.mxu0 %v7131_v34  ;;  %6066 = vmatpush3.msra.mxu0 %v5491_v30  ;;  %v5522_v30 = vld [vmem:[%s9521_s1 + $0x398] sm:$0xff] }
  0xb9   : > { %1845 = vmatmul.mubr.f32.gmra.mxu1 %v7014_v57  ;;  %2442 = vmatprep.subr.mxu1 %v9526_v40  ;;  %v5503_v57 = vld [vmem:[%s9521_s1 + $0x300] sm:$0xff] }
  0xba   : > { %1849 = vmatprep.mubr.f32.mxu1 %v7136_v35  ;;  %2443 = vmatpush1.msra.mxu1 %v5509_v36  ;;  %v5520_v36 = vld [vmem:[%s9521_s1 + $0x388] sm:$0xff] }
  0xbb   : > { %1216 = vmatmul.mubr.f32.gmra.mxu0 %v7142_v37  ;;  %2444 = vmatprep.subr.mxu1 %v9526_v40 }
  0xbc   : > { %1220 = vmatprep.mubr.f32.mxu0 %v7145_v38  ;;  %6067 = vmatprep.subr.mxu0 %v5490_v39 }
  0xbd   : > { %1850 = vmatmul.mubr.f32.gmra.mxu1 %v7027_v62  ;;  %6068 = vmatpush3.msra.mxu0 %v5490_v39  ;;  %v7229_v62 = vld [vmem:[#allocation3 + $0x120] sm:$0xff] }
  0xbe   : > { %1854 = vmatprep.mubr.f32.mxu1 %v7153_v41  ;;  %2445 = vmatpush1.msra.mxu1 %v5508_v42  ;;  %v5519_v39 = vld [vmem:[%s9521_s1 + $0x380] sm:$0xff] }
  0xbf   : > { %1221 = vmatmul.mubr.f32.gmra.mxu0 %v7160_v2  ;;  %2446 = vmatprep.subr.mxu1 %v9526_v40  ;;  %v7372_v42 = vld [vmem:[#allocation3 + $0x199] sm:$0xff] }
  0xc0   : > { %1225 = vmatprep.mubr.f32.mxu0 %v7163_v44  ;;  %2447 = vmatpush1.msra.mxu1 %v5507_v45  ;;  %v1655_v45 = vld [vmem:[#allocation3 + $0x1a] sm:$0xff] }
  0xc1   : > { %1855 = vmatmul.mubr.f32.gmra.mxu1 %v7039_v60  ;;  %2448 = vmatprep.subr.mxu1 %v9526_v40  ;;  %v7244_v60 = vld [vmem:[#allocation3 + $0x128] sm:$0xff] }
  0xc2   : > { %1859 = vmatprep.mubr.f32.mxu1 %v7170_v46  ;;  %6069 = vmatprep.subr.mxu0 %v5489_v47 }
  0xc3   : > { %1226 = vmatmul.mubr.f32.gmra.mxu0 %v7177_v3  ;;  %2449 = vmatpush1.msra.mxu1 %v5506_v48  ;;  %v5549_v48 = vld [vmem:[%s9521_s1 + $0x470] sm:$0xff] }
  0xc4   : > { %1230 = vmatprep.mubr.f32.mxu0 %v7183_v49  ;;  %6070 = vmatpush3.msra.mxu0 %v5489_v47  ;;  %v1656_v47 = vld [vmem:[#allocation3 + $0x22] sm:$0xff] }
  0xc5   : > { %1860 = vmatmul.mubr.f32.gmra.mxu1 %v7052_v12  ;;  %2450 = vmatprep.subr.mxu1 %v9526_v40  ;;  %v7257_v12 = vld [vmem:[%s9521_s1 + $0x478] sm:$0xff] }
  0xc6   : > { %1864 = vmatprep.mubr.f32.mxu1 %v7188_v50  ;;  %2451 = vmatpush1.msra.mxu1 %v5505_v51  ;;  %v5548_v51 = vld [vmem:[%s9521_s1 + $0x468] sm:$0xff] }
  0xc7   : > { %1231 = vmatmul.mubr.f32.gmra.mxu0 %v7194_v52  ;;  %2452 = vmatprep.subr.mxu1 %v9526_v40 }
  0xc8   : > { %1235 = vmatprep.mubr.f32.mxu0 %v7197_v53  ;;  %6071 = vmatprep.subr.mxu0 %v5488_v4 }
  0xc9   : > { %1865 = vmatmul.mubr.f32.gmra.mxu1 %v7066_v13  ;;  %6072 = vmatpush3.msra.mxu0 %v5488_v4  ;;  %v7268_v13 = vld [vmem:[#allocation3 + $0x141] sm:$0xff]  ;;  %v7413_v4 = vld [vmem:[#allocation3 + $0x52] sm:$0xff] }
  0xca   : > { %1869 = vmatprep.mubr.f32.mxu1 %v7205_v54  ;;  %2453 = vmatpush1.msra.mxu1 %v5504_v55  ;;  %v5546_v55 = vld [vmem:[%s9521_s1 + $0x458] sm:$0xff] }
  0xcb   : > { %1236 = vmatmul.mubr.f32.gmra.mxu0 %v7212_v56  ;;  %2454 = vmatprep.subr.mxu1 %v9526_v40 }
  0xcc   : > { %1240 = vmatprep.mubr.f32.mxu0 %v7215_v5  ;;  %2455 = vmatpush1.msra.mxu1 %v5503_v57  ;;  %v7427_v57 = vld [vmem:[#allocation3 + $0x6a] sm:$0xff] }
  0xcd   : > { %1870 = vmatmul.mubr.f32.gmra.mxu1 %v7077_v15  ;;  %2456 = vmatprep.subr.mxu1 %v9526_v40  ;;  %v5528_v15 = vld [vmem:[%s9521_s1 + $0x3c8] sm:$0xff] }
  0xce   : > { %1874 = vmatprep.mubr.f32.mxu1 %v7222_v58  ;;  %6073 = vmatprep.subr.mxu0 %v5487_v61 }
  0xcf   : > { %1241 = vmatmul.mubr.f32.gmra.mxu0 %v7229_v62  ;;  %2457 = vmatpush2.msra.mxu1 %v5534_v63  ;;  %v7435_v63 = vld [vmem:[#allocation3 + $0x7a] sm:$0xff] }
  0xd0   : > { %1245 = vmatprep.mubr.f32.mxu0 %v7235_v6  ;;  %6074 = vmatpush3.msra.mxu0 %v5487_v61 }
  0xd1   : > { %1875 = vmatmul.mubr.f32.gmra.mxu1 %v7090_v21  ;;  %2458 = vmatprep.subr.mxu1 %v9526_v40  ;;  %v7310_v21 = vld [vmem:[#allocation3 + $0x158] sm:$0xff] }
  0xd2   : > { %1879 = vmatprep.mubr.f32.mxu1 %v7093_v22  ;;  %2459 = vmatpush2.msra.mxu1 %v5533_v7  ;;  %v7313_v22 = vld [vmem:[#allocation3 + $0x169] sm:$0xff]  ;;  %v5543_v7 = vld [vmem:[%s9521_s1 + $0x440] sm:$0xff] }
  0xd3   : > { %1246 = vmatmul.mubr.f32.gmra.mxu0 %v7244_v60  ;;  %2460 = vmatprep.subr.mxu1 %v9526_v40 }
  0xd4   : > { %1250 = vmatprep.mubr.f32.mxu0 %v7247_v11  ;;  %2461 = vmatpush2.msra.mxu1 %v5532_v8  ;;  %v5542_v8 = vld [vmem:[%s9521_s1 + $0x438] sm:$0xff] }
  0xd5   : > { %1880 = vmatmul.mubr.f32.gmra.mxu1 %v7108_v26  ;;  %6129 = vmatprep.subr.mxu0 %v7257_v12  ;;  %v7326_v26 = vld [vmem:[#allocation3 + $0x168] sm:$0xff] }
  0xd6   : > { %1884 = vmatprep.mubr.f32.mxu1 %v7111_v27  ;;  %2462 = vmatprep.subr.mxu1 %v9526_v40  ;;  %v7329_v27 = vld [vmem:[#allocation3 + $0x171] sm:$0xff] }
  0xd7   : > { %1251 = vmatmul.mubr.f32.gmra.mxu0 %v7262_v0  ;;  %2463 = vmatpush2.msra.mxu1 %v5531_v9  ;;  %v5541_v9 = vld [vmem:[%s9521_s1 + $0x430] sm:$0xff] }
  0xd8   : > { %1255 = vmatprep.mubr.f32.mxu0 %v7268_v13  ;;  %2464 = vmatprep.subr.mxu1 %v9526_v40 }
  0xd9   : > { %1885 = vmatmul.mubr.f32.gmra.mxu1 %v7125_v31  ;;  %v7342_v31 = vld [vmem:[#allocation3 + $0x170] sm:$0xff] }
  0xda   : > { %1889 = vmatprep.mubr.f32.mxu1 %v7131_v34  ;;  %2465 = vmatpush2.msra.mxu1 %v5530_v1  ;;  %v5521_v34 = vld [vmem:[%s9521_s1 + $0x390] sm:$0xff] }
  0xdb   : > { %1256 = vmatmul.mubr.f32.gmra.mxu0 %v7278_v33  ;;  %2466 = vmatprep.subr.mxu1 %v9526_v40 }
  0xdc   : > { %1260 = vmatprep.mubr.f32.mxu0 %v7282_v10  ;;  %2467 = vmatpush2.msra.mxu1 %v5529_v14 }
  0xdd   : > { %1890 = vmatmul.mubr.f32.gmra.mxu1 %v7142_v37  ;;  %2468 = vmatprep.subr.mxu1 %v9526_v40  ;;  %v7358_v37 = vld [vmem:[#allocation3 + $0x180] sm:$0xff] }
  0xde   : > { %1894 = vmatprep.mubr.f32.mxu1 %v7145_v38  ;;  %2469 = vmatpush2.msra.mxu1 %v5528_v15  ;;  %v7361_v38 = vld [vmem:[#allocation3 + $0x189] sm:$0xff]  ;;  %v5539_v15 = vld [vmem:[%s9521_s1 + $0x420] sm:$0xff] }
  0xdf   : > { %1261 = vmatmul.mubr.f32.gmra.mxu0 %v7294_v16  ;;  %2470 = vmatprep.subr.mxu1 %v9526_v40 }
  0xe0   : > { %1265 = vmatprep.mubr.f32.mxu0 %v7297_v17  ;;  %2471 = vmatpush2.msra.mxu1 %v5527_v19  ;;  %v5538_v19 = vld [vmem:[%s9521_s1 + $0x418] sm:$0xff] }
  0xe1   : > { %1895 = vmatmul.mubr.f32.gmra.mxu1 %v7160_v2  ;;  %2472 = vmatprep.subr.mxu1 %v9526_v40  ;;  %v7380_v2 = vld [vmem:[#allocation3 + $0x1a1] sm:$0xff] }
  0xe2   : > { %1899 = vmatprep.mubr.f32.mxu1 %v7163_v44  ;;  %2473 = vmatpush2.msra.mxu1 %v5526_v20  ;;  %v7385_v44 = vld [vmem:[#allocation3 + $0x1a0] sm:$0xff] }
  0xe3   : > { %1266 = vmatmul.mubr.f32.gmra.mxu0 %v7310_v21  ;;  %2474 = vmatprep.subr.mxu1 %v9526_v40  ;;  %v7489_v20 = vld [vmem:[#allocation3 + $0xc2] sm:$0xff] }
  0xe4   : > { %1270 = vmatprep.mubr.f32.mxu0 %v7313_v22  ;;  %2475 = vmatpush2.msra.mxu1 %v5525_v23  ;;  %v7499_v23 = vld [vmem:[#allocation3 + $0xca] sm:$0xff] }
  0xe5   : > { %1900 = vmatmul.mubr.f32.gmra.mxu1 %v7177_v3  ;;  %2476 = vmatprep.subr.mxu1 %v9526_v40  ;;  %v7391_v3 = vld [vmem:[#allocation3 + $0x32] sm:$0xff] }
  0xe6   : > { %1904 = vmatprep.mubr.f32.mxu1 %v7183_v49  ;;  %2477 = vmatpush2.msra.mxu1 %v5524_v59  ;;  %v7399_v49 = vld [vmem:[#allocation3 + $0x3a] sm:$0xff]  ;;  %v5536_v59 = vld [vmem:[%s9521_s1 + $0x408] sm:$0xff] }
  0xe7   : > { %1271 = vmatmul.mubr.f32.gmra.mxu0 %v7326_v26  ;;  %2478 = vmatprep.subr.mxu1 %v9526_v40 }
  0xe8   : > { %1275 = vmatprep.mubr.f32.mxu0 %v7329_v27  ;;  %2479 = vmatpush2.msra.mxu1 %v5523_v28  ;;  %v5535_v28 = vld [vmem:[%s9521_s1 + $0x400] sm:$0xff] }
  0xe9   : > { %1905 = vmatmul.mubr.f32.gmra.mxu1 %v7194_v52  ;;  %2480 = vmatprep.subr.mxu1 %v9526_v40  ;;  %v7405_v52 = vld [vmem:[#allocation3 + $0x4a] sm:$0xff] }
  0xea   : > { %1909 = vmatprep.mubr.f32.mxu1 %v7197_v53  ;;  %2481 = vmatpush2.msra.mxu1 %v5522_v30  ;;  %v5547_v53 = vld [vmem:[%s9521_s1 + $0x460] sm:$0xff]  ;;  %v7516_v30 = vld [vmem:[#allocation3 + $0x1b1] sm:$0xff] }
  0xeb   : > { %1276 = vmatmul.mubr.f32.gmra.mxu0 %v7342_v31  ;;  %2482 = vmatprep.subr.mxu1 %v9526_v40 }
  0xec   : > { %1280 = vmatprep.mubr.f32.mxu0 %v7345_v32  ;;  %2483 = vmatpush2.msra.mxu1 %v5521_v34 }
  0xed   : > { %1910 = vmatmul.mubr.f32.gmra.mxu1 %v7212_v56  ;;  %2484 = vmatprep.subr.mxu1 %v9526_v40  ;;  %v7419_v56 = vld [vmem:[#allocation3 + $0x62] sm:$0xff] }
  0xee   : > { %1914 = vmatprep.mubr.f32.mxu1 %v7215_v5  ;;  %2485 = vmatpush2.msra.mxu1 %v5520_v36  ;;  %v5545_v5 = vld [vmem:[%s9521_s1 + $0x450] sm:$0xff] }
  0xef   : > { %1281 = vmatmul.mubr.f32.gmra.mxu0 %v7358_v37  ;;  %2486 = vmatprep.subr.mxu1 %v9526_v40  ;;  %v7527_v36 = vld [vmem:[#allocation3 + $0x1b0] sm:$0xff] }
  0xf0   : > { %1285 = vmatprep.mubr.f32.mxu0 %v7361_v38  ;;  %2487 = vmatpush2.msra.mxu1 %v5519_v39  ;;  %v7536_v39 = vld [vmem:[#allocation3 + $0xfa] sm:$0xff] }
  0xf1   : > { %1915 = vmatmul.mubr.f32.gmra.mxu1 %v7229_v62  ;;  %v5544_v62 = vld [vmem:[%s9521_s1 + $0x448] sm:$0xff] }
  0xf2   : > { %1919 = vmatprep.mubr.f32.mxu1 %v7235_v6 }
  0xf3   : > { %1286 = vmatmul.mubr.f32.gmra.mxu0 %v6927_v24 }
  0xf4   : > { %1290 = vmatprep.mubr.f32.mxu0 %v7372_v42 }
  0xf5   : > { %1920 = vmatmul.mubr.f32.gmra.mxu1 %v7244_v60  ;;  %v7445_v60 = vld [vmem:[#allocation3 + $0x82] sm:$0xff] }
  0xf6   : > { %1924 = vmatprep.mubr.f32.mxu1 %v7247_v11 }
  0xf7   : > { %1291 = vmatmul.mubr.f32.gmra.mxu0 %v7377_v43 }
  0xf8   : > { %1295 = vmatprep.mubr.f32.mxu0 %v7380_v2 }
  0xf9   : > { %1925 = vmatmul.mubr.f32.gmra.mxu1 %v7262_v0 }
  0xfa   : > { %1929 = vmatprep.mubr.f32.mxu1 %v7268_v13  ;;  %v7463_v13 = vld [vmem:[#allocation3 + $0x9a] sm:$0xff] }
  0xfb   : > { %1296 = vmatmul.mubr.f32.gmra.mxu0 %v7385_v44 }
  0xfc   : > { %6075 = vmatprep.mubr.f32.mxu0 %v1655_v45 }
  0xfd   : > { %1930 = vmatmul.mubr.f32.gmra.mxu1 %v7278_v33  ;;  %v5540_v33 = vld [vmem:[%s9521_s1 + $0x428] sm:$0xff] }
  0xfe   : > { %1934 = vmatprep.mubr.f32.mxu1 %v7282_v10  ;;  %v7471_v10 = vld [vmem:[#allocation3 + $0xaa] sm:$0xff] }
  0xff   : > { %6076 = vmatmul.mubr.f32.vlgmr.msra.gmra.mxu0 %v1656_v47  ;;  %v7550_v47 = vld [vmem:[#allocation3 + $0x1b8] sm:$0xff] }
 0x100   : > { %6130 = vmatpush3.msra.mxu0 %v7257_v12  ;;  %6078 = vmatprep.mubr.f32.mxu0 %v7391_v3  ;;  %v7453_v12 = vld [vmem:[#allocation3 + $0x92] sm:$0xff]  ;;  %9537 = vst [vmem:[#allocation15_spill] sm:$0xff] %v7550_v47 }
 0x101   : > { %1935 = vmatmul.mubr.f32.gmra.mxu1 %v7294_v16  ;;  %6131 = vmatprep.subr.mxu0 %v5549_v48  ;;  %v7481_v16 = vld [vmem:[#allocation3 + $0xb2] sm:$0xff] }
 0x102   : > { %1939 = vmatprep.mubr.f32.mxu1 %v7297_v17  ;;  %6132 = vmatpush3.msra.mxu0 %v5549_v48  ;;  %v7553_v48 = vld [vmem:[#allocation3 + $0x122] sm:$0xff] }
 0x103   : > { %6079 = vmatmul.mubr.f32.gmra.mxu0 %v7399_v49  ;;  %6133 = vmatprep.subr.mxu0 %v5548_v51 }
 0x104   : > { %6081 = vmatprep.mubr.f32.mxu0 %v7405_v52  ;;  %6134 = vmatpush3.msra.mxu0 %v5548_v51  ;;  %v2267_v51 = vld [vmem:[#allocation3 + $0x30] sm:$0xff] }
 0x105   : > { %1940 = vmatmul.mubr.f32.gmra.mxu1 %v7310_v21  ;;  %6135 = vmatprep.subr.mxu0 %v5547_v53 }
 0x106   : > { %1944 = vmatprep.mubr.f32.mxu1 %v7313_v22  ;;  %6136 = vmatpush3.msra.mxu0 %v5547_v53  ;;  %v5537_v22 = vld [vmem:[%s9521_s1 + $0x410] sm:$0xff] }
 0x107   : > { %6082 = vmatmul.mubr.f32.gmra.mxu0 %v7413_v4  ;;  %6137 = vmatprep.subr.mxu0 %v5546_v55  ;;  %v872_v53 = vld [vmem:[#allocation3 + $0x1d7] sm:$0x1] }
 0x108   : > { %6084 = vmatprep.mubr.f32.mxu0 %v7419_v56  ;;  %v7429_v61 = vpop.f32.mrf.mxu1  ;;  %6138 = vmatpush3.msra.mxu0 %v5546_v55  ;;  %v2304_v55 = vld [vmem:[#allocation3 + $0x39] sm:$0xff]  ;;  %892 = vst [vmem:[#allocation3 + $0x1d9] sm:$0x1] %v872_v53  ;;  %v2269_v53 = vld [vmem:[#allocation3 + $0x48] sm:$0xff] }
 0x109   : > { %1945 = vmatmul.mubr.f32.gmra.mxu1 %v7326_v26  ;;  %6139 = vmatprep.subr.mxu0 %v5545_v5  ;;  %v7507_v26 = vld [vmem:[#allocation3 + $0xda] sm:$0xff] }
 0x10a   : > { %1949 = vmatprep.mubr.f32.mxu1 %v7329_v27  ;;  %v7438_v6 = vpop.f32.mrf.mxu1  ;;  %6140 = vmatpush3.msra.mxu0 %v5545_v5 }
 0x10b   : > { %6085 = vmatmul.mubr.f32.gmra.mxu0 %v7427_v57  ;;  %6141 = vmatprep.subr.mxu0 %v5544_v62 }
 0x10c   : > { %6087 = vmatprep.mubr.f32.mxu0 %v7435_v63  ;;  %v7447_v11 = vpop.f32.mrf.mxu1  ;;  %6142 = vmatpush3.msra.mxu0 %v5544_v62  ;;  %v7559_v62 = vld [vmem:[#allocation3 + $0x12a] sm:$0xff] }
 0x10d   : > { %1950 = vmatmul.mubr.f32.gmra.mxu1 %v7342_v31  ;;  %6143 = vmatprep.subr.mxu0 %v5543_v7  ;;  %v7519_v31 = vld [vmem:[#allocation3 + $0xe2] sm:$0xff] }
 0x10e   : > { %1954 = vmatprep.mubr.f32.mxu1 %v7345_v32  ;;  %v7456_v0 = vpop.f32.mrf.mxu1  ;;  %6144 = vmatpush3.msra.mxu0 %v5543_v7  ;;  %v7522_v32 = vld [vmem:[#allocation3 + $0xf2] sm:$0xff]  ;;  %v832_v7 = vld [vmem:[#allocation3 + $0x1ca] sm:$0x1] }
 0x10f   : > { %6088 = vmatmul.mubr.f32.gmra.mxu0 %v7445_v60  ;;  %6145 = vmatprep.subr.mxu0 %v5542_v8  ;;  %852 = vst [vmem:[#allocation3 + $0x1c8] sm:$0x1] %v832_v7 }
 0x110   : > { %6090 = vmatprep.mubr.f32.mxu0 %v7453_v12  ;;  %v7465_v1 = vpop.f32.mrf.mxu1  ;;  %6146 = vmatpush3.msra.mxu0 %v5542_v8 }
 0x111   : > { %1955 = vmatmul.mubr.f32.gmra.mxu1 %v7358_v37  ;;  %6147 = vmatprep.subr.mxu0 %v5541_v9  ;;  %v7530_v37 = vld [vmem:[#allocation3 + $0x1b9] sm:$0xff] }
 0x112   : > { %1959 = vmatprep.mubr.f32.mxu1 %v7361_v38  ;;  %v7474_v14 = vpop.f32.mrf.mxu1  ;;  %6148 = vmatpush3.msra.mxu0 %v5541_v9  ;;  %v7563_v9 = vld [vmem:[#allocation3 + $0x13a] sm:$0xff] }
 0x113   : > { %6091 = vmatmul.mubr.f32.gmra.mxu0 %v7463_v13  ;;  %6149 = vmatprep.subr.mxu0 %v5540_v33 }
 0x114   : > { %6093 = vmatprep.mubr.f32.mxu0 %v7471_v10  ;;  %v7483_v17 = vpop.f32.mrf.mxu1  ;;  %6150 = vmatpush3.msra.mxu0 %v5540_v33  ;;  %v2268_v33 = vld [vmem:[#allocation3 + $0x38] sm:$0xff] }
 0x115   : > { %1960 = vmatmul.mubr.f32.gmra.mxu1 %v6927_v24  ;;  %6151 = vmatprep.subr.mxu0 %v5539_v15 }
 0x116   : > { %1964 = vmatprep.mubr.f32.mxu1 %v7372_v42  ;;  %v7492_v21 = vpop.f32.mrf.mxu1  ;;  %6152 = vmatpush3.msra.mxu0 %v5539_v15  ;;  %v7539_v42 = vld [vmem:[#allocation3 + $0x10a] sm:$0xff] }
 0x117   : > { %6094 = vmatmul.mubr.f32.gmra.mxu0 %v7481_v16  ;;  %6153 = vmatprep.subr.mxu0 %v5538_v19 }
 0x118   : > { %6096 = vmatprep.mubr.f32.mxu0 %v7489_v20  ;;  %v7501_v24 = vpop.f32.mrf.mxu1  ;;  %6154 = vmatpush3.msra.mxu0 %v5538_v19 }
 0x119   : > { %1965 = vmatmul.mubr.f32.gmra.mxu1 %v7377_v43  ;;  %6155 = vmatprep.subr.mxu0 %v5537_v22 }
 0x11a   : > { %1969 = vmatprep.mubr.f32.mxu1 %v7380_v2  ;;  %v7510_v27 = vpop.f32.mrf.mxu1  ;;  %6156 = vmatpush3.msra.mxu0 %v5537_v22  ;;  %v2303_v2 = vld [vmem:[#allocation3 + $0x31] sm:$0xff]  ;;  %v2305_v22 = vld [vmem:[#allocation3 + $0x49] sm:$0xff] }
 0x11b   : > { %6097 = vmatmul.mubr.f32.gmra.mxu0 %v7499_v23  ;;  %6157 = vmatprep.subr.mxu0 %v5536_v59 }
 0x11c   : > { %6099 = vmatprep.mubr.f32.mxu0 %v7507_v26  ;;  %6158 = vmatpush3.msra.mxu0 %v5536_v59  ;;  %v7570_v59 = vld [vmem:[#allocation3 + $0x142] sm:$0xff] }
 0x11d   : > { %1970 = vmatmul.mubr.f32.gmra.mxu1 %v7385_v44  ;;  %v7524_v34 = vpop.f32.mrf.mxu1  ;;  %6159 = vmatprep.subr.mxu0 %v5535_v28  ;;  %v7546_v44 = vld [vmem:[#allocation3 + $0x112] sm:$0xff] }
 0x11e   : > { %1974 = vmatprep.mubr.f32.mxu1 %v7516_v30  ;;  %6160 = vmatpush3.msra.mxu0 %v5535_v28 }
 0x11f   : > { %6100 = vmatmul.mubr.f32.gmra.mxu0 %v7519_v31  ;;  %v7532_v38 = vpop.f32.mrf.mxu1  ;;  %3230 = vmatprep.subr.mxu0 %v9526_v40  ;;  %v7583_v40 = vld [vmem:[#allocation3 + $0x15a] sm:$0xff] }
 0x120   : > { %6102 = vmatprep.mubr.f32.mxu0 %v7522_v32 }
 0x121   : > { %1975 = vmatmul.mubr.f32.gmra.mxu1 %v7527_v36 }
 0x122   : > { %1979 = vmatprep.mubr.f32.mxu1 %v7530_v37  ;;  %v7542_v43 = vpop.f32.mrf.mxu1 }
 0x123   : > { %6103 = vmatmul.mubr.f32.gmra.mxu0 %v7536_v39 }
 0x124   : > { %6105 = vmatprep.mubr.f32.mxu0 %v7539_v42  ;;  %v7548_v45 = vpop.f32.mrf.mxu1 }
 0x125   : > { %1980 = vmatmul.mubr.f32.gmra.mxu1 %v7550_v47  ;;  %v7621_v47 = vld [vmem:[#allocation3 + $0x1a2] sm:$0xff] }
 0x126   : > { %2488 = vmatprep.mubr.f32.mxu1 %v2303_v2 }
 0x127   : > { %6106 = vmatmul.mubr.f32.gmra.mxu0 %v7546_v44  ;;  %v7556_v5 = vpop.f32.mrf.mxu1 }
 0x128   : > { %9538 = vst [vmem:[#allocation16_spill] sm:$0xff] %v7556_v5  ;;  %6108 = vmatprep.mubr.f32.mxu0 %v7553_v48 }
 0x129   : > { %2489 = vmatmul.mubr.f32.vlgmr.msra.gmra.mxu1 %v2267_v51  ;;  %v7561_v8 = vpop.f32.mrf.mxu1  ;;  %v7574_v51 = vld [vmem:[#allocation3 + $0x152] sm:$0xff] }
 0x12a   : > { %2493 = vmatprep.mubr.f32.mxu1 %v2304_v55  ;;  %v1122_v15 = vpop.f32.mrf.mxu0 }
 0x12b   : > { %6109 = vmatmul.mubr.f32.gmra.mxu0 %v7559_v62  ;;  %v7567_v19 = vadd.f32 %v7438_v6, %v1122_v15  ;;  %v2306_v6 = vld [vmem:[#allocation3 + $0x51] sm:$0xff] }
 0x12c   : > { %6111 = vmatprep.mubr.f32.mxu0 %v7563_v9  ;;  %v7572_v28 = vpop.f32.mrf.mxu1  ;;  %v1124_v2 = vpop.f32.mrf.mxu0 }
 0x12d   : > { %9539 = vst [vmem:[#allocation17_spill] sm:$0xff] %v7567_v19  ;;  %9540 = vst [vmem:[#allocation18_spill] sm:$0xff] %v7572_v28  ;;  %2494 = vmatmul.mubr.f32.gmra.mxu1 %v2268_v33  ;;  %v7587_v19 = vld [vmem:[#allocation3 + $0x16a] sm:$0xff] }
 0x12e   : > { %2498 = vmatprep.mubr.f32.mxu1 %v2305_v22  ;;  %v7576_v55 = vpop.f32.mrf.mxu1  ;;  %v2270_v22 = vld [vmem:[#allocation3 + $0x50] sm:$0xff] }
 0x12f   : > { %6112 = vmatmul.mubr.f32.gmra.mxu0 %v7570_v59  ;;  %v1127_v7 = vpop.f32.mrf.mxu0 }
 0x130   : > { %6114 = vmatprep.mubr.f32.mxu0 %v7574_v51  ;;  %v7581_v15 = vadd.f32 %v7429_v61, %v1127_v7  ;;  %v7596_v7 = vld [vmem:[#allocation3 + $0x172] sm:$0xff] }
 0x131   : > { %2499 = vmatmul.mubr.f32.gmra.mxu1 %v2269_v53  ;;  %v7585_v2 = vpop.f32.mrf.mxu1  ;;  %v1129_v33 = vpop.f32.mrf.mxu0 }
 0x132   : > { %9541 = vst [vmem:[#allocation19_spill] sm:$0xff] %v7581_v15  ;;  %9542 = vst [vmem:[#allocation20_spill] sm:$0xff] %v7585_v2  ;;  %2503 = vmatprep.mubr.f32.mxu1 %v2306_v6  ;;  %v7600_v2 = vld [vmem:[#allocation3 + $0x182] sm:$0xff] }
 0x133   : > { %6115 = vmatmul.mubr.f32.gmra.mxu0 %v7583_v40  ;;  %v7590_v28 = vpop.f32.mrf.mxu1  ;;  %v1132_v5 = vpop.f32.mrf.mxu0  ;;  %v2271_v6 = vld [vmem:[#allocation3 + $0x60] sm:$0xff] }
 0x134   : > { %9543 = vst [vmem:[#allocation21_spill] sm:$0xff] %v7590_v28  ;;  %6117 = vmatprep.mubr.f32.mxu0 %v7587_v19  ;;  %v7594_v61 = vadd.f32 %v7456_v0, %v1132_v5  ;;  %v7607_v0 = vld [vmem:[#allocation3 + $0x18a] sm:$0xff] }
 0x135   : > { %2504 = vmatmul.mubr.f32.gmra.mxu1 %v2270_v22  ;;  %v7598_v53 = vpop.f32.mrf.mxu1  ;;  %v1134_v33 = vpop.f32.mrf.mxu0  ;;  %v7612_v22 = vld [vmem:[#allocation3 + $0x19a] sm:$0xff] }
 0x136   : > { %9544 = vst [vmem:[#allocation22_spill] sm:$0xff] %v7594_v61  ;;  %9545 = vst [vmem:[#allocation23_spill] sm:$0xff] %v7598_v53  ;;  %2508 = vmatprep.mubr.f32.mxu1 %v7085_v18  ;;  %v2272_v18 = vld [vmem:[#allocation3 + $0x68] sm:$0xff] }
 0x137   : > { %6118 = vmatmul.mubr.f32.gmra.mxu0 %v7596_v7  ;;  %v7604_v28 = vpop.f32.mrf.mxu1 }
 0x138   : > { %9546 = vst [vmem:[#allocation24_spill] sm:$0xff] %v7604_v28  ;;  %6120 = vmatprep.mubr.f32.mxu0 %v7600_v2  ;;  %v1137_v15 = vpop.f32.mrf.mxu0 }
 0x139   : > { %2509 = vmatmul.mubr.f32.gmra.mxu1 %v2271_v6  ;;  %v7610_v5 = vadd.f32 %v7447_v11, %v1137_v15  ;;  %v7626_v15 = vld [vmem:[#allocation3 + $0x1b2] sm:$0xff] }
 0x13a   : > { %2513 = vmatprep.mubr.f32.mxu1 %v7101_v25  ;;  %v7615_v33 = vpop.f32.mrf.mxu1  ;;  %v1139_v61 = vpop.f32.mrf.mxu0 }
 0x13b   : > { %9547 = vst [vmem:[#allocation25_spill] sm:$0xff] %v7615_v33  ;;  %6121 = vmatmul.mubr.f32.gmra.mxu0 %v7607_v0  ;;  %v2273_v61 = vld [vmem:[#allocation3 + $0x78] sm:$0xff] }
 0x13c   : > { %v7618_v28 = vpop.f32.mrf.mxu1  ;;  %6123 = vmatprep.mubr.f32.mxu0 %v7612_v22  ;;  %v1142_v53 = vpop.f32.mrf.mxu0  ;;  %v7635_v33 = vld [vmem:[#allocation3 + $0x1ba] sm:$0xff] }
 0x13d   : > { %9548 = vst [vmem:[#allocation26_spill] sm:$0xff] %v7618_v28  ;;  %2514 = vmatmul.mubr.f32.gmra.mxu1 %v2272_v18  ;;  %v7624_v11 = vadd.f32 %v7474_v14, %v1142_v53 }
 0x13e   : > { %2518 = vmatprep.mubr.f32.mxu1 %v7118_v29  ;;  %v7629_v25 = vpop.f32.mrf.mxu1  ;;  %v1144_v6 = vpop.f32.mrf.mxu0  ;;  %v2274_v29 = vld [vmem:[#allocation3 + $0x80] sm:$0xff] }
 0x13f   : > { %9549 = vst [vmem:[#allocation27_spill] sm:$0xff] %v7624_v11  ;;  %6124 = vmatmul.mubr.f32.gmra.mxu0 %v7621_v47 }
 0x140   : > { %v7632_v28 = vpop.f32.mrf.mxu1  ;;  %6126 = vmatprep.mubr.f32.mxu0 %v7626_v15 }
 0x141   : > { %9550 = vst [vmem:[#allocation28_spill] sm:$0xff] %v7632_v28  ;;  %2519 = vmatmul.mubr.f32.gmra.mxu1 %v2273_v61  ;;  %v1147_v18 = vpop.f32.mrf.mxu0 }
 0x142   : > { %v7638_v14 = vadd.f32 %v7465_v1, %v1147_v18  ;;  %2523 = vmatprep.mubr.f32.mxu1 %v7136_v35  ;;  %v2275_v1 = vld [vmem:[#allocation3 + $0x90] sm:$0xff] }
 0x143   : > { %6127 = vmatmul.mubr.f32.gmra.mxu0 %v7635_v33  ;;  %v7642_v53 = vpop.f32.mrf.mxu1  ;;  %v1149_v6 = vpop.f32.mrf.mxu0 }
 0x144   : > { %6161 = vmatprep.mubr.f32.mxu0 %v7391_v3 }
 0x145   : > { %2524 = vmatmul.mubr.f32.gmra.mxu1 %v2274_v29  ;;  %v7645_v11 = vpop.f32.mrf.mxu1  ;;  %v1152_v28 = vpop.f32.mrf.mxu0 }
 0x146   : > { %v7648_v61 = vadd.f32 %v7492_v21, %v1152_v28  ;;  %2528 = vmatprep.mubr.f32.mxu1 %v7153_v41  ;;  %v2276_v21 = vld [vmem:[#allocation3 + $0x98] sm:$0xff] }
 0x147   : > { %6162 = vmatmul.mubr.f32.vlgmr.msra.gmra.mxu0 %v7399_v49  ;;  %v7652_v35 = vpop.f32.mrf.mxu1  ;;  %v1154_v18 = vpop.f32.mrf.mxu0 }
 0x148   : > { %9551 = vst [vmem:[#allocation29_spill] sm:$0xff] %v7648_v61  ;;  %6164 = vmatprep.mubr.f32.mxu0 %v7405_v52 }
 0x149   : > { %2529 = vmatmul.mubr.f32.gmra.mxu1 %v2275_v1  ;;  %v7655_v6 = vpop.f32.mrf.mxu1  ;;  %v1157_v3 = vpop.f32.mrf.mxu0 }
 0x14a   : > { %v7658_v29 = vadd.f32 %v7483_v17, %v1157_v3  ;;  %2533 = vmatprep.mubr.f32.mxu1 %v7170_v46  ;;  %v2277_v17 = vld [vmem:[#allocation3 + $0xa8] sm:$0xff] }
 0x14b   : > { %6165 = vmatmul.mubr.f32.gmra.mxu0 %v7413_v4  ;;  %v7662_v41 = vpop.f32.mrf.mxu1  ;;  %v1159_v49 = vpop.f32.mrf.mxu0 }
 0x14c   : > { %6167 = vmatprep.mubr.f32.mxu0 %v7419_v56 }
 0x14d   : > { %2534 = vmatmul.mubr.f32.gmra.mxu1 %v2276_v21  ;;  %v7665_v28 = vpop.f32.mrf.mxu1  ;;  %v1162_v52 = vpop.f32.mrf.mxu0 }
 0x14e   : > { %v7668_v1 = vadd.f32 %v7510_v27, %v1162_v52  ;;  %2538 = vmatprep.mubr.f32.mxu1 %v7188_v50  ;;  %v2278_v27 = vld [vmem:[#allocation3 + $0xb0] sm:$0xff] }
 0x14f   : > { %6168 = vmatmul.mubr.f32.gmra.mxu0 %v7427_v57  ;;  %v1164_v46 = vpop.f32.mrf.mxu0 }
 0x150   : > { %9552 = vst [vmem:[#allocation30_spill] sm:$0xff] %v7668_v1  ;;  %v7672_v18 = vpop.f32.mrf.mxu1  ;;  %6170 = vmatprep.mubr.f32.mxu0 %v7435_v63  ;;  %v2279_v63 = vld [vmem:[#allocation3 + $0xc0] sm:$0xff] }
 0x151   : > { %2539 = vmatmul.mubr.f32.gmra.mxu1 %v2277_v17  ;;  %v1167_v4 = vpop.f32.mrf.mxu0 }
 0x152   : > { %v7675_v56 = vpop.f32.mrf.mxu1  ;;  %v7678_v3 = vadd.f32 %v7501_v24, %v1167_v4  ;;  %2543 = vmatprep.mubr.f32.mxu1 %v7205_v54  ;;  %v2316_v24 = vld [vmem:[#allocation3 + $0xc9] sm:$0xff] }
 0x153   : > { %6171 = vmatmul.mubr.f32.gmra.mxu0 %v7445_v60  ;;  %v1169_v50 = vpop.f32.mrf.mxu0 }
 0x154   : > { %v7682_v21 = vpop.f32.mrf.mxu1  ;;  %6173 = vmatprep.mubr.f32.mxu0 %v7453_v12  ;;  %v2280_v12 = vld [vmem:[#allocation3 + $0xc8] sm:$0xff] }
 0x155   : > { %2544 = vmatmul.mubr.f32.gmra.mxu1 %v2278_v27  ;;  %v2281_v27 = vld [vmem:[#allocation3 + $0xd8] sm:$0xff] }
 0x156   : > { %v7685_v57 = vpop.f32.mrf.mxu1  ;;  %2548 = vmatprep.mubr.f32.mxu1 %v7222_v58  ;;  %v3229_v58 = vld [vmem:[%s9523_s3 + $0x178] sm:$0xff] }
 0x157   : > { %9553 = vst [vmem:[#allocation31_spill] sm:$0xff] %v7685_v57  ;;  %v1172_v49 = vpop.f32.mrf.mxu0  ;;  %6174 = vmatmul.mubr.f32.gmra.mxu0 %v7463_v13  ;;  %v2317_v13 = vld [vmem:[#allocation3 + $0xd9] sm:$0xff]  ;;  %6215 = vmatprep.subr.mxu1 %v3229_v58 }
 0x158   : > { %v7690_v54 = vadd.f32 %v7532_v38, %v1172_v49  ;;  %6176 = vmatprep.mubr.f32.mxu0 %v7471_v10  ;;  %6216 = vmatpush3.msra.mxu1 %v3229_v58  ;;  %v2318_v49 = vld [vmem:[#allocation3 + $0xe1] sm:$0xff] }
 0x159   : > { %v7693_v60 = vpop.f32.mrf.mxu1  ;;  %2549 = vmatmul.mubr.f32.gmra.mxu1 %v2279_v63  ;;  %v1174_v52 = vpop.f32.mrf.mxu0 }
 0x15a   : > { %9554 = vst [vmem:[#allocation32_spill] sm:$0xff] %v7690_v54  ;;  %9555 = vst [vmem:[#allocation33_spill] sm:$0xff] %v7693_v60  ;;  %2553 = vmatprep.mubr.f32.mxu1 %v2316_v24  ;;  %v2282_v24 = vld [vmem:[#allocation3 + $0xe0] sm:$0xff]  ;;  %v3228_v52 = vld [vmem:[%s9523_s3 + $0x170] sm:$0xff] }
 0x15b   : > { %v1808_v17 = vpop.f32.mrf.mxu1  ;;  %v1177_v46 = vpop.f32.mrf.mxu0  ;;  %6177 = vmatmul.mubr.f32.gmra.mxu0 %v7481_v16  ;;  %6217 = vmatprep.subr.mxu1 %v3228_v52  ;;  %v2338_v54 = vld [vmem:[#allocation3 + $0x1d1] sm:$0xff] }
 0x15c   : > { %v7700_v38 = vadd.f32 %v7524_v34, %v1177_v46  ;;  %6179 = vmatprep.mubr.f32.mxu0 %v7489_v20  ;;  %6218 = vmatpush3.msra.mxu1 %v3228_v52  ;;  %v3194_v52 = vld [vmem:[%s9523_s3 + $0x60] sm:$0xff] }
 0x15d   : > { %v7703_v10 = vpop.f32.mrf.mxu1  ;;  %2554 = vmatmul.mubr.f32.gmra.mxu1 %v2280_v12  ;;  %v1179_v4 = vpop.f32.mrf.mxu0 }
 0x15e   : > { %2558 = vmatprep.mubr.f32.mxu1 %v2317_v13  ;;  %v2283_v13 = vld [vmem:[#allocation3 + $0xf0] sm:$0xff] }
 0x15f   : > { %v1813_v50 = vpop.f32.mrf.mxu1  ;;  %v1182_v63 = vpop.f32.mrf.mxu0  ;;  %6180 = vmatmul.mubr.f32.gmra.mxu0 %v7499_v23  ;;  %v2319_v23 = vld [vmem:[#allocation3 + $0xf1] sm:$0xff] }
 0x160   : > { %v7707_v16 = vadd.f32 %v7548_v45, %v1182_v63  ;;  %6182 = vmatprep.mubr.f32.mxu0 %v7507_v26  ;;  %v3197_v26 = vld [vmem:[%s9523_s3 + $0x78] sm:$0xff]  ;;  %v3196_v50 = vld [vmem:[%s9523_s3 + $0x70] sm:$0xff] }
 0x161   : > { %v7710_v34 = vpop.f32.mrf.mxu1  ;;  %2559 = vmatmul.mubr.f32.gmra.mxu1 %v2281_v27  ;;  %v1184_v20 = vpop.f32.mrf.mxu0  ;;  %3231 = vmatpush1.msra.mxu0 %v3197_v26 }
 0x162   : > { %9556 = vst [vmem:[#allocation34_spill] sm:$0xff] %v7707_v16  ;;  %9557 = vst [vmem:[#allocation35_spill] sm:$0xff] %v7710_v34  ;;  %2563 = vmatprep.mubr.f32.mxu1 %v2318_v49  ;;  %v2284_v20 = vld [vmem:[#allocation3 + $0xf8] sm:$0xff] }
 0x163   : > { %v1818_v12 = vpop.f32.mrf.mxu1  ;;  %v1187_v58 = vpop.f32.mrf.mxu0  ;;  %6183 = vmatmul.mubr.f32.gmra.mxu0 %v7519_v31  ;;  %v9558_v31 = vmov 0.0  }
 0x164   : > { %v7717_v45 = vadd.f32 %v7542_v43, %v1187_v58  ;;  %6185 = vmatprep.mubr.f32.mxu0 %v7522_v32  ;;  %3232 = vmatprep.subr.mxu0 %v9558_v31  ;;  %v2320_v43 = vld [vmem:[#allocation3 + $0xf9] sm:$0xff]  ;;  %v3227_v12 = vld [vmem:[%s9523_s3 + $0x168] sm:$0xff] }
 0x165   : > { %v7723_v17 = vpop.f32.mrf.mxu1  ;;  %2564 = vmatmul.mubr.f32.gmra.mxu1 %v2282_v24  ;;  %v1189_v46 = vpop.f32.mrf.mxu0  ;;  %3233 = vmatpush1.msra.mxu0 %v3196_v50  ;;  %v3192_v50 = vld [vmem:[%s9523_s3 + $0x50] sm:$0xff] }
 0x166   : > { %2568 = vmatprep.mubr.f32.mxu1 %v2319_v23  ;;  %3234 = vmatprep.subr.mxu0 %v9558_v31 }
 0x167   : > { %v1823_v4 = vpop.f32.mrf.mxu1  ;;  %v1192_v27 = vpop.f32.mrf.mxu0  ;;  %6186 = vmatmul.mubr.f32.gmra.mxu0 %v7536_v39  ;;  %v3195_v39 = vld [vmem:[%s9523_s3 + $0x68] sm:$0xff]  ;;  %6219 = vmatprep.subr.mxu1 %v3227_v12 }
 0x168   : > { %v7728_v32 = vadd.f32 %v7561_v8, %v1192_v27  ;;  %6188 = vmatprep.mubr.f32.mxu0 %v7539_v42  ;;  %v2321_v42 = vld [vmem:[#allocation3 + $0x109] sm:$0xff]  ;;  %3235 = vmatpush1.msra.mxu0 %v3195_v39 }
 0x169   : > { %v7734_v63 = vpop.f32.mrf.mxu1  ;;  %2569 = vmatmul.mubr.f32.gmra.mxu1 %v2283_v13  ;;  %v1194_v49 = vpop.f32.mrf.mxu0  ;;  %3236 = vmatprep.subr.mxu0 %v9558_v31  ;;  %v2322_v13 = vld [vmem:[#allocation3 + $0x111] sm:$0xff] }
 0x16a   : > { %9559 = vst [vmem:[#allocation36_spill] sm:$0xff] %v7728_v32  ;;  %9560 = vst [vmem:[#allocation37_spill] sm:$0xff] %v7734_v63  ;;  %2573 = vmatprep.mubr.f32.mxu1 %v2320_v43  ;;  %3237 = vmatpush1.msra.mxu0 %v3194_v52  ;;  %v2286_v49 = vld [vmem:[#allocation3 + $0x110] sm:$0xff]  ;;  %v3226_v52 = vld [vmem:[%s9523_s3 + $0x160] sm:$0xff] }
 0x16b   : > { %v1828_v8 = vpop.f32.mrf.mxu1  ;;  %v7740_v24 = vpop.f32.mrf.mxu0  ;;  %6189 = vmatmul.mubr.f32.gmra.mxu0 %v7546_v44  ;;  %v2285_v44 = vld [vmem:[#allocation3 + $0x108] sm:$0xff]  ;;  %3238 = vmatprep.subr.mxu0 %v9558_v31 }
 0x16c   : > { %6191 = vmatprep.mubr.f32.mxu0 %v7553_v48  ;;  %v3193_v48 = vld [vmem:[%s9523_s3 + $0x58] sm:$0xff]  ;;  %6220 = vmatpush3.msra.mxu1 %v3227_v12  ;;  %v2334_v32 = vld [vmem:[#allocation3 + $0x1a1] sm:$0xff] }
 0x16d   : > { %v7750_v58 = vpop.f32.mrf.mxu1  ;;  %2574 = vmatmul.mubr.f32.gmra.mxu1 %v2284_v20  ;;  %v1199_v23 = vpop.f32.mrf.mxu0  ;;  %3239 = vmatpush1.msra.mxu0 %v3193_v48 }
 0x16e   : > { %2578 = vmatprep.mubr.f32.mxu1 %v2321_v42  ;;  %3240 = vmatprep.subr.mxu0 %v9558_v31  ;;  %v3190_v42 = vld [vmem:[%s9523_s3 + $0x40] sm:$0xff]  ;;  %v2324_v23 = vld [vmem:[#allocation3 + $0x129] sm:$0xff] }
 0x16f   : > { %v1833_v26 = vpop.f32.mrf.mxu1  ;;  %v1202_v46 = vpop.f32.mrf.mxu0  ;;  %6192 = vmatmul.mubr.f32.gmra.mxu0 %v7559_v62  ;;  %6221 = vmatprep.subr.mxu1 %v3226_v52 }
 0x170   : > { %v7758_v4 = vadd.f32 %v7576_v55, %v1202_v46  ;;  %6194 = vmatprep.mubr.f32.mxu0 %v7563_v9  ;;  %v2323_v55 = vld [vmem:[#allocation3 + $0x121] sm:$0xff]  ;;  %3241 = vmatpush1.msra.mxu0 %v3192_v50  ;;  %v3189_v26 = vld [vmem:[%s9523_s3 + $0x38] sm:$0xff] }
 0x171   : > { %v7762_v27 = vpop.f32.mrf.mxu1  ;;  %2579 = vmatmul.mubr.f32.gmra.mxu1 %v2285_v44  ;;  %v1204_v43 = vpop.f32.mrf.mxu0  ;;  %v3191_v9 = vld [vmem:[%s9523_s3 + $0x48] sm:$0xff]  ;;  %3242 = vmatprep.subr.mxu0 %v9558_v31 }
 0x172   : > { %9561 = vst [vmem:[#allocation38_spill] sm:$0xff] %v7758_v4  ;;  %9562 = vst [vmem:[#allocation39_spill] sm:$0xff] %v7762_v27  ;;  %2583 = vmatprep.mubr.f32.mxu1 %v2322_v13  ;;  %3243 = vmatpush1.msra.mxu0 %v3191_v9  ;;  %v2288_v46 = vld [vmem:[#allocation3 + $0x128] sm:$0xff]  ;;  %v2325_v43 = vld [vmem:[#allocation3 + $0x139] sm:$0xff] }
 0x173   : > { %v1838_v62 = vpop.f32.mrf.mxu1  ;;  %v7767_v20 = vpop.f32.mrf.mxu0  ;;  %6195 = vmatmul.mubr.f32.gmra.mxu0 %v7570_v59  ;;  %v2287_v59 = vld [vmem:[#allocation3 + $0x120] sm:$0xff]  ;;  %3244 = vmatprep.subr.mxu0 %v9558_v31 }
 0x174   : > { %6197 = vmatprep.mubr.f32.mxu0 %v7574_v51  ;;  %3245 = vmatpush1.msra.mxu0 %v3190_v42  ;;  %v3187_v62 = vld [vmem:[%s9523_s3 + $0x28] sm:$0xff]  ;;  %v3225_v42 = vld [vmem:[%s9523_s3 + $0x158] sm:$0xff] }
 0x175   : > { %v7775_v39 = vpop.f32.mrf.mxu1  ;;  %2584 = vmatmul.mubr.f32.gmra.mxu1 %v2286_v49  ;;  %v1209_v8 = vpop.f32.mrf.mxu0  ;;  %3246 = vmatprep.subr.mxu0 %v9558_v31  ;;  %v2333_v4 = vld [vmem:[#allocation3 + $0x199] sm:$0xff] }
 0x176   : > { %2588 = vmatprep.mubr.f32.mxu1 %v2323_v55  ;;  %6222 = vmatpush3.msra.mxu1 %v3226_v52  ;;  %v2326_v8 = vld [vmem:[#allocation3 + $0x141] sm:$0xff] }
 0x177   : > { %v1843_v12 = vpop.f32.mrf.mxu1  ;;  %v7784_v51 = vpop.f32.mrf.mxu0  ;;  %6198 = vmatmul.mubr.f32.gmra.mxu0 %v7583_v40  ;;  %6223 = vmatprep.subr.mxu1 %v3225_v42 }
 0x178   : > { %9563 = vst [vmem:[#allocation40_spill] sm:$0xff] %v7784_v51  ;;  %6200 = vmatprep.mubr.f32.mxu0 %v7587_v19  ;;  %v3188_v19 = vld [vmem:[%s9523_s3 + $0x30] sm:$0xff]  ;;  %3247 = vmatpush1.msra.mxu0 %v3189_v26  ;;  %v3185_v12 = vld [vmem:[%s9523_s3 + $0x18] sm:$0xff] }
 0x179   : > { %v7789_v44 = vpop.f32.mrf.mxu1  ;;  %2589 = vmatmul.mubr.f32.gmra.mxu1 %v2287_v59  ;;  %v1214_v48 = vpop.f32.mrf.mxu0  ;;  %3248 = vmatprep.subr.mxu0 %v9558_v31 }
 0x17a   : > { %9564 = vst [vmem:[#allocation41_spill] sm:$0xff] %v7789_v44  ;;  %2593 = vmatprep.mubr.f32.mxu1 %v2324_v23  ;;  %3249 = vmatpush1.msra.mxu0 %v3188_v19  ;;  %v2327_v48 = vld [vmem:[#allocation3 + $0x151] sm:$0xff] }
 0x17b   : > { %v1848_v13 = vpop.f32.mrf.mxu1  ;;  %v7795_v40 = vpop.f32.mrf.mxu0  ;;  %6201 = vmatmul.mubr.f32.gmra.mxu0 %v7596_v7  ;;  %v2289_v7 = vld [vmem:[#allocation3 + $0x138] sm:$0xff]  ;;  %3250 = vmatprep.subr.mxu0 %v9558_v31  ;;  %v2291_v19 = vld [vmem:[#allocation3 + $0x150] sm:$0xff] }
 0x17c   : > { %6203 = vmatprep.mubr.f32.mxu0 %v7600_v2  ;;  %v3186_v2 = vld [vmem:[%s9523_s3 + $0x20] sm:$0xff]  ;;  %3251 = vmatpush1.msra.mxu0 %v3187_v62  ;;  %v2373_v13 = vld [vmem:[#allocation3 + $0x1ca] sm:$0xff] }
 0x17d   : > { %v7802_v50 = vpop.f32.mrf.mxu1  ;;  %2594 = vmatmul.mubr.f32.gmra.mxu1 %v2288_v46  ;;  %v1219_v49 = vpop.f32.mrf.mxu0  ;;  %3252 = vmatprep.subr.mxu0 %v9558_v31  ;;  %v2328_v62 = vld [vmem:[#allocation3 + $0x159] sm:$0xff] }
 0x17e   : > { %2598 = vmatprep.mubr.f32.mxu1 %v2325_v43  ;;  %3253 = vmatpush1.msra.mxu0 %v3186_v2  ;;  %v3184_v43 = vld [vmem:[%s9523_s3 + $0x10] sm:$0xff]  ;;  %v3182_v2 = vld [vmem:[%s9523_s3] sm:$0xff] }
 0x17f   : > { %v1853_v55 = vpop.f32.mrf.mxu1  ;;  %v7808_v9 = vpop.f32.mrf.mxu0  ;;  %6204 = vmatmul.mubr.f32.gmra.mxu0 %v7607_v0  ;;  %v2290_v0 = vld [vmem:[#allocation3 + $0x140] sm:$0xff]  ;;  %3254 = vmatprep.subr.mxu0 %v9558_v31 }
 0x180   : > { %6206 = vmatprep.mubr.f32.mxu0 %v7612_v22  ;;  %3255 = vmatpush1.msra.mxu0 %v3185_v12  ;;  %v2329_v12 = vld [vmem:[#allocation3 + $0x169] sm:$0xff] }
 0x181   : > { %v7819_v59 = vpop.f32.mrf.mxu1  ;;  %2599 = vmatmul.mubr.f32.gmra.mxu1 %v2289_v7  ;;  %v1224_v52 = vpop.f32.mrf.mxu0  ;;  %3256 = vmatprep.subr.mxu0 %v9558_v31  ;;  %v2374_v7 = vld [vmem:[#allocation3 + $0x1d2] sm:$0xff] }
 0x182   : > { %9565 = vst [vmem:[#allocation42_spill] sm:$0xff] %v7819_v59  ;;  %2603 = vmatprep.mubr.f32.mxu1 %v2326_v8  ;;  %6224 = vmatpush3.msra.mxu1 %v3225_v42  ;;  %v2292_v42 = vld [vmem:[#allocation3 + $0x158] sm:$0xff] }
 0x183   : > { %v1858_v23 = vpop.f32.mrf.mxu1  ;;  %v7825_v22 = vpop.f32.mrf.mxu0  ;;  %6207 = vmatmul.mubr.f32.gmra.mxu0 %v7621_v47 }
 0x184   : > { %6209 = vmatprep.mubr.f32.mxu0 %v7626_v15  ;;  %v3183_v15 = vld [vmem:[%s9523_s3 + $0x8] sm:$0xff]  ;;  %3257 = vmatpush1.msra.mxu0 %v3184_v43  ;;  %v3213_v23 = vld [vmem:[%s9523_s3 + $0xf8] sm:$0xff]  ;;  %v3212_v43 = vld [vmem:[%s9523_s3 + $0xf0] sm:$0xff] }
 0x185   : > { %v7830_v26 = vpop.f32.mrf.mxu1  ;;  %2604 = vmatmul.mubr.f32.gmra.mxu1 %v2290_v0  ;;  %v1229_v46 = vpop.f32.mrf.mxu0  ;;  %3258 = vmatprep.subr.mxu0 %v9558_v31 }
 0x186   : > { %2608 = vmatprep.mubr.f32.mxu1 %v2327_v48  ;;  %3259 = vmatpush1.msra.mxu0 %v3183_v15  ;;  %v3211_v15 = vld [vmem:[%s9523_s3 + $0xe8] sm:$0xff] }
 0x187   : > { %v1863_v49 = vpop.f32.mrf.mxu1  ;;  %v7835_v47 = vpop.f32.mrf.mxu0  ;;  %6210 = vmatmul.mubr.f32.gmra.mxu0 %v7635_v33  ;;  %v3224_v33 = vld [vmem:[%s9523_s3 + $0x150] sm:$0xff]  ;;  %3260 = vmatprep.subr.mxu0 %v9558_v31 }
 0x188   : > { %6212 = vmatprep.mubr.f32.mxu0 %v2373_v13  ;;  %3261 = vmatpush1.msra.mxu0 %v3182_v2  ;;  %v2293_v13 = vld [vmem:[#allocation3 + $0x168] sm:$0xff]  ;;  %v2294_v2 = vld [vmem:[#allocation3 + $0x170] sm:$0xff] }
 0x189   : > { %v7842_v55 = vpop.f32.mrf.mxu1  ;;  %2609 = vmatmul.mubr.f32.gmra.mxu1 %v2291_v19  ;;  %v1234_v8 = vpop.f32.mrf.mxu0  ;;  %6225 = vmatprep.subr.mxu1 %v3224_v33 }
 0x18a   : > { %9566 = vst [vmem:[#allocation43_spill] sm:$0xff] %v7842_v55  ;;  %2613 = vmatprep.mubr.f32.mxu1 %v2328_v62  ;;  %3262 = vmatprep.subr.mxu0 %v9558_v31  ;;  %v2330_v62 = vld [vmem:[#allocation3 + $0x171] sm:$0xff] }
 0x18b   : > { %v1868_v52 = vpop.f32.mrf.mxu1  ;;  %v7851_v0 = vpop.f32.mrf.mxu0  ;;  %6213 = vmatmul.mubr.f32.gmra.mxu0 %v2374_v7  ;;  %6226 = vmatpush3.msra.mxu1 %v3224_v33  ;;  %v3210_v33 = vld [vmem:[%s9523_s3 + $0xe0] sm:$0xff] }
 0x18c   : > { %3263 = vmatpush2.msra.mxu0 %v3213_v23  ;;  %v3223_v23 = vld [vmem:[%s9523_s3 + $0x148] sm:$0xff] }
 0x18d   : > { %v7857_v48 = vpop.f32.mrf.mxu1  ;;  %2614 = vmatmul.mubr.f32.gmra.mxu1 %v2292_v42  ;;  %v1239_v46 = vpop.f32.mrf.mxu0  ;;  %3264 = vmatprep.subr.mxu0 %v9558_v31 }
 0x18e   : > { %2618 = vmatprep.mubr.f32.mxu1 %v2329_v12  ;;  %3265 = vmatpush2.msra.mxu0 %v3212_v43  ;;  %v2331_v12 = vld [vmem:[#allocation3 + $0x181] sm:$0xff]  ;;  %v3209_v43 = vld [vmem:[%s9523_s3 + $0xd8] sm:$0xff] }
 0x18f   : > { %v1873_v19 = vpop.f32.mrf.mxu1  ;;  %v7863_v49 = vpop.f32.mrf.mxu0  ;;  %3266 = vmatprep.subr.mxu0 %v9558_v31  ;;  %6227 = vmatprep.subr.mxu1 %v3223_v23 }
 0x190   : > { %3267 = vmatpush2.msra.mxu0 %v3211_v15  ;;  %v2295_v19 = vld [vmem:[#allocation3 + $0x180] sm:$0xff]  ;;  %6228 = vmatpush3.msra.mxu1 %v3223_v23  ;;  %v3207_v23 = vld [vmem:[%s9523_s3 + $0xc8] sm:$0xff] }
 0x191   : > { %v7869_v7 = vpop.f32.mrf.mxu1  ;;  %2619 = vmatmul.mubr.f32.gmra.mxu1 %v2293_v13  ;;  %v1244_v8 = vpop.f32.mrf.mxu0  ;;  %3268 = vmatprep.subr.mxu0 %v9558_v31 }
 0x192   : > { %9567 = vst [vmem:[#allocation44_spill] sm:$0xff] %v7869_v7  ;;  %2623 = vmatprep.mubr.f32.mxu1 %v2330_v62  ;;  %3269 = vmatpush2.msra.mxu0 %v3210_v33  ;;  %v2332_v8 = vld [vmem:[#allocation3 + $0x189] sm:$0xff]  ;;  %v3222_v33 = vld [vmem:[%s9523_s3 + $0x140] sm:$0xff] }
 0x193   : > { %v1878_v42 = vpop.f32.mrf.mxu1  ;;  %v7875_v52 = vpop.f32.mrf.mxu0  ;;  %3270 = vmatprep.subr.mxu0 %v9558_v31  ;;  %6229 = vmatprep.subr.mxu1 %v3222_v33 }
 0x194   : > { %3271 = vmatpush2.msra.mxu0 %v3209_v43  ;;  %6230 = vmatpush3.msra.mxu1 %v3222_v33 }
 0x195   : > { %v7881_v46 = vpop.f32.mrf.mxu1  ;;  %2624 = vmatmul.mubr.f32.gmra.mxu1 %v2294_v2  ;;  %v1249_v13 = vpop.f32.mrf.mxu0  ;;  %v3208_v2 = vld [vmem:[%s9523_s3 + $0xd0] sm:$0xff]  ;;  %3272 = vmatprep.subr.mxu0 %v9558_v31 }
 0x196   : > { %2628 = vmatprep.mubr.f32.mxu1 %v2331_v12  ;;  %v3221_v13 = vld [vmem:[%s9523_s3 + $0x138] sm:$0xff]  ;;  %3273 = vmatpush2.msra.mxu0 %v3208_v2 }
 0x197   : > { %v1883_v62 = vpop.f32.mrf.mxu1  ;;  %v7886_v15 = vpop.f32.mrf.mxu0  ;;  %3274 = vmatprep.subr.mxu0 %v9558_v31  ;;  %6231 = vmatprep.subr.mxu1 %v3221_v13  ;;  %v2297_v2 = vld [vmem:[#allocation3 + $0x198] sm:$0xff] }
 0x198   : > { %v2296_v62 = vld [vmem:[#allocation3 + $0x188] sm:$0xff]  ;;  %3275 = vmatpush2.msra.mxu0 %v3207_v23  ;;  %6232 = vmatpush3.msra.mxu1 %v3221_v13 }
 0x199   : > { %v7895_v42 = vpop.f32.mrf.mxu1  ;;  %2629 = vmatmul.mubr.f32.gmra.mxu1 %v2295_v19  ;;  %v1254_v12 = vpop.f32.mrf.mxu0  ;;  %v3206_v19 = vld [vmem:[%s9523_s3 + $0xc0] sm:$0xff]  ;;  %3276 = vmatprep.subr.mxu0 %v9558_v31  ;;  %v3219_v13 = vld [vmem:[%s9523_s3 + $0x128] sm:$0xff] }
 0x19a   : > { %9568 = vst [vmem:[#allocation45_spill] sm:$0xff] %v7895_v42  ;;  %2633 = vmatprep.mubr.f32.mxu1 %v2332_v8  ;;  %v3220_v8 = vld [vmem:[%s9523_s3 + $0x130] sm:$0xff]  ;;  %3277 = vmatpush2.msra.mxu0 %v3206_v19  ;;  %v2298_v19 = vld [vmem:[#allocation3 + $0x1a0] sm:$0xff] }
 0x19b   : > { %v1888_v51 = vpop.f32.mrf.mxu1  ;;  %v7904_v43 = vpop.f32.mrf.mxu0  ;;  %3278 = vmatprep.subr.mxu0 %v9558_v31  ;;  %6233 = vmatprep.subr.mxu1 %v3220_v8 }
 0x19c   : > { %v3205_v51 = vld [vmem:[%s9523_s3 + $0xb8] sm:$0xff]  ;;  %6234 = vmatpush3.msra.mxu1 %v3220_v8 }
 0x19d   : > { %v7910_v12 = vpop.f32.mrf.mxu1  ;;  %2634 = vmatmul.mubr.f32.gmra.mxu1 %v2296_v62  ;;  %v1259_v42 = vpop.f32.mrf.mxu0  ;;  %3279 = vmatpush2.msra.mxu0 %v3205_v51  ;;  %v3201_v8 = vld [vmem:[%s9523_s3 + $0x98] sm:$0xff] }
 0x19e   : > { %2638 = vmatprep.mubr.f32.mxu1 %v2333_v4  ;;  %v3204_v42 = vld [vmem:[%s9523_s3 + $0xb0] sm:$0xff]  ;;  %3280 = vmatprep.subr.mxu0 %v9558_v31  ;;  %v3203_v4 = vld [vmem:[%s9523_s3 + $0xa8] sm:$0xff] }
 0x19f   : > { %v1893_v33 = vpop.f32.mrf.mxu1  ;;  %v7919_v23 = vpop.f32.mrf.mxu0  ;;  %3281 = vmatpush2.msra.mxu0 %v3204_v42  ;;  %6235 = vmatprep.subr.mxu1 %v3219_v13 }
 0x1a0   : > { %3282 = vmatprep.subr.mxu0 %v9558_v31  ;;  %6236 = vmatpush3.msra.mxu1 %v3219_v13  ;;  %v3216_v13 = vld [vmem:[%s9523_s3 + $0x110] sm:$0xff] }
 0x1a1   : > { %v7925_v62 = vpop.f32.mrf.mxu1  ;;  %2639 = vmatmul.mubr.f32.gmra.mxu1 %v2297_v2  ;;  %v1264_v7 = vpop.f32.mrf.mxu0  ;;  %3283 = vmatpush2.msra.mxu0 %v3203_v4  ;;  %v3218_v2 = vld [vmem:[%s9523_s3 + $0x120] sm:$0xff] }
 0x1a2   : > { %9569 = vst [vmem:[#allocation46_spill] sm:$0xff] %v7925_v62  ;;  %2643 = vmatprep.mubr.f32.mxu1 %v2334_v32  ;;  %v3202_v7 = vld [vmem:[%s9523_s3 + $0xa0] sm:$0xff]  ;;  %3284 = vmatprep.subr.mxu0 %v9558_v31 }
 0x1a3   : > { %v1898_v33 = vpop.f32.mrf.mxu1  ;;  %v7934_v51 = vpop.f32.mrf.mxu0  ;;  %3285 = vmatpush2.msra.mxu0 %v3202_v7  ;;  %6237 = vmatprep.subr.mxu1 %v3218_v2  ;;  %v3200_v7 = vld [vmem:[%s9523_s3 + $0x90] sm:$0xff] }
 0x1a4   : > { %v3217_v33 = vld [vmem:[%s9523_s3 + $0x118] sm:$0xff]  ;;  %3286 = vmatprep.subr.mxu0 %v9558_v31  ;;  %6238 = vmatpush3.msra.mxu1 %v3218_v2  ;;  %v2337_v2 = vld [vmem:[#allocation3 + $0x1c9] sm:$0xff] }
 0x1a5   : > { %v7943_v62 = vpop.f32.mrf.mxu1  ;;  %2644 = vmatmul.mubr.f32.gmra.mxu1 %v2298_v19  ;;  %v1269_v32 = vpop.f32.mrf.mxu0  ;;  %3287 = vmatpush2.msra.mxu0 %v3201_v8  ;;  %v3199_v8 = vld [vmem:[%s9523_s3 + $0x88] sm:$0xff] }
 0x1a6   : > { %2648 = vmatprep.mubr.f32.mxu1 %v7516_v30  ;;  %6239 = vmatprep.subr.mxu1 %v3217_v33 }
 0x1a7   : > { %v1903_v42 = vpop.f32.mrf.mxu1  ;;  %v7950_v4 = vpop.f32.mrf.mxu0  ;;  %6240 = vmatpush3.msra.mxu1 %v3217_v33  ;;  %3288 = vmatprep.subr.mxu0 %v9558_v31  ;;  %v2301_v33 = vld [vmem:[#allocation3 + $0x1c8] sm:$0xff] }
 0x1a8   : > { %6241 = vmatprep.subr.mxu1 %v3216_v13  ;;  %3289 = vmatpush2.msra.mxu0 %v3200_v7  ;;  %v3214_v7 = vld [vmem:[%s9523_s3 + $0x100] sm:$0xff] }
 0x1a9   : > { %v7956_v19 = vpop.f32.mrf.mxu1  ;;  %2649 = vmatmul.mubr.f32.gmra.mxu1 %v7527_v36  ;;  %v1274_v30 = vpop.f32.mrf.mxu0  ;;  %v3215_v36 = vld [vmem:[%s9523_s3 + $0x108] sm:$0xff]  ;;  %3290 = vmatprep.subr.mxu0 %v9558_v31 }
 0x1aa   : > { %2653 = vmatprep.mubr.f32.mxu1 %v7530_v37  ;;  %v9570_v37 = vld [vmem:[#allocation15_spill] sm:$0xff]  ;;  %6242 = vmatpush3.msra.mxu1 %v3216_v13  ;;  %v7991_v13 = vld [vmem:[%s9523_s3 + $0x2f8] sm:$0xff] }
 0x1ab   : > { %v1908_v32 = vpop.f32.mrf.mxu1  ;;  %v7966_v42 = vpop.f32.mrf.mxu0  ;;  %6243 = vmatprep.subr.mxu1 %v3215_v36  ;;  %3291 = vmatpush2.msra.mxu0 %v3199_v8  ;;  %9571 = vst [vmem:[#allocation15_spill] sm:$0xff] %v7991_v13 }
 0x1ac   : > { %6244 = vmatpush3.msra.mxu1 %v3215_v36  ;;  %3292 = vmatprep.subr.mxu0 %v9558_v31 }
 0x1ad   : > { %v7975_v30 = vpop.f32.mrf.mxu1  ;;  %2654 = vmatmul.mubr.f32.gmra.mxu1 %v9570_v37  ;;  %v1279_v32 = vpop.f32.mrf.mxu0  ;;  %v3198_v37 = vld [vmem:[%s9523_s3 + $0x80] sm:$0xff]  ;;  %6245 = vmatprep.subr.mxu1 %v3214_v7 }
 0x1ae   : > { %2658 = vmatprep.mubr.f32.mxu1 %v2337_v2  ;;  %v2302_v32 = vld [vmem:[#allocation3 + $0x1d0] sm:$0xff]  ;;  %3293 = vmatpush2.msra.mxu0 %v3198_v37 }
 0x1af   : > { %v1913_v16 = vpop.f32.mrf.mxu1  ;;  %v7982_v55 = vpop.f32.mrf.mxu0  ;;  %6246 = vmatpush3.msra.mxu1 %v3214_v7  ;;  %6295 = vmatprep.subr.mxu0 %v7991_v13 }
 0x1b0   : > { %3858 = vmatprep.subr.mxu1 %v9558_v31  ;;  %v8012_v31 = vld [vmem:[%s9522_s2] ss:$0 sm:$0xff] }
 0x1b1   : > { %v7993_v2 = vpop.f32.mrf.mxu1  ;;  %2659 = vmatmul.mubr.f32.gmra.mxu1 %v2301_v33  ;;  %v1284_v16 = vpop.f32.mrf.mxu0  ;;  %v1549_v60 = vadd.f32 %v8012_v31, %v7610_v5 }
 0x1b2   : > { %2663 = vmatprep.mubr.f32.mxu1 %v2338_v54 }
 0x1b3   : > { %v1918_v8 = vpop.f32.mrf.mxu1  ;;  %v7995_v59 = vpop.f32.mrf.mxu0 }
 0x1b5   : > { %v7999_v36 = vpop.f32.mrf.mxu1  ;;  %2664 = vmatmul.mubr.f32.gmra.mxu1 %v2302_v32  ;;  %v1289_v1 = vpop.f32.mrf.mxu0 }
 0x1b6   : > { %v9573_v1 = vld [vmem:[#allocation19_spill] sm:$0xff] }
 0x1b7   : > { %v1923_v44 = vpop.f32.mrf.mxu1  ;;  %v8001_v61 = vpop.f32.mrf.mxu0 }
 0x1b8   : > { %9572 = vst [vmem:[#allocation47_spill] sm:$0xff] %v8001_v61  ;;  %v1547_v44 = vadd.f32 %v8012_v31, %v9573_v1 }
 0x1b9   : > { %v8003_v33 = vpop.f32.mrf.mxu1  ;;  %v1294_v54 = vpop.f32.mrf.mxu0 }
 0x1bb   : > { %v1928_v16 = vpop.f32.mrf.mxu1  ;;  %v8005_v37 = vpop.f32.mrf.mxu0 }
 0x1bd   : > { %v8007_v8 = vpop.f32.mrf.mxu1  ;;  %v1299_v7 = vpop.f32.mrf.mxu0 }
 0x1bf   : > { %v1933_v13 = vpop.f32.mrf.mxu1  ;;  %v6077_v32 = vpop.f32.mrf.mxu0 }
 0x1c0   : > { %v2057_v27 = vadd.f32 %v6077_v32, %v7703_v10 }
 0x1c1   : > { %v8017_v63 = vpop.f32.mrf.mxu1  ;;  %v8019_v54 = vpop.f32.mrf.mxu0 }
 0x1c2   : > { %9574 = vst [vmem:[#allocation19_spill] sm:$0xff] %v8019_v54  ;;  %v8021_v16 = vadd.f32 %v2057_v27, %v1547_v44  ;;  %v1551_v54 = vadd.f32 %v8012_v31, %v7638_v14 }
 0x1c3   : > { %v1938_v34 = vpop.f32.mrf.mxu1  ;;  %v6080_v7 = vpop.f32.mrf.mxu0 }
 0x1c4   : > { %9575 = vst [vmem:[#allocation48_spill] sm:$0xff] %v8021_v16  ;;  %v2067_v57 = vadd.f32 %v6080_v7, %v7723_v17  ;;  %v1553_v16 = vadd.f32 %v8012_v31, %v7658_v29 }
 0x1c5   : > { %v8026_v13 = vpop.f32.mrf.mxu1  ;;  %v8028_v61 = vpop.f32.mrf.mxu0 }
 0x1c6   : > { %v8030_v1 = vadd.f32 %v2067_v57, %v1549_v60 }
 0x1c7   : > { %v1943_v10 = vpop.f32.mrf.mxu1  ;;  %v6083_v32 = vpop.f32.mrf.mxu0 }
 0x1c8   : > { %9576 = vst [vmem:[#allocation49_spill] sm:$0xff] %v8030_v1  ;;  %v2077_v27 = vadd.f32 %v6083_v32, %v7750_v58  ;;  %v1555_v1 = vadd.f32 %v8012_v31, %v7678_v3 }
 0x1c9   : > { %v8035_v34 = vpop.f32.mrf.mxu1  ;;  %v8037_v44 = vpop.f32.mrf.mxu0 }
 0x1ca   : > { %v8039_v5 = vadd.f32 %v2077_v27, %v1551_v54 }
 0x1cb   : > { %v1948_v17 = vpop.f32.mrf.mxu1  ;;  %v6086_v7 = vpop.f32.mrf.mxu0 }
 0x1cc   : > { %9577 = vst [vmem:[#allocation50_spill] sm:$0xff] %v8039_v5  ;;  %v2087_v57 = vadd.f32 %v6086_v7, %v7775_v39  ;;  %v1557_v5 = vadd.f32 %v8012_v31, %v7700_v38 }
 0x1cd   : > { %v8044_v60 = vpop.f32.mrf.mxu1  ;;  %v8046_v10 = vpop.f32.mrf.mxu0 }
 0x1ce   : > { %v8048_v14 = vadd.f32 %v2087_v57, %v1553_v16 }
 0x1cf   : > { %v1953_v58 = vpop.f32.mrf.mxu1  ;;  %v6089_v32 = vpop.f32.mrf.mxu0 }
 0x1d0   : > { %9578 = vst [vmem:[#allocation51_spill] sm:$0xff] %v8048_v14  ;;  %v2097_v54 = vadd.f32 %v6089_v32, %v7802_v50  ;;  %v1559_v14 = vadd.f32 %v8012_v31, %v7717_v45 }
 0x1d1   : > { %v8053_v27 = vpop.f32.mrf.mxu1  ;;  %v8055_v17 = vpop.f32.mrf.mxu0 }
 0x1d2   : > { %v8057_v29 = vadd.f32 %v2097_v54, %v1555_v1  ;;  %v9582_v1 = vld [vmem:[#allocation16_spill] sm:$0xff] }
 0x1d3   : > { %v1958_v39 = vpop.f32.mrf.mxu1  ;;  %v6092_v7 = vpop.f32.mrf.mxu0  ;;  %v1443_v54 = vadd.f32 %v9582_v1, %v7740_v24 }
 0x1d4   : > { %9579 = vst [vmem:[#allocation52_spill] sm:$0xff] %v8057_v29  ;;  %v2107_v16 = vadd.f32 %v6092_v7, %v7830_v26 }
 0x1d5   : > { %v8062_v57 = vpop.f32.mrf.mxu1  ;;  %v8064_v58 = vpop.f32.mrf.mxu0 }
 0x1d6   : > { %9580 = vst [vmem:[#allocation53_spill] sm:$0xff] %v8064_v58  ;;  %v8066_v3 = vadd.f32 %v2107_v16, %v1557_v5  ;;  %v1561_v5 = vadd.f32 %v8012_v31, %v1443_v54  ;;  %v9584_v16 = vld [vmem:[#allocation18_spill] sm:$0xff] }
 0x1d7   : > { %v1963_v50 = vpop.f32.mrf.mxu1  ;;  %v6095_v32 = vpop.f32.mrf.mxu0 }
 0x1d8   : > { %9581 = vst [vmem:[#allocation54_spill] sm:$0xff] %v8066_v3  ;;  %v2117_v39 = vadd.f32 %v6095_v32, %v7857_v48  ;;  %v1453_v50 = vadd.f32 %v9584_v16, %v7767_v20 }
 0x1d9   : > { %v8073_v29 = vpop.f32.mrf.mxu1  ;;  %v8075_v38 = vpop.f32.mrf.mxu0 }
 0x1da   : > { %v8077_v26 = vadd.f32 %v2117_v39, %v1559_v14  ;;  %v1563_v14 = vadd.f32 %v8012_v31, %v1453_v50  ;;  %v9586_v39 = vld [vmem:[#allocation20_spill] sm:$0xff] }
 0x1db   : > { %v1968_v7 = vpop.f32.mrf.mxu1  ;;  %v6098_v58 = vpop.f32.mrf.mxu0 }
 0x1dc   : > { %9583 = vst [vmem:[#allocation16_spill] sm:$0xff] %v8077_v26  ;;  %v2127_v45 = vadd.f32 %v6098_v58, %v7881_v46  ;;  %v1463_v7 = vadd.f32 %v9586_v39, %v7795_v40 }
 0x1dd   : > { %v8083_v3 = vpop.f32.mrf.mxu1  ;;  %v8085_v24 = vpop.f32.mrf.mxu0 }
 0x1de   : > { %v8087_v48 = vadd.f32 %v2127_v45, %v1561_v5  ;;  %v1565_v5 = vadd.f32 %v8012_v31, %v1463_v7  ;;  %v9589_v45 = vld [vmem:[#allocation23_spill] sm:$0xff]  ;;  %v9592_v7 = vld [vmem:[#allocation25_spill] sm:$0xff] }
 0x1df   : > { %v1973_v32 = vpop.f32.mrf.mxu1  ;;  %v6101_v1 = vpop.f32.mrf.mxu0 }
 0x1e0   : > { %9585 = vst [vmem:[#allocation18_spill] sm:$0xff] %v8087_v48  ;;  %v2137_v54 = vadd.f32 %v6101_v1, %v7910_v12  ;;  %v1473_v32 = vadd.f32 %v9589_v45, %v7825_v22  ;;  %v9591_v12 = vld [vmem:[#allocation24_spill] sm:$0xff] }
 0x1e1   : > { %v8093_v26 = vpop.f32.mrf.mxu1  ;;  %v8095_v20 = vpop.f32.mrf.mxu0  ;;  %v1468_v1 = vadd.f32 %v9591_v12, %v7808_v9 }
 0x1e2   : > { %9587 = vst [vmem:[#allocation20_spill] sm:$0xff] %v8095_v20  ;;  %v8097_v46 = vadd.f32 %v2137_v54, %v1563_v14 }
 0x1e3   : > { %v1978_v58 = vpop.f32.mrf.mxu1  ;;  %v6104_v16 = vpop.f32.mrf.mxu0 }
 0x1e4   : > { %9588 = vst [vmem:[#allocation55_spill] sm:$0xff] %v8097_v46  ;;  %v2147_v50 = vadd.f32 %v6104_v16, %v7943_v62  ;;  %v1567_v58 = vadd.f32 %v8012_v31, %v1473_v32  ;;  %v1483_v46 = vadd.f32 %v9592_v7, %v7851_v0  ;;  %v1566_v16 = vadd.f32 %v8012_v31, %v1468_v1 }
 0x1e5   : > { %v8103_v48 = vpop.f32.mrf.mxu1  ;;  %v8105_v40 = vpop.f32.mrf.mxu0  ;;  %v1493_v0 = vadd.f32 %v7629_v25, %v7875_v52  ;;  %v1503_v52 = vadd.f32 %v7642_v53, %v7904_v43  ;;  %v1513_v43 = vadd.f32 %v7652_v35, %v7934_v51  ;;  %v1523_v51 = vadd.f32 %v7662_v41, %v7966_v42 }
 0x1e6   : > { %9590 = vst [vmem:[#allocation23_spill] sm:$0xff] %v8105_v40  ;;  %v8109_v39 = vadd.f32 %v2147_v50, %v1565_v5  ;;  %v9593_v40 = vld [vmem:[#allocation26_spill] sm:$0xff]  ;;  %v1569_v32 = vadd.f32 %v8012_v31, %v1483_v46  ;;  %v1533_v42 = vadd.f32 %v7672_v18, %v7995_v59  ;;  %v1543_v18 = vadd.f32 %v7682_v21, %v8005_v37 }
 0x1e7   : > { %v1983_v14 = vpop.f32.mrf.mxu1  ;;  %v6107_v54 = vpop.f32.mrf.mxu0  ;;  %v1478_v20 = vadd.f32 %v9593_v40, %v7835_v47  ;;  %v9594_v40 = vld [vmem:[#allocation28_spill] sm:$0xff]  ;;  %v1571_v25 = vadd.f32 %v8012_v31, %v1493_v0  ;;  %v1573_v53 = vadd.f32 %v8012_v31, %v1503_v52  ;;  %v1575_v35 = vadd.f32 %v8012_v31, %v1513_v43 }
 0x1e8   : > { %v2157_v22 = vadd.f32 %v6107_v54, %v7975_v30  ;;  %v1577_v41 = vadd.f32 %v8012_v31, %v1523_v51  ;;  %v1581_v21 = vadd.f32 %v8012_v31, %v1543_v18 }
 0x1e9   : > { %v8115_v45 = vpop.f32.mrf.mxu1  ;;  %v2151_v62 = vpop.f32.mrf.mxu0  ;;  %v1568_v47 = vadd.f32 %v8012_v31, %v1478_v20 }
 0x1ea   : > { %v8120_v9 = vadd.f32 %v2157_v22, %v1567_v58  ;;  %v2152_v5 = vadd.f32 %v2151_v62, %v7956_v19  ;;  %v1488_v58 = vadd.f32 %v9594_v40, %v7863_v49 }
 0x1eb   : > { %v2492_v50 = vpop.f32.mrf.mxu1  ;;  %v6110_v12 = vpop.f32.mrf.mxu0 }
 0x1ec   : > { %v8126_v30 = vadd.f32 %v2152_v5, %v1566_v16  ;;  %v2167_v14 = vadd.f32 %v6110_v12, %v7999_v36  ;;  %v1570_v49 = vadd.f32 %v8012_v31, %v1488_v58  ;;  %v1498_v5 = vadd.f32 %v7645_v11, %v7886_v15 }
 0x1ed   : > { %v8129_v54 = vpop.f32.mrf.mxu1  ;;  %v2161_v1 = vpop.f32.mrf.mxu0  ;;  %v1508_v15 = vadd.f32 %v7655_v6, %v7919_v23  ;;  %v1518_v23 = vadd.f32 %v7665_v28, %v7950_v4  ;;  %v1528_v28 = vadd.f32 %v7675_v56, %v7982_v55  ;;  %v9595_v55 = vld [vmem:[#allocation47_spill] sm:$0xff] }
 0x1ee   : > { %v8134_v19 = vadd.f32 %v2167_v14, %v1569_v32  ;;  %v2162_v7 = vadd.f32 %v2161_v1, %v7993_v2  ;;  %v1572_v11 = vadd.f32 %v8012_v31, %v1498_v5 }
 0x1ef   : > { %v2497_v46 = vpop.f32.mrf.mxu1  ;;  %v6113_v22 = vpop.f32.mrf.mxu0  ;;  %v1574_v6 = vadd.f32 %v8012_v31, %v1508_v15  ;;  %v1578_v56 = vadd.f32 %v8012_v31, %v1528_v28 }
 0x1f0   : > { %v8140_v36 = vadd.f32 %v2162_v7, %v1568_v47  ;;  %v2177_v62 = vadd.f32 %v6113_v22, %v8007_v8 }
 0x1f1   : > { %v8143_v16 = vpop.f32.mrf.mxu1  ;;  %v2171_v20 = vpop.f32.mrf.mxu0 }
 0x1f2   : > { %v8148_v2 = vadd.f32 %v2177_v62, %v1571_v25  ;;  %v2172_v50 = vadd.f32 %v2171_v20, %v8003_v33 }
 0x1f3   : > { %v2502_v12 = vpop.f32.mrf.mxu1  ;;  %v6116_v32 = vpop.f32.mrf.mxu0 }
 0x1f4   : > { %v8154_v8 = vadd.f32 %v2172_v50, %v1570_v49  ;;  %v2187_v0 = vadd.f32 %v6116_v32, %v8026_v13  ;;  %v1576_v50 = vadd.f32 %v8012_v31, %v1518_v23 }
 0x1f5   : > { %v8157_v14 = vpop.f32.mrf.mxu1  ;;  %v2181_v1 = vpop.f32.mrf.mxu0 }
 0x1f6   : > { %v8162_v33 = vadd.f32 %v2187_v0, %v1573_v53  ;;  %v2182_v47 = vadd.f32 %v2181_v1, %v8017_v63  ;;  %v1579_v53 = vadd.f32 %v8012_v31, %v1533_v42  ;;  %v9596_v1 = vld [vmem:[#allocation31_spill] sm:$0xff] }
 0x1f7   : > { %v2507_v40 = vpop.f32.mrf.mxu1  ;;  %v6119_v58 = vpop.f32.mrf.mxu0 }
 0x1f8   : > { %v8168_v13 = vadd.f32 %v2182_v47, %v1572_v11  ;;  %v2197_v7 = vadd.f32 %v6119_v58, %v8044_v60  ;;  %v1538_v11 = vadd.f32 %v9596_v1, %v9595_v55 }
 0x1f9   : > { %v8171_v46 = vpop.f32.mrf.mxu1  ;;  %v2191_v22 = vpop.f32.mrf.mxu0 }
 0x1fa   : > { %v8176_v63 = vadd.f32 %v2197_v7, %v1575_v35  ;;  %v2192_v25 = vadd.f32 %v2191_v22, %v8035_v34  ;;  %v1580_v51 = vadd.f32 %v8012_v31, %v1538_v11  ;;  %v9597_v7 = vld [vmem:[#allocation33_spill] sm:$0xff]  ;;  %v9598_v22 = vld [vmem:[#allocation19_spill] sm:$0xff] }
 0x1fb   : > { %v2512_v52 = vpop.f32.mrf.mxu1  ;;  %v6122_v62 = vpop.f32.mrf.mxu0 }
 0x1fc   : > { %v8182_v60 = vadd.f32 %v2192_v25, %v1574_v6  ;;  %v2207_v20 = vadd.f32 %v6122_v62, %v8062_v57  ;;  %v2052_v6 = vadd.f32 %v9598_v22, %v9597_v7  ;;  %v9599_v62 = vld [vmem:[#allocation17_spill] sm:$0xff]  ;;  %v9605_v7 = vld [vmem:[#allocation27_spill] sm:$0xff] }
 0x1fd   : > { %v2515_v49 = vpop.f32.mrf.mxu1  ;;  %v2201_v5 = vpop.f32.mrf.mxu0  ;;  %v1550_v22 = vadd.f32 %v8012_v31, %v9605_v7 }
 0x1fe   : > { %v8188_v4 = vadd.f32 %v2207_v20, %v1577_v41  ;;  %v2202_v34 = vadd.f32 %v2201_v5, %v8053_v27  ;;  %v1546_v41 = vadd.f32 %v8012_v31, %v9599_v62  ;;  %v9600_v20 = vld [vmem:[#allocation35_spill] sm:$0xff] }
 0x1ff   : > { %v2517_v12 = vpop.f32.mrf.mxu1  ;;  %v6125_v32 = vpop.f32.mrf.mxu0  ;;  %v2062_v5 = vadd.f32 %v8028_v61, %v9600_v20 }
 0x200   : > { %v8194_v59 = vadd.f32 %v2202_v34, %v1576_v50  ;;  %v2217_v57 = vadd.f32 %v6125_v32, %v8083_v3  ;;  %v2230_v34 = vadd.f32 %v2052_v6, %v1546_v41  ;;  %v9601_v12 = vld [vmem:[#allocation48_spill] sm:$0xff] }
 0x201   : > { %v8197_v43 = vpop.f32.mrf.mxu1  ;;  %v2211_v0 = vpop.f32.mrf.mxu0 }
 0x202   : > { %v8202_v27 = vadd.f32 %v2217_v57, %v1579_v53  ;;  %v2212_v15 = vadd.f32 %v2211_v0, %v8073_v29  ;;  %v9602_v53 = vld [vmem:[#allocation22_spill] sm:$0xff] }
 0x203   : > { %v2522_v47 = vpop.f32.mrf.mxu1  ;;  %v6128_v40 = vpop.f32.mrf.mxu0  ;;  %v1548_v18 = vadd.f32 %v8012_v31, %v9602_v53 }
 0x204   : > { %v8206_v37 = vadd.f32 %v2212_v15, %v1578_v56  ;;  %v2227_v3 = vadd.f32 %v6128_v40, %v8103_v48  ;;  %v9603_v15 = vld [vmem:[#allocation37_spill] sm:$0xff] }
 0x205   : > { %v2525_v58 = vpop.f32.mrf.mxu1  ;;  %v2221_v35 = vpop.f32.mrf.mxu0  ;;  %v2232_v1 = vadd.f32 %v2062_v5, %v1548_v18  ;;  %v2072_v47 = vadd.f32 %v8037_v44, %v9603_v15 }
 0x206   : > { %v8212_v23 = vadd.f32 %v2227_v3, %v1581_v21  ;;  %v2222_v25 = vadd.f32 %v2221_v35, %v8093_v26  ;;  %v9604_v21 = vld [vmem:[#allocation49_spill] sm:$0xff] }
 0x207   : > { %v2527_v29 = vpop.f32.mrf.mxu1  ;;  %v6163_v52 = vpop.f32.mrf.mxu0  ;;  %v2234_v41 = vadd.f32 %v2072_v47, %v1550_v22  ;;  %v9611_v47 = vld [vmem:[#allocation30_spill] sm:$0xff] }
 0x208   : > { %v8217_v42 = vadd.f32 %v2222_v25, %v1580_v51  ;;  %v2741_v48 = vadd.f32 %v6163_v52, %v8129_v54  ;;  %v9606_v29 = vld [vmem:[#allocation39_spill] sm:$0xff] }
 0x209   : > { %v8222_v50 = vpop.f32.mrf.mxu1  ;;  %v2735_v28 = vpop.f32.mrf.mxu0  ;;  %v2082_v44 = vadd.f32 %v8046_v10, %v9606_v29 }
 0x20a   : > { %v2915_v32 = vadd.f32 %v2741_v48, %v9601_v12  ;;  %v2736_v26 = vadd.f32 %v2735_v28, %v8115_v45  ;;  %v9607_v48 = vld [vmem:[#allocation50_spill] sm:$0xff]  ;;  %v9608_v28 = vld [vmem:[#allocation29_spill] sm:$0xff] }
 0x20b   : > { %v2532_v57 = vpop.f32.mrf.mxu1  ;;  %v6166_v0 = vpop.f32.mrf.mxu0 }
 0x20c   : > { %v2951_v56 = vmax.f32 %v2915_v32, 0.0  ;;  %v2914_v55 = vadd.f32 %v2736_v26, %v2230_v34  ;;  %v2751_v54 = vadd.f32 %v6166_v0, %v8157_v14  ;;  %v1552_v34 = vadd.f32 %v8012_v31, %v9608_v28  ;;  %v9609_v0 = vld [vmem:[#allocation41_spill] sm:$0xff] }
 0x20d   : > { %v2535_v11 = vpop.f32.mrf.mxu1  ;;  %v2745_v61 = vpop.f32.mrf.mxu0 }
 0x20e   : > { %2987 = vst [vmem:[#allocation4 + $0x9] sm:$0xff] %v2951_v56  ;;  %3040 = vst [vmem:[#allocation4 + $0xb] sm:$0x40] %v2951_v56  ;;  %v2950_v40 = vmax.f32 %v2914_v55, 0.0  ;;  %v2917_v45 = vadd.f32 %v2751_v54, %v9604_v21  ;;  %v2746_v3 = vadd.f32 %v2745_v61, %v8143_v16  ;;  %v2236_v53 = vadd.f32 %v2082_v44, %v1552_v34  ;;  %v9610_v55 = vld [vmem:[#allocation51_spill] sm:$0xff]  ;;  %v9615_v44 = vld [vmem:[#allocation32_spill] sm:$0xff] }
 0x20f   : > { %v2537_v35 = vpop.f32.mrf.mxu1  ;;  %v6169_v51 = vpop.f32.mrf.mxu0  ;;  %v2092_v56 = vadd.f32 %v8055_v17, %v9609_v0 }
 0x210   : > { %2986 = vst [vmem:[#allocation4 + $0x1] sm:$0xff] %v2950_v40  ;;  %v8235_v14 = vmax.f32 %v2917_v45, 0.0  ;;  %v2916_v6 = vadd.f32 %v2746_v3, %v2232_v1  ;;  %v2761_v25 = vadd.f32 %v6169_v51, %v2515_v49  ;;  %v9612_v45 = vld [vmem:[#allocation42_spill] sm:$0xff]  ;;  %v9613_v3 = vld [vmem:[#allocation53_spill] sm:$0xff] }
 0x211   : > { %v2540_v52 = vpop.f32.mrf.mxu1  ;;  %v2755_v62 = vpop.f32.mrf.mxu0  ;;  %v2102_v35 = vadd.f32 %v9613_v3, %v9612_v45 }
 0x212   : > { %2989 = vst [vmem:[#allocation4 + $0x21] sm:$0xff] %v8235_v14  ;;  %3041 = vst [vmem:[#allocation4 + $0x23] sm:$0x40] %v8235_v14  ;;  %v8241_v16 = vmax.f32 %v2916_v6, 0.0  ;;  %v2919_v20 = vadd.f32 %v2761_v25, %v9607_v48  ;;  %v2756_v5 = vadd.f32 %v2755_v62, %v8171_v46  ;;  %v9614_v6 = vld [vmem:[#allocation52_spill] sm:$0xff]  ;;  %v1556_v62 = vadd.f32 %v8012_v31, %v9615_v44 }
 0x213   : > { %v2542_v49 = vpop.f32.mrf.mxu1  ;;  %v6172_v12 = vpop.f32.mrf.mxu0 }
 0x214   : > { %2988 = vst [vmem:[#allocation4 + $0x19] sm:$0xff] %v8241_v16  ;;  %3023 = vst [vmem:[#allocation4 + $0x17] sm:$0x2] %v8241_v16  ;;  %v8249_v10 = vmax.f32 %v2919_v20, 0.0  ;;  %v2918_v32 = vadd.f32 %v2756_v5, %v2234_v41  ;;  %v2771_v26 = vadd.f32 %v6172_v12, %v2525_v58  ;;  %v1554_v58 = vadd.f32 %v8012_v31, %v9611_v47 }
 0x215   : > { %v2545_v18 = vpop.f32.mrf.mxu1  ;;  %v2765_v57 = vpop.f32.mrf.mxu0  ;;  %v2240_v28 = vadd.f32 %v2102_v35, %v1556_v62  ;;  %v9620_v35 = vld [vmem:[#allocation16_spill] sm:$0xff] }
 0x216   : > { %2991 = vst [vmem:[#allocation4 + $0x39] sm:$0xff] %v8249_v10  ;;  %3042 = vst [vmem:[#allocation4 + $0x3b] sm:$0x40] %v8249_v10  ;;  %v8255_v46 = vmax.f32 %v2918_v32, 0.0  ;;  %v2921_v54 = vadd.f32 %v2771_v26, %v9610_v55  ;;  %v2766_v1 = vadd.f32 %v2765_v57, %v8197_v43  ;;  %v2238_v22 = vadd.f32 %v2092_v56, %v1554_v58  ;;  %v9616_v32 = vld [vmem:[#allocation43_spill] sm:$0xff] }
 0x217   : > { %v2547_v61 = vpop.f32.mrf.mxu1  ;;  %v6175_v15 = vpop.f32.mrf.mxu0 }
 0x218   : > { %2990 = vst [vmem:[#allocation4 + $0x31] sm:$0xff] %v8255_v46  ;;  %3024 = vst [vmem:[#allocation4 + $0x2f] sm:$0x2] %v8255_v46  ;;  %v8263_v17 = vmax.f32 %v2921_v54, 0.0  ;;  %v2920_v40 = vadd.f32 %v2766_v1, %v2236_v53  ;;  %v2781_v21 = vadd.f32 %v6175_v15, %v2535_v11  ;;  %v9617_v53 = vld [vmem:[#allocation54_spill] sm:$0xff] }
 0x219   : > { %v2550_v51 = vpop.f32.mrf.mxu1  ;;  %v2775_v7 = vpop.f32.mrf.mxu0  ;;  %v9618_v1 = vld [vmem:[#allocation34_spill] sm:$0xff] }
 0x21a   : > { %2993 = vst [vmem:[#allocation4 + $0x51] sm:$0xff] %v8263_v17  ;;  %3043 = vst [vmem:[#allocation4 + $0x53] sm:$0x40] %v8263_v17  ;;  %v8269_v43 = vmax.f32 %v2920_v40, 0.0  ;;  %v2923_v25 = vadd.f32 %v2781_v21, %v9614_v6  ;;  %v2776_v29 = vadd.f32 %v2775_v7, %v8222_v50  ;;  %v2112_v50 = vadd.f32 %v8075_v38, %v9616_v32  ;;  %v9621_v6 = vld [vmem:[#allocation36_spill] sm:$0xff] }
 0x21b   : > { %v2552_v11 = vpop.f32.mrf.mxu1  ;;  %v6178_v41 = vpop.f32.mrf.mxu0  ;;  %v1558_v61 = vadd.f32 %v8012_v31, %v9618_v1  ;;  %v9625_v1 = vld [vmem:[#allocation18_spill] sm:$0xff] }
 0x21c   : > { %2992 = vst [vmem:[#allocation4 + $0x49] sm:$0xff] %v8269_v43  ;;  %3025 = vst [vmem:[#allocation4 + $0x47] sm:$0x2] %v8269_v43  ;;  %v8277_v48 = vmax.f32 %v2923_v25, 0.0  ;;  %v2922_v20 = vadd.f32 %v2776_v29, %v2238_v22  ;;  %v2791_v5 = vadd.f32 %v6178_v41, %v2545_v18  ;;  %v1560_v25 = vadd.f32 %v8012_v31, %v9621_v6 }
 0x21d   : > { %v3064_v34 = vld [vmem:[#allocation4 + $0x40] sm:$0x3]  ;;  %v2555_v49 = vpop.f32.mrf.mxu1  ;;  %v2785_v12 = vpop.f32.mrf.mxu0  ;;  %v2242_v45 = vadd.f32 %v2112_v50, %v1558_v61 }
 0x21e   : > { %3067 = vst [vmem:[#allocation4 + $0x10] sm:$0x3] %v3064_v34  ;;  %2995 = vst [vmem:[#allocation4 + $0x69] sm:$0xff] %v8277_v48  ;;  %v8283_v26 = vmax.f32 %v2922_v20, 0.0  ;;  %v2925_v57 = vadd.f32 %v2791_v5, %v9617_v53  ;;  %v2786_v0 = vadd.f32 %v2785_v12, %v2540_v52  ;;  %v9619_v52 = vld [vmem:[#allocation44_spill] sm:$0xff]  ;;  %v9622_v5 = vld [vmem:[#allocation45_spill] sm:$0xff] }
 0x21f   : > { %3044 = vst [vmem:[#allocation4 + $0x6b] sm:$0x40] %v8277_v48  ;;  %v2557_v56 = vpop.f32.mrf.mxu1  ;;  %v6181_v55 = vpop.f32.mrf.mxu0  ;;  %v8286_v18 = vld [vmem:[#allocation4 + $0x30] sm:$0xff]  ;;  %v8288_v54 = vld [vmem:[#allocation4 + $0x38] sm:$0xff]  ;;  %v2122_v58 = vadd.f32 %v8085_v24, %v9619_v52 }
 0x220   : > { %2994 = vst [vmem:[#allocation4 + $0x61] sm:$0xff] %v8283_v26  ;;  %3026 = vst [vmem:[#allocation4 + $0x5f] sm:$0x2] %v8283_v26  ;;  %v8294_v38 = vmax.f32 %v2925_v57, 0.0  ;;  %v2924_v15 = vadd.f32 %v2786_v0, %v2240_v28  ;;  %v2801_v47 = vadd.f32 %v6181_v55, %v2555_v49  ;;  %v9623_v28 = vld [vmem:[#allocation20_spill] sm:$0xff]  ;;  %v9624_v56 = vld [vmem:[#allocation38_spill] sm:$0xff] }
 0x221   : > { %3065 = vst [vmem:[#allocation4] sm:$0xff] %v8286_v18  ;;  %3066 = vst [vmem:[#allocation4 + $0x8] sm:$0xff] %v8288_v54  ;;  %v2560_v40 = vpop.f32.mrf.mxu1  ;;  %v2795_v21 = vpop.f32.mrf.mxu0  ;;  %v2244_v11 = vadd.f32 %v2122_v58, %v1560_v25  ;;  %v2132_v34 = vadd.f32 %v9623_v28, %v9622_v5  ;;  %v1562_v55 = vadd.f32 %v8012_v31, %v9624_v56  ;;  %v3153_v5 = vld [vmem:[#allocation4 + $0x22] sm:$0xff]  ;;  %v9629_v28 = vmov 0.0  }
 0x222   : > { %2997 = vst [vmem:[#allocation4 + $0x81] sm:$0xff] %v8294_v38  ;;  %3045 = vst [vmem:[#allocation4 + $0x83] sm:$0x40] %v8294_v38  ;;  %v8302_v3 = vmax.f32 %v2924_v15, 0.0  ;;  %v2927_v7 = vadd.f32 %v2801_v47, %v9620_v35  ;;  %v2796_v22 = vadd.f32 %v2795_v21, %v2550_v51  ;;  %v5567_v47 = vld [vmem:[%s9523_s3 + $0x1f8] sm:$0xff] }
 0x223   : > { %v2562_v29 = vpop.f32.mrf.mxu1  ;;  %v6184_v44 = vpop.f32.mrf.mxu0  ;;  %v3152_v21 = vld [vmem:[#allocation4 + $0x1a] sm:$0xff]  ;;  %v2246_v35 = vadd.f32 %v2132_v34, %v1562_v55  ;;  %v5566_v34 = vld [vmem:[%s9523_s3 + $0x1f0] sm:$0xff] }
 0x224   : > { %2996 = vst [vmem:[#allocation4 + $0x79] sm:$0xff] %v8302_v3  ;;  %3027 = vst [vmem:[#allocation4 + $0x77] sm:$0x2] %v8302_v3  ;;  %v8309_v24 = vmax.f32 %v2927_v7, 0.0  ;;  %v2926_v62 = vadd.f32 %v2796_v22, %v2242_v45  ;;  %v5598_v45 = vld [vmem:[%s9523_s3 + $0x2f0] sm:$0xff] }
 0x225   : > { %v2565_v41 = vpop.f32.mrf.mxu1  ;;  %v2805_v20 = vpop.f32.mrf.mxu0  ;;  %v9626_v29 = vld [vmem:[#allocation15_spill] sm:$0xff] }
 0x226   : > { %2999 = vst [vmem:[#allocation4 + $0x99] sm:$0xff] %v8309_v24  ;;  %3046 = vst [vmem:[#allocation4 + $0x9b] sm:$0x40] %v8309_v24  ;;  %v8315_v51 = vmax.f32 %v2926_v62, 0.0  ;;  %v2811_v49 = vadd.f32 %v6184_v44, %v2565_v41  ;;  %v2806_v12 = vadd.f32 %v2805_v20, %v2560_v40  ;;  %v9627_v62 = vld [vmem:[#allocation40_spill] sm:$0xff] }
 0x227   : > { %v2567_v32 = vpop.f32.mrf.mxu1  ;;  %v6187_v50 = vpop.f32.mrf.mxu0 }
 0x228   : > { %v3118_v53 = vld [vmem:[#allocation4 + $0x1] sm:$0xff]  ;;  %v3151_v0 = vld [vmem:[#allocation4 + $0xa] sm:$0xff]  ;;  %2998 = vst [vmem:[#allocation4 + $0x91] sm:$0xff] %v8315_v51  ;;  %3028 = vst [vmem:[#allocation4 + $0x8f] sm:$0x2] %v8315_v51  ;;  %v2929_v61 = vadd.f32 %v2811_v49, %v9625_v1  ;;  %v2928_v15 = vadd.f32 %v2806_v12, %v2244_v11 }
 0x229   : > { %v3150_v57 = vld [vmem:[#allocation4 + $0x2] sm:$0xff]  ;;  %3294 = vmatprep.mubr.f32.mxu0 %v3118_v53  ;;  %v2570_v52 = vpop.f32.mrf.mxu1  ;;  %v2815_v58 = vpop.f32.mrf.mxu0  ;;  %v3154_v12 = vld [vmem:[#allocation4 + $0x32] sm:$0xff] }
 0x22a   : > { %6247 = vmatprep.mubr.f32.mxu1 %v3150_v57  ;;  %3295 = vmatmul.mubr.f32.vlgmr.msra.gmra.mxu0 %v8286_v18  ;;  %v3119_v40 = vld [vmem:[#allocation4 + $0x9] sm:$0xff]  ;;  %v8329_v7 = vmax.f32 %v2929_v61, 0.0  ;;  %v8331_v22 = vmax.f32 %v2928_v15, 0.0  ;;  %v2816_v6 = vadd.f32 %v2815_v58, %v2570_v52  ;;  %v9628_v11 = vld [vmem:[#allocation21_spill] sm:$0xff]  ;;  %v8359_v58 = vld [vmem:[#allocation4 + $0x18] sm:$0xff] }
 0x22b   : > { %6248 = vmatmul.mubr.f32.vlgmr.msra.gmra.mxu1 %v3151_v0  ;;  %3299 = vmatprep.mubr.f32.mxu0 %v3119_v40  ;;  %v2572_v25 = vpop.f32.mrf.mxu1  ;;  %v8334_v44 = vpop.f32.mrf.mxu0  ;;  %v1458_v41 = vadd.f32 %v9628_v11, %v9627_v62  ;;  %v5597_v32 = vld [vmem:[%s9523_s3 + $0x2e8] sm:$0xff]  ;;  %v9631_v57 = vld [vmem:[#allocation23_spill] sm:$0xff]  ;;  %v3155_v40 = vld [vmem:[#allocation4 + $0x3a] sm:$0xff] }
 0x22c   : > { %6250 = vmatprep.mubr.f32.mxu1 %v3152_v21  ;;  %6296 = vmatpush3.msra.mxu0 %v9626_v29  ;;  %3001 = vst [vmem:[#allocation4 + $0xb1] sm:$0xff] %v8329_v7  ;;  %3047 = vst [vmem:[#allocation4 + $0xb3] sm:$0x40] %v8329_v7  ;;  %v2930_v20 = vadd.f32 %v2816_v6, %v2246_v35  ;;  %v9630_v53 = vld [vmem:[#allocation46_spill] sm:$0xff]  ;;  %v5596_v21 = vld [vmem:[%s9523_s3 + $0x2e0] sm:$0xff] }
 0x22d   : > { %3859 = vmatpush1.msra.mxu1 %v5567_v47  ;;  %3000 = vst [vmem:[#allocation4 + $0xa9] sm:$0xff] %v8331_v22  ;;  %3029 = vst [vmem:[#allocation4 + $0xa7] sm:$0x2] %v8331_v22  ;;  %6297 = vmatprep.subr.mxu0 %v5598_v45  ;;  %v2575_v49 = vpop.f32.mrf.mxu1  ;;  %v2142_v0 = vadd.f32 %v9631_v57, %v9630_v53  ;;  %v2825_v61 = vpop.f32.mrf.mxu0  ;;  %v1564_v15 = vadd.f32 %v8012_v31, %v1458_v41  ;;  %v9632_v47 = vld [vmem:[#allocation55_spill] sm:$0xff]  ;;  %v8374_v11 = vld [vmem:[#allocation4 + $0x20] sm:$0xff] }
 0x22e   : > { %3860 = vmatprep.subr.mxu1 %v9629_v28  ;;  %3300 = vmatmul.mubr.f32.gmra.mxu0 %v8288_v54  ;;  %v8352_v56 = vmax.f32 %v2930_v20, 0.0  ;;  %v2821_v55 = vadd.f32 %v6187_v50, %v2575_v49  ;;  %v3156_v31 = vld [vmem:[#allocation4 + $0x4a] sm:$0xff]  ;;  %v3157_v41 = vld [vmem:[#allocation4 + $0x52] sm:$0xff]  ;;  %v5564_v20 = vld [vmem:[%s9523_s3 + $0x1e0] sm:$0xff] }
 0x22f   : > { %6251 = vmatmul.mubr.f32.gmra.mxu1 %v3153_v5  ;;  %3304 = vmatprep.mubr.f32.mxu0 %v8241_v16  ;;  %v2577_v1 = vpop.f32.mrf.mxu1  ;;  %v5565_v16 = vld [vmem:[%s9523_s3 + $0x1e8] sm:$0xff]  ;;  %v6193_v29 = vpop.f32.mrf.mxu0 }
 0x230   : > { %6253 = vmatprep.mubr.f32.mxu1 %v3154_v12  ;;  %6298 = vmatpush3.msra.mxu0 %v5598_v45  ;;  %3002 = vst [vmem:[#allocation4 + $0xc1] sm:$0xff] %v8352_v56  ;;  %3030 = vst [vmem:[#allocation4 + $0xbf] sm:$0x2] %v8352_v56  ;;  %v2931_v52 = vadd.f32 %v2821_v55, %v9632_v47  ;;  %v2248_v45 = vadd.f32 %v2142_v0, %v1564_v15  ;;  %v3158_v5 = vld [vmem:[#allocation4 + $0x62] sm:$0xff]  ;;  %v3159_v0 = vld [vmem:[#allocation4 + $0x6a] sm:$0xff] }
 0x231   : > { %3861 = vmatpush1.msra.mxu1 %v5566_v34  ;;  %6299 = vmatprep.subr.mxu0 %v5597_v32  ;;  %v2580_v50 = vpop.f32.mrf.mxu1  ;;  %v5595_v34 = vld [vmem:[%s9523_s3 + $0x2d8] sm:$0xff]  ;;  %v2835_v53 = vpop.f32.mrf.mxu0  ;;  %v5594_v1 = vld [vmem:[%s9523_s3 + $0x2d0] sm:$0xff] }
 0x232   : > { %3862 = vmatprep.subr.mxu1 %v9629_v28  ;;  %3305 = vmatmul.mubr.f32.gmra.mxu0 %v8359_v58  ;;  %v8369_v35 = vmax.f32 %v2931_v52, 0.0  ;;  %v2826_v6 = vadd.f32 %v2825_v61, %v2580_v50  ;;  %v3160_v55 = vld [vmem:[#allocation4 + $0x7a] sm:$0xff]  ;;  %v8410_v50 = vld [vmem:[#allocation4 + $0x92] sm:$0xff] }
 0x233   : > { %6254 = vmatmul.mubr.f32.gmra.mxu1 %v3155_v40  ;;  %3309 = vmatprep.mubr.f32.mxu0 %v8235_v14  ;;  %v2582_v25 = vpop.f32.mrf.mxu1  ;;  %v6196_v47 = vpop.f32.mrf.mxu0  ;;  %v3161_v40 = vld [vmem:[#allocation4 + $0x82] sm:$0xff] }
 0x234   : > { %6256 = vmatprep.mubr.f32.mxu1 %v3156_v31  ;;  %6300 = vmatpush3.msra.mxu0 %v5597_v32  ;;  %3003 = vst [vmem:[#allocation4 + $0xc9] sm:$0xff] %v8369_v35  ;;  %3048 = vst [vmem:[#allocation4 + $0xcb] sm:$0x40] %v8369_v35  ;;  %v2932_v62 = vadd.f32 %v2826_v6, %v2248_v45  ;;  %v5593_v31 = vld [vmem:[%s9523_s3 + $0x2c8] sm:$0xff] }
 0x235   : > { %3863 = vmatpush1.msra.mxu1 %v5565_v16  ;;  %6301 = vmatprep.subr.mxu0 %v5596_v21  ;;  %v2585_v14 = vpop.f32.mrf.mxu1  ;;  %v5562_v16 = vld [vmem:[%s9523_s3 + $0x1d0] sm:$0xff]  ;;  %v2845_v6 = vpop.f32.mrf.mxu0 }
 0x236   : > { %3864 = vmatprep.subr.mxu1 %v9629_v28  ;;  %3310 = vmatmul.mubr.f32.gmra.mxu0 %v8374_v11  ;;  %v8384_v49 = vmax.f32 %v2932_v62, 0.0  ;;  %v2831_v12 = vadd.f32 %v8334_v44, %v2585_v14  ;;  %v5563_v44 = vld [vmem:[%s9523_s3 + $0x1d8] sm:$0xff]  ;;  %v8422_v62 = vld [vmem:[#allocation4 + $0x48] sm:$0xff] }
 0x237   : > { %6257 = vmatmul.mubr.f32.gmra.mxu1 %v3157_v41  ;;  %3314 = vmatprep.mubr.f32.mxu0 %v8255_v46  ;;  %v2587_v32 = vpop.f32.mrf.mxu1  ;;  %v8424_v41 = vld [vmem:[#allocation4 + $0x9a] sm:$0xff] }
 0x238   : > { %6259 = vmatprep.mubr.f32.mxu1 %v3158_v5  ;;  %3865 = vmatpush1.msra.mxu1 %v5564_v20  ;;  %3004 = vst [vmem:[#allocation4 + $0xd9] sm:$0xff] %v8384_v49  ;;  %3031 = vst [vmem:[#allocation4 + $0xd7] sm:$0x2] %v8384_v49  ;;  %v2933_v57 = vadd.f32 %v2831_v12, %v8109_v39  ;;  %v8432_v20 = vld [vmem:[#allocation4 + $0xaa] sm:$0xff]  ;;  %v6199_v12 = vpop.f32.mrf.mxu0 }
 0x239   : > { %6302 = vmatpush3.msra.mxu0 %v5596_v21  ;;  %3866 = vmatprep.subr.mxu1 %v9629_v28  ;;  %v2590_v46 = vpop.f32.mrf.mxu1 }
 0x23a   : > { %6303 = vmatprep.subr.mxu0 %v5595_v34  ;;  %3315 = vmatmul.mubr.f32.gmra.mxu0 %v8286_v18  ;;  %v8399_v61 = vmax.f32 %v2933_v57, 0.0  ;;  %v2836_v39 = vadd.f32 %v2835_v53, %v2590_v46  ;;  %v8444_v53 = vld [vmem:[#allocation4 + $0x50] sm:$0xff] }
 0x23b   : > { %6260 = vmatmul.mubr.f32.gmra.mxu1 %v3159_v0  ;;  %3319 = vmatprep.mubr.f32.mxu0 %v8249_v10  ;;  %v2592_v15 = vpop.f32.mrf.mxu1  ;;  %v8446_v57 = vld [vmem:[#allocation4 + $0xb2] sm:$0xff] }
 0x23c   : > { %6262 = vmatprep.mubr.f32.mxu1 %v3160_v55  ;;  %3867 = vmatpush1.msra.mxu1 %v5563_v44  ;;  %3005 = vst [vmem:[#allocation4 + $0xe1] sm:$0xff] %v8399_v61  ;;  %3049 = vst [vmem:[#allocation4 + $0xe3] sm:$0x40] %v8399_v61  ;;  %v2934_v52 = vadd.f32 %v2836_v39, %v8126_v30  ;;  %v8454_v44 = vld [vmem:[#allocation4 + $0xc2] sm:$0xff]  ;;  %v2855_v39 = vpop.f32.mrf.mxu0  ;;  %v5559_v15 = vld [vmem:[%s9523_s3 + $0x1b8] sm:$0xff] }
 0x23d   : > { %6304 = vmatpush3.msra.mxu0 %v5595_v34  ;;  %3868 = vmatprep.subr.mxu1 %v9629_v28  ;;  %v2595_v10 = vpop.f32.mrf.mxu1 }
 0x23e   : > { %6305 = vmatprep.subr.mxu0 %v5594_v1  ;;  %3320 = vmatmul.mubr.f32.gmra.mxu0 %v8288_v54  ;;  %v8415_v21 = vmax.f32 %v2934_v52, 0.0  ;;  %v2841_v30 = vadd.f32 %v6193_v29, %v2595_v10 }
 0x23f   : > { %6263 = vmatmul.mubr.f32.gmra.mxu1 %v3161_v40  ;;  %3324 = vmatprep.mubr.f32.mxu0 %v8269_v43  ;;  %v2597_v45 = vpop.f32.mrf.mxu1  ;;  %v5561_v43 = vld [vmem:[%s9523_s3 + $0x1c8] sm:$0xff] }
 0x240   : > { %6265 = vmatprep.mubr.f32.mxu1 %v8410_v50  ;;  %3869 = vmatpush1.msra.mxu1 %v5562_v16  ;;  %3006 = vst [vmem:[#allocation4 + $0xf1] sm:$0xff] %v8415_v21  ;;  %3032 = vst [vmem:[#allocation4 + $0xef] sm:$0x2] %v8415_v21  ;;  %v2935_v25 = vadd.f32 %v2841_v30, %v8120_v9  ;;  %v5592_v9 = vld [vmem:[%s9523_s3 + $0x2c0] sm:$0xff]  ;;  %v5558_v16 = vld [vmem:[%s9523_s3 + $0x1b0] sm:$0xff]  ;;  %v6202_v45 = vpop.f32.mrf.mxu0 }
 0x241   : > { %6306 = vmatpush3.msra.mxu0 %v5594_v1  ;;  %3870 = vmatprep.subr.mxu1 %v9629_v28  ;;  %v2600_v29 = vpop.f32.mrf.mxu1 }
 0x242   : > { %6307 = vmatprep.subr.mxu0 %v5593_v31  ;;  %3325 = vmatmul.mubr.f32.gmra.mxu0 %v8422_v62  ;;  %v8437_v14 = vmax.f32 %v2935_v25, 0.0  ;;  %v2846_v5 = vadd.f32 %v2845_v6, %v2600_v29  ;;  %v8489_v25 = vld [vmem:[#allocation4 + $0x68] sm:$0xff] }
 0x243   : > { %6266 = vmatmul.mubr.f32.gmra.mxu1 %v8424_v41  ;;  %3329 = vmatprep.mubr.f32.mxu0 %v8263_v17  ;;  %v2602_v34 = vpop.f32.mrf.mxu1  ;;  %v5560_v17 = vld [vmem:[%s9523_s3 + $0x1c0] sm:$0xff] }
 0x244   : > { %6268 = vmatprep.mubr.f32.mxu1 %v8432_v20  ;;  %3871 = vmatpush1.msra.mxu1 %v5561_v43  ;;  %3007 = vst [vmem:[#allocation4 + $0xf9] sm:$0xff] %v8437_v14  ;;  %3050 = vst [vmem:[#allocation4 + $0xfb] sm:$0x40] %v8437_v14  ;;  %v2936_v32 = vadd.f32 %v2846_v5, %v8140_v36  ;;  %v5591_v36 = vld [vmem:[%s9523_s3 + $0x2b8] sm:$0xff]  ;;  %v8496_v29 = vld [vmem:[#allocation4 + $0xe2] sm:$0xff] }
 0x245   : > { %6308 = vmatpush3.msra.mxu0 %v5593_v31  ;;  %3872 = vmatprep.subr.mxu1 %v9629_v28  ;;  %v2605_v0 = vpop.f32.mrf.mxu1 }
 0x246   : > { %6309 = vmatprep.subr.mxu0 %v5592_v9  ;;  %3330 = vmatmul.mubr.f32.gmra.mxu0 %v8444_v53  ;;  %v8459_v46 = vmax.f32 %v2936_v32, 0.0  ;;  %v2851_v55 = vadd.f32 %v6196_v47, %v2605_v0  ;;  %v8470_v47 = vld [vmem:[#allocation4 + $0x60] sm:$0xff]  ;;  %v2865_v0 = vpop.f32.mrf.mxu0 }
 0x247   : > { %6269 = vmatmul.mubr.f32.gmra.mxu1 %v8446_v57  ;;  %3334 = vmatprep.mubr.f32.mxu0 %v8283_v26  ;;  %v2607_v1 = vpop.f32.mrf.mxu1  ;;  %v8472_v26 = vld [vmem:[#allocation4 + $0xca] sm:$0xff]  ;;  %v5556_v32 = vld [vmem:[%s9523_s3 + $0x1a0] sm:$0xff] }
 0x248   : > { %6271 = vmatprep.mubr.f32.mxu1 %v8454_v44  ;;  %3873 = vmatpush1.msra.mxu1 %v5560_v17  ;;  %3008 = vst [vmem:[#allocation4 + $0x109] sm:$0xff] %v8459_v46  ;;  %3033 = vst [vmem:[#allocation4 + $0x107] sm:$0x2] %v8459_v46  ;;  %v2937_v52 = vadd.f32 %v2851_v55, %v8134_v19  ;;  %v8482_v19 = vld [vmem:[#allocation4 + $0xda] sm:$0xff] }
 0x249   : > { %6310 = vmatpush3.msra.mxu0 %v5592_v9  ;;  %3874 = vmatprep.subr.mxu1 %v9629_v28  ;;  %v2610_v40 = vpop.f32.mrf.mxu1  ;;  %v5590_v9 = vld [vmem:[%s9523_s3 + $0x2b0] sm:$0xff] }
 0x24a   : > { %6311 = vmatprep.subr.mxu0 %v5591_v36  ;;  %3335 = vmatmul.mubr.f32.gmra.mxu0 %v8470_v47  ;;  %v8479_v10 = vmax.f32 %v2937_v52, 0.0  ;;  %v2856_v31 = vadd.f32 %v2855_v39, %v2610_v40 }
 0x24b   : > { %6272 = vmatmul.mubr.f32.gmra.mxu1 %v8472_v26  ;;  %3339 = vmatprep.mubr.f32.mxu0 %v8277_v48  ;;  %v2612_v30 = vpop.f32.mrf.mxu1  ;;  %v5557_v48 = vld [vmem:[%s9523_s3 + $0x1a8] sm:$0xff]  ;;  %v8505_v34 = vld [vmem:[#allocation4 + $0xf2] sm:$0xff]  ;;  %v8521_v1 = vld [vmem:[#allocation4 + $0xfa] sm:$0xff] }
 0x24c   : > { %3875 = vmatpush1.msra.mxu1 %v5559_v15  ;;  %6274 = vmatprep.mubr.f32.mxu1 %v8482_v19  ;;  %3009 = vst [vmem:[#allocation4 + $0x111] sm:$0xff] %v8479_v10  ;;  %3051 = vst [vmem:[#allocation4 + $0x113] sm:$0x40] %v8479_v10  ;;  %v2938_v6 = vadd.f32 %v2856_v31, %v8154_v8  ;;  %v8538_v30 = vld [vmem:[#allocation4 + $0x80] sm:$0xff] }
 0x24d   : > { %3876 = vmatprep.subr.mxu1 %v9629_v28  ;;  %6312 = vmatpush3.msra.mxu0 %v5591_v36  ;;  %v2615_v43 = vpop.f32.mrf.mxu1  ;;  %v5555_v36 = vld [vmem:[%s9523_s3 + $0x198] sm:$0xff] }
 0x24e   : > { %3877 = vmatpush1.msra.mxu1 %v5558_v16  ;;  %3340 = vmatmul.mubr.f32.gmra.mxu0 %v8489_v25  ;;  %v8501_v8 = vmax.f32 %v2938_v6, 0.0  ;;  %v2861_v5 = vadd.f32 %v6199_v12, %v2615_v43  ;;  %v6205_v16 = vpop.f32.mrf.mxu0  ;;  %v5553_v6 = vld [vmem:[%s9523_s3 + $0x188] sm:$0xff] }
 0x24f   : > { %3878 = vmatprep.subr.mxu1 %v9629_v28  ;;  %6275 = vmatmul.mubr.f32.gmra.mxu1 %v8496_v29  ;;  %v2617_v17 = vpop.f32.mrf.mxu1 }
 0x250   : > { %3344 = vmatprep.mubr.f32.mxu0 %v8302_v3  ;;  %3879 = vmatpush1.msra.mxu1 %v5557_v48  ;;  %3010 = vst [vmem:[#allocation4 + $0x121] sm:$0xff] %v8501_v8  ;;  %3034 = vst [vmem:[#allocation4 + $0x11f] sm:$0x2] %v8501_v8  ;;  %v2939_v12 = vadd.f32 %v2861_v5, %v8148_v2  ;;  %v8515_v3 = vld [vmem:[#allocation4 + $0x78] sm:$0xff]  ;;  %v5554_v2 = vld [vmem:[%s9523_s3 + $0x190] sm:$0xff]  ;;  %v2875_v17 = vpop.f32.mrf.mxu0 }
 0x251   : > { %6277 = vmatprep.mubr.f32.mxu1 %v8505_v34  ;;  %3880 = vmatprep.subr.mxu1 %v9629_v28  ;;  %v2620_v55 = vpop.f32.mrf.mxu1 }
 0x252   : > { %6313 = vmatprep.subr.mxu0 %v5590_v9  ;;  %3881 = vmatpush1.msra.mxu1 %v5556_v32  ;;  %v8523_v39 = vmax.f32 %v2939_v12, 0.0  ;;  %v2866_v15 = vadd.f32 %v2865_v0, %v2620_v55  ;;  %v5583_v12 = vld [vmem:[%s9523_s3 + $0x278] sm:$0xff] }
 0x253   : > { %3345 = vmatmul.mubr.f32.gmra.mxu0 %v8515_v3  ;;  %3882 = vmatprep.subr.mxu1 %v9629_v28  ;;  %v2622_v52 = vpop.f32.mrf.mxu1  ;;  %v8531_v40 = vld [vmem:[#allocation4 + $0x10a] sm:$0xff]  ;;  %v8544_v48 = vld [vmem:[#allocation4 + $0x112] sm:$0xff] }
 0x254   : > { %6278 = vmatmul.mubr.f32.gmra.mxu1 %v8521_v1  ;;  %3349 = vmatprep.mubr.f32.mxu0 %v8294_v38  ;;  %3011 = vst [vmem:[#allocation4 + $0x129] sm:$0xff] %v8523_v39  ;;  %3052 = vst [vmem:[#allocation4 + $0x12b] sm:$0x40] %v8523_v39  ;;  %v2940_v31 = vadd.f32 %v2866_v15, %v8168_v13  ;;  %v5552_v13 = vld [vmem:[%s9523_s3 + $0x180] sm:$0xff]  ;;  %v5582_v15 = vld [vmem:[%s9523_s3 + $0x270] sm:$0xff] }
 0x255   : > { %3883 = vmatpush1.msra.mxu1 %v5555_v36  ;;  %6280 = vmatprep.mubr.f32.mxu1 %v8531_v40  ;;  %v2625_v38 = vpop.f32.mrf.mxu1 }
 0x256   : > { %3884 = vmatprep.subr.mxu1 %v9629_v28  ;;  %v8546_v43 = vmax.f32 %v2940_v31, 0.0  ;;  %v2871_v5 = vadd.f32 %v6202_v45, %v2625_v38  ;;  %v8558_v45 = vld [vmem:[#allocation4 + $0x90] sm:$0xff]  ;;  %6314 = vmatpush3.msra.mxu0 %v5590_v9  ;;  %v6208_v31 = vpop.f32.mrf.mxu0  ;;  %v5581_v38 = vld [vmem:[%s9523_s3 + $0x268] sm:$0xff] }
 0x257   : > { %3885 = vmatpush1.msra.mxu1 %v5554_v2  ;;  %3350 = vmatmul.mubr.f32.gmra.mxu0 %v8538_v30  ;;  %v2627_v32 = vpop.f32.mrf.mxu1 }
 0x258   : > { %3886 = vmatprep.subr.mxu1 %v9629_v28  ;;  %6281 = vmatmul.mubr.f32.gmra.mxu1 %v8544_v48  ;;  %3012 = vst [vmem:[#allocation4 + $0x139] sm:$0xff] %v8546_v43  ;;  %3035 = vst [vmem:[#allocation4 + $0x137] sm:$0x2] %v8546_v43  ;;  %v2941_v0 = vadd.f32 %v2871_v5, %v8162_v33 }
 0x259   : > { %3887 = vmatpush1.msra.mxu1 %v5553_v6  ;;  %3354 = vmatprep.mubr.f32.mxu0 %v8315_v51  ;;  %v5589_v51 = vld [vmem:[%s9523_s3 + $0x2a8] sm:$0xff]  ;;  %v2630_v36 = vpop.f32.mrf.mxu1 }
 0x25a   : > { %3888 = vmatprep.subr.mxu1 %v9629_v28  ;;  %v8567_v55 = vmax.f32 %v2941_v0, 0.0  ;;  %v2876_v33 = vadd.f32 %v2875_v17, %v2630_v36  ;;  %6315 = vmatprep.subr.mxu0 %v5589_v51  ;;  %v2885_v0 = vpop.f32.mrf.mxu0  ;;  %v5579_v36 = vld [vmem:[%s9523_s3 + $0x258] sm:$0xff] }
 0x25b   : > { %3889 = vmatpush1.msra.mxu1 %v5552_v13  ;;  %3355 = vmatmul.mubr.f32.gmra.mxu0 %v8558_v45  ;;  %v2632_v9 = vpop.f32.mrf.mxu1  ;;  %v8574_v2 = vld [vmem:[#allocation4 + $0x122] sm:$0xff]  ;;  %v8576_v52 = vld [vmem:[#allocation4 + $0x12a] sm:$0xff] }
 0x25c   : > { %3890 = vmatprep.subr.mxu1 %v9629_v28  ;;  %3359 = vmatprep.mubr.f32.mxu0 %v8309_v24  ;;  %3013 = vst [vmem:[#allocation4 + $0x141] sm:$0xff] %v8567_v55  ;;  %3053 = vst [vmem:[#allocation4 + $0x143] sm:$0x40] %v8567_v55  ;;  %v2942_v6 = vadd.f32 %v2876_v33, %v8182_v60  ;;  %v8583_v24 = vld [vmem:[#allocation4 + $0x98] sm:$0xff]  ;;  %v5580_v60 = vld [vmem:[%s9523_s3 + $0x260] sm:$0xff] }
 0x25d   : > { %3891 = vmatpush2.msra.mxu1 %v5583_v12  ;;  %6283 = vmatprep.mubr.f32.mxu1 %v8574_v2  ;;  %v2635_v5 = vpop.f32.mrf.mxu1  ;;  %v5578_v9 = vld [vmem:[%s9523_s3 + $0x250] sm:$0xff] }
 0x25e   : > { %3892 = vmatprep.subr.mxu1 %v9629_v28  ;;  %v8589_v13 = vmax.f32 %v2942_v6, 0.0  ;;  %v2881_v32 = vadd.f32 %v6205_v16, %v2635_v5  ;;  %6284 = vmatmul.mubr.f32.gmra.mxu1 %v8576_v52  ;;  %v8601_v16 = vld [vmem:[#allocation4 + $0xa8] sm:$0xff]  ;;  %v6211_v5 = vpop.f32.mrf.mxu0 }
 0x25f   : > { %3893 = vmatpush2.msra.mxu1 %v5582_v15  ;;  %3360 = vmatmul.mubr.f32.gmra.mxu0 %v8583_v24  ;;  %v2637_v17 = vpop.f32.mrf.mxu1 }
 0x260   : > { %3894 = vmatprep.subr.mxu1 %v9629_v28  ;;  %3364 = vmatprep.mubr.f32.mxu0 %v8331_v22  ;;  %3014 = vst [vmem:[#allocation4 + $0x151] sm:$0xff] %v8589_v13  ;;  %3036 = vst [vmem:[#allocation4 + $0x14f] sm:$0x2] %v8589_v13  ;;  %v2943_v12 = vadd.f32 %v2881_v32, %v8176_v63  ;;  %v5588_v22 = vld [vmem:[%s9523_s3 + $0x2a0] sm:$0xff] }
 0x261   : > { %3895 = vmatpush2.msra.mxu1 %v5581_v38  ;;  %6316 = vmatpush3.msra.mxu0 %v5589_v51  ;;  %v2640_v33 = vpop.f32.mrf.mxu1 }
 0x262   : > { %3896 = vmatprep.subr.mxu1 %v9629_v28  ;;  %v8610_v15 = vmax.f32 %v2943_v12, 0.0  ;;  %v2886_v63 = vadd.f32 %v2885_v0, %v2640_v33  ;;  %6317 = vmatprep.subr.mxu0 %v5588_v22  ;;  %v2895_v33 = vpop.f32.mrf.mxu0 }
 0x263   : > { %3897 = vmatpush2.msra.mxu1 %v5580_v60  ;;  %3365 = vmatmul.mubr.f32.gmra.mxu0 %v8601_v16  ;;  %v2642_v51 = vpop.f32.mrf.mxu1  ;;  %v8617_v6 = vld [vmem:[#allocation4 + $0x13a] sm:$0xff]  ;;  %v8619_v38 = vld [vmem:[#allocation4 + $0x142] sm:$0xff] }
 0x264   : > { %3898 = vmatprep.subr.mxu1 %v9629_v28  ;;  %3369 = vmatprep.mubr.f32.mxu0 %v8329_v7  ;;  %3015 = vst [vmem:[#allocation4 + $0x159] sm:$0xff] %v8610_v15  ;;  %3054 = vst [vmem:[#allocation4 + $0x15b] sm:$0x40] %v8610_v15  ;;  %v2944_v32 = vadd.f32 %v2886_v63, %v8194_v59  ;;  %v8626_v7 = vld [vmem:[#allocation4 + $0xb0] sm:$0xff]  ;;  %v5577_v60 = vld [vmem:[%s9523_s3 + $0x248] sm:$0xff] }
 0x265   : > { %3899 = vmatpush2.msra.mxu1 %v5579_v36  ;;  %6286 = vmatprep.mubr.f32.mxu1 %v8617_v6  ;;  %v2645_v17 = vpop.f32.mrf.mxu1  ;;  %v5576_v59 = vld [vmem:[%s9523_s3 + $0x240] sm:$0xff] }
 0x266   : > { %3900 = vmatprep.subr.mxu1 %v9629_v28  ;;  %v8632_v0 = vmax.f32 %v2944_v32, 0.0  ;;  %v2891_v12 = vadd.f32 %v6208_v31, %v2645_v17  ;;  %6287 = vmatmul.mubr.f32.gmra.mxu1 %v8619_v38  ;;  %v8644_v31 = vld [vmem:[#allocation4 + $0xc0] sm:$0xff] }
 0x267   : > { %3901 = vmatpush2.msra.mxu1 %v5578_v9  ;;  %3370 = vmatmul.mubr.f32.gmra.mxu0 %v8626_v7  ;;  %v2647_v36 = vpop.f32.mrf.mxu1  ;;  %v5575_v9 = vld [vmem:[%s9523_s3 + $0x238] sm:$0xff] }
 0x268   : > { %3902 = vmatprep.subr.mxu1 %v9629_v28  ;;  %3374 = vmatprep.mubr.f32.mxu0 %v8352_v56  ;;  %3016 = vst [vmem:[#allocation4 + $0x169] sm:$0xff] %v8632_v0  ;;  %3037 = vst [vmem:[#allocation4 + $0x167] sm:$0x2] %v8632_v0  ;;  %v2945_v63 = vadd.f32 %v2891_v12, %v8188_v4  ;;  %v5587_v56 = vld [vmem:[%s9523_s3 + $0x298] sm:$0xff] }
 0x269   : > { %3903 = vmatpush2.msra.mxu1 %v5577_v60  ;;  %6318 = vmatpush3.msra.mxu0 %v5588_v22  ;;  %v2650_v51 = vpop.f32.mrf.mxu1  ;;  %v5574_v60 = vld [vmem:[%s9523_s3 + $0x230] sm:$0xff] }
 0x26a   : > { %3904 = vmatprep.subr.mxu1 %v9629_v28  ;;  %v8653_v32 = vmax.f32 %v2945_v63, 0.0  ;;  %v2896_v4 = vadd.f32 %v2895_v33, %v2650_v51  ;;  %6319 = vmatprep.subr.mxu0 %v5587_v56  ;;  %v5573_v33 = vld [vmem:[%s9523_s3 + $0x228] sm:$0xff] }
 0x26b   : > { %3905 = vmatpush2.msra.mxu1 %v5576_v59  ;;  %3375 = vmatmul.mubr.f32.gmra.mxu0 %v8644_v31  ;;  %v2652_v22 = vpop.f32.mrf.mxu1  ;;  %v8660_v17 = vld [vmem:[#allocation4 + $0x152] sm:$0xff]  ;;  %v8662_v12 = vld [vmem:[#allocation4 + $0x15a] sm:$0xff]  ;;  %v6214_v59 = vpop.f32.mrf.mxu0 }
 0x26c   : > { %3906 = vmatprep.subr.mxu1 %v9629_v28  ;;  %3379 = vmatprep.mubr.f32.mxu0 %v8369_v35  ;;  %3017 = vst [vmem:[#allocation4 + $0x171] sm:$0xff] %v8653_v32  ;;  %3055 = vst [vmem:[#allocation4 + $0x173] sm:$0x40] %v8653_v32  ;;  %v2946_v36 = vadd.f32 %v2896_v4, %v8206_v37  ;;  %v8669_v35 = vld [vmem:[#allocation4 + $0xc8] sm:$0xff]  ;;  %v5572_v37 = vld [vmem:[%s9523_s3 + $0x220] sm:$0xff] }
 0x26d   : > { %3907 = vmatpush2.msra.mxu1 %v5575_v9  ;;  %6289 = vmatprep.mubr.f32.mxu1 %v8660_v17  ;;  %v2655_v63 = vpop.f32.mrf.mxu1  ;;  %v2905_v22 = vpop.f32.mrf.mxu0 }
 0x26e   : > { %3908 = vmatprep.subr.mxu1 %v9629_v28  ;;  %v8675_v9 = vmax.f32 %v2946_v36, 0.0  ;;  %v2901_v51 = vadd.f32 %v6211_v5, %v2655_v63  ;;  %6290 = vmatmul.mubr.f32.gmra.mxu1 %v8662_v12  ;;  %v8687_v5 = vld [vmem:[#allocation4 + $0xd8] sm:$0xff] }
 0x26f   : > { %3909 = vmatpush2.msra.mxu1 %v5574_v60  ;;  %3380 = vmatmul.mubr.f32.gmra.mxu0 %v8669_v35  ;;  %v2657_v4 = vpop.f32.mrf.mxu1  ;;  %v5571_v36 = vld [vmem:[%s9523_s3 + $0x218] sm:$0xff] }
 0x270   : > { %9633 = vst [vmem:[#allocation24_spill] sm:$0xff] %v8675_v9  ;;  %3910 = vmatprep.subr.mxu1 %v9629_v28  ;;  %3384 = vmatprep.mubr.f32.mxu0 %v8384_v49  ;;  %3018 = vst [vmem:[#allocation4 + $0x181] sm:$0xff] %v8675_v9  ;;  %v2947_v60 = vadd.f32 %v2901_v51, %v8202_v27  ;;  %v5586_v49 = vld [vmem:[%s9523_s3 + $0x290] sm:$0xff] }
 0x271   : > { %3911 = vmatpush2.msra.mxu1 %v5573_v33  ;;  %3038 = vst [vmem:[#allocation4 + $0x17f] sm:$0x2] %v8675_v9  ;;  %6320 = vmatpush3.msra.mxu0 %v5587_v56  ;;  %v2660_v33 = vpop.f32.mrf.mxu1  ;;  %v5570_v51 = vld [vmem:[%s9523_s3 + $0x210] sm:$0xff] }
 0x272   : > { %3912 = vmatprep.subr.mxu1 %v9629_v28  ;;  %v8696_v63 = vmax.f32 %v2947_v60, 0.0  ;;  %v2906_v27 = vadd.f32 %v2905_v22, %v2660_v33  ;;  %6321 = vmatprep.subr.mxu0 %v5586_v49  ;;  %v8712_v22 = vld [vmem:[#allocation4 + $0xe0] sm:$0xff]  ;;  %v5569_v60 = vld [vmem:[%s9523_s3 + $0x208] sm:$0xff] }
 0x273   : > { %3913 = vmatpush2.msra.mxu1 %v5572_v37  ;;  %3385 = vmatmul.mubr.f32.gmra.mxu0 %v8687_v5  ;;  %v2662_v56 = vpop.f32.mrf.mxu1  ;;  %v8703_v4 = vld [vmem:[#allocation4 + $0x16a] sm:$0xff] }
 0x274   : > { %9634 = vst [vmem:[#allocation25_spill] sm:$0xff] %v8696_v63  ;;  %3914 = vmatprep.subr.mxu1 %v9629_v28  ;;  %3389 = vmatprep.mubr.f32.mxu0 %v8399_v61  ;;  %3019 = vst [vmem:[#allocation4 + $0x189] sm:$0xff] %v8696_v63  ;;  %v2948_v37 = vadd.f32 %v2906_v27, %v8217_v42  ;;  %v8710_v61 = vld [vmem:[#allocation4 + $0x172] sm:$0xff]  ;;  %v5568_v27 = vld [vmem:[%s9523_s3 + $0x200] sm:$0xff] }
 0x275   : > { %3915 = vmatpush2.msra.mxu1 %v5571_v36  ;;  %3056 = vst [vmem:[#allocation4 + $0x18b] sm:$0x40] %v8696_v63  ;;  %6292 = vmatprep.mubr.f32.mxu1 %v8703_v4  ;;  %v2665_v36 = vpop.f32.mrf.mxu1  ;;  %v3745_v42 = vld [vmem:[#allocation4 + $0x19] sm:$0xff] }
 0x276   : > { %3916 = vmatprep.subr.mxu1 %v9629_v28  ;;  %v2984_v33 = vmax.f32 %v2948_v37, 0.0  ;;  %v2911_v56 = vadd.f32 %v6214_v59, %v2665_v36  ;;  %6293 = vmatmul.mubr.f32.gmra.mxu1 %v8710_v61  ;;  %v8728_v59 = vld [vmem:[#allocation4 + $0xf0] sm:$0xff]  ;;  %v5647_v37 = vld [vmem:[%s9523_s3 + $0x478] sm:$0xff] }
 0x277   : > { %3917 = vmatpush2.msra.mxu1 %v5570_v51  ;;  %3390 = vmatmul.mubr.f32.gmra.mxu0 %v8712_v22  ;;  %v2667_v63 = vpop.f32.mrf.mxu1  ;;  %v8723_v51 = vld [vmem:[#allocation4 + $0x168] sm:$0xff]  ;;  %v3074_v36 = vld [vmem:[#allocation4 + $0x178] sm:$0x3] }
 0x278   : > { %3918 = vmatprep.subr.mxu1 %v9629_v28  ;;  %3922 = vmatprep.mubr.f32.mxu1 %v3745_v42  ;;  %3020 = vst [vmem:[#allocation4 + $0x199] sm:$0xff] %v2984_v33  ;;  %3039 = vst [vmem:[#allocation4 + $0x197] sm:$0x2] %v2984_v33  ;;  %v2949_v9 = vadd.f32 %v2911_v56, %v8212_v23  ;;  %v5585_v63 = vld [vmem:[%s9523_s3 + $0x288] sm:$0xff]  ;;  %v8742_v33 = vld [vmem:[#allocation4 + $0xf8] sm:$0xff] }
 0x279   : > { %3919 = vmatpush2.msra.mxu1 %v5569_v60  ;;  %3394 = vmatprep.mubr.f32.mxu0 %v8415_v21  ;;  %3076 = vst [vmem:[#allocation4 + $0x198] sm:$0xff] %v8723_v51  ;;  %v3746_v21 = vld [vmem:[#allocation4 + $0x21] sm:$0xff]  ;;  %v8740_v60 = vld [vmem:[#allocation4 + $0x170] sm:$0xff] }
 0x27a   : > { %3920 = vmatprep.subr.mxu1 %v9629_v28  ;;  %v2985_v23 = vmax.f32 %v2949_v9, 0.0  ;;  %6322 = vmatpush3.msra.mxu0 %v5586_v49  ;;  %v8753_v9 = vld [vmem:[#allocation4 + $0x31] sm:$0xff]  ;;  %v8757_v49 = vld [vmem:[#allocation4 + $0x108] sm:$0xff]  ;;  %v5644_v42 = vld [vmem:[%s9523_s3 + $0x460] sm:$0xff] }
 0x27b   : > { %3921 = vmatpush2.msra.mxu1 %v5568_v27  ;;  %3395 = vmatmul.mubr.f32.gmra.mxu0 %v8728_v59  ;;  %v5645_v56 = vld [vmem:[%s9523_s3 + $0x468] sm:$0xff]  ;;  %v8783_v27 = vld [vmem:[#allocation4 + $0x120] sm:$0xff] }
 0x27c   : > { %3923 = vmatmul.mubr.f32.vlgmr.msra.gmra.mxu1 %v8359_v58  ;;  %3399 = vmatprep.mubr.f32.mxu0 %v8437_v14  ;;  %3021 = vst [vmem:[#allocation4 + $0x1a1] sm:$0xff] %v2985_v23  ;;  %3057 = vst [vmem:[#allocation4 + $0x1a3] sm:$0x40] %v2985_v23  ;;  %v5584_v58 = vld [vmem:[%s9523_s3 + $0x280] sm:$0xff]  ;;  %v5646_v14 = vld [vmem:[%s9523_s3 + $0x470] sm:$0xff] }
 0x27d   : > { %3927 = vmatprep.mubr.f32.mxu1 %v3746_v21  ;;  %6323 = vmatprep.subr.mxu0 %v5585_v63  ;;  %3077 = vst [vmem:[#allocation4 + $0x1a0] sm:$0xff] %v8740_v60  ;;  %3078 = vst [vmem:[#allocation4 + $0x1a8] sm:$0x3] %v3074_v36  ;;  %v8808_v23 = vld [vmem:[#allocation4 + $0x138] sm:$0xff]  ;;  %v8815_v21 = vld [vmem:[#allocation4 + $0x69] sm:$0xff] }
 0x27e   : > { %6375 = vmatprep.subr.mxu1 %v5647_v37  ;;  %6324 = vmatpush3.msra.mxu0 %v5585_v63  ;;  %v8794_v63 = vld [vmem:[#allocation4 + $0x128] sm:$0xff]  ;;  %v8819_v36 = vld [vmem:[#allocation4 + $0x140] sm:$0xff] }
 0x27f   : > { %3400 = vmatmul.mubr.f32.gmra.mxu0 %v8742_v33  ;;  %6376 = vmatpush3.msra.mxu1 %v5647_v37  ;;  %v5641_v37 = vld [vmem:[%s9523_s3 + $0x448] sm:$0xff] }
 0x280   : > { %3928 = vmatmul.mubr.f32.gmra.mxu1 %v8374_v11  ;;  %3404 = vmatprep.mubr.f32.mxu0 %v8459_v46  ;;  %v8764_v11 = vld [vmem:[#allocation4 + $0x39] sm:$0xff]  ;;  %v8768_v46 = vld [vmem:[#allocation4 + $0x110] sm:$0xff] }
 0x281   : > { %3932 = vmatprep.mubr.f32.mxu1 %v8753_v9  ;;  %6325 = vmatprep.subr.mxu0 %v5584_v58 }
 0x282   : > { %6377 = vmatprep.subr.mxu1 %v5646_v14  ;;  %6326 = vmatpush3.msra.mxu0 %v5584_v58  ;;  %v5638_v58 = vld [vmem:[%s9523_s3 + $0x430] sm:$0xff] }
 0x283   : > { %3405 = vmatmul.mubr.f32.gmra.mxu0 %v8757_v49  ;;  %6378 = vmatpush3.msra.mxu1 %v5646_v14  ;;  %v5637_v14 = vld [vmem:[%s9523_s3 + $0x428] sm:$0xff] }
 0x284   : > { %3933 = vmatmul.mubr.f32.gmra.mxu1 %v8286_v18  ;;  %3409 = vmatprep.mubr.f32.mxu0 %v8479_v10  ;;  %v8776_v18 = vld [vmem:[#allocation4 + $0x49] sm:$0xff]  ;;  %v5643_v10 = vld [vmem:[%s9523_s3 + $0x458] sm:$0xff] }
 0x285   : > { %3937 = vmatprep.mubr.f32.mxu1 %v8764_v11  ;;  %4486 = vmatprep.subr.mxu0 %v9629_v28 }
 0x286   : > { %6379 = vmatprep.subr.mxu1 %v5645_v56 }
 0x287   : > { %3410 = vmatmul.mubr.f32.gmra.mxu0 %v8768_v46  ;;  %6380 = vmatpush3.msra.mxu1 %v5645_v56  ;;  %v8833_v56 = vld [vmem:[#allocation4 + $0x150] sm:$0xff] }
 0x288   : > { %3938 = vmatmul.mubr.f32.gmra.mxu1 %v8288_v54  ;;  %3414 = vmatprep.mubr.f32.mxu0 %v8501_v8  ;;  %v5642_v54 = vld [vmem:[%s9523_s3 + $0x450] sm:$0xff] }
 0x289   : > { %3942 = vmatprep.mubr.f32.mxu1 %v8776_v18  ;;  %6381 = vmatprep.subr.mxu1 %v5644_v42  ;;  %v8790_v8 = vld [vmem:[#allocation4 + $0x51] sm:$0xff] }
 0x28a   : > { %6382 = vmatpush3.msra.mxu1 %v5644_v42  ;;  %v8840_v42 = vld [vmem:[#allocation4 + $0x81] sm:$0xff] }
 0x28b   : > { %3415 = vmatmul.mubr.f32.gmra.mxu0 %v8783_v27  ;;  %6383 = vmatprep.subr.mxu1 %v5643_v10 }
 0x28c   : > { %3943 = vmatmul.mubr.f32.gmra.mxu1 %v8422_v62  ;;  %3419 = vmatprep.mubr.f32.mxu0 %v8523_v39  ;;  %v8801_v62 = vld [vmem:[#allocation4 + $0x61] sm:$0xff] }
 0x28d   : > { %3947 = vmatprep.mubr.f32.mxu1 %v8790_v8  ;;  %6384 = vmatpush3.msra.mxu1 %v5643_v10  ;;  %v5640_v39 = vld [vmem:[%s9523_s3 + $0x440] sm:$0xff]  ;;  %v8844_v10 = vld [vmem:[#allocation4 + $0x158] sm:$0xff] }
 0x28e   : > { %6385 = vmatprep.subr.mxu1 %v5642_v54 }
 0x28f   : > { %3420 = vmatmul.mubr.f32.gmra.mxu0 %v8794_v63  ;;  %6386 = vmatpush3.msra.mxu1 %v5642_v54  ;;  %v5635_v54 = vld [vmem:[%s9523_s3 + $0x418] sm:$0xff] }
 0x290   : > { %3948 = vmatmul.mubr.f32.gmra.mxu1 %v8444_v53  ;;  %3424 = vmatprep.mubr.f32.mxu0 %v8546_v43  ;;  %v5639_v53 = vld [vmem:[%s9523_s3 + $0x438] sm:$0xff] }
 0x291   : > { %3952 = vmatprep.mubr.f32.mxu1 %v8801_v62  ;;  %6387 = vmatprep.subr.mxu1 %v5641_v37 }
 0x292   : > { %6388 = vmatpush3.msra.mxu1 %v5641_v37  ;;  %v5634_v37 = vld [vmem:[%s9523_s3 + $0x410] sm:$0xff] }
 0x293   : > { %3425 = vmatmul.mubr.f32.gmra.mxu0 %v8808_v23  ;;  %6389 = vmatprep.subr.mxu1 %v5640_v39 }
 0x294   : > { %3953 = vmatmul.mubr.f32.gmra.mxu1 %v8470_v47  ;;  %3429 = vmatprep.mubr.f32.mxu0 %v8567_v55  ;;  %v8826_v47 = vld [vmem:[#allocation4 + $0x79] sm:$0xff] }
 0x295   : > { %3957 = vmatprep.mubr.f32.mxu1 %v8815_v21  ;;  %6390 = vmatpush3.msra.mxu1 %v5640_v39  ;;  %v5633_v39 = vld [vmem:[%s9523_s3 + $0x408] sm:$0xff] }
 0x296   : > { %6391 = vmatprep.subr.mxu1 %v5639_v53 }
 0x297   : > { %3430 = vmatmul.mubr.f32.gmra.mxu0 %v8819_v36  ;;  %6392 = vmatpush3.msra.mxu1 %v5639_v53  ;;  %v5632_v53 = vld [vmem:[%s9523_s3 + $0x400] sm:$0xff] }
 0x298   : > { %3958 = vmatmul.mubr.f32.gmra.mxu1 %v8489_v25  ;;  %3434 = vmatprep.mubr.f32.mxu0 %v8589_v13  ;;  %v5636_v25 = vld [vmem:[%s9523_s3 + $0x420] sm:$0xff] }
 0x299   : > { %3962 = vmatprep.mubr.f32.mxu1 %v8826_v47  ;;  %6393 = vmatprep.subr.mxu1 %v5638_v58 }
 0x29a   : > { %6394 = vmatpush3.msra.mxu1 %v5638_v58  ;;  %v3777_v58 = vld [vmem:[#allocation4 + $0x1a] sm:$0xff] }
 0x29b   : > { %3435 = vmatmul.mubr.f32.gmra.mxu0 %v8833_v56  ;;  %6395 = vmatprep.subr.mxu1 %v5637_v14 }
 0x29c   : > { %3963 = vmatmul.mubr.f32.gmra.mxu1 %v8515_v3  ;;  %3439 = vmatprep.mubr.f32.mxu0 %v8610_v15  ;;  %v8851_v3 = vld [vmem:[#allocation4 + $0x91] sm:$0xff] }
 0x29d   : > { %3967 = vmatprep.mubr.f32.mxu1 %v8840_v42  ;;  %6396 = vmatpush3.msra.mxu1 %v5637_v14  ;;  %v8872_v14 = vld [vmem:[#allocation4 + $0xa9] sm:$0xff] }
 0x29e   : > { %6397 = vmatprep.subr.mxu1 %v5636_v25 }
 0x29f   : > { %3440 = vmatmul.mubr.f32.gmra.mxu0 %v8844_v10  ;;  %6398 = vmatpush3.msra.mxu1 %v5636_v25  ;;  %v5615_v25 = vld [vmem:[%s9523_s3 + $0x378] sm:$0xff] }
 0x2a0   : > { %3968 = vmatmul.mubr.f32.gmra.mxu1 %v8538_v30  ;;  %3444 = vmatprep.mubr.f32.mxu0 %v8632_v0  ;;  %v8863_v30 = vld [vmem:[#allocation4 + $0x99] sm:$0xff] }
 0x2a1   : > { %3972 = vmatprep.mubr.f32.mxu1 %v8851_v3  ;;  %6399 = vmatprep.subr.mxu1 %v5635_v54 }
 0x2a2   : > { %6400 = vmatpush3.msra.mxu1 %v5635_v54  ;;  %v8878_v54 = vld [vmem:[#allocation4 + $0x32] sm:$0xff] }
 0x2a3   : > { %3445 = vmatmul.mubr.f32.gmra.mxu0 %v8723_v51  ;;  %6401 = vmatprep.subr.mxu1 %v5634_v37 }
 0x2a4   : > { %3973 = vmatmul.mubr.f32.gmra.mxu1 %v8558_v45  ;;  %3449 = vmatprep.mubr.f32.mxu0 %v8653_v32  ;;  %v3778_v45 = vld [vmem:[#allocation4 + $0x22] sm:$0xff] }
 0x2a5   : > { %3977 = vmatprep.mubr.f32.mxu1 %v8863_v30  ;;  %6402 = vmatpush3.msra.mxu1 %v5634_v37  ;;  %v8881_v37 = vld [vmem:[#allocation4 + $0xb1] sm:$0xff] }
 0x2a6   : > { %6403 = vmatprep.subr.mxu1 %v5633_v39  ;;  %9635 = vst [vmem:[#allocation26_spill] sm:$0xff] %v8881_v37 }
 0x2a7   : > { %3450 = vmatmul.mubr.f32.gmra.mxu0 %v8740_v60  ;;  %6404 = vmatpush3.msra.mxu1 %v5633_v39  ;;  %v8889_v39 = vld [vmem:[#allocation4 + $0x3a] sm:$0xff] }
 0x2a8   : > { %3978 = vmatmul.mubr.f32.gmra.mxu1 %v8583_v24  ;;  %6327 = vmatprep.mubr.f32.mxu0 %v3777_v58  ;;  %v5614_v24 = vld [vmem:[%s9523_s3 + $0x370] sm:$0xff] }
 0x2a9   : > { %3982 = vmatprep.mubr.f32.mxu1 %v8872_v14  ;;  %6405 = vmatprep.subr.mxu1 %v5632_v53  ;;  %v8900_v58 = vld [vmem:[#allocation4 + $0x4a] sm:$0xff] }
 0x2aa   : > { %6406 = vmatpush3.msra.mxu1 %v5632_v53  ;;  %v8895_v53 = vld [vmem:[#allocation4 + $0xc1] sm:$0xff] }
 0x2ab   : > { %6328 = vmatmul.mubr.f32.vlgmr.msra.gmra.mxu0 %v3778_v45  ;;  %9636 = vst [vmem:[#allocation28_spill] sm:$0xff] %v8895_v53  ;;  %v5612_v45 = vld [vmem:[%s9523_s3 + $0x360] sm:$0xff] }
 0x2ac   : > { %3983 = vmatmul.mubr.f32.gmra.mxu1 %v8601_v16  ;;  %6330 = vmatprep.mubr.f32.mxu0 %v8878_v54  ;;  %v5613_v16 = vld [vmem:[%s9523_s3 + $0x368] sm:$0xff] }
 0x2ad   : > { %3987 = vmatprep.mubr.f32.mxu1 %v8881_v37  ;;  %4487 = vmatpush1.msra.mxu0 %v5615_v25  ;;  %v8910_v25 = vld [vmem:[#allocation4 + $0x52] sm:$0xff]  ;;  %v8950_v37 = vld [vmem:[#allocation4 + $0x82] sm:$0xff] }
 0x2ae   : > { %4488 = vmatprep.subr.mxu0 %v9629_v28 }
 0x2af   : > { %4489 = vmatpush1.msra.mxu0 %v5614_v24  ;;  %v5611_v24 = vld [vmem:[%s9523_s3 + $0x358] sm:$0xff] }
 0x2b0   : > { %3988 = vmatmul.mubr.f32.gmra.mxu1 %v8626_v7  ;;  %6331 = vmatmul.mubr.f32.gmra.mxu0 %v8889_v39  ;;  %v8908_v7 = vld [vmem:[#allocation4 + $0xc9] sm:$0xff] }
 0x2b1   : > { %3992 = vmatprep.mubr.f32.mxu1 %v8895_v53  ;;  %4490 = vmatprep.subr.mxu0 %v9629_v28  ;;  %9637 = vst [vmem:[#allocation47_spill] sm:$0xff] %v8908_v7  ;;  %v8917_v53 = vld [vmem:[#allocation4 + $0x62] sm:$0xff] }
 0x2b2   : > { %6333 = vmatprep.mubr.f32.mxu0 %v8900_v58  ;;  %4491 = vmatpush1.msra.mxu0 %v5613_v16  ;;  %v8926_v16 = vld [vmem:[#allocation4 + $0xd9] sm:$0xff] }
 0x2b3   : > { %4492 = vmatprep.subr.mxu0 %v9629_v28  ;;  %9638 = vst [vmem:[#allocation31_spill] sm:$0xff] %v8926_v16 }
 0x2b4   : > { %3993 = vmatmul.mubr.f32.gmra.mxu1 %v8644_v31  ;;  %4493 = vmatpush1.msra.mxu0 %v5612_v45  ;;  %v5610_v31 = vld [vmem:[%s9523_s3 + $0x350] sm:$0xff]  ;;  %v5609_v45 = vld [vmem:[%s9523_s3 + $0x348] sm:$0xff] }
 0x2b5   : > { %3997 = vmatprep.mubr.f32.mxu1 %v8908_v7  ;;  %6334 = vmatmul.mubr.f32.gmra.mxu0 %v8910_v25  ;;  %v8932_v7 = vld [vmem:[#allocation4 + $0x6a] sm:$0xff] }
 0x2b6   : > { %4494 = vmatprep.subr.mxu0 %v9629_v28  ;;  %6336 = vmatprep.mubr.f32.mxu0 %v8917_v53 }
 0x2b7   : > { %4495 = vmatpush1.msra.mxu0 %v5611_v24  ;;  %v8936_v24 = vld [vmem:[#allocation4 + $0x7a] sm:$0xff] }
 0x2b8   : > { %4496 = vmatprep.subr.mxu0 %v9629_v28  ;;  %3998 = vmatmul.mubr.f32.gmra.mxu1 %v8669_v35  ;;  %v5608_v35 = vld [vmem:[%s9523_s3 + $0x340] sm:$0xff] }
 0x2b9   : > { %4497 = vmatpush1.msra.mxu0 %v5610_v31  ;;  %4002 = vmatprep.mubr.f32.mxu1 %v8926_v16  ;;  %v8944_v31 = vld [vmem:[#allocation4 + $0xe1] sm:$0xff]  ;;  %v5607_v16 = vld [vmem:[%s9523_s3 + $0x338] sm:$0xff] }
 0x2ba   : > { %6337 = vmatmul.mubr.f32.gmra.mxu0 %v8932_v7  ;;  %4498 = vmatprep.subr.mxu0 %v9629_v28 }
 0x2bb   : > { %6339 = vmatprep.mubr.f32.mxu0 %v8936_v24  ;;  %4499 = vmatpush1.msra.mxu0 %v5609_v45  ;;  %v5606_v45 = vld [vmem:[%s9523_s3 + $0x330] sm:$0xff] }
 0x2bc   : > { %4500 = vmatprep.subr.mxu0 %v9629_v28  ;;  %4003 = vmatmul.mubr.f32.gmra.mxu1 %v8687_v5  ;;  %v8960_v5 = vld [vmem:[#allocation4 + $0xf1] sm:$0xff] }
 0x2bd   : > { %4501 = vmatpush1.msra.mxu0 %v5608_v35  ;;  %4007 = vmatprep.mubr.f32.mxu1 %v8944_v31  ;;  %v5605_v35 = vld [vmem:[%s9523_s3 + $0x328] sm:$0xff] }
 0x2be   : > { %6340 = vmatmul.mubr.f32.gmra.mxu0 %v8950_v37  ;;  %4502 = vmatprep.subr.mxu0 %v9629_v28 }
 0x2bf   : > { %6342 = vmatprep.mubr.f32.mxu0 %v8410_v50  ;;  %4503 = vmatpush1.msra.mxu0 %v5607_v16  ;;  %v5604_v50 = vld [vmem:[%s9523_s3 + $0x320] sm:$0xff]  ;;  %v5603_v16 = vld [vmem:[%s9523_s3 + $0x318] sm:$0xff] }
 0x2c0   : > { %4504 = vmatprep.subr.mxu0 %v9629_v28  ;;  %4008 = vmatmul.mubr.f32.gmra.mxu1 %v8712_v22  ;;  %v8974_v22 = vld [vmem:[#allocation4 + $0xf9] sm:$0xff] }
 0x2c1   : > { %4505 = vmatpush1.msra.mxu0 %v5606_v45  ;;  %4012 = vmatprep.mubr.f32.mxu1 %v8960_v5 }
 0x2c2   : > { %6343 = vmatmul.mubr.f32.gmra.mxu0 %v8424_v41  ;;  %4506 = vmatprep.subr.mxu0 %v9629_v28  ;;  %v5602_v41 = vld [vmem:[%s9523_s3 + $0x310] sm:$0xff] }
 0x2c3   : > { %6345 = vmatprep.mubr.f32.mxu0 %v8432_v20  ;;  %4507 = vmatpush1.msra.mxu0 %v5605_v35  ;;  %v8988_v20 = vld [vmem:[#allocation4 + $0x109] sm:$0xff] }
 0x2c4   : > { %4508 = vmatprep.subr.mxu0 %v9629_v28  ;;  %4013 = vmatmul.mubr.f32.gmra.mxu1 %v8728_v59  ;;  %v5601_v59 = vld [vmem:[%s9523_s3 + $0x308] sm:$0xff] }
 0x2c5   : > { %4509 = vmatpush1.msra.mxu0 %v5604_v50  ;;  %4017 = vmatprep.mubr.f32.mxu1 %v8974_v22 }
 0x2c6   : > { %6346 = vmatmul.mubr.f32.gmra.mxu0 %v8446_v57  ;;  %4510 = vmatprep.subr.mxu0 %v9629_v28  ;;  %v5600_v57 = vld [vmem:[%s9523_s3 + $0x300] sm:$0xff] }
 0x2c7   : > { %6348 = vmatprep.mubr.f32.mxu0 %v8454_v44  ;;  %4511 = vmatpush1.msra.mxu0 %v5603_v16  ;;  %v9002_v44 = vld [vmem:[#allocation4 + $0x111] sm:$0xff]  ;;  %v9640_v16 = vld [vmem:[#allocation25_spill] sm:$0xff] }
 0x2c8   : > { %4512 = vmatprep.subr.mxu0 %v9629_v28  ;;  %4018 = vmatmul.mubr.f32.gmra.mxu1 %v8742_v33  ;;  %v5631_v33 = vld [vmem:[%s9523_s3 + $0x3f8] sm:$0xff] }
 0x2c9   : > { %4513 = vmatpush1.msra.mxu0 %v5602_v41  ;;  %4022 = vmatprep.mubr.f32.mxu1 %v8988_v20 }
 0x2ca   : > { %6349 = vmatmul.mubr.f32.gmra.mxu0 %v8472_v26  ;;  %4514 = vmatprep.subr.mxu0 %v9629_v28  ;;  %v5630_v26 = vld [vmem:[%s9523_s3 + $0x3f0] sm:$0xff] }
 0x2cb   : > { %6351 = vmatprep.mubr.f32.mxu0 %v8482_v19  ;;  %4515 = vmatpush1.msra.mxu0 %v5601_v59  ;;  %v9016_v19 = vld [vmem:[#allocation4 + $0x121] sm:$0xff] }
 0x2cc   : > { %4516 = vmatprep.subr.mxu0 %v9629_v28  ;;  %4023 = vmatmul.mubr.f32.gmra.mxu1 %v8757_v49  ;;  %v5629_v49 = vld [vmem:[%s9523_s3 + $0x3e8] sm:$0xff] }
 0x2cd   : > { %4517 = vmatpush1.msra.mxu0 %v5600_v57  ;;  %4027 = vmatprep.mubr.f32.mxu1 %v9002_v44  ;;  %v9124_v57 = vld [vmem:[#allocation4 + $0x188] sm:$0xff] }
 0x2ce   : > { %6352 = vmatmul.mubr.f32.gmra.mxu0 %v8496_v29  ;;  %4518 = vmatprep.subr.mxu0 %v9629_v28  ;;  %v5628_v29 = vld [vmem:[%s9523_s3 + $0x3e0] sm:$0xff] }
 0x2cf   : > { %6354 = vmatprep.mubr.f32.mxu0 %v8505_v34  ;;  %4519 = vmatpush2.msra.mxu0 %v5631_v33  ;;  %v9030_v34 = vld [vmem:[#allocation4 + $0x129] sm:$0xff] }
 0x2d0   : > { %4520 = vmatprep.subr.mxu0 %v9629_v28  ;;  %4028 = vmatmul.mubr.f32.gmra.mxu1 %v8768_v46  ;;  %v5627_v46 = vld [vmem:[%s9523_s3 + $0x3d8] sm:$0xff] }
 0x2d1   : > { %4521 = vmatpush2.msra.mxu0 %v5630_v26  ;;  %4032 = vmatprep.mubr.f32.mxu1 %v9016_v19 }
 0x2d2   : > { %6355 = vmatmul.mubr.f32.gmra.mxu0 %v8521_v1  ;;  %4522 = vmatprep.subr.mxu0 %v9629_v28  ;;  %v5626_v1 = vld [vmem:[%s9523_s3 + $0x3d0] sm:$0xff] }
 0x2d3   : > { %6357 = vmatprep.mubr.f32.mxu0 %v8531_v40  ;;  %4523 = vmatpush2.msra.mxu0 %v5629_v49  ;;  %v5625_v40 = vld [vmem:[%s9523_s3 + $0x3c8] sm:$0xff]  ;;  %v4344_v49 = vld [vmem:[#allocation4 + $0x50] sm:$0xff] }
 0x2d4   : > { %4524 = vmatprep.subr.mxu0 %v9629_v28  ;;  %4033 = vmatmul.mubr.f32.gmra.mxu1 %v8783_v27 }
 0x2d5   : > { %4525 = vmatpush2.msra.mxu0 %v5628_v29  ;;  %4037 = vmatprep.mubr.f32.mxu1 %v9030_v34 }
 0x2d6   : > { %6358 = vmatmul.mubr.f32.gmra.mxu0 %v8544_v48  ;;  %4526 = vmatprep.subr.mxu0 %v9629_v28  ;;  %v5624_v48 = vld [vmem:[%s9523_s3 + $0x3c0] sm:$0xff] }
 0x2d7   : > { %6360 = vmatprep.mubr.f32.mxu0 %v8574_v2  ;;  %4527 = vmatpush2.msra.mxu0 %v5627_v46  ;;  %v5623_v2 = vld [vmem:[%s9523_s3 + $0x3b8] sm:$0xff] }
 0x2d8   : > { %4528 = vmatprep.subr.mxu0 %v9629_v28  ;;  %4038 = vmatmul.mubr.f32.gmra.mxu1 %v8794_v63 }
 0x2d9   : > { %4529 = vmatpush2.msra.mxu0 %v5626_v1  ;;  %4042 = vmatprep.mubr.f32.mxu1 %v8546_v43  ;;  %v5622_v43 = vld [vmem:[%s9523_s3 + $0x3b0] sm:$0xff] }
 0x2da   : > { %6361 = vmatmul.mubr.f32.gmra.mxu0 %v8576_v52  ;;  %4530 = vmatprep.subr.mxu0 %v9629_v28  ;;  %v5621_v52 = vld [vmem:[%s9523_s3 + $0x3a8] sm:$0xff] }
 0x2db   : > { %6363 = vmatprep.mubr.f32.mxu0 %v8617_v6  ;;  %4531 = vmatpush2.msra.mxu0 %v5625_v40  ;;  %v5619_v6 = vld [vmem:[%s9523_s3 + $0x398] sm:$0xff] }
 0x2dc   : > { %4532 = vmatprep.subr.mxu0 %v9629_v28  ;;  %4043 = vmatmul.mubr.f32.gmra.mxu1 %v8808_v23 }
 0x2dd   : > { %4533 = vmatpush2.msra.mxu0 %v5624_v48  ;;  %4047 = vmatprep.mubr.f32.mxu1 %v8567_v55  ;;  %v5620_v55 = vld [vmem:[%s9523_s3 + $0x3a0] sm:$0xff] }
 0x2de   : > { %6364 = vmatmul.mubr.f32.gmra.mxu0 %v8619_v38  ;;  %4534 = vmatprep.subr.mxu0 %v9629_v28  ;;  %v5618_v38 = vld [vmem:[%s9523_s3 + $0x390] sm:$0xff]  ;;  %v4345_v48 = vld [vmem:[#allocation4 + $0x60] sm:$0xff] }
 0x2df   : > { %6366 = vmatprep.mubr.f32.mxu0 %v8660_v17  ;;  %4535 = vmatpush2.msra.mxu0 %v5623_v2  ;;  %v9098_v17 = vld [vmem:[#allocation4 + $0x18a] sm:$0xff] }
 0x2e0   : > { %4536 = vmatprep.subr.mxu0 %v9629_v28  ;;  %4048 = vmatmul.mubr.f32.gmra.mxu1 %v8819_v36 }
 0x2e1   : > { %4537 = vmatpush2.msra.mxu0 %v5622_v43  ;;  %4052 = vmatprep.mubr.f32.mxu1 %v8589_v13  ;;  %v9086_v13 = vld [vmem:[#allocation4 + $0x182] sm:$0xff] }
 0x2e2   : > { %6367 = vmatmul.mubr.f32.gmra.mxu0 %v8662_v12  ;;  %4538 = vmatprep.subr.mxu0 %v9629_v28  ;;  %v5616_v12 = vld [vmem:[%s9523_s3 + $0x380] sm:$0xff] }
 0x2e3   : > { %6369 = vmatprep.mubr.f32.mxu0 %v8703_v4  ;;  %4539 = vmatpush2.msra.mxu0 %v5621_v52 }
 0x2e4   : > { %4540 = vmatprep.subr.mxu0 %v9629_v28  ;;  %4053 = vmatmul.mubr.f32.gmra.mxu1 %v8833_v56 }
 0x2e5   : > { %4541 = vmatpush2.msra.mxu0 %v5620_v55  ;;  %4057 = vmatprep.mubr.f32.mxu1 %v8610_v15  ;;  %v5617_v15 = vld [vmem:[%s9523_s3 + $0x388] sm:$0xff] }
 0x2e6   : > { %6370 = vmatmul.mubr.f32.gmra.mxu0 %v8710_v61  ;;  %4542 = vmatprep.subr.mxu0 %v9629_v28  ;;  %v4346_v55 = vld [vmem:[#allocation4 + $0x68] sm:$0xff] }
 0x2e7   : > { %6372 = vmatprep.mubr.f32.mxu0 %v9086_v13  ;;  %4543 = vmatpush2.msra.mxu0 %v5619_v6 }
 0x2e8   : > { %4544 = vmatprep.subr.mxu0 %v9629_v28  ;;  %4058 = vmatmul.mubr.f32.gmra.mxu1 %v8844_v10 }
 0x2e9   : > { %4545 = vmatpush2.msra.mxu0 %v5618_v38  ;;  %4062 = vmatprep.mubr.f32.mxu1 %v8632_v0  ;;  %v4341_v0 = vld [vmem:[#allocation4 + $0x30] sm:$0xff] }
 0x2ea   : > { %6373 = vmatmul.mubr.f32.gmra.mxu0 %v9098_v17  ;;  %4546 = vmatprep.subr.mxu0 %v9629_v28  ;;  %v3296_v4 = vpop.f32.mrf.mxu0 }
 0x2eb   : > { %4547 = vmatpush2.msra.mxu0 %v5617_v15  ;;  %4550 = vmatprep.mubr.f32.mxu0 %v8753_v9  ;;  %v6249_v61 = vpop.f32.mrf.mxu1  ;;  %v4347_v15 = vld [vmem:[#allocation4 + $0x78] sm:$0xff] }
 0x2ec   : > { %4548 = vmatprep.subr.mxu0 %v9629_v28  ;;  %4063 = vmatmul.mubr.f32.gmra.mxu1 %v8723_v51  ;;  %v3298_v27 = vpop.f32.mrf.mxu0  ;;  %v9639_v28 = vld [vmem:[#allocation24_spill] sm:$0xff] }
 0x2ed   : > { %4549 = vmatpush2.msra.mxu0 %v5616_v12  ;;  %4067 = vmatprep.mubr.f32.mxu1 %v8653_v32  ;;  %v3521_v63 = vpop.f32.mrf.mxu1  ;;  %v4342_v51 = vld [vmem:[#allocation4 + $0x38] sm:$0xff]  ;;  %v9117_v32 = vld [vmem:[#allocation4 + $0x180] sm:$0xff] }
 0x2ee   : > { %4551 = vmatmul.mubr.f32.vlgmr.msra.gmra.mxu0 %v4341_v0  ;;  %v9109_v23 = vadd.f32 %v3521_v63, %v3296_v4  ;;  %v3301_v36 = vpop.f32.mrf.mxu0 }
 0x2ef   : > { %4555 = vmatprep.mubr.f32.mxu0 %v8764_v11  ;;  %v6252_v56 = vpop.f32.mrf.mxu1  ;;  %v9113_v9 = vadd.f32 %v6249_v61, %v3301_v36  ;;  %v4413_v61 = vld [vmem:[#allocation4 + $0x92] sm:$0xff] }
 0x2f0   : > { %4068 = vmatmul.mubr.f32.gmra.mxu1 %v8740_v60  ;;  %v3303_v10 = vpop.f32.mrf.mxu0  ;;  %v4343_v60 = vld [vmem:[#allocation4 + $0x48] sm:$0xff] }
 0x2f1   : > { %4072 = vmatprep.mubr.f32.mxu1 %v9639_v28  ;;  %v3531_v45 = vpop.f32.mrf.mxu1  ;;  %v4416_v10 = vld [vmem:[#allocation4 + $0xb2] sm:$0xff] }
 0x2f2   : > { %4556 = vmatmul.mubr.f32.gmra.mxu0 %v4342_v51  ;;  %v3306_v35 = vpop.f32.mrf.mxu0 }
 0x2f3   : > { %4560 = vmatprep.mubr.f32.mxu0 %v8776_v18  ;;  %v6255_v50 = vpop.f32.mrf.mxu1  ;;  %v9120_v11 = vadd.f32 %v3531_v45, %v3306_v35 }
 0x2f4   : > { %4073 = vmatmul.mubr.f32.gmra.mxu1 %v9117_v32  ;;  %v3308_v41 = vpop.f32.mrf.mxu0 }
 0x2f5   : > { %4077 = vmatprep.mubr.f32.mxu1 %v9640_v16  ;;  %v3541_v59 = vpop.f32.mrf.mxu1  ;;  %v4350_v16 = vld [vmem:[#allocation4 + $0x98] sm:$0xff]  ;;  %v4418_v41 = vld [vmem:[#allocation4 + $0xca] sm:$0xff] }
 0x2f6   : > { %4561 = vmatmul.mubr.f32.gmra.mxu0 %v4343_v60  ;;  %v3311_v33 = vpop.f32.mrf.mxu0 }
 0x2f7   : > { %4565 = vmatprep.mubr.f32.mxu0 %v8790_v8  ;;  %v6258_v18 = vpop.f32.mrf.mxu1  ;;  %v9127_v26 = vadd.f32 %v6252_v56, %v3311_v33  ;;  %v4415_v56 = vld [vmem:[#allocation4 + $0xaa] sm:$0xff] }
 0x2f8   : > { %4078 = vmatmul.mubr.f32.gmra.mxu1 %v9124_v57  ;;  %v3313_v29 = vpop.f32.mrf.mxu0 }
 0x2f9   : > { %6407 = vmatprep.mubr.f32.mxu1 %v8878_v54  ;;  %v3551_v46 = vpop.f32.mrf.mxu1 }
 0x2fa   : > { %4566 = vmatmul.mubr.f32.gmra.mxu0 %v4344_v49  ;;  %v3316_v1 = vpop.f32.mrf.mxu0  ;;  %v4351_v49 = vld [vmem:[#allocation4 + $0xa8] sm:$0xff] }
 0x2fb   : > { %4570 = vmatprep.mubr.f32.mxu0 %v8801_v62  ;;  %v6261_v40 = vpop.f32.mrf.mxu1  ;;  %v9132_v8 = vadd.f32 %v3541_v59, %v3316_v1  ;;  %v4420_v1 = vld [vmem:[#allocation4 + $0xe2] sm:$0xff] }
 0x2fc   : > { %6408 = vmatmul.mubr.f32.vlgmr.msra.gmra.mxu1 %v8889_v39  ;;  %v3318_v2 = vpop.f32.mrf.mxu0 }
 0x2fd   : > { %6410 = vmatprep.mubr.f32.mxu1 %v8900_v58  ;;  %v3561_v43 = vpop.f32.mrf.mxu1  ;;  %v4421_v2 = vld [vmem:[#allocation4 + $0xf2] sm:$0xff] }
 0x2fe   : > { %4571 = vmatmul.mubr.f32.gmra.mxu0 %v4345_v48  ;;  %v3321_v54 = vpop.f32.mrf.mxu0 }
 0x2ff   : > { %4575 = vmatprep.mubr.f32.mxu0 %v8815_v21  ;;  %v9136_v52 = vpop.f32.mrf.mxu1  ;;  %v9139_v62 = vadd.f32 %v6255_v50, %v3321_v54  ;;  %v4417_v50 = vld [vmem:[#allocation4 + $0xc2] sm:$0xff] }
 0x300   : > { %6411 = vmatmul.mubr.f32.gmra.mxu1 %v8910_v25  ;;  %v3323_v39 = vpop.f32.mrf.mxu0 }
 0x301   : > { %6413 = vmatprep.mubr.f32.mxu1 %v8917_v53  ;;  %v3571_v6 = vpop.f32.mrf.mxu1  ;;  %v4422_v39 = vld [vmem:[#allocation4 + $0xfa] sm:$0xff] }
 0x302   : > { %4576 = vmatmul.mubr.f32.gmra.mxu0 %v4346_v55  ;;  %v3326_v58 = vpop.f32.mrf.mxu0  ;;  %v9642_v55 = vld [vmem:[#allocation28_spill] sm:$0xff] }
 0x303   : > { %4580 = vmatprep.mubr.f32.mxu0 %v8826_v47  ;;  %v9143_v38 = vpop.f32.mrf.mxu1  ;;  %v9146_v21 = vadd.f32 %v3551_v46, %v3326_v58  ;;  %v9641_v46 = vld [vmem:[#allocation26_spill] sm:$0xff] }
 0x304   : > { %6414 = vmatmul.mubr.f32.gmra.mxu1 %v8932_v7  ;;  %v3328_v25 = vpop.f32.mrf.mxu0  ;;  %v4348_v7 = vld [vmem:[#allocation4 + $0x80] sm:$0xff] }
 0x305   : > { %6416 = vmatprep.mubr.f32.mxu1 %v8936_v24  ;;  %v9149_v12 = vpop.f32.mrf.mxu1  ;;  %v4414_v24 = vld [vmem:[#allocation4 + $0x9a] sm:$0xff]  ;;  %v4423_v25 = vld [vmem:[#allocation4 + $0x10a] sm:$0xff] }
 0x306   : > { %4581 = vmatmul.mubr.f32.gmra.mxu0 %v4347_v15  ;;  %v3331_v53 = vpop.f32.mrf.mxu0 }
 0x307   : > { %4585 = vmatprep.mubr.f32.mxu0 %v8840_v42  ;;  %v9152_v4 = vpop.f32.mrf.mxu1  ;;  %v9155_v47 = vadd.f32 %v6258_v18, %v3331_v53  ;;  %v4419_v18 = vld [vmem:[#allocation4 + $0xda] sm:$0xff] }
 0x308   : > { %6417 = vmatmul.mubr.f32.gmra.mxu1 %v8950_v37  ;;  %v3333_v0 = vpop.f32.mrf.mxu0  ;;  %v4349_v37 = vld [vmem:[#allocation4 + $0x90] sm:$0xff]  ;;  %v4353_v53 = vld [vmem:[#allocation4 + $0xc0] sm:$0xff] }
 0x309   : > { %6419 = vmatprep.mubr.f32.mxu1 %v4413_v61  ;;  %v9157_v27 = vpop.f32.mrf.mxu1  ;;  %v9643_v61 = vld [vmem:[#allocation47_spill] sm:$0xff] }
 0x30a   : > { %4586 = vmatmul.mubr.f32.gmra.mxu0 %v4348_v7  ;;  %v3336_v63 = vpop.f32.mrf.mxu0  ;;  %v4424_v7 = vld [vmem:[#allocation4 + $0x112] sm:$0xff] }
 0x30b   : > { %4590 = vmatprep.mubr.f32.mxu0 %v8851_v3  ;;  %v9160_v36 = vpop.f32.mrf.mxu1  ;;  %v9162_v42 = vadd.f32 %v3561_v43, %v3336_v63  ;;  %v4352_v43 = vld [vmem:[#allocation4 + $0xb0] sm:$0xff] }
 0x30c   : > { %6420 = vmatmul.mubr.f32.gmra.mxu1 %v4414_v24  ;;  %v3338_v28 = vpop.f32.mrf.mxu0 }
 0x30d   : > { %6422 = vmatprep.mubr.f32.mxu1 %v4415_v56  ;;  %v9164_v51 = vpop.f32.mrf.mxu1  ;;  %v4425_v56 = vld [vmem:[#allocation4 + $0x122] sm:$0xff]  ;;  %v9644_v28 = vld [vmem:[#allocation31_spill] sm:$0xff] }
 0x30e   : > { %4591 = vmatmul.mubr.f32.gmra.mxu0 %v4349_v37  ;;  %v3341_v45 = vpop.f32.mrf.mxu0  ;;  %v4354_v37 = vld [vmem:[#allocation4 + $0xc8] sm:$0xff] }
 0x30f   : > { %4595 = vmatprep.mubr.f32.mxu0 %v8863_v30  ;;  %v9167_v3 = vadd.f32 %v6261_v40, %v3341_v45  ;;  %v9169_v35 = vpop.f32.mrf.mxu1 }
 0x310   : > { %6423 = vmatmul.mubr.f32.gmra.mxu1 %v4416_v10  ;;  %v3343_v60 = vpop.f32.mrf.mxu0  ;;  %v4426_v10 = vld [vmem:[#allocation4 + $0x12a] sm:$0xff] }
 0x311   : > { %6425 = vmatprep.mubr.f32.mxu1 %v4417_v50  ;;  %v9172_v33 = vpop.f32.mrf.mxu1  ;;  %v4427_v60 = vld [vmem:[#allocation4 + $0x13a] sm:$0xff] }
 0x312   : > { %4596 = vmatmul.mubr.f32.gmra.mxu0 %v4350_v16 }
 0x313   : > { %4600 = vmatprep.mubr.f32.mxu0 %v8872_v14  ;;  %v3346_v59 = vpop.f32.mrf.mxu0 }
 0x314   : > { %6426 = vmatmul.mubr.f32.gmra.mxu1 %v4418_v41  ;;  %v9174_v30 = vadd.f32 %v3571_v6, %v3346_v59  ;;  %v9177_v48 = vpop.f32.mrf.mxu1  ;;  %v4355_v41 = vld [vmem:[#allocation4 + $0xd8] sm:$0xff] }
 0x315   : > { %6428 = vmatprep.mubr.f32.mxu1 %v4419_v18  ;;  %v3348_v29 = vpop.f32.mrf.mxu0  ;;  %v4428_v18 = vld [vmem:[#allocation4 + $0x142] sm:$0xff] }
 0x316   : > { %4601 = vmatmul.mubr.f32.gmra.mxu0 %v4351_v49  ;;  %v9183_v58 = vpop.f32.mrf.mxu1 }
 0x317   : > { %4605 = vmatprep.mubr.f32.mxu0 %v9641_v46  ;;  %v3351_v40 = vpop.f32.mrf.mxu0  ;;  %v4429_v46 = vld [vmem:[#allocation4 + $0x152] sm:$0xff] }
 0x318   : > { %6429 = vmatmul.mubr.f32.gmra.mxu1 %v4420_v1  ;;  %v9180_v14 = vadd.f32 %v9136_v52, %v3351_v40  ;;  %v9189_v24 = vpop.f32.mrf.mxu1  ;;  %v4356_v1 = vld [vmem:[#allocation4 + $0xe0] sm:$0xff] }
 0x319   : > { %6431 = vmatprep.mubr.f32.mxu1 %v4421_v2  ;;  %v3353_v54 = vpop.f32.mrf.mxu0  ;;  %v4430_v2 = vld [vmem:[#allocation4 + $0x15a] sm:$0xff] }
 0x31a   : > { %4606 = vmatmul.mubr.f32.gmra.mxu0 %v4352_v43  ;;  %v9195_v50 = vpop.f32.mrf.mxu1 }
 0x31b   : > { %4610 = vmatprep.mubr.f32.mxu0 %v9642_v55  ;;  %v3356_v6 = vpop.f32.mrf.mxu0  ;;  %v4431_v55 = vld [vmem:[#allocation4 + $0x16a] sm:$0xff] }
 0x31c   : > { %6432 = vmatmul.mubr.f32.gmra.mxu1 %v4422_v39  ;;  %v9186_v15 = vadd.f32 %v9149_v12, %v3356_v6  ;;  %v4432_v6 = vld [vmem:[#allocation4 + $0x172] sm:$0xff] }
 0x31d   : > { %6434 = vmatprep.mubr.f32.mxu1 %v4423_v25  ;;  %v3358_v52 = vpop.f32.mrf.mxu0 }
 0x31e   : > { %4611 = vmatmul.mubr.f32.gmra.mxu0 %v4353_v53  ;;  %v9200_v59 = vpop.f32.mrf.mxu1  ;;  %v4358_v52 = vld [vmem:[#allocation4 + $0xf8] sm:$0xff] }
 0x31f   : > { %4615 = vmatprep.mubr.f32.mxu0 %v9643_v61  ;;  %v3361_v0 = vpop.f32.mrf.mxu0 }
 0x320   : > { %6435 = vmatmul.mubr.f32.gmra.mxu1 %v4424_v7  ;;  %v9192_v63 = vadd.f32 %v9143_v38, %v3361_v0  ;;  %v9206_v40 = vpop.f32.mrf.mxu1  ;;  %v4435_v0 = vld [vmem:[#allocation4 + $0x19a] sm:$0xff] }
 0x321   : > { %6437 = vmatprep.mubr.f32.mxu1 %v4425_v56  ;;  %v3363_v12 = vpop.f32.mrf.mxu0  ;;  %v4359_v56 = vld [vmem:[#allocation4 + $0x108] sm:$0xff] }
 0x322   : > { %4616 = vmatmul.mubr.f32.gmra.mxu0 %v4354_v37 }
 0x323   : > { %4620 = vmatprep.mubr.f32.mxu0 %v9644_v28  ;;  %v3366_v45 = vpop.f32.mrf.mxu0 }
 0x324   : > { %6438 = vmatmul.mubr.f32.gmra.mxu1 %v4426_v10  ;;  %v9198_v16 = vadd.f32 %v9157_v27, %v3366_v45 }
 0x325   : > { %6440 = vmatprep.mubr.f32.mxu1 %v4427_v60  ;;  %v3368_v38 = vpop.f32.mrf.mxu0 }
 0x326   : > { %4621 = vmatmul.mubr.f32.gmra.mxu0 %v4355_v41  ;;  %v9209_v54 = vpop.f32.mrf.mxu1  ;;  %v4361_v41 = vld [vmem:[#allocation4 + $0x120] sm:$0xff] }
 0x327   : > { %4625 = vmatprep.mubr.f32.mxu0 %v8944_v31  ;;  %v3371_v49 = vpop.f32.mrf.mxu0 }
 0x328   : > { %6441 = vmatmul.mubr.f32.gmra.mxu1 %v4428_v18  ;;  %v9204_v29 = vadd.f32 %v9152_v4, %v3371_v49  ;;  %v4357_v4 = vld [vmem:[#allocation4 + $0xf0] sm:$0xff]  ;;  %v9215_v53 = vpop.f32.mrf.mxu1 }
 0x329   : > { %6443 = vmatprep.mubr.f32.mxu1 %v4429_v46  ;;  %v3373_v27 = vpop.f32.mrf.mxu0 }
 0x32a   : > { %4626 = vmatmul.mubr.f32.gmra.mxu0 %v4356_v1  ;;  %v4362_v1 = vld [vmem:[#allocation4 + $0x128] sm:$0xff] }
 0x32b   : > { %4630 = vmatprep.mubr.f32.mxu0 %v8960_v5  ;;  %v3376_v43 = vpop.f32.mrf.mxu0 }
 0x32c   : > { %6444 = vmatmul.mubr.f32.gmra.mxu1 %v4430_v2  ;;  %v9212_v31 = vadd.f32 %v9164_v51, %v3376_v43  ;;  %v4395_v2 = vld [vmem:[#allocation4 + $0x139] sm:$0xff] }
 0x32d   : > { %6446 = vmatprep.mubr.f32.mxu1 %v4431_v55  ;;  %v3378_v39 = vpop.f32.mrf.mxu0 }
 0x32e   : > { %4631 = vmatmul.mubr.f32.gmra.mxu0 %v4357_v4  ;;  %v9221_v61 = vpop.f32.mrf.mxu1  ;;  %v4363_v4 = vld [vmem:[#allocation4 + $0x138] sm:$0xff] }
 0x32f   : > { %4635 = vmatprep.mubr.f32.mxu0 %v8974_v22  ;;  %v3381_v25 = vpop.f32.mrf.mxu0 }
 0x330   : > { %6447 = vmatmul.mubr.f32.gmra.mxu1 %v4432_v6  ;;  %v9218_v5 = vadd.f32 %v9160_v36, %v3381_v25  ;;  %v9228_v37 = vpop.f32.mrf.mxu1  ;;  %v4396_v6 = vld [vmem:[#allocation4 + $0x141] sm:$0xff] }
 0x331   : > { %6449 = vmatprep.mubr.f32.mxu1 %v9086_v13  ;;  %v3383_v51 = vpop.f32.mrf.mxu0  ;;  %v4436_v13 = vld [vmem:[#allocation4 + $0x1a2] sm:$0xff] }
 0x332   : > { %4636 = vmatmul.mubr.f32.gmra.mxu0 %v4358_v52  ;;  %v4364_v51 = vld [vmem:[#allocation4 + $0x140] sm:$0xff] }
 0x333   : > { %4640 = vmatprep.mubr.f32.mxu0 %v8988_v20  ;;  %v3386_v7 = vpop.f32.mrf.mxu0 }
 0x334   : > { %6450 = vmatmul.mubr.f32.gmra.mxu1 %v9098_v17  ;;  %v9226_v22 = vadd.f32 %v9172_v33, %v3386_v7  ;;  %v4360_v17 = vld [vmem:[#allocation4 + $0x110] sm:$0xff] }
 0x335   : > { %6452 = vmatprep.mubr.f32.mxu1 %v4435_v0  ;;  %v3388_v36 = vpop.f32.mrf.mxu0 }
 0x336   : > { %4641 = vmatmul.mubr.f32.gmra.mxu0 %v4359_v56  ;;  %v9231_v28 = vpop.f32.mrf.mxu1  ;;  %v4397_v56 = vld [vmem:[#allocation4 + $0x151] sm:$0xff] }
 0x337   : > { %4645 = vmatprep.mubr.f32.mxu0 %v9002_v44  ;;  %v3391_v12 = vpop.f32.mrf.mxu0 }
 0x338   : > { %6453 = vmatmul.mubr.f32.gmra.mxu1 %v4436_v13  ;;  %v9234_v20 = vadd.f32 %v9169_v35, %v3391_v12  ;;  %v9236_v10 = vpop.f32.mrf.mxu1  ;;  %v4365_v12 = vld [vmem:[#allocation4 + $0x150] sm:$0xff] }
 0x339   : > { %v3393_v33 = vpop.f32.mrf.mxu0 }
 0x33a   : > { %4646 = vmatmul.mubr.f32.gmra.mxu0 %v4360_v17 }
 0x33b   : > { %4650 = vmatprep.mubr.f32.mxu0 %v9016_v19  ;;  %v3396_v45 = vpop.f32.mrf.mxu0 }
 0x33c   : > { %v9239_v60 = vpop.f32.mrf.mxu1  ;;  %v9242_v44 = vadd.f32 %v9183_v58, %v3396_v45  ;;  %v4398_v45 = vld [vmem:[#allocation4 + $0x159] sm:$0xff] }
 0x33d   : > { %v3398_v38 = vpop.f32.mrf.mxu0 }
 0x33e   : > { %4651 = vmatmul.mubr.f32.gmra.mxu0 %v4361_v41  ;;  %v3926_v18 = vpop.f32.mrf.mxu1 }
 0x33f   : > { %4655 = vmatprep.mubr.f32.mxu0 %v9030_v34  ;;  %v3401_v35 = vpop.f32.mrf.mxu0  ;;  %v4366_v18 = vld [vmem:[#allocation4 + $0x158] sm:$0xff] }
 0x340   : > { %v9245_v49 = vpop.f32.mrf.mxu1  ;;  %v9248_v46 = vadd.f32 %v9177_v48, %v3401_v35 }
 0x341   : > { %v3403_v19 = vpop.f32.mrf.mxu0 }
 0x342   : > { %4656 = vmatmul.mubr.f32.gmra.mxu0 %v4362_v1  ;;  %v3931_v27 = vpop.f32.mrf.mxu1  ;;  %v4399_v19 = vld [vmem:[#allocation4 + $0x169] sm:$0xff] }
 0x343   : > { %4660 = vmatprep.mubr.f32.mxu0 %v4395_v2  ;;  %v3406_v58 = vpop.f32.mrf.mxu0 }
 0x344   : > { %v9250_v43 = vpop.f32.mrf.mxu1  ;;  %v9253_v55 = vadd.f32 %v9195_v50, %v3406_v58  ;;  %v4367_v58 = vld [vmem:[#allocation4 + $0x168] sm:$0xff] }
 0x345   : > { %v3408_v34 = vpop.f32.mrf.mxu0 }
 0x346   : > { %4661 = vmatmul.mubr.f32.gmra.mxu0 %v4363_v4  ;;  %v3936_v39 = vpop.f32.mrf.mxu1 }
 0x347   : > { %4665 = vmatprep.mubr.f32.mxu0 %v4396_v6  ;;  %v3411_v48 = vpop.f32.mrf.mxu0  ;;  %v4400_v39 = vld [vmem:[#allocation4 + $0x171] sm:$0xff] }
 0x348   : > { %v9255_v25 = vpop.f32.mrf.mxu1  ;;  %v9258_v52 = vadd.f32 %v9189_v24, %v3411_v48 }
 0x349   : > { %v3413_v7 = vpop.f32.mrf.mxu0 }
 0x34a   : > { %4666 = vmatmul.mubr.f32.gmra.mxu0 %v4364_v51  ;;  %v3941_v0 = vpop.f32.mrf.mxu1  ;;  %v4368_v51 = vld [vmem:[#allocation4 + $0x170] sm:$0xff] }
 0x34b   : > { %4670 = vmatprep.mubr.f32.mxu0 %v4397_v56  ;;  %v3416_v50 = vpop.f32.mrf.mxu0  ;;  %v4401_v56 = vld [vmem:[#allocation4 + $0x181] sm:$0xff] }
 0x34c   : > { %v9260_v36 = vpop.f32.mrf.mxu1  ;;  %v9263_v13 = vadd.f32 %v9206_v40, %v3416_v50 }
 0x34d   : > { %v3418_v17 = vpop.f32.mrf.mxu0 }
 0x34e   : > { %4671 = vmatmul.mubr.f32.gmra.mxu0 %v4365_v12  ;;  %v3946_v33 = vpop.f32.mrf.mxu1 }
 0x34f   : > { %4675 = vmatprep.mubr.f32.mxu0 %v4398_v45  ;;  %v3421_v24 = vpop.f32.mrf.mxu0  ;;  %v4402_v45 = vld [vmem:[#allocation4 + $0x189] sm:$0xff] }
 0x350   : > { %v9265_v41 = vpop.f32.mrf.mxu1  ;;  %v9268_v38 = vadd.f32 %v9200_v59, %v3421_v24 }
 0x351   : > { %v3423_v35 = vpop.f32.mrf.mxu0 }
 0x352   : > { %4676 = vmatmul.mubr.f32.gmra.mxu0 %v4366_v18  ;;  %v3951_v1 = vpop.f32.mrf.mxu1 }
 0x353   : > { %4680 = vmatprep.mubr.f32.mxu0 %v4399_v19  ;;  %v3426_v40 = vpop.f32.mrf.mxu0  ;;  %v4403_v19 = vld [vmem:[#allocation4 + $0x199] sm:$0xff] }
 0x354   : > { %v9270_v27 = vpop.f32.mrf.mxu1  ;;  %v9273_v2 = vadd.f32 %v9215_v53, %v3426_v40 }
 0x355   : > { %v3428_v4 = vpop.f32.mrf.mxu0 }
 0x356   : > { %4681 = vmatmul.mubr.f32.gmra.mxu0 %v4367_v58  ;;  %v3956_v34 = vpop.f32.mrf.mxu1  ;;  %v4371_v58 = vld [vmem:[#allocation4 + $0x198] sm:$0xff] }
 0x357   : > { %4685 = vmatprep.mubr.f32.mxu0 %v4400_v39  ;;  %v3431_v59 = vpop.f32.mrf.mxu0  ;;  %v4404_v39 = vld [vmem:[#allocation4 + $0x1a1] sm:$0xff] }
 0x358   : > { %v9275_v6 = vpop.f32.mrf.mxu1  ;;  %v9278_v48 = vadd.f32 %v9209_v54, %v3431_v59 }
 0x359   : > { %v3433_v7 = vpop.f32.mrf.mxu0 }
 0x35a   : > { %4686 = vmatmul.mubr.f32.gmra.mxu0 %v4368_v51  ;;  %v3961_v0 = vpop.f32.mrf.mxu1 }
 0x35b   : > { %4690 = vmatprep.mubr.f32.mxu0 %v4401_v56  ;;  %v3436_v53 = vpop.f32.mrf.mxu0 }
 0x35c   : > { %v9280_v50 = vpop.f32.mrf.mxu1  ;;  %v9283_v12 = vadd.f32 %v9228_v37, %v3436_v53 }
 0x35d   : > { %v3438_v17 = vpop.f32.mrf.mxu0 }
 0x35e   : > { %4691 = vmatmul.mubr.f32.gmra.mxu0 %v9117_v32  ;;  %v3966_v33 = vpop.f32.mrf.mxu1 }
 0x35f   : > { %4695 = vmatprep.mubr.f32.mxu0 %v4402_v45  ;;  %v3441_v54 = vpop.f32.mrf.mxu0 }
 0x360   : > { %v9286_v24 = vpop.f32.mrf.mxu1  ;;  %v9289_v18 = vadd.f32 %v9221_v61, %v3441_v54 }
 0x361   : > { %v3443_v35 = vpop.f32.mrf.mxu0 }
 0x362   : > { %4696 = vmatmul.mubr.f32.gmra.mxu0 %v9124_v57  ;;  %v3971_v1 = vpop.f32.mrf.mxu1  ;;  %v4372_v57 = vld [vmem:[#allocation4 + $0x1a0] sm:$0xff] }
 0x363   : > { %4700 = vmatprep.mubr.f32.mxu0 %v4403_v19  ;;  %v3446_v37 = vpop.f32.mrf.mxu0 }
 0x364   : > { %v9292_v40 = vpop.f32.mrf.mxu1  ;;  %v9295_v32 = vadd.f32 %v9236_v10, %v3446_v37  ;;  %v9303_v10 = vld [vmem:[%s9524_s4] ss:$0 sm:$0xff] }
 0x365   : > { %v3448_v4 = vpop.f32.mrf.mxu0  ;;  %v3681_v53 = vadd.f32 %v9303_v10, %v9113_v9  ;;  %v3683_v9 = vadd.f32 %v9303_v10, %v9127_v26 }
 0x366   : > { %4701 = vmatmul.mubr.f32.gmra.mxu0 %v4371_v58  ;;  %v3976_v34 = vpop.f32.mrf.mxu1 }
 0x367   : > { %4705 = vmatprep.mubr.f32.mxu0 %v4404_v39  ;;  %v3451_v61 = vpop.f32.mrf.mxu0  ;;  %v3682_v39 = vadd.f32 %v9303_v10, %v9120_v11 }
 0x368   : > { %v3979_v59 = vpop.f32.mrf.mxu1  ;;  %v9298_v51 = vadd.f32 %v9231_v28, %v3451_v61  ;;  %v3680_v28 = vadd.f32 %v9303_v10, %v9109_v23 }
 0x369   : > { %v3453_v7 = vpop.f32.mrf.mxu0 }
 0x36a   : > { %4706 = vmatmul.mubr.f32.gmra.mxu0 %v4372_v57  ;;  %v3981_v0 = vpop.f32.mrf.mxu1 }
 0x36b   : > { %v6329_v56 = vpop.f32.mrf.mxu0  ;;  %v3685_v0 = vadd.f32 %v9303_v10, %v9139_v62 }
 0x36c   : > { %v9307_v17 = vpop.f32.mrf.mxu1  ;;  %v4155_v33 = vadd.f32 %v6329_v56, %v9245_v49 }
 0x36d   : > { %v4149_v45 = vpop.f32.mrf.mxu0 }
 0x36e   : > { %v9312_v54 = vadd.f32 %v4155_v33, %v3681_v53  ;;  %v3986_v35 = vpop.f32.mrf.mxu1  ;;  %v4150_v1 = vadd.f32 %v4149_v45, %v9239_v60  ;;  %v3684_v53 = vadd.f32 %v9303_v10, %v9132_v8 }
 0x370   : > { %v9315_v19 = vadd.f32 %v4150_v1, %v3680_v28  ;;  %v3989_v37 = vpop.f32.mrf.mxu1  ;;  %v6332_v58 = vpop.f32.mrf.mxu0  ;;  %v3687_v1 = vadd.f32 %v9303_v10, %v9155_v47 }
 0x371   : > { %v4165_v4 = vadd.f32 %v6332_v58, %v9255_v25 }
 0x372   : > { %v3991_v34 = vpop.f32.mrf.mxu1  ;;  %v4159_v49 = vpop.f32.mrf.mxu0 }
 0x373   : > { %v9322_v23 = vadd.f32 %v4165_v4, %v3683_v9  ;;  %v4160_v61 = vadd.f32 %v4159_v49, %v9250_v43  ;;  %v3686_v9 = vadd.f32 %v9303_v10, %v9146_v21  ;;  %v3689_v49 = vadd.f32 %v9303_v10, %v9167_v3 }
 0x374   : > { %v3994_v57 = vpop.f32.mrf.mxu1 }
 0x375   : > { %v9325_v60 = vadd.f32 %v4160_v61, %v3682_v39  ;;  %v6335_v7 = vpop.f32.mrf.mxu0 }
 0x376   : > { %v4175_v26 = vadd.f32 %v6335_v7, %v9265_v41  ;;  %v3996_v56 = vpop.f32.mrf.mxu1  ;;  %v3688_v7 = vadd.f32 %v9303_v10, %v9162_v42 }
 0x377   : > { %v4169_v25 = vpop.f32.mrf.mxu0  ;;  %v3691_v56 = vadd.f32 %v9303_v10, %v9180_v14 }
 0x378   : > { %v9332_v33 = vadd.f32 %v4175_v26, %v3685_v0  ;;  %v4170_v11 = vadd.f32 %v4169_v25, %v9260_v36  ;;  %v3999_v45 = vpop.f32.mrf.mxu1 }
 0x37a   : > { %v9335_v43 = vadd.f32 %v4170_v11, %v3684_v53  ;;  %v6338_v28 = vpop.f32.mrf.mxu0  ;;  %v4001_v35 = vpop.f32.mrf.mxu1 }
 0x37b   : > { %v4185_v62 = vadd.f32 %v6338_v28, %v9275_v6 }
 0x37c   : > { %v4179_v41 = vpop.f32.mrf.mxu0  ;;  %v4004_v58 = vpop.f32.mrf.mxu1 }
 0x37d   : > { %v9342_v8 = vadd.f32 %v4185_v62, %v3687_v1  ;;  %v4180_v4 = vadd.f32 %v4179_v41, %v9270_v27 }
 0x37e   : > { %v6341_v36 = vpop.f32.mrf.mxu0  ;;  %v4006_v34 = vpop.f32.mrf.mxu1 }
 0x37f   : > { %v9347_v39 = vadd.f32 %v4180_v4, %v3686_v9  ;;  %v4195_v47 = vadd.f32 %v6341_v36, %v9286_v24  ;;  %v3690_v24 = vadd.f32 %v9303_v10, %v9174_v30 }
 0x380   : > { %v4189_v61 = vpop.f32.mrf.mxu0  ;;  %v4009_v6 = vpop.f32.mrf.mxu1 }
 0x381   : > { %v9352_v0 = vadd.f32 %v4195_v47, %v3689_v49  ;;  %v4190_v21 = vadd.f32 %v4189_v61, %v9280_v50  ;;  %v3693_v50 = vadd.f32 %v9303_v10, %v9192_v63 }
 0x382   : > { %v6344_v26 = vpop.f32.mrf.mxu0  ;;  %v4011_v27 = vpop.f32.mrf.mxu1 }
 0x383   : > { %v9357_v25 = vadd.f32 %v4190_v21, %v3688_v7  ;;  %v4205_v3 = vadd.f32 %v6344_v26, %v3979_v59  ;;  %v3692_v59 = vadd.f32 %v9303_v10, %v9186_v15 }
 0x384   : > { %v4199_v53 = vpop.f32.mrf.mxu0  ;;  %v4014_v11 = vpop.f32.mrf.mxu1 }
 0x385   : > { %v9361_v28 = vadd.f32 %v4205_v3, %v3691_v56  ;;  %v4200_v42 = vadd.f32 %v4199_v53, %v9292_v40  ;;  %v3695_v40 = vadd.f32 %v9303_v10, %v9204_v29 }
 0x386   : > { %v6347_v35 = vpop.f32.mrf.mxu0  ;;  %v4016_v1 = vpop.f32.mrf.mxu1 }
 0x387   : > { %v9366_v62 = vadd.f32 %v4200_v42, %v3690_v24  ;;  %v4215_v14 = vadd.f32 %v6347_v35, %v3989_v37  ;;  %v3694_v37 = vadd.f32 %v9303_v10, %v9198_v16 }
 0x388   : > { %v4209_v41 = vpop.f32.mrf.mxu0  ;;  %v4019_v9 = vpop.f32.mrf.mxu1 }
 0x389   : > { %v9370_v4 = vadd.f32 %v4215_v14, %v3693_v50  ;;  %v4210_v30 = vadd.f32 %v4209_v41, %v9307_v17  ;;  %v3697_v17 = vadd.f32 %v9303_v10, %v9218_v5 }
 0x38a   : > { %v6350_v36 = vpop.f32.mrf.mxu0  ;;  %v4021_v34 = vpop.f32.mrf.mxu1 }
 0x38b   : > { %v9375_v49 = vadd.f32 %v4210_v30, %v3692_v59  ;;  %v4225_v63 = vadd.f32 %v6350_v36, %v3999_v45  ;;  %v3696_v45 = vadd.f32 %v9303_v10, %v9212_v31 }
 0x38c   : > { %v4219_v47 = vpop.f32.mrf.mxu0  ;;  %v4024_v61 = vpop.f32.mrf.mxu1 }
 0x38d   : > { %v9379_v7 = vadd.f32 %v4225_v63, %v3695_v40  ;;  %v4220_v15 = vadd.f32 %v4219_v47, %v3994_v57  ;;  %v3699_v57 = vadd.f32 %v9303_v10, %v9234_v20 }
 0x38e   : > { %v6353_v21 = vpop.f32.mrf.mxu0  ;;  %v4026_v26 = vpop.f32.mrf.mxu1 }
 0x38f   : > { %v9383_v27 = vadd.f32 %v4220_v15, %v3694_v37  ;;  %v4235_v56 = vadd.f32 %v6353_v21, %v4009_v6  ;;  %v3698_v6 = vadd.f32 %v9303_v10, %v9226_v22  ;;  %v3702_v26 = vadd.f32 %v9303_v10, %v9253_v55 }
 0x390   : > { %v4229_v29 = vpop.f32.mrf.mxu0  ;;  %v4029_v3 = vpop.f32.mrf.mxu1 }
 0x391   : > { %v9387_v53 = vadd.f32 %v4235_v56, %v3697_v17  ;;  %v4230_v24 = vadd.f32 %v4229_v29, %v4004_v58  ;;  %v3701_v58 = vadd.f32 %v9303_v10, %v9248_v46 }
 0x392   : > { %v6356_v16 = vpop.f32.mrf.mxu0  ;;  %v4031_v42 = vpop.f32.mrf.mxu1 }
 0x393   : > { %v9391_v35 = vadd.f32 %v4230_v24, %v3696_v45  ;;  %v4245_v1 = vadd.f32 %v6356_v16, %v4019_v9  ;;  %v3700_v9 = vadd.f32 %v9303_v10, %v9242_v44  ;;  %v3705_v24 = vadd.f32 %v9303_v10, %v9268_v38 }
 0x394   : > { %v4239_v5 = vpop.f32.mrf.mxu0  ;;  %v4034_v50 = vpop.f32.mrf.mxu1 }
 0x395   : > { %v9395_v14 = vadd.f32 %v4245_v1, %v3699_v57  ;;  %v4240_v41 = vadd.f32 %v4239_v5, %v4014_v11  ;;  %v3703_v11 = vadd.f32 %v9303_v10, %v9258_v52  ;;  %v3704_v52 = vadd.f32 %v9303_v10, %v9263_v13 }
 0x396   : > { %v6359_v31 = vpop.f32.mrf.mxu0  ;;  %v4036_v59 = vpop.f32.mrf.mxu1 }
 0x397   : > { %v9399_v30 = vadd.f32 %v4240_v41, %v3698_v6  ;;  %v4255_v36 = vadd.f32 %v6359_v31, %v4029_v3  ;;  %v3706_v41 = vadd.f32 %v9303_v10, %v9273_v2  ;;  %v3708_v2 = vadd.f32 %v9303_v10, %v9283_v12 }
 0x398   : > { %v4249_v20 = vpop.f32.mrf.mxu0  ;;  %v4039_v34 = vpop.f32.mrf.mxu1  ;;  %v3710_v12 = vadd.f32 %v9303_v10, %v9295_v32 }
 0x399   : > { %v9403_v40 = vadd.f32 %v4255_v36, %v3701_v58  ;;  %v4250_v63 = vadd.f32 %v4249_v20, %v4024_v61  ;;  %v3707_v20 = vadd.f32 %v9303_v10, %v9278_v48  ;;  %v3709_v48 = vadd.f32 %v9303_v10, %v9289_v18 }
 0x39a   : > { %v6362_v22 = vpop.f32.mrf.mxu0  ;;  %v4041_v47 = vpop.f32.mrf.mxu1  ;;  %v3711_v18 = vadd.f32 %v9303_v10, %v9298_v51 }
 0x39b   : > { %v9407_v37 = vadd.f32 %v4250_v63, %v3700_v9  ;;  %v4265_v15 = vadd.f32 %v6362_v22, %v4039_v34 }
 0x39c   : > { %v4259_v46 = vpop.f32.mrf.mxu0  ;;  %v4044_v21 = vpop.f32.mrf.mxu1 }
 0x39d   : > { %v9411_v17 = vadd.f32 %v4265_v15, %v3703_v11  ;;  %v4260_v56 = vadd.f32 %v4259_v46, %v4034_v50 }
 0x39e   : > { %v6365_v44 = vpop.f32.mrf.mxu0  ;;  %v4046_v29 = vpop.f32.mrf.mxu1 }
 0x39f   : > { %v9413_v3 = vadd.f32 %v4260_v56, %v3702_v26 }
 0x3a0   : > { %v4269_v61 = vpop.f32.mrf.mxu0  ;;  %v4049_v45 = vpop.f32.mrf.mxu1 }
 0x3a1   : > { %v4270_v16 = vadd.f32 %v4269_v61, %v4044_v21  ;;  %v4275_v42 = vadd.f32 %v6365_v44, %v4049_v45 }
 0x3a2   : > { %v6368_v57 = vpop.f32.mrf.mxu0  ;;  %v4051_v1 = vpop.f32.mrf.mxu1 }
 0x3a3   : > { %v9419_v55 = vadd.f32 %v4270_v16, %v3704_v52  ;;  %v9421_v5 = vadd.f32 %v4275_v42, %v3705_v24 }
 0x3a4   : > { %v4279_v50 = vpop.f32.mrf.mxu0  ;;  %v4054_v6 = vpop.f32.mrf.mxu1 }
 0x3a5   : > { %v4280_v31 = vadd.f32 %v4279_v50, %v4054_v6 }
 0x3a6   : > { %v6371_v59 = vpop.f32.mrf.mxu0  ;;  %v4056_v58 = vpop.f32.mrf.mxu1 }
 0x3a7   : > { %v9425_v13 = vadd.f32 %v4280_v31, %v3706_v41 }
 0x3a8   : > { %v4289_v36 = vpop.f32.mrf.mxu0  ;;  %v4059_v38 = vpop.f32.mrf.mxu1 }
 0x3a9   : > { %v4285_v34 = vadd.f32 %v6368_v57, %v4059_v38 }
 0x3aa   : > { %v6374_v9 = vpop.f32.mrf.mxu0  ;;  %v4061_v63 = vpop.f32.mrf.mxu1 }
 0x3ab   : > { %v9429_v22 = vadd.f32 %v4285_v34, %v3707_v20 }
 0x3ac   : > { %v4299_v47 = vpop.f32.mrf.mxu0  ;;  %v4064_v11 = vpop.f32.mrf.mxu1 }
 0x3ad   : > { %v4290_v15 = vadd.f32 %v4289_v36, %v4064_v11 }
 0x3ae   : > { %v4552_v46 = vpop.f32.mrf.mxu0  ;;  %v4066_v21 = vpop.f32.mrf.mxu1 }
 0x3af   : > { %v9433_v26 = vadd.f32 %v4290_v15, %v3708_v2  ;;  %v4969_v2 = vld [vmem:[#allocation3 + $0x39] sm:$0xff] }
 0x3b0   : > { %v4554_v56 = vpop.f32.mrf.mxu0  ;;  %v4069_v44 = vpop.f32.mrf.mxu1 }
 0x3b1   : > { %v4295_v29 = vadd.f32 %v6371_v59, %v4069_v44 }
 0x3b2   : > { %v4557_v61 = vpop.f32.mrf.mxu0  ;;  %v4071_v45 = vpop.f32.mrf.mxu1 }
 0x3b3   : > { %v9437_v52 = vadd.f32 %v4295_v29, %v3709_v48 }
 0x3b4   : > { %v4559_v24 = vpop.f32.mrf.mxu0  ;;  %v4074_v16 = vpop.f32.mrf.mxu1 }
 0x3b5   : > { %v4300_v42 = vadd.f32 %v4299_v47, %v4074_v16  ;;  %v4971_v16 = vld [vmem:[#allocation3 + $0x51] sm:$0xff] }
 0x3b6   : > { %v4562_v57 = vpop.f32.mrf.mxu0  ;;  %v4076_v1 = vpop.f32.mrf.mxu1 }
 0x3b7   : > { %v9441_v50 = vadd.f32 %v4300_v42, %v3710_v12 }
 0x3b8   : > { %v4564_v6 = vpop.f32.mrf.mxu0  ;;  %v4079_v41 = vpop.f32.mrf.mxu1 }
 0x3b9   : > { %v4305_v31 = vadd.f32 %v6374_v9, %v4079_v41  ;;  %v4968_v9 = vld [vmem:[#allocation3 + $0x31] sm:$0xff]  ;;  %v4970_v6 = vld [vmem:[#allocation3 + $0x49] sm:$0xff] }
 0x3ba   : > { %v4567_v59 = vpop.f32.mrf.mxu0  ;;  %v4081_v58 = vpop.f32.mrf.mxu1 }
 0x3bb   : > { %v9445_v36 = vadd.f32 %v4305_v31, %v3711_v18  ;;  %v4973_v58 = vld [vmem:[#allocation3 + $0x69] sm:$0xff] }
 0x3bc   : > { %v4569_v38 = vpop.f32.mrf.mxu0  ;;  %v6409_v20 = vpop.f32.mrf.mxu1 }
 0x3bd   : > { %v4783_v34 = vadd.f32 %v6409_v20, %v4557_v61 }
 0x3be   : > { %v4572_v63 = vpop.f32.mrf.mxu0  ;;  %v4777_v32 = vpop.f32.mrf.mxu1 }
 0x3bf   : > { %v4937_v47 = vadd.f32 %v4783_v34, %v9312_v54  ;;  %v4778_v11 = vadd.f32 %v4777_v32, %v4552_v46 }
 0x3c0   : > { %v4574_v15 = vpop.f32.mrf.mxu0  ;;  %v6412_v21 = vpop.f32.mrf.mxu1 }
 0x3c1   : > { %v5001_v56 = vmul.f32 0.1, %v4937_v47  ;;  %v4936_v51 = vadd.f32 %v4778_v11, %v9315_v19  ;;  %v4793_v10 = vadd.f32 %v6412_v21, %v4567_v59  ;;  %v4972_v47 = vld [vmem:[#allocation3 + $0x61] sm:$0xff] }
 0x3c2   : > { %v4577_v44 = vpop.f32.mrf.mxu0  ;;  %v4787_v48 = vpop.f32.mrf.mxu1 }
 0x3c3   : > { %v5033_v29 = vadd.f32 %v5001_v56, %v4969_v2  ;;  %v5000_v45 = vmul.f32 0.1, %v4936_v51  ;;  %v4939_v61 = vadd.f32 %v4793_v10, %v9322_v23  ;;  %v4788_v24 = vadd.f32 %v4787_v48, %v4562_v57  ;;  %v4975_v48 = vld [vmem:[#allocation3 + $0x81] sm:$0xff] }
 0x3c4   : > { %v4579_v54 = vpop.f32.mrf.mxu0  ;;  %v6415_v46 = vpop.f32.mrf.mxu1 }
 0x3c5   : > { %5065 = vst [vmem:[%s6608_s30 + $0x8] sm:$0xff] %v5033_v29  ;;  %v5032_v12 = vadd.f32 %v5000_v45, %v4968_v9  ;;  %v5003_v42 = vmul.f32 0.1, %v4939_v61  ;;  %v4938_v1 = vadd.f32 %v4788_v24, %v9325_v60  ;;  %v4803_v19 = vadd.f32 %v6415_v46, %v4577_v44 }
 0x3c6   : > { %v4582_v41 = vpop.f32.mrf.mxu0  ;;  %v4797_v18 = vpop.f32.mrf.mxu1 }
 0x3c7   : > { %5064 = vst [vmem:[%s6608_s30] sm:$0xff] %v5032_v12  ;;  %v5035_v31 = vadd.f32 %v5003_v42, %v4971_v16  ;;  %v5002_v59 = vmul.f32 0.1, %v4938_v1  ;;  %v4941_v23 = vadd.f32 %v4803_v19, %v9332_v33  ;;  %v4798_v57 = vadd.f32 %v4797_v18, %v4572_v63  ;;  %v4976_v1 = vld [vmem:[#allocation3 + $0x91] sm:$0xff] }
 0x3c8   : > { %v4584_v38 = vpop.f32.mrf.mxu0  ;;  %v6418_v20 = vpop.f32.mrf.mxu1 }
 0x3c9   : > { %5067 = vst [vmem:[%s6608_s30 + $0x18] sm:$0xff] %v5035_v31  ;;  %v5034_v34 = vadd.f32 %v5002_v59, %v4970_v6  ;;  %v5005_v32 = vmul.f32 0.1, %v4941_v23  ;;  %v4940_v60 = vadd.f32 %v4798_v57, %v9335_v43  ;;  %v4974_v43 = vld [vmem:[#allocation3 + $0x79] sm:$0xff] }
 0x3ca   : > { %v4587_v11 = vpop.f32.mrf.mxu0  ;;  %v4807_v2 = vpop.f32.mrf.mxu1  ;;  %v4977_v59 = vld [vmem:[#allocation3 + $0x99] sm:$0xff] }
 0x3cb   : > { %5066 = vst [vmem:[%s6608_s30 + $0x10] sm:$0xff] %v5034_v34  ;;  %v5037_v15 = vadd.f32 %v5005_v32, %v4973_v58  ;;  %v5004_v21 = vmul.f32 0.1, %v4940_v60  ;;  %v4813_v56 = vadd.f32 %v6418_v20, %v4587_v11  ;;  %v4808_v51 = vadd.f32 %v4807_v2, %v4582_v41  ;;  %v4978_v60 = vld [vmem:[#allocation3 + $0xa9] sm:$0xff] }
 0x3cc   : > { %v4589_v33 = vpop.f32.mrf.mxu0  ;;  %v6421_v63 = vpop.f32.mrf.mxu1 }
 0x3cd   : > { %5069 = vst [vmem:[%s6608_s30 + $0x28] sm:$0xff] %v5037_v15  ;;  %v5036_v10 = vadd.f32 %v5004_v21, %v4972_v47  ;;  %v4943_v9 = vadd.f32 %v4813_v56, %v9342_v8  ;;  %v4942_v44 = vadd.f32 %v4808_v51, %v9347_v39  ;;  %v4979_v51 = vld [vmem:[#allocation3 + $0xb1] sm:$0xff] }
 0x3ce   : > { %v4592_v29 = vpop.f32.mrf.mxu0  ;;  %v4817_v45 = vpop.f32.mrf.mxu1 }
 0x3cf   : > { %5068 = vst [vmem:[%s6608_s30 + $0x20] sm:$0xff] %v5036_v10  ;;  %v5007_v61 = vmul.f32 0.1, %v4943_v9  ;;  %v5006_v24 = vmul.f32 0.1, %v4942_v44  ;;  %v4818_v16 = vadd.f32 %v4817_v45, %v4592_v29 }
 0x3d0   : > { %v4594_v54 = vpop.f32.mrf.mxu0  ;;  %v6424_v8 = vpop.f32.mrf.mxu1 }
 0x3d1   : > { %v5039_v46 = vadd.f32 %v5007_v61, %v4975_v48  ;;  %v5038_v12 = vadd.f32 %v5006_v24, %v4974_v43  ;;  %v4944_v42 = vadd.f32 %v4818_v16, %v9357_v25  ;;  %v4980_v43 = vld [vmem:[#allocation3 + $0xc1] sm:$0xff] }
 0x3d2   : > { %v4597_v19 = vpop.f32.mrf.mxu0  ;;  %v4827_v23 = vpop.f32.mrf.mxu1 }
 0x3d3   : > { %5071 = vst [vmem:[%s6608_s30 + $0x38] sm:$0xff] %v5039_v46  ;;  %5070 = vst [vmem:[%s6608_s30 + $0x30] sm:$0xff] %v5038_v12  ;;  %v5008_v39 = vmul.f32 0.1, %v4944_v42  ;;  %v4823_v6 = vadd.f32 %v6421_v63, %v4597_v19  ;;  %v4981_v46 = vld [vmem:[#allocation3 + $0xc9] sm:$0xff] }
 0x3d4   : > { %v4599_v41 = vpop.f32.mrf.mxu0  ;;  %v6427_v32 = vpop.f32.mrf.mxu1 }
 0x3d5   : > { %v5040_v18 = vadd.f32 %v5008_v39, %v4976_v1  ;;  %v4945_v31 = vadd.f32 %v4823_v6, %v9352_v0  ;;  %v4982_v6 = vld [vmem:[#allocation3 + $0xd9] sm:$0xff] }
 0x3d6   : > { %v4602_v57 = vpop.f32.mrf.mxu0  ;;  %v4837_v56 = vpop.f32.mrf.mxu1 }
 0x3d7   : > { %5072 = vst [vmem:[%s6608_s30 + $0x40] sm:$0xff] %v5040_v18  ;;  %v5009_v58 = vmul.f32 0.1, %v4945_v31  ;;  %v4828_v38 = vadd.f32 %v4827_v23, %v4602_v57 }
 0x3d8   : > { %v4604_v25 = vpop.f32.mrf.mxu0  ;;  %v6430_v48 = vpop.f32.mrf.mxu1 }
 0x3d9   : > { %v5041_v20 = vadd.f32 %v5009_v58, %v4977_v59  ;;  %v4946_v34 = vadd.f32 %v4828_v38, %v9366_v62  ;;  %v4983_v58 = vld [vmem:[#allocation3 + $0xe1] sm:$0xff] }
 0x3da   : > { %v4607_v47 = vpop.f32.mrf.mxu0  ;;  %v4847_v54 = vpop.f32.mrf.mxu1 }
 0x3db   : > { %5073 = vst [vmem:[%s6608_s30 + $0x48] sm:$0xff] %v5041_v20  ;;  %v5010_v11 = vmul.f32 0.1, %v4946_v34  ;;  %v4833_v2 = vadd.f32 %v6424_v8, %v4607_v47  ;;  %v4984_v47 = vld [vmem:[#allocation3 + $0xf1] sm:$0xff] }
 0x3dc   : > { %v4609_v15 = vpop.f32.mrf.mxu0  ;;  %v6433_v39 = vpop.f32.mrf.mxu1 }
 0x3dd   : > { %v5042_v0 = vadd.f32 %v5010_v11, %v4978_v60  ;;  %v4947_v21 = vadd.f32 %v4833_v2, %v9361_v28 }
 0x3de   : > { %v4612_v33 = vpop.f32.mrf.mxu0  ;;  %v4857_v57 = vpop.f32.mrf.mxu1 }
 0x3df   : > { %5074 = vst [vmem:[%s6608_s30 + $0x50] sm:$0xff] %v5042_v0  ;;  %v5011_v63 = vmul.f32 0.1, %v4947_v21  ;;  %v4838_v10 = vadd.f32 %v4837_v56, %v4612_v33 }
 0x3e0   : > { %v4614_v9 = vpop.f32.mrf.mxu0  ;;  %v6436_v60 = vpop.f32.mrf.mxu1 }
 0x3e1   : > { %v5043_v62 = vadd.f32 %v5011_v63, %v4979_v51  ;;  %v4948_v44 = vadd.f32 %v4838_v10, %v9375_v49  ;;  %v4985_v51 = vld [vmem:[#allocation3 + $0xf9] sm:$0xff] }
 0x3e2   : > { %v4617_v29 = vpop.f32.mrf.mxu0  ;;  %v4867_v56 = vpop.f32.mrf.mxu1 }
 0x3e3   : > { %5075 = vst [vmem:[%s6608_s30 + $0x58] sm:$0xff] %v5043_v62  ;;  %v5012_v45 = vmul.f32 0.1, %v4948_v44  ;;  %v4843_v61 = vadd.f32 %v6427_v32, %v4617_v29 }
 0x3e4   : > { %v4619_v24 = vpop.f32.mrf.mxu0  ;;  %v6439_v44 = vpop.f32.mrf.mxu1 }
 0x3e5   : > { %v5044_v28 = vadd.f32 %v5012_v45, %v4980_v43  ;;  %v4949_v16 = vadd.f32 %v4843_v61, %v9370_v4 }
 0x3e6   : > { %v4622_v12 = vpop.f32.mrf.mxu0 }
 0x3e7   : > { %5076 = vst [vmem:[%s6608_s30 + $0x60] sm:$0xff] %v5044_v28  ;;  %v5013_v42 = vmul.f32 0.1, %v4949_v16  ;;  %v4848_v1 = vadd.f32 %v4847_v54, %v4622_v12  ;;  %v4877_v28 = vpop.f32.mrf.mxu1  ;;  %v4987_v16 = vld [vmem:[#allocation3 + $0x111] sm:$0xff] }
 0x3e8   : > { %v4624_v8 = vpop.f32.mrf.mxu0 }
 0x3e9   : > { %v5045_v49 = vadd.f32 %v5013_v42, %v4981_v46  ;;  %v4950_v19 = vadd.f32 %v4848_v1, %v9383_v27  ;;  %v6442_v8 = vpop.f32.mrf.mxu1 }
 0x3ea   : > { %v4627_v41 = vpop.f32.mrf.mxu0 }
 0x3eb   : > { %5077 = vst [vmem:[%s6608_s30 + $0x68] sm:$0xff] %v5045_v49  ;;  %v5014_v18 = vmul.f32 0.1, %v4950_v19  ;;  %v4853_v31 = vadd.f32 %v6430_v48, %v4627_v41  ;;  %v4986_v48 = vld [vmem:[#allocation3 + $0x109] sm:$0xff]  ;;  %v4988_v49 = vld [vmem:[#allocation3 + $0x121] sm:$0xff] }
 0x3ec   : > { %v4629_v59 = vpop.f32.mrf.mxu0 }
 0x3ed   : > { %v5046_v4 = vadd.f32 %v5014_v18, %v4982_v6  ;;  %v4951_v23 = vadd.f32 %v4853_v31, %v9379_v7  ;;  %v4887_v31 = vpop.f32.mrf.mxu1  ;;  %v4989_v59 = vld [vmem:[#allocation3 + $0x129] sm:$0xff] }
 0x3ee   : > { %v4632_v38 = vpop.f32.mrf.mxu0 }
 0x3ef   : > { %5078 = vst [vmem:[%s6608_s30 + $0x70] sm:$0xff] %v5046_v4  ;;  %v5015_v25 = vmul.f32 0.1, %v4951_v23  ;;  %v4858_v20 = vadd.f32 %v4857_v57, %v4632_v38 }
 0x3f0   : > { %v4634_v34 = vpop.f32.mrf.mxu0 }
 0x3f1   : > { %v5047_v27 = vadd.f32 %v5015_v25, %v4983_v58  ;;  %v4952_v32 = vadd.f32 %v4858_v20, %v9391_v35  ;;  %v6445_v25 = vpop.f32.mrf.mxu1  ;;  %v4990_v20 = vld [vmem:[#allocation3 + $0x139] sm:$0xff] }
 0x3f2   : > { %v4637_v11 = vpop.f32.mrf.mxu0 }
 0x3f3   : > { %5079 = vst [vmem:[%s6608_s30 + $0x78] sm:$0xff] %v5047_v27  ;;  %v5016_v2 = vmul.f32 0.1, %v4952_v32  ;;  %v4863_v15 = vadd.f32 %v6433_v39, %v4637_v11  ;;  %v4897_v11 = vpop.f32.mrf.mxu1 }
 0x3f4   : > { %v4639_v0 = vpop.f32.mrf.mxu0 }
 0x3f5   : > { %v5048_v7 = vadd.f32 %v5016_v2, %v4984_v47  ;;  %v4953_v21 = vadd.f32 %v4863_v15, %v9387_v53  ;;  %v4991_v2 = vld [vmem:[#allocation3 + $0x141] sm:$0xff] }
 0x3f6   : > { %v4642_v33 = vpop.f32.mrf.mxu0 }
 0x3f7   : > { %5080 = vst [vmem:[%s6608_s30 + $0x80] sm:$0xff] %v5048_v7  ;;  %v5017_v63 = vmul.f32 0.1, %v4953_v21  ;;  %v4868_v10 = vadd.f32 %v4867_v56, %v4642_v33  ;;  %v4992_v33 = vld [vmem:[#allocation3 + $0x151] sm:$0xff] }
 0x3f8   : > { %v4644_v9 = vpop.f32.mrf.mxu0 }
 0x3f9   : > { %v5049_v35 = vadd.f32 %v5017_v63, %v4985_v51  ;;  %v4954_v62 = vadd.f32 %v4868_v10, %v9399_v30  ;;  %v6448_v51 = vpop.f32.mrf.mxu1 }
 0x3fa   : > { %v4647_v43 = vpop.f32.mrf.mxu0 }
 0x3fb   : > { %5081 = vst [vmem:[%s6608_s30 + $0x88] sm:$0xff] %v5049_v35  ;;  %v5018_v29 = vmul.f32 0.1, %v4954_v62  ;;  %v4873_v45 = vadd.f32 %v6436_v60, %v4647_v43 }
 0x3fc   : > { %v4649_v61 = vpop.f32.mrf.mxu0 }
 0x3fd   : > { %v5050_v53 = vadd.f32 %v5018_v29, %v4986_v48  ;;  %v4955_v24 = vadd.f32 %v4873_v45, %v9395_v14  ;;  %v4993_v48 = vld [vmem:[#allocation3 + $0x159] sm:$0xff] }
 0x3fe   : > { %v4652_v54 = vpop.f32.mrf.mxu0 }
 0x3ff   : > { %5082 = vst [vmem:[%s6608_s30 + $0x90] sm:$0xff] %v5050_v53  ;;  %v5019_v46 = vmul.f32 0.1, %v4955_v24  ;;  %v4878_v12 = vadd.f32 %v4877_v28, %v4652_v54  ;;  %v4994_v28 = vld [vmem:[#allocation3 + $0x169] sm:$0xff] }
 0x400   : > { %v4654_v42 = vpop.f32.mrf.mxu0 }
 0x401   : > { %v5051_v30 = vadd.f32 %v5019_v46, %v4987_v16  ;;  %v4956_v1 = vadd.f32 %v4878_v12, %v9407_v37 }
 0x402   : > { %v4657_v19 = vpop.f32.mrf.mxu0 }
 0x403   : > { %5083 = vst [vmem:[%s6608_s30 + $0x98] sm:$0xff] %v5051_v30  ;;  %v5020_v39 = vmul.f32 0.1, %v4956_v1  ;;  %v4883_v6 = vadd.f32 %v6439_v44, %v4657_v19  ;;  %v4907_v44 = vpop.f32.mrf.mxu1  ;;  %v4995_v1 = vld [vmem:[#allocation3 + $0x171] sm:$0xff] }
 0x404   : > { %v4659_v41 = vpop.f32.mrf.mxu0 }
 0x405   : > { %v5052_v14 = vadd.f32 %v5020_v39, %v4988_v49  ;;  %v4957_v18 = vadd.f32 %v4883_v6, %v9403_v40  ;;  %v6451_v24 = vpop.f32.mrf.mxu1 }
 0x406   : > { %v4662_v4 = vpop.f32.mrf.mxu0 }
 0x407   : > { %5084 = vst [vmem:[%s6608_s30 + $0xa0] sm:$0xff] %v5052_v14  ;;  %v5021_v23 = vmul.f32 0.1, %v4957_v18  ;;  %v4888_v57 = vadd.f32 %v4887_v31, %v4662_v4  ;;  %v4917_v30 = vpop.f32.mrf.mxu1  ;;  %v4996_v14 = vld [vmem:[#allocation3 + $0x181] sm:$0xff] }
 0x408   : > { %v4664_v58 = vpop.f32.mrf.mxu0 }
 0x409   : > { %v5053_v37 = vadd.f32 %v5021_v23, %v4989_v59  ;;  %v4958_v38 = vadd.f32 %v4888_v57, %v9413_v3  ;;  %v6454_v41 = vpop.f32.mrf.mxu1  ;;  %v4997_v58 = vld [vmem:[#allocation3 + $0x189] sm:$0xff] }
 0x40a   : > { %v4667_v34 = vpop.f32.mrf.mxu0 }
 0x40b   : > { %5085 = vst [vmem:[%s6608_s30 + $0xa8] sm:$0xff] %v5053_v37  ;;  %v5022_v27 = vmul.f32 0.1, %v4958_v38  ;;  %v4893_v32 = vadd.f32 %v6442_v8, %v4667_v34  ;;  %v4927_v57 = vpop.f32.mrf.mxu1 }
 0x40c   : > { %v4669_v60 = vpop.f32.mrf.mxu0 }
 0x40d   : > { %v5054_v40 = vadd.f32 %v5022_v27, %v4990_v20  ;;  %v4959_v47 = vadd.f32 %v4893_v32, %v9411_v17  ;;  %v4998_v27 = vld [vmem:[#allocation3 + $0x199] sm:$0xff] }
 0x40e   : > { %v4672_v15 = vpop.f32.mrf.mxu0 }
 0x40f   : > { %5086 = vst [vmem:[%s6608_s30 + $0xb0] sm:$0xff] %v5054_v40  ;;  %v5023_v0 = vmul.f32 0.1, %v4959_v47  ;;  %v4898_v7 = vadd.f32 %v4897_v11, %v4672_v15 }
 0x410   : > { %v4674_v21 = vpop.f32.mrf.mxu0 }
 0x411   : > { %v5055_v3 = vadd.f32 %v5023_v0, %v4991_v2  ;;  %v4960_v56 = vadd.f32 %v4898_v7, %v9419_v55  ;;  %v4999_v2 = vld [vmem:[#allocation3 + $0x1a1] sm:$0xff] }
 0x412   : > { %v4677_v63 = vpop.f32.mrf.mxu0 }
 0x413   : > { %5087 = vst [vmem:[%s6608_s30 + $0xb8] sm:$0xff] %v5055_v3  ;;  %v5024_v10 = vmul.f32 0.1, %v4960_v56  ;;  %v4903_v9 = vadd.f32 %v6445_v25, %v4677_v63 }
 0x414   : > { %v4679_v35 = vpop.f32.mrf.mxu0 }
 0x415   : > { %v5056_v17 = vadd.f32 %v5024_v10, %v4992_v33  ;;  %v4961_v62 = vadd.f32 %v4903_v9, %v9421_v5 }
 0x416   : > { %v4682_v43 = vpop.f32.mrf.mxu0 }
 0x417   : > { %5088 = vst [vmem:[%s6608_s30 + $0xc0] sm:$0xff] %v5056_v17  ;;  %v5025_v29 = vmul.f32 0.1, %v4961_v62  ;;  %v4908_v45 = vadd.f32 %v4907_v44, %v4682_v43 }
 0x418   : > { %v4684_v61 = vpop.f32.mrf.mxu0 }
 0x419   : > { %v5057_v55 = vadd.f32 %v5025_v29, %v4993_v48  ;;  %v4962_v53 = vadd.f32 %v4908_v45, %v9425_v13 }
 0x41a   : > { %v4687_v16 = vpop.f32.mrf.mxu0 }
 0x41b   : > { %5089 = vst [vmem:[%s6608_s30 + $0xc8] sm:$0xff] %v5057_v55  ;;  %v5026_v54 = vmul.f32 0.1, %v4962_v53  ;;  %v4913_v46 = vadd.f32 %v6448_v51, %v4687_v16 }
 0x41c   : > { %v4689_v12 = vpop.f32.mrf.mxu0 }
 0x41d   : > { %v5058_v5 = vadd.f32 %v5026_v54, %v4994_v28  ;;  %v4963_v42 = vadd.f32 %v4913_v46, %v9429_v22 }
 0x41e   : > { %v4692_v8 = vpop.f32.mrf.mxu0 }
 0x41f   : > { %5090 = vst [vmem:[%s6608_s30 + $0xd0] sm:$0xff] %v5058_v5  ;;  %v5027_v49 = vmul.f32 0.1, %v4963_v42  ;;  %v4918_v19 = vadd.f32 %v4917_v30, %v4692_v8 }
 0x420   : > { %v4694_v39 = vpop.f32.mrf.mxu0 }
 0x421   : > { %v5059_v13 = vadd.f32 %v5027_v49, %v4995_v1  ;;  %v4964_v6 = vadd.f32 %v4918_v19, %v9433_v26 }
 0x422   : > { %v4697_v18 = vpop.f32.mrf.mxu0 }
 0x423   : > { %5091 = vst [vmem:[%s6608_s30 + $0xd8] sm:$0xff] %v5059_v13  ;;  %v5028_v31 = vmul.f32 0.1, %v4964_v6  ;;  %v4923_v59 = vadd.f32 %v6451_v24, %v4697_v18 }
 0x424   : > { %v4699_v4 = vpop.f32.mrf.mxu0 }
 0x425   : > { %v5060_v22 = vadd.f32 %v5028_v31, %v4996_v14  ;;  %v4965_v23 = vadd.f32 %v4923_v59, %v9437_v52 }
 0x426   : > { %v4702_v37 = vpop.f32.mrf.mxu0 }
 0x427   : > { %5092 = vst [vmem:[%s6608_s30 + $0xe0] sm:$0xff] %v5060_v22  ;;  %v5029_v38 = vmul.f32 0.1, %v4965_v23  ;;  %v4928_v25 = vadd.f32 %v4927_v57, %v4702_v37 }
 0x428   : > { %v4704_v26 = vpop.f32.mrf.mxu0 }
 0x429   : > { %v5061_v20 = vadd.f32 %v5029_v38, %v4997_v58  ;;  %v4966_v34 = vadd.f32 %v4928_v25, %v9441_v50 }
 0x42a   : > { %v4707_v32 = vpop.f32.mrf.mxu0 }
 0x42b   : > { %5093 = vst [vmem:[%s6608_s30 + $0xe8] sm:$0xff] %v5061_v20  ;;  %v5030_v60 = vmul.f32 0.1, %v4966_v34  ;;  %v4933_v40 = vadd.f32 %v6454_v41, %v4707_v32 }
 0x42c   : > { %v4709_v47 = vpop.f32.mrf.mxu0 }
 0x42d   : > { %v5062_v11 = vadd.f32 %v5030_v60, %v4998_v27  ;;  %v4967_v52 = vadd.f32 %v4933_v40, %v9445_v36 }
 0x42f   : > { %5094 = vst [vmem:[%s6608_s30 + $0xf0] sm:$0xff] %v5062_v11  ;;  %v5031_v15 = vmul.f32 0.1, %v4967_v52 }
 0x431   : > { %v5063_v0 = vadd.f32 %v5031_v15, %v4999_v2 }
 0x433   : > { %5095 = vst [vmem:[%s6608_s30 + $0xf8] sm:$0xff] %v5063_v0 }
 0x434 PF: > { %s15_s20 = sadd.s32 1, %s6514_s20   ;;  %s9645_s18 = smov %s6510_s19 }
 0x435   : > { %p12_p5 = scmp.ge.s32.totalorder %s15_s20, 4   ;;  %s9646_s19 = smov %s9648_s21 }
 0x437   :  { %14 = sbr.rel (!%p12_p5) target bundleno = 2 (0x2), region = 381 }
 0x43c   :  { %5128 = vsyncmov [#allocation5] }
 0x43f   :  { %s5129_s29 = vpop.sfrf %5128 }
 0x440   :  { %p5650_p6 = scmp.ne.s32.totalorder %s5129_s29, 0 }
 0x442   :  { %5133 = shalt.err (%p5650_p6)  }
 0x443   :  { %5135 = vsyncmov [#allocation5 + $0x1] }
 0x446   :  { %s5136_s6 = vpop.sfrf %5135 }
 0x447   :  { %p5651_p7 = scmp.ne.s32.totalorder %s5136_s6, 0 }
 0x449   :  { %5140 = shalt.err (%p5651_p7)  }
 0x44a   :  { %5142 = vsyncmov [#allocation5 + $0x2] }
 0x44d   :  { %s5143_s30 = vpop.sfrf %5142 }
 0x44e   :  { %p5652_p8 = scmp.ne.s32.totalorder %s5143_s30, 0 }
 0x450   :  { %5147 = shalt.err (%p5652_p8)  }
 0x451   :  { %5149 = vsyncmov [#allocation5 + $0x3] }
 0x454   :  { %s5150_s7 = vpop.sfrf %5149 }
 0x455   :  { %p5653_p9 = scmp.ne.s32.totalorder %s5150_s7, 0 }
 0x457   :  { %5154 = shalt.err (%p5653_p9)  }
 0x458   :  { %5156 = vsyncmov [#allocation5 + $0x4] }
 0x45b   :  { %s5157_s21 = vpop.sfrf %5156 }
 0x45c   :  { %p5654_p10 = scmp.ne.s32.totalorder %s5157_s21, 0 }
 0x45e   :  { %5161 = shalt.err (%p5654_p10)  }
 0x45f   :  { %5163 = vsyncmov [#allocation5 + $0x5] }
 0x462   :  { %s5164_s0 = vpop.sfrf %5163 }
 0x463   :  { %p5655_p11 = scmp.ne.s32.totalorder %s5164_s0, 0 }
 0x465   :  { %5168 = shalt.err (%p5655_p11)  }

</bundles_post_ra>
